<compile_context>
chip_gen: v6e
topology: v6e:2x2x1
jax: 0.10.0
libtpu: 0.0.40
codegen_flags: <defaults>
</compile_context>

<pallas_src>
import functools

import jax
import jax.numpy as jnp
from jax import lax
from jax.experimental import pallas as pl
from jax.experimental.pallas import tpu as pltpu


_MXU_DTYPE = jnp.bfloat16   # matmul operand dtype (accumulation stays f32)


def _round_up(x, m):
    return (x + m - 1) // m * m


# -----------------------------------------------------------------------------
# Glue: im2col patch extraction from NHWC (pure JAX slicing / reshape)
# -----------------------------------------------------------------------------
def _im2col_nhwc(x, kh, kw, stride, pad):
    """x: (N, H, W, C) -> patches (N, Ho*Wo, kh*kw*C); K index = (di*kw+dj)*C + c."""
    N, H, W, C = x.shape
    (pt, pb), (pleft, pright) = pad
    xp = jnp.pad(x, ((0, 0), (pt, pb), (pleft, pright), (0, 0)))
    Ho = (H + pt + pb - kh) // stride + 1
    Wo = (W + pleft + pright - kw) // stride + 1
    cols = []
    for di in range(kh):
        for dj in range(kw):
            cols.append(xp[:, di:di + stride * Ho:stride,
                           dj:dj + stride * Wo:stride, :])
    p = jnp.stack(cols, axis=3)                # (N, Ho, Wo, kh*kw, C)
    p = p.reshape(N, Ho * Wo, kh * kw * C)
    return p, Ho, Wo


# -----------------------------------------------------------------------------
# Pallas kernel: (M, K) @ (K, Cout) + bias + per-instance InstanceNorm + LeakyReLU
# -----------------------------------------------------------------------------
def _layer_kernel(p_ref, w_ref, b_ref, o_ref, *, n_inst, p_rows,
                  normalize, lrelu):
    # bf16 x bf16 -> f32 accumulation on the MXU.
    y = jnp.dot(p_ref[...], w_ref[...], preferred_element_type=jnp.float32)
    y = y + b_ref[...]                                       # (1, Coutp) bcast
    if normalize:
        # InstanceNorm2d: per-channel stats over the P spatial rows of each
        # instance; one-pass sum & sum-of-squares, biased var, eps=1e-5.
        inv_p = 1.0 / p_rows
        for i in range(n_inst):                  # static loop, N is tiny
            lo, hi = i * p_rows, (i + 1) * p_rows
            seg = y[lo:hi]
            s = jnp.sum(seg, axis=0, keepdims=True)
            ss = jnp.sum(seg * seg, axis=0, keepdims=True)
            mean = s * inv_p
            var = ss * inv_p - mean * mean
            seg = (seg - mean) * lax.rsqrt(var + 1e-5)
            if lrelu:
                seg = jnp.where(seg > 0, seg, 0.2 * seg)
            o_ref[lo:hi, :] = seg
    else:
        if lrelu:
            y = jnp.where(y > 0, y, 0.2 * y)
        o_ref[...] = y


def conv_block(x, w, b, *, stride, pad, normalize, lrelu):
    """x: (N, H, W, Cin) NHWC f32.  w: (Cout, Cin, kh, kw).  b: (Cout,) or None.

    Returns (N, Ho, Wo, Cout) NHWC f32.
    """
    Cout, Cin, kh, kw = w.shape
    N = x.shape[0]

    patches, Ho, Wo = _im2col_nhwc(x.astype(_MXU_DTYPE), kh, kw, stride, pad)
    P = Ho * Wo
    K = Cin * kh * kw
    M = N * P
    Kp = _round_up(K, 128)
    Coutp = _round_up(Cout, 128)

    p2d = patches.reshape(M, K)
    if Kp != K:
        p2d = jnp.pad(p2d, ((0, 0), (0, Kp - K)))

    # (Cout, Cin, kh, kw) -> (K, Cout) with K ordered (kh, kw, cin) to match im2col.
    w_mat = w.transpose(2, 3, 1, 0).reshape(K, Cout).astype(jnp.float32)
    if Kp != K or Coutp != Cout:
        w_mat = jnp.pad(w_mat, ((0, Kp - K), (0, Coutp - Cout)))
    w_mat = w_mat.astype(_MXU_DTYPE)

    b_row = jnp.zeros((1, Coutp), jnp.float32)
    if b is not None:
        b_row = b_row.at[0, :Cout].set(b.astype(jnp.float32))

    # Tile M only when per-instance stats are NOT needed (layer 1): gives a
    # "parallel" axis so both TensorCores on v7x get work.
    tile_m = M if (normalize or M <= 256) else 256
    grid = (M // tile_m,)

    kernel = functools.partial(_layer_kernel, n_inst=N, p_rows=P,
                               normalize=normalize, lrelu=lrelu)
    out = pl.pallas_call(
        kernel,
        out_shape=jax.ShapeDtypeStruct((M, Coutp), jnp.float32),
        grid=grid,
        in_specs=[
            pl.BlockSpec((tile_m, Kp), lambda i: (i, 0)),     # patches
            pl.BlockSpec((Kp, Coutp), lambda i: (0, 0)),      # shared weights
            pl.BlockSpec((1, Coutp), lambda i: (0, 0)),       # shared bias
        ],
        out_specs=pl.BlockSpec((tile_m, Coutp), lambda i: (i, 0)),
        compiler_params=pltpu.CompilerParams(
            dimension_semantics=("parallel",),
            vmem_limit_bytes=32 << 20,
        ),
    )(p2d, w_mat, b_row)

    if Coutp != Cout:
        out = out[:, :Cout]
    return out.reshape(N, Ho, Wo, Cout)


# -----------------------------------------------------------------------------
# Discriminator_1 forward (Pallas) — public interface is NCHW like PyTorch
# -----------------------------------------------------------------------------
def discriminator_forward(params, img_a, img_b):
    a = jnp.transpose(img_a, (0, 2, 3, 1))           # NCHW -> NHWC (once)
    b = jnp.transpose(img_b, (0, 2, 3, 1))
    x = jnp.concatenate([a, b], axis=-1)             # (N, H, W, 2*in_ch)
    sym = ((1, 1), (1, 1))
    x = conv_block(x, params["w1"], params["b1"], stride=2, pad=sym,
                   normalize=False, lrelu=True)       # -> 64
    x = conv_block(x, params["w2"], params["b2"], stride=2, pad=sym,
                   normalize=True, lrelu=True)        # -> 128
    x = conv_block(x, params["w3"], params["b3"], stride=2, pad=sym,
                   normalize=True, lrelu=True)        # -> 256
    x = conv_block(x, params["w4"], params["b4"], stride=2, pad=sym,
                   normalize=True, lrelu=True)        # -> 512
    # ZeroPad2d((1,0,1,0)) + Conv2d(512, 1, k=4, p=1, bias=False)
    # == conv with asymmetric pad (top=2, bottom=1, left=2, right=1), stride 1.
    x = conv_block(x, params["w5"], None, stride=1, pad=((2, 1), (2, 1)),
                   normalize=False, lrelu=False)      # -> 1
    return jnp.transpose(x, (0, 3, 1, 2))             # NHWC -> NCHW (once)


# -----------------------------------------------------------------------------
# Pure-JAX reference (full f32, NCHW) for correctness check
# -----------------------------------------------------------------------------
def _ref_conv(x, w, b, stride, pad):
    y = lax.conv_general_dilated(
        x, w, window_strides=(stride, stride), padding=list(pad),
        dimension_numbers=("NCHW", "OIHW", "NCHW"),
        precision=lax.Precision.HIGHEST)
    if b is not None:
        y = y + b.reshape(1, -1, 1, 1)
    return y


def _ref_inorm(x):
    m = jnp.mean(x, axis=(2, 3), keepdims=True)
    v = jnp.mean((x - m) ** 2, axis=(2, 3), keepdims=True)
    return (x - m) * lax.rsqrt(v + 1e-5)


def _lrelu(x):
    return jnp.where(x > 0, x, 0.2 * x)


def reference_forward(params, img_a, img_b):
    x = jnp.concatenate([img_a, img_b], axis=1)
    sym = ((1, 1), (1, 1))
    x = _lrelu(_ref_conv(x, params["w1"], params["b1"], 2, sym))
    x = _lrelu(_ref_inorm(_ref_conv(x, params["w2"], params["b2"], 2, sym)))
    x = _lrelu(_ref_inorm(_ref_conv(x, params["w3"], params["b3"], 2, sym)))
    x = _lrelu(_ref_inorm(_ref_conv(x, params["w4"], params["b4"], 2, sym)))
    x = _ref_conv(x, params["w5"], None, 1, ((2, 1), (2, 1)))
    return x


# -----------------------------------------------------------------------------
# Deterministic parameter init (synthetic; shapes match the PyTorch module)
# -----------------------------------------------------------------------------
def init_params(key, in_channels=3):
    ks = jax.random.split(key, 9)
    scale = 0.02

    def w(k, cout, cin):
        return scale * jax.random.normal(k, (cout, cin, 4, 4), jnp.float32)

    def b(k, cout):
        return scale * jax.random.normal(k, (cout,), jnp.float32)

    return {
        "w1": w(ks[0], 64, in_channels * 2), "b1": b(ks[1], 64),
        "w2": w(ks[2], 128, 64),             "b2": b(ks[3], 128),
        "w3": w(ks[4], 256, 128),            "b3": b(ks[5], 256),
        "w4": w(ks[6], 512, 256),            "b4": b(ks[7], 512),
        "w5": w(ks[8], 1, 512),              # final conv: bias=False
    }


if __name__ == "__main__":
    key = jax.random.PRNGKey(0)
    k_params, k_a, k_b = jax.random.split(key, 3)

    N, C, H, W = 2, 3, 32, 32
    params = init_params(k_params, in_channels=C)
    img_a = jax.random.normal(k_a, (N, C, H, W), jnp.float32)
    img_b = jax.random.normal(k_b, (N, C, H, W), jnp.float32)

    fwd = jax.jit(discriminator_forward)
    ref_fwd = jax.jit(reference_forward)

    out = jax.block_until_ready(fwd(params, img_a, img_b))
    ref = jax.block_until_ready(ref_fwd(params, img_a, img_b))

    assert out.shape == (N, 1, 2, 2), out.shape
    # Tolerance covers bf16 MXU operands (f32 accumulation) across 5 layers.
    assert jnp.allclose(out, ref, rtol=5e-2, atol=5e-2), \
        float(jnp.max(jnp.abs(out - ref)))

    print("KERNEL_OK")
</pallas_src>

<mosaic_0001>
module attributes {stable_mosaic.version = 11 : i64} {
  func.func @_layer_kernel(%arg0: i32, %arg1: memref<256x128xbf16, #tpu.memory_space<vmem>>, %arg2: memref<128x128xbf16, #tpu.memory_space<vmem>>, %arg3: memref<1x128xf32, #tpu.memory_space<vmem>>, %arg4: memref<256x128xf32, #tpu.memory_space<vmem>>) attributes {dimension_semantics = [#tpu.dimension_semantics<parallel>], iteration_bounds = array<i64: 2>, scalar_prefetch = 0 : i64, scratch_operands = 0 : i64, tpu.core_type = #tpu.core_type<tc>, window_params = [{transform_indices = @transform_0, window_bounds = array<i64: 256, 128>}, {pipeline_mode = #tpu.pipeline_mode<synchronous>, transform_indices = @transform_1, window_bounds = array<i64: 128, 128>}, {pipeline_mode = #tpu.pipeline_mode<synchronous>, transform_indices = @transform_2, window_bounds = array<i64: 1, 128>}, {transform_indices = @transform_3, window_bounds = array<i64: 256, 128>}]} {
    %c0 = arith.constant 0 : index
    %c0_0 = arith.constant 0 : index
    %0 = vector.load %arg1[%c0, %c0_0] : memref<256x128xbf16, #tpu.memory_space<vmem>>, vector<256x128xbf16>
    %c0_1 = arith.constant 0 : index
    %c0_2 = arith.constant 0 : index
    %1 = vector.load %arg2[%c0_1, %c0_2] : memref<128x128xbf16, #tpu.memory_space<vmem>>, vector<128x128xbf16>
    %cst = arith.constant dense<0.000000e+00> : vector<256x128xf32>
    %2 = tpu.matmul %0, %1, %cst {dimension_numbers = #tpu.dot_dimension_numbers<[1], [0], [0], [1], [0, 0, 1, 1], [], []>} : vector<256x128xbf16>, vector<128x128xbf16>, vector<256x128xf32> -> vector<256x128xf32>
    %c0_3 = arith.constant 0 : index
    %c0_4 = arith.constant 0 : index
    %3 = vector.load %arg3[%c0_3, %c0_4] : memref<1x128xf32, #tpu.memory_space<vmem>>, vector<1x128xf32>
    %4 = vector.broadcast %3 : vector<1x128xf32> to vector<256x128xf32>
    %5 = arith.addf %2, %4 : vector<256x128xf32>
    %cst_5 = arith.constant 0.000000e+00 : f32
    %6 = vector.broadcast %cst_5 : f32 to vector<256x128xf32>
    %7 = arith.cmpf ogt, %5, %6 : vector<256x128xf32>
    %cst_6 = arith.constant 2.000000e-01 : f32
    %8 = vector.broadcast %cst_6 : f32 to vector<256x128xf32>
    %9 = arith.mulf %8, %5 : vector<256x128xf32>
    %10 = arith.select %7, %5, %9 : vector<256x128xi1>, vector<256x128xf32>
    %c0_7 = arith.constant 0 : index
    %c0_8 = arith.constant 0 : index
    %11 = vector.load %arg4[%c0_7, %c0_8] : memref<256x128xf32, #tpu.memory_space<vmem>>, vector<256x128xf32>
    tpu.vector_store %arg4[%c0_7, %c0_8], %10 {strides = array<i32>} : memref<256x128xf32, #tpu.memory_space<vmem>>, vector<256x128xf32>,
    return
  }
  func.func @transform_0(%arg0: i32) -> (i32, i32) {
    %c0_i32 = arith.constant 0 : i32
    %c0_i32_0 = arith.constant 0 : i32
    return %arg0, %c0_i32 : i32, i32
  }
  func.func @transform_1(%arg0: i32) -> (i32, i32) {
    %c0_i32 = arith.constant 0 : i32
    %c0_i32_0 = arith.constant 0 : i32
    %c0_i32_1 = arith.constant 0 : i32
    return %c0_i32, %c0_i32_0 : i32, i32
  }
  func.func @transform_2(%arg0: i32) -> (i32, i32) {
    %c0_i32 = arith.constant 0 : i32
    %c0_i32_0 = arith.constant 0 : i32
    %c0_i32_1 = arith.constant 0 : i32
    return %c0_i32, %c0_i32_0 : i32, i32
  }
  func.func @transform_3(%arg0: i32) -> (i32, i32) {
    %c0_i32 = arith.constant 0 : i32
    %c0_i32_0 = arith.constant 0 : i32
    return %arg0, %c0_i32 : i32, i32
  }
}

module attributes {stable_mosaic.version = 11 : i64} {
  func.func @_layer_kernel(%arg0: i32, %arg1: memref<128x1024xbf16, #tpu.memory_space<vmem>>, %arg2: memref<1024x128xbf16, #tpu.memory_space<vmem>>, %arg3: memref<1x128xf32, #tpu.memory_space<vmem>>, %arg4: memref<128x128xf32, #tpu.memory_space<vmem>>) attributes {dimension_semantics = [#tpu.dimension_semantics<parallel>], iteration_bounds = array<i64: 1>, scalar_prefetch = 0 : i64, scratch_operands = 0 : i64, tpu.core_type = #tpu.core_type<tc>, window_params = [{transform_indices = @transform_0, window_bounds = array<i64: 128, 1024>}, {pipeline_mode = #tpu.pipeline_mode<synchronous>, transform_indices = @transform_1, window_bounds = array<i64: 1024, 128>}, {pipeline_mode = #tpu.pipeline_mode<synchronous>, transform_indices = @transform_2, window_bounds = array<i64: 1, 128>}, {transform_indices = @transform_3, window_bounds = array<i64: 128, 128>}]} {
    %c0 = arith.constant 0 : index
    %c0_0 = arith.constant 0 : index
    %0 = vector.load %arg1[%c0, %c0_0] : memref<128x1024xbf16, #tpu.memory_space<vmem>>, vector<128x1024xbf16>
    %c0_1 = arith.constant 0 : index
    %c0_2 = arith.constant 0 : index
    %1 = vector.load %arg2[%c0_1, %c0_2] : memref<1024x128xbf16, #tpu.memory_space<vmem>>, vector<1024x128xbf16>
    %cst = arith.constant dense<0.000000e+00> : vector<128x128xf32>
    %2 = tpu.matmul %0, %1, %cst {dimension_numbers = #tpu.dot_dimension_numbers<[1], [0], [0], [1], [0, 0, 1, 1], [], []>} : vector<128x1024xbf16>, vector<1024x128xbf16>, vector<128x128xf32> -> vector<128x128xf32>
    %c0_3 = arith.constant 0 : index
    %c0_4 = arith.constant 0 : index
    %3 = vector.load %arg3[%c0_3, %c0_4] : memref<1x128xf32, #tpu.memory_space<vmem>>, vector<1x128xf32>
    %4 = vector.broadcast %3 : vector<1x128xf32> to vector<128x128xf32>
    %5 = arith.addf %2, %4 : vector<128x128xf32>
    %6 = vector.extract_strided_slice %5 {offsets = [0, 0], sizes = [64, 128], strides = [1, 1]} : vector<128x128xf32> to vector<64x128xf32>
    %cst_5 = arith.constant dense<0.000000e+00> : vector<128xf32>
    %7 = vector.multi_reduction <add>, %6, %cst_5 [0] : vector<64x128xf32> to vector<128xf32>
    %8 = vector.shape_cast %7 : vector<128xf32> to vector<1x128xf32>
    %9 = arith.mulf %6, %6 : vector<64x128xf32>
    %cst_6 = arith.constant dense<0.000000e+00> : vector<128xf32>
    %10 = vector.multi_reduction <add>, %9, %cst_6 [0] : vector<64x128xf32> to vector<128xf32>
    %11 = vector.shape_cast %10 : vector<128xf32> to vector<1x128xf32>
    %cst_7 = arith.constant 1.562500e-02 : f32
    %12 = vector.broadcast %cst_7 : f32 to vector<1x128xf32>
    %13 = arith.mulf %8, %12 : vector<1x128xf32>
    %cst_8 = arith.constant 1.562500e-02 : f32
    %14 = vector.broadcast %cst_8 : f32 to vector<1x128xf32>
    %15 = arith.mulf %11, %14 : vector<1x128xf32>
    %16 = arith.mulf %13, %13 : vector<1x128xf32>
    %17 = arith.subf %15, %16 : vector<1x128xf32>
    %18 = vector.broadcast %13 : vector<1x128xf32> to vector<64x128xf32>
    %19 = arith.subf %6, %18 : vector<64x128xf32>
    %cst_9 = arith.constant 9.99999974E-6 : f32
    %20 = vector.broadcast %cst_9 : f32 to vector<1x128xf32>
    %21 = arith.addf %17, %20 : vector<1x128xf32>
    %22 = math.rsqrt %21 : vector<1x128xf32>
    %23 = vector.broadcast %22 : vector<1x128xf32> to vector<64x128xf32>
    %24 = arith.mulf %19, %23 : vector<64x128xf32>
    %cst_10 = arith.constant 0.000000e+00 : f32
    %25 = vector.broadcast %cst_10 : f32 to vector<64x128xf32>
    %26 = arith.cmpf ogt, %24, %25 : vector<64x128xf32>
    %cst_11 = arith.constant 2.000000e-01 : f32
    %27 = vector.broadcast %cst_11 : f32 to vector<64x128xf32>
    %28 = arith.mulf %27, %24 : vector<64x128xf32>
    %29 = arith.select %26, %24, %28 : vector<64x128xi1>, vector<64x128xf32>
    %c0_12 = arith.constant 0 : index
    %c0_13 = arith.constant 0 : index
    %30 = vector.load %arg4[%c0_12, %c0_13] : memref<128x128xf32, #tpu.memory_space<vmem>>, vector<64x128xf32>
    tpu.vector_store %arg4[%c0_12, %c0_13], %29 {strides = array<i32>} : memref<128x128xf32, #tpu.memory_space<vmem>>, vector<64x128xf32>,
    %31 = vector.extract_strided_slice %5 {offsets = [64, 0], sizes = [64, 128], strides = [1, 1]} : vector<128x128xf32> to vector<64x128xf32>
    %cst_14 = arith.constant dense<0.000000e+00> : vector<128xf32>
    %32 = vector.multi_reduction <add>, %31, %cst_14 [0] : vector<64x128xf32> to vector<128xf32>
    %33 = vector.shape_cast %32 : vector<128xf32> to vector<1x128xf32>
    %34 = arith.mulf %31, %31 : vector<64x128xf32>
    %cst_15 = arith.constant dense<0.000000e+00> : vector<128xf32>
    %35 = vector.multi_reduction <add>, %34, %cst_15 [0] : vector<64x128xf32> to vector<128xf32>
    %36 = vector.shape_cast %35 : vector<128xf32> to vector<1x128xf32>
    %cst_16 = arith.constant 1.562500e-02 : f32
    %37 = vector.broadcast %cst_16 : f32 to vector<1x128xf32>
    %38 = arith.mulf %33, %37 : vector<1x128xf32>
    %cst_17 = arith.constant 1.562500e-02 : f32
    %39 = vector.broadcast %cst_17 : f32 to vector<1x128xf32>
    %40 = arith.mulf %36, %39 : vector<1x128xf32>
    %41 = arith.mulf %38, %38 : vector<1x128xf32>
    %42 = arith.subf %40, %41 : vector<1x128xf32>
    %43 = vector.broadcast %38 : vector<1x128xf32> to vector<64x128xf32>
    %44 = arith.subf %31, %43 : vector<64x128xf32>
    %cst_18 = arith.constant 9.99999974E-6 : f32
    %45 = vector.broadcast %cst_18 : f32 to vector<1x128xf32>
    %46 = arith.addf %42, %45 : vector<1x128xf32>
    %47 = math.rsqrt %46 : vector<1x128xf32>
    %48 = vector.broadcast %47 : vector<1x128xf32> to vector<64x128xf32>
    %49 = arith.mulf %44, %48 : vector<64x128xf32>
    %cst_19 = arith.constant 0.000000e+00 : f32
    %50 = vector.broadcast %cst_19 : f32 to vector<64x128xf32>
    %51 = arith.cmpf ogt, %49, %50 : vector<64x128xf32>
    %cst_20 = arith.constant 2.000000e-01 : f32
    %52 = vector.broadcast %cst_20 : f32 to vector<64x128xf32>
    %53 = arith.mulf %52, %49 : vector<64x128xf32>
    %54 = arith.select %51, %49, %53 : vector<64x128xi1>, vector<64x128xf32>
    %c64 = arith.constant 64 : index
    %c0_21 = arith.constant 0 : index
    %55 = vector.load %arg4[%c64, %c0_21] : memref<128x128xf32, #tpu.memory_space<vmem>>, vector<64x128xf32>
    tpu.vector_store %arg4[%c64, %c0_21], %54 {strides = array<i32>} : memref<128x128xf32, #tpu.memory_space<vmem>>, vector<64x128xf32>,
    return
  }
  func.func @transform_0(%arg0: i32) -> (i32, i32) {
    %c0_i32 = arith.constant 0 : i32
    %c0_i32_0 = arith.constant 0 : i32
    return %arg0, %c0_i32 : i32, i32
  }
  func.func @transform_1(%arg0: i32) -> (i32, i32) {
    %c0_i32 = arith.constant 0 : i32
    %c0_i32_0 = arith.constant 0 : i32
    %c0_i32_1 = arith.constant 0 : i32
    return %c0_i32, %c0_i32_0 : i32, i32
  }
  func.func @transform_2(%arg0: i32) -> (i32, i32) {
    %c0_i32 = arith.constant 0 : i32
    %c0_i32_0 = arith.constant 0 : i32
    %c0_i32_1 = arith.constant 0 : i32
    return %c0_i32, %c0_i32_0 : i32, i32
  }
  func.func @transform_3(%arg0: i32) -> (i32, i32) {
    %c0_i32 = arith.constant 0 : i32
    %c0_i32_0 = arith.constant 0 : i32
    return %arg0, %c0_i32 : i32, i32
  }
}

module attributes {stable_mosaic.version = 11 : i64} {
  func.func @_layer_kernel(%arg0: i32, %arg1: memref<32x2048xbf16, #tpu.memory_space<vmem>>, %arg2: memref<2048x256xbf16, #tpu.memory_space<vmem>>, %arg3: memref<1x256xf32, #tpu.memory_space<vmem>>, %arg4: memref<32x256xf32, #tpu.memory_space<vmem>>) attributes {dimension_semantics = [#tpu.dimension_semantics<parallel>], iteration_bounds = array<i64: 1>, scalar_prefetch = 0 : i64, scratch_operands = 0 : i64, tpu.core_type = #tpu.core_type<tc>, window_params = [{transform_indices = @transform_0, window_bounds = array<i64: 32, 2048>}, {pipeline_mode = #tpu.pipeline_mode<synchronous>, transform_indices = @transform_1, window_bounds = array<i64: 2048, 256>}, {pipeline_mode = #tpu.pipeline_mode<synchronous>, transform_indices = @transform_2, window_bounds = array<i64: 1, 256>}, {transform_indices = @transform_3, window_bounds = array<i64: 32, 256>}]} {
    %c0 = arith.constant 0 : index
    %c0_0 = arith.constant 0 : index
    %0 = vector.load %arg1[%c0, %c0_0] : memref<32x2048xbf16, #tpu.memory_space<vmem>>, vector<32x2048xbf16>
    %c0_1 = arith.constant 0 : index
    %c0_2 = arith.constant 0 : index
    %1 = vector.load %arg2[%c0_1, %c0_2] : memref<2048x256xbf16, #tpu.memory_space<vmem>>, vector<2048x256xbf16>
    %cst = arith.constant dense<0.000000e+00> : vector<32x256xf32>
    %2 = tpu.matmul %0, %1, %cst {dimension_numbers = #tpu.dot_dimension_numbers<[1], [0], [0], [1], [0, 0, 1, 1], [], []>} : vector<32x2048xbf16>, vector<2048x256xbf16>, vector<32x256xf32> -> vector<32x256xf32>
    %c0_3 = arith.constant 0 : index
    %c0_4 = arith.constant 0 : index
    %3 = vector.load %arg3[%c0_3, %c0_4] : memref<1x256xf32, #tpu.memory_space<vmem>>, vector<1x256xf32>
    %4 = vector.broadcast %3 : vector<1x256xf32> to vector<32x256xf32>
    %5 = arith.addf %2, %4 : vector<32x256xf32>
    %6 = vector.extract_strided_slice %5 {offsets = [0, 0], sizes = [16, 256], strides = [1, 1]} : vector<32x256xf32> to vector<16x256xf32>
    %cst_5 = arith.constant dense<0.000000e+00> : vector<256xf32>
    %7 = vector.multi_reduction <add>, %6, %cst_5 [0] : vector<16x256xf32> to vector<256xf32>
    %8 = vector.shape_cast %7 : vector<256xf32> to vector<1x256xf32>
    %9 = arith.mulf %6, %6 : vector<16x256xf32>
    %cst_6 = arith.constant dense<0.000000e+00> : vector<256xf32>
    %10 = vector.multi_reduction <add>, %9, %cst_6 [0] : vector<16x256xf32> to vector<256xf32>
    %11 = vector.shape_cast %10 : vector<256xf32> to vector<1x256xf32>
    %cst_7 = arith.constant 6.250000e-02 : f32
    %12 = vector.broadcast %cst_7 : f32 to vector<1x256xf32>
    %13 = arith.mulf %8, %12 : vector<1x256xf32>
    %cst_8 = arith.constant 6.250000e-02 : f32
    %14 = vector.broadcast %cst_8 : f32 to vector<1x256xf32>
    %15 = arith.mulf %11, %14 : vector<1x256xf32>
    %16 = arith.mulf %13, %13 : vector<1x256xf32>
    %17 = arith.subf %15, %16 : vector<1x256xf32>
    %18 = vector.broadcast %13 : vector<1x256xf32> to vector<16x256xf32>
    %19 = arith.subf %6, %18 : vector<16x256xf32>
    %cst_9 = arith.constant 9.99999974E-6 : f32
    %20 = vector.broadcast %cst_9 : f32 to vector<1x256xf32>
    %21 = arith.addf %17, %20 : vector<1x256xf32>
    %22 = math.rsqrt %21 : vector<1x256xf32>
    %23 = vector.broadcast %22 : vector<1x256xf32> to vector<16x256xf32>
    %24 = arith.mulf %19, %23 : vector<16x256xf32>
    %cst_10 = arith.constant 0.000000e+00 : f32
    %25 = vector.broadcast %cst_10 : f32 to vector<16x256xf32>
    %26 = arith.cmpf ogt, %24, %25 : vector<16x256xf32>
    %cst_11 = arith.constant 2.000000e-01 : f32
    %27 = vector.broadcast %cst_11 : f32 to vector<16x256xf32>
    %28 = arith.mulf %27, %24 : vector<16x256xf32>
    %29 = arith.select %26, %24, %28 : vector<16x256xi1>, vector<16x256xf32>
    %c0_12 = arith.constant 0 : index
    %c0_13 = arith.constant 0 : index
    %30 = vector.load %arg4[%c0_12, %c0_13] : memref<32x256xf32, #tpu.memory_space<vmem>>, vector<16x256xf32>
    tpu.vector_store %arg4[%c0_12, %c0_13], %29 {strides = array<i32>} : memref<32x256xf32, #tpu.memory_space<vmem>>, vector<16x256xf32>,
    %31 = vector.extract_strided_slice %5 {offsets = [16, 0], sizes = [16, 256], strides = [1, 1]} : vector<32x256xf32> to vector<16x256xf32>
    %cst_14 = arith.constant dense<0.000000e+00> : vector<256xf32>
    %32 = vector.multi_reduction <add>, %31, %cst_14 [0] : vector<16x256xf32> to vector<256xf32>
    %33 = vector.shape_cast %32 : vector<256xf32> to vector<1x256xf32>
    %34 = arith.mulf %31, %31 : vector<16x256xf32>
    %cst_15 = arith.constant dense<0.000000e+00> : vector<256xf32>
    %35 = vector.multi_reduction <add>, %34, %cst_15 [0] : vector<16x256xf32> to vector<256xf32>
    %36 = vector.shape_cast %35 : vector<256xf32> to vector<1x256xf32>
    %cst_16 = arith.constant 6.250000e-02 : f32
    %37 = vector.broadcast %cst_16 : f32 to vector<1x256xf32>
    %38 = arith.mulf %33, %37 : vector<1x256xf32>
    %cst_17 = arith.constant 6.250000e-02 : f32
    %39 = vector.broadcast %cst_17 : f32 to vector<1x256xf32>
    %40 = arith.mulf %36, %39 : vector<1x256xf32>
    %41 = arith.mulf %38, %38 : vector<1x256xf32>
    %42 = arith.subf %40, %41 : vector<1x256xf32>
    %43 = vector.broadcast %38 : vector<1x256xf32> to vector<16x256xf32>
    %44 = arith.subf %31, %43 : vector<16x256xf32>
    %cst_18 = arith.constant 9.99999974E-6 : f32
    %45 = vector.broadcast %cst_18 : f32 to vector<1x256xf32>
    %46 = arith.addf %42, %45 : vector<1x256xf32>
    %47 = math.rsqrt %46 : vector<1x256xf32>
    %48 = vector.broadcast %47 : vector<1x256xf32> to vector<16x256xf32>
    %49 = arith.mulf %44, %48 : vector<16x256xf32>
    %cst_19 = arith.constant 0.000000e+00 : f32
    %50 = vector.broadcast %cst_19 : f32 to vector<16x256xf32>
    %51 = arith.cmpf ogt, %49, %50 : vector<16x256xf32>
    %cst_20 = arith.constant 2.000000e-01 : f32
    %52 = vector.broadcast %cst_20 : f32 to vector<16x256xf32>
    %53 = arith.mulf %52, %49 : vector<16x256xf32>
    %54 = arith.select %51, %49, %53 : vector<16x256xi1>, vector<16x256xf32>
    %c16 = arith.constant 16 : index
    %c0_21 = arith.constant 0 : index
    %55 = vector.load %arg4[%c16, %c0_21] : memref<32x256xf32, #tpu.memory_space<vmem>>, vector<16x256xf32>
    tpu.vector_store %arg4[%c16, %c0_21], %54 {strides = array<i32>} : memref<32x256xf32, #tpu.memory_space<vmem>>, vector<16x256xf32>,
    return
  }
  func.func @transform_0(%arg0: i32) -> (i32, i32) {
    %c0_i32 = arith.constant 0 : i32
    %c0_i32_0 = arith.constant 0 : i32
    return %arg0, %c0_i32 : i32, i32
  }
  func.func @transform_1(%arg0: i32) -> (i32, i32) {
    %c0_i32 = arith.constant 0 : i32
    %c0_i32_0 = arith.constant 0 : i32
    %c0_i32_1 = arith.constant 0 : i32
    return %c0_i32, %c0_i32_0 : i32, i32
  }
  func.func @transform_2(%arg0: i32) -> (i32, i32) {
    %c0_i32 = arith.constant 0 : i32
    %c0_i32_0 = arith.constant 0 : i32
    %c0_i32_1 = arith.constant 0 : i32
    return %c0_i32, %c0_i32_0 : i32, i32
  }
  func.func @transform_3(%arg0: i32) -> (i32, i32) {
    %c0_i32 = arith.constant 0 : i32
    %c0_i32_0 = arith.constant 0 : i32
    return %arg0, %c0_i32 : i32, i32
  }
}

module attributes {stable_mosaic.version = 11 : i64} {
  func.func @_layer_kernel(%arg0: i32, %arg1: memref<8x4096xbf16, #tpu.memory_space<vmem>>, %arg2: memref<4096x512xbf16, #tpu.memory_space<vmem>>, %arg3: memref<1x512xf32, #tpu.memory_space<vmem>>, %arg4: memref<8x512xf32, #tpu.memory_space<vmem>>) attributes {dimension_semantics = [#tpu.dimension_semantics<parallel>], iteration_bounds = array<i64: 1>, scalar_prefetch = 0 : i64, scratch_operands = 0 : i64, tpu.core_type = #tpu.core_type<tc>, window_params = [{transform_indices = @transform_0, window_bounds = array<i64: 8, 4096>}, {pipeline_mode = #tpu.pipeline_mode<synchronous>, transform_indices = @transform_1, window_bounds = array<i64: 4096, 512>}, {pipeline_mode = #tpu.pipeline_mode<synchronous>, transform_indices = @transform_2, window_bounds = array<i64: 1, 512>}, {transform_indices = @transform_3, window_bounds = array<i64: 8, 512>}]} {
    %c0 = arith.constant 0 : index
    %c0_0 = arith.constant 0 : index
    %0 = vector.load %arg1[%c0, %c0_0] : memref<8x4096xbf16, #tpu.memory_space<vmem>>, vector<8x4096xbf16>
    %c0_1 = arith.constant 0 : index
    %c0_2 = arith.constant 0 : index
    %1 = vector.load %arg2[%c0_1, %c0_2] : memref<4096x512xbf16, #tpu.memory_space<vmem>>, vector<4096x512xbf16>
    %cst = arith.constant dense<0.000000e+00> : vector<8x512xf32>
    %2 = tpu.matmul %0, %1, %cst {dimension_numbers = #tpu.dot_dimension_numbers<[1], [0], [0], [1], [0, 0, 1, 1], [], []>} : vector<8x4096xbf16>, vector<4096x512xbf16>, vector<8x512xf32> -> vector<8x512xf32>
    %c0_3 = arith.constant 0 : index
    %c0_4 = arith.constant 0 : index
    %3 = vector.load %arg3[%c0_3, %c0_4] : memref<1x512xf32, #tpu.memory_space<vmem>>, vector<1x512xf32>
    %4 = vector.broadcast %3 : vector<1x512xf32> to vector<8x512xf32>
    %5 = arith.addf %2, %4 : vector<8x512xf32>
    %6 = vector.extract_strided_slice %5 {offsets = [0, 0], sizes = [4, 512], strides = [1, 1]} : vector<8x512xf32> to vector<4x512xf32>
    %cst_5 = arith.constant dense<0.000000e+00> : vector<512xf32>
    %7 = vector.multi_reduction <add>, %6, %cst_5 [0] : vector<4x512xf32> to vector<512xf32>
    %8 = vector.shape_cast %7 : vector<512xf32> to vector<1x512xf32>
    %9 = arith.mulf %6, %6 : vector<4x512xf32>
    %cst_6 = arith.constant dense<0.000000e+00> : vector<512xf32>
    %10 = vector.multi_reduction <add>, %9, %cst_6 [0] : vector<4x512xf32> to vector<512xf32>
    %11 = vector.shape_cast %10 : vector<512xf32> to vector<1x512xf32>
    %cst_7 = arith.constant 2.500000e-01 : f32
    %12 = vector.broadcast %cst_7 : f32 to vector<1x512xf32>
    %13 = arith.mulf %8, %12 : vector<1x512xf32>
    %cst_8 = arith.constant 2.500000e-01 : f32
    %14 = vector.broadcast %cst_8 : f32 to vector<1x512xf32>
    %15 = arith.mulf %11, %14 : vector<1x512xf32>
    %16 = arith.mulf %13, %13 : vector<1x512xf32>
    %17 = arith.subf %15, %16 : vector<1x512xf32>
    %18 = vector.broadcast %13 : vector<1x512xf32> to vector<4x512xf32>
    %19 = arith.subf %6, %18 : vector<4x512xf32>
    %cst_9 = arith.constant 9.99999974E-6 : f32
    %20 = vector.broadcast %cst_9 : f32 to vector<1x512xf32>
    %21 = arith.addf %17, %20 : vector<1x512xf32>
    %22 = math.rsqrt %21 : vector<1x512xf32>
    %23 = vector.broadcast %22 : vector<1x512xf32> to vector<4x512xf32>
    %24 = arith.mulf %19, %23 : vector<4x512xf32>
    %cst_10 = arith.constant 0.000000e+00 : f32
    %25 = vector.broadcast %cst_10 : f32 to vector<4x512xf32>
    %26 = arith.cmpf ogt, %24, %25 : vector<4x512xf32>
    %cst_11 = arith.constant 2.000000e-01 : f32
    %27 = vector.broadcast %cst_11 : f32 to vector<4x512xf32>
    %28 = arith.mulf %27, %24 : vector<4x512xf32>
    %29 = arith.select %26, %24, %28 : vector<4x512xi1>, vector<4x512xf32>
    %c0_12 = arith.constant 0 : index
    %c0_13 = arith.constant 0 : index
    %30 = vector.load %arg4[%c0_12, %c0_13] : memref<8x512xf32, #tpu.memory_space<vmem>>, vector<4x512xf32>
    tpu.vector_store %arg4[%c0_12, %c0_13], %29 {strides = array<i32>} : memref<8x512xf32, #tpu.memory_space<vmem>>, vector<4x512xf32>,
    %31 = vector.extract_strided_slice %5 {offsets = [4, 0], sizes = [4, 512], strides = [1, 1]} : vector<8x512xf32> to vector<4x512xf32>
    %cst_14 = arith.constant dense<0.000000e+00> : vector<512xf32>
    %32 = vector.multi_reduction <add>, %31, %cst_14 [0] : vector<4x512xf32> to vector<512xf32>
    %33 = vector.shape_cast %32 : vector<512xf32> to vector<1x512xf32>
    %34 = arith.mulf %31, %31 : vector<4x512xf32>
    %cst_15 = arith.constant dense<0.000000e+00> : vector<512xf32>
    %35 = vector.multi_reduction <add>, %34, %cst_15 [0] : vector<4x512xf32> to vector<512xf32>
    %36 = vector.shape_cast %35 : vector<512xf32> to vector<1x512xf32>
    %cst_16 = arith.constant 2.500000e-01 : f32
    %37 = vector.broadcast %cst_16 : f32 to vector<1x512xf32>
    %38 = arith.mulf %33, %37 : vector<1x512xf32>
    %cst_17 = arith.constant 2.500000e-01 : f32
    %39 = vector.broadcast %cst_17 : f32 to vector<1x512xf32>
    %40 = arith.mulf %36, %39 : vector<1x512xf32>
    %41 = arith.mulf %38, %38 : vector<1x512xf32>
    %42 = arith.subf %40, %41 : vector<1x512xf32>
    %43 = vector.broadcast %38 : vector<1x512xf32> to vector<4x512xf32>
    %44 = arith.subf %31, %43 : vector<4x512xf32>
    %cst_18 = arith.constant 9.99999974E-6 : f32
    %45 = vector.broadcast %cst_18 : f32 to vector<1x512xf32>
    %46 = arith.addf %42, %45 : vector<1x512xf32>
    %47 = math.rsqrt %46 : vector<1x512xf32>
    %48 = vector.broadcast %47 : vector<1x512xf32> to vector<4x512xf32>
    %49 = arith.mulf %44, %48 : vector<4x512xf32>
    %cst_19 = arith.constant 0.000000e+00 : f32
    %50 = vector.broadcast %cst_19 : f32 to vector<4x512xf32>
    %51 = arith.cmpf ogt, %49, %50 : vector<4x512xf32>
    %cst_20 = arith.constant 2.000000e-01 : f32
    %52 = vector.broadcast %cst_20 : f32 to vector<4x512xf32>
    %53 = arith.mulf %52, %49 : vector<4x512xf32>
    %54 = arith.select %51, %49, %53 : vector<4x512xi1>, vector<4x512xf32>
    %c4 = arith.constant 4 : index
    %c0_21 = arith.constant 0 : index
    %55 = vector.load %arg4[%c4, %c0_21] : memref<8x512xf32, #tpu.memory_space<vmem>>, vector<4x512xf32>
    tpu.vector_store %arg4[%c4, %c0_21], %54 {strides = array<i32>} : memref<8x512xf32, #tpu.memory_space<vmem>>, vector<4x512xf32>,
    return
  }
  func.func @transform_0(%arg0: i32) -> (i32, i32) {
    %c0_i32 = arith.constant 0 : i32
    %c0_i32_0 = arith.constant 0 : i32
    return %arg0, %c0_i32 : i32, i32
  }
  func.func @transform_1(%arg0: i32) -> (i32, i32) {
    %c0_i32 = arith.constant 0 : i32
    %c0_i32_0 = arith.constant 0 : i32
    %c0_i32_1 = arith.constant 0 : i32
    return %c0_i32, %c0_i32_0 : i32, i32
  }
  func.func @transform_2(%arg0: i32) -> (i32, i32) {
    %c0_i32 = arith.constant 0 : i32
    %c0_i32_0 = arith.constant 0 : i32
    %c0_i32_1 = arith.constant 0 : i32
    return %c0_i32, %c0_i32_0 : i32, i32
  }
  func.func @transform_3(%arg0: i32) -> (i32, i32) {
    %c0_i32 = arith.constant 0 : i32
    %c0_i32_0 = arith.constant 0 : i32
    return %arg0, %c0_i32 : i32, i32
  }
}

module attributes {stable_mosaic.version = 11 : i64} {
  func.func @_layer_kernel(%arg0: i32, %arg1: memref<8x8192xbf16, #tpu.memory_space<vmem>>, %arg2: memref<8192x128xbf16, #tpu.memory_space<vmem>>, %arg3: memref<1x128xf32, #tpu.memory_space<vmem>>, %arg4: memref<8x128xf32, #tpu.memory_space<vmem>>) attributes {dimension_semantics = [#tpu.dimension_semantics<parallel>], iteration_bounds = array<i64: 1>, scalar_prefetch = 0 : i64, scratch_operands = 0 : i64, tpu.core_type = #tpu.core_type<tc>, window_params = [{transform_indices = @transform_0, window_bounds = array<i64: 8, 8192>}, {pipeline_mode = #tpu.pipeline_mode<synchronous>, transform_indices = @transform_1, window_bounds = array<i64: 8192, 128>}, {pipeline_mode = #tpu.pipeline_mode<synchronous>, transform_indices = @transform_2, window_bounds = array<i64: 1, 128>}, {transform_indices = @transform_3, window_bounds = array<i64: 8, 128>}]} {
    %c0 = arith.constant 0 : index
    %c0_0 = arith.constant 0 : index
    %0 = vector.load %arg1[%c0, %c0_0] : memref<8x8192xbf16, #tpu.memory_space<vmem>>, vector<8x8192xbf16>
    %c0_1 = arith.constant 0 : index
    %c0_2 = arith.constant 0 : index
    %1 = vector.load %arg2[%c0_1, %c0_2] : memref<8192x128xbf16, #tpu.memory_space<vmem>>, vector<8192x128xbf16>
    %cst = arith.constant dense<0.000000e+00> : vector<8x128xf32>
    %2 = tpu.matmul %0, %1, %cst {dimension_numbers = #tpu.dot_dimension_numbers<[1], [0], [0], [1], [0, 0, 1, 1], [], []>} : vector<8x8192xbf16>, vector<8192x128xbf16>, vector<8x128xf32> -> vector<8x128xf32>
    %c0_3 = arith.constant 0 : index
    %c0_4 = arith.constant 0 : index
    %3 = vector.load %arg3[%c0_3, %c0_4] : memref<1x128xf32, #tpu.memory_space<vmem>>, vector<1x128xf32>
    %4 = vector.broadcast %3 : vector<1x128xf32> to vector<8x128xf32>
    %5 = arith.addf %2, %4 : vector<8x128xf32>
    %c0_5 = arith.constant 0 : index
    %c0_6 = arith.constant 0 : index
    %6 = vector.load %arg4[%c0_5, %c0_6] : memref<8x128xf32, #tpu.memory_space<vmem>>, vector<8x128xf32>
    tpu.vector_store %arg4[%c0_5, %c0_6], %5 {strides = array<i32>} : memref<8x128xf32, #tpu.memory_space<vmem>>, vector<8x128xf32>,
    return
  }
  func.func @transform_0(%arg0: i32) -> (i32, i32) {
    %c0_i32 = arith.constant 0 : i32
    %c0_i32_0 = arith.constant 0 : i32
    return %arg0, %c0_i32 : i32, i32
  }
  func.func @transform_1(%arg0: i32) -> (i32, i32) {
    %c0_i32 = arith.constant 0 : i32
    %c0_i32_0 = arith.constant 0 : i32
    %c0_i32_1 = arith.constant 0 : i32
    return %c0_i32, %c0_i32_0 : i32, i32
  }
  func.func @transform_2(%arg0: i32) -> (i32, i32) {
    %c0_i32 = arith.constant 0 : i32
    %c0_i32_0 = arith.constant 0 : i32
    %c0_i32_1 = arith.constant 0 : i32
    return %c0_i32, %c0_i32_0 : i32, i32
  }
  func.func @transform_3(%arg0: i32) -> (i32, i32) {
    %c0_i32 = arith.constant 0 : i32
    %c0_i32_0 = arith.constant 0 : i32
    return %arg0, %c0_i32 : i32, i32
  }
}

</mosaic_0001>

<bundles_post_ra>
// kernel: discriminator_forward.5
= control target key start
LH: loop header
LB: loop body
LE: loop exit
PB: predicated region body
PF: predicated region fallthrough
CT: control target
= control target key end

     0   :  { %s903_s12 = smov 0   ;;  %s1037_s0 = inlined_call_operand.vmem [shape: bf16[512,128], index: 0, kind: input, shape index: {}]   ;;  %s1038_s1 = inlined_call_operand.vmem [shape: bf16[128,128], index: 1, kind: input, shape index: {}]   ;;  %s1039_s2 = inlined_call_operand.vmem [shape: f32[1,128], index: 2, kind: input, shape index: {}]   ;;  %s1040_s3 = inlined_call_operand.vmem [shape: f32[512,128], index: 3, kind: output, shape index: {}]  }
   0x1 LB: > { %s719_s13 = sadd.s32 4294967295, %s881_s12   ;;  %p723_p0 = scmp.ge.s32.totalorder %s881_s12, 1  ;;  %s881_s12 = sphi %s903_s12, %s13_s12  }
   0x2   : > { %p138_p1 = scmp.lt.s32.totalorder %s881_s12, 3 }
   0x4   : > { %p139_p2 = pnand %p723_p0, %p138_p1 }
   0x5   : > { %s724_s16 = sshll.u32 (!%p139_p2), %s719_s13, 5 }
   0x6   : > { %142 = sbr.rel (%p139_p2) target bundleno = 274 (0x112), region = 32  ;;  %p163_p3 = scmp.lt.s32.totalorder (!%p139_p2), %s724_s16, 63 }
   0xb   : > { %v851_v0 = vld [vmem:[%s1038_s1 + $0x38] sm:$0xff]   ;;  %v852_v1 = vld [vmem:[%s1038_s1 + $0x30] sm:$0xff]   ;;  %s1042_s16 = smov (!%p163_p3, %s724_s16), 63  ;;  %v853_v2 = vld [vmem:[%s1038_s1 + $0x28] sm:$0xff]  }
   0xc   : > { %779 = vmatprep.subr.bf16.mxu0 %v851_v0  ;;  %827 = vmatprep.subr.bf16.mxu1 %v851_v0  ;;  %s725_s21 = sshll.u32 %s1042_s16, 2  ;;  %v854_v3 = vld [vmem:[%s1038_s1 + $0x20] sm:$0xff]   ;;  %v855_v6 = vld [vmem:[%s1038_s1 + $0x18] sm:$0xff]   ;;  %v856_v7 = vld [vmem:[%s1038_s1 + $0x10] sm:$0xff]   ;;  %s727_s10 = sshll.u32 %s1042_s16, 3 }
   0xd   : > { %780 = vmatpush3.bf16.msra.mxu0 %v851_v0  ;;  %835 = vmatpush3.bf16.msra.mxu1 %v851_v0  ;;  %s926_s24 = scalar_lea.vmem %s1037_s0, %s725_s21  ;;  %v857_v8 = vld [vmem:[%s1038_s1 + $0x8] sm:$0xff]   ;;  %v858_v9 = vld [vmem:[%s1038_s1] sm:$0xff]   ;;  %s970_s14 = scalar_lea.vmem %s1040_s3, %s727_s10 }
   0xe   : > { %781 = vmatprep.subr.bf16.mxu0 %v852_v1  ;;  %828 = vmatprep.subr.bf16.mxu1 %v852_v1  ;;  %v859_v4 = vld [vmem:[%s926_s24] sm:$0xff]   ;;  %v861_v10 = vld [vmem:[%s926_s24 + $0x8] sm:$0xff]   ;;  %v863_v12 = vld [vmem:[%s926_s24 + $0x10] sm:$0xff]  }
   0xf   : > { %v860_v5 = vld [vmem:[%s926_s24 + $0x40] sm:$0xff]   ;;  %795 = vmatprep.mubr.bf16.mxu0 %v859_v4  ;;  %v862_v11 = vld [vmem:[%s926_s24 + $0x48] sm:$0xff]   ;;  %v864_v13 = vld [vmem:[%s926_s24 + $0x50] sm:$0xff]  }
  0x10   : > { %811 = vmatprep.mubr.bf16.mxu1 %v860_v5  ;;  %v865_v14 = vld [vmem:[%s926_s24 + $0x18] sm:$0xff]   ;;  %v867_v16 = vld [vmem:[%s926_s24 + $0x20] sm:$0xff]   ;;  %v869_v18 = vld [vmem:[%s926_s24 + $0x28] sm:$0xff]  }
  0x11   : > { %782 = vmatpush3.bf16.msra.mxu0 %v852_v1  ;;  %836 = vmatpush3.bf16.msra.mxu1 %v852_v1  ;;  %v866_v15 = vld [vmem:[%s926_s24 + $0x58] sm:$0xff]   ;;  %v868_v17 = vld [vmem:[%s926_s24 + $0x60] sm:$0xff]   ;;  %v870_v19 = vld [vmem:[%s926_s24 + $0x68] sm:$0xff]  }
  0x12   : > { %783 = vmatprep.subr.bf16.mxu0 %v853_v2  ;;  %829 = vmatprep.subr.bf16.mxu1 %v853_v2  ;;  %v871_v20 = vld [vmem:[%s926_s24 + $0x30] sm:$0xff]   ;;  %v873_v22 = vld [vmem:[%s926_s24 + $0x38] sm:$0xff]   ;;  %v962_v24 = vld [vmem:[%s1039_s2] ss:$0 sm:$0xff] }
  0x13   : > { %v872_v21 = vld [vmem:[%s926_s24 + $0x70] sm:$0xff]   ;;  %v874_v23 = vld [vmem:[%s926_s24 + $0x78] sm:$0xff]  }
  0x15   : > { %784 = vmatpush3.bf16.msra.mxu0 %v853_v2  ;;  %837 = vmatpush3.bf16.msra.mxu1 %v853_v2 }
  0x16   : > { %785 = vmatprep.subr.bf16.mxu0 %v854_v3  ;;  %830 = vmatprep.subr.bf16.mxu1 %v854_v3 }
  0x19   : > { %786 = vmatpush3.bf16.msra.mxu0 %v854_v3  ;;  %838 = vmatpush3.bf16.msra.mxu1 %v854_v3 }
  0x1a   : > { %787 = vmatprep.subr.bf16.mxu0 %v855_v6  ;;  %831 = vmatprep.subr.bf16.mxu1 %v855_v6 }
  0x1d   : > { %788 = vmatpush3.bf16.msra.mxu0 %v855_v6  ;;  %839 = vmatpush3.bf16.msra.mxu1 %v855_v6 }
  0x1e   : > { %789 = vmatprep.subr.bf16.mxu0 %v856_v7  ;;  %832 = vmatprep.subr.bf16.mxu1 %v856_v7 }
  0x21   : > { %790 = vmatpush3.bf16.msra.mxu0 %v856_v7  ;;  %840 = vmatpush3.bf16.msra.mxu1 %v856_v7 }
  0x22   : > { %791 = vmatprep.subr.bf16.mxu0 %v857_v8  ;;  %833 = vmatprep.subr.bf16.mxu1 %v857_v8 }
  0x25   : > { %792 = vmatpush3.bf16.msra.mxu0 %v857_v8  ;;  %841 = vmatpush3.bf16.msra.mxu1 %v857_v8 }
  0x26   : > { %793 = vmatprep.subr.bf16.mxu0 %v858_v9  ;;  %834 = vmatprep.subr.bf16.mxu1 %v858_v9 }
  0x29   : > { %794 = vmatpush3.bf16.msra.mxu0 %v858_v9  ;;  %842 = vmatpush3.bf16.msra.mxu1 %v858_v9 }
  0x2c   : > { %796 = vmatmul.mubr.bf16.vlgmr.msra.gmra.mxu0 %v861_v10  ;;  %812 = vmatmul.mubr.bf16.vlgmr.msra.gmra.mxu1 %v862_v11 }
  0x2d   : > { %799 = vmatprep.mubr.bf16.mxu0 %v863_v12  ;;  %815 = vmatprep.mubr.bf16.mxu1 %v864_v13 }
  0x34   : > { %800 = vmatmul.mubr.bf16.gmra.mxu0 %v865_v14  ;;  %816 = vmatmul.mubr.bf16.gmra.mxu1 %v866_v15 }
  0x35   : > { %803 = vmatprep.mubr.bf16.mxu0 %v867_v16  ;;  %819 = vmatprep.mubr.bf16.mxu1 %v868_v17 }
  0x3c   : > { %804 = vmatmul.mubr.bf16.gmra.mxu0 %v869_v18  ;;  %820 = vmatmul.mubr.bf16.gmra.mxu1 %v870_v19 }
  0x3d   : > { %807 = vmatprep.mubr.bf16.mxu0 %v871_v20  ;;  %823 = vmatprep.mubr.bf16.mxu1 %v872_v21 }
  0x44   : > { %808 = vmatmul.mubr.bf16.gmra.mxu0 %v873_v22  ;;  %824 = vmatmul.mubr.bf16.gmra.mxu1 %v874_v23 }
  0xec   : > { %v797_v25 = vpop.f32.mrf.mxu0  ;;  %v813_v26 = vpop.f32.mrf.mxu1 }
  0xed   : > { %v417_v27 = vadd.f32 %v797_v25, %v962_v24  ;;  %v481_v28 = vadd.f32 %v813_v26, %v962_v24 }
  0xee   : > { %v408_v29 = vpop.f32.mrf.mxu0  ;;  %v472_v30 = vpop.f32.mrf.mxu1 }
  0xef   : > { %vm537_vm0 = vcmp.gt.f32.partialorder %v417_v27, 0.0  ;;  %v569_v31 = vmul.f32 0.2, %v417_v27  ;;  %vm553_vm1 = vcmp.gt.f32.partialorder %v481_v28, 0.0  ;;  %v585_v32 = vmul.f32 0.2, %v481_v28 }
  0xf0   : > { %v409_v33 = vadd.f32 %v962_v24, %v408_v29  ;;  %v473_v34 = vadd.f32 %v962_v24, %v472_v30  ;;  %v798_v35 = vpop.f32.mrf.mxu0  ;;  %v814_v36 = vpop.f32.mrf.mxu1 }
  0xf1   : > { %v601_v37 = vsel %vm537_vm0, %v417_v27, %v569_v31  ;;  %v617_v38 = vsel %vm553_vm1, %v481_v28, %v585_v32  ;;  %v420_v39 = vadd.f32 %v798_v35, %v962_v24  ;;  %v484_v40 = vadd.f32 %v814_v36, %v962_v24 }
  0xf2   : > { %633 = vst [vmem:[%s970_s14 + $0x10] sm:$0xff] %v601_v37  ;;  %649 = vst [vmem:[%s970_s14 + $0x90] sm:$0xff] %v617_v38  ;;  %vm535_vm2 = vcmp.gt.f32.partialorder %v409_v33, 0.0  ;;  %v567_v41 = vmul.f32 0.2, %v409_v33  ;;  %vm551_vm3 = vcmp.gt.f32.partialorder %v473_v34, 0.0  ;;  %v411_v43 = vpop.f32.mrf.mxu0  ;;  %v475_v44 = vpop.f32.mrf.mxu1 }
  0xf3   : > { %v583_v42 = vmul.f32 0.2, %v473_v34  ;;  %vm538_vm4 = vcmp.gt.f32.partialorder %v420_v39, 0.0  ;;  %v570_v45 = vmul.f32 0.2, %v420_v39  ;;  %vm554_vm5 = vcmp.gt.f32.partialorder %v484_v40, 0.0 }
  0xf4   : > { %v586_v46 = vmul.f32 0.2, %v484_v40  ;;  %v599_v47 = vsel %vm535_vm2, %v409_v33, %v567_v41  ;;  %v412_v49 = vadd.f32 %v962_v24, %v411_v43  ;;  %v476_v50 = vadd.f32 %v962_v24, %v475_v44  ;;  %v801_v51 = vpop.f32.mrf.mxu0  ;;  %v817_v52 = vpop.f32.mrf.mxu1 }
  0xf5   : > { %v615_v48 = vsel %vm551_vm3, %v473_v34, %v583_v42  ;;  %631 = vst [vmem:[%s970_s14] sm:$0xff] %v599_v47  ;;  %v602_v53 = vsel %vm538_vm4, %v420_v39, %v570_v45  ;;  %v433_v55 = vadd.f32 %v801_v51, %v962_v24  ;;  %v497_v56 = vadd.f32 %v817_v52, %v962_v24 }
  0xf6   : > { %647 = vst [vmem:[%s970_s14 + $0x80] sm:$0xff] %v615_v48  ;;  %v618_v54 = vsel %vm554_vm5, %v484_v40, %v586_v46  ;;  %634 = vst [vmem:[%s970_s14 + $0x18] sm:$0xff] %v602_v53  ;;  %vm536_vm6 = vcmp.gt.f32.partialorder %v412_v49, 0.0  ;;  %v568_v57 = vmul.f32 0.2, %v412_v49  ;;  %vm552_vm7 = vcmp.gt.f32.partialorder %v476_v50, 0.0  ;;  %v424_v59 = vpop.f32.mrf.mxu0  ;;  %v488_v60 = vpop.f32.mrf.mxu1 }
  0xf7   : > { %650 = vst [vmem:[%s970_s14 + $0x98] sm:$0xff] %v618_v54  ;;  %v584_v58 = vmul.f32 0.2, %v476_v50  ;;  %vm541_vm8 = vcmp.gt.f32.partialorder %v433_v55, 0.0  ;;  %v573_v61 = vmul.f32 0.2, %v433_v55  ;;  %v425_v1 = vadd.f32 %v962_v24, %v424_v59 }
  0xf8   : > { %vm557_vm9 = vcmp.gt.f32.partialorder %v497_v56, 0.0  ;;  %v589_v62 = vmul.f32 0.2, %v497_v56  ;;  %v600_v63 = vsel %vm536_vm6, %v412_v49, %v568_v57  ;;  %v489_v2 = vadd.f32 %v962_v24, %v488_v60  ;;  %v802_v3 = vpop.f32.mrf.mxu0  ;;  %v818_v4 = vpop.f32.mrf.mxu1 }
  0xf9   : > { %v616_v0 = vsel %vm552_vm7, %v476_v50, %v584_v58  ;;  %632 = vst [vmem:[%s970_s14 + $0x8] sm:$0xff] %v600_v63  ;;  %v605_v5 = vsel %vm541_vm8, %v433_v55, %v573_v61  ;;  %v436_v7 = vadd.f32 %v802_v3, %v962_v24  ;;  %v500_v8 = vadd.f32 %v818_v4, %v962_v24 }
  0xfa   : > { %648 = vst [vmem:[%s970_s14 + $0x88] sm:$0xff] %v616_v0  ;;  %v621_v6 = vsel %vm557_vm9, %v497_v56, %v589_v62  ;;  %637 = vst [vmem:[%s970_s14 + $0x30] sm:$0xff] %v605_v5  ;;  %vm539_vm10 = vcmp.gt.f32.partialorder %v425_v1, 0.0  ;;  %v571_v9 = vmul.f32 0.2, %v425_v1  ;;  %vm555_vm11 = vcmp.gt.f32.partialorder %v489_v2, 0.0  ;;  %v427_v11 = vpop.f32.mrf.mxu0  ;;  %v491_v12 = vpop.f32.mrf.mxu1 }
  0xfb   : > { %653 = vst [vmem:[%s970_s14 + $0xb0] sm:$0xff] %v621_v6  ;;  %v587_v10 = vmul.f32 0.2, %v489_v2  ;;  %vm542_vm12 = vcmp.gt.f32.partialorder %v436_v7, 0.0  ;;  %v574_v13 = vmul.f32 0.2, %v436_v7  ;;  %v428_v17 = vadd.f32 %v962_v24, %v427_v11 }
  0xfc   : > { %vm558_vm13 = vcmp.gt.f32.partialorder %v500_v8, 0.0  ;;  %v590_v14 = vmul.f32 0.2, %v500_v8  ;;  %v603_v15 = vsel %vm539_vm10, %v425_v1, %v571_v9  ;;  %v492_v18 = vadd.f32 %v962_v24, %v491_v12  ;;  %v805_v19 = vpop.f32.mrf.mxu0  ;;  %v821_v20 = vpop.f32.mrf.mxu1 }
  0xfd   : > { %v619_v16 = vsel %vm555_vm11, %v489_v2, %v587_v10  ;;  %635 = vst [vmem:[%s970_s14 + $0x20] sm:$0xff] %v603_v15  ;;  %v606_v21 = vsel %vm542_vm12, %v436_v7, %v574_v13  ;;  %v449_v23 = vadd.f32 %v805_v19, %v962_v24  ;;  %v513_v25 = vadd.f32 %v821_v20, %v962_v24 }
  0xfe   : > { %651 = vst [vmem:[%s970_s14 + $0xa0] sm:$0xff] %v619_v16  ;;  %v622_v22 = vsel %vm558_vm13, %v500_v8, %v590_v14  ;;  %638 = vst [vmem:[%s970_s14 + $0x38] sm:$0xff] %v606_v21  ;;  %vm540_vm14 = vcmp.gt.f32.partialorder %v428_v17, 0.0  ;;  %v572_v26 = vmul.f32 0.2, %v428_v17  ;;  %vm556_vm15 = vcmp.gt.f32.partialorder %v492_v18, 0.0  ;;  %v440_v28 = vpop.f32.mrf.mxu0  ;;  %v504_v29 = vpop.f32.mrf.mxu1 }
  0xff   : > { %654 = vst [vmem:[%s970_s14 + $0xb8] sm:$0xff] %v622_v22  ;;  %v588_v27 = vmul.f32 0.2, %v492_v18  ;;  %vm545_vm0 = vcmp.gt.f32.partialorder %v449_v23, 0.0  ;;  %v577_v30 = vmul.f32 0.2, %v449_v23  ;;  %v441_v34 = vadd.f32 %v962_v24, %v440_v28 }
 0x100   : > { %vm561_vm1 = vcmp.gt.f32.partialorder %v513_v25, 0.0  ;;  %v593_v31 = vmul.f32 0.2, %v513_v25  ;;  %v604_v32 = vsel %vm540_vm14, %v428_v17, %v572_v26  ;;  %v505_v35 = vadd.f32 %v962_v24, %v504_v29  ;;  %v806_v36 = vpop.f32.mrf.mxu0  ;;  %v822_v37 = vpop.f32.mrf.mxu1 }
 0x101   : > { %v620_v33 = vsel %vm556_vm15, %v492_v18, %v588_v27  ;;  %636 = vst [vmem:[%s970_s14 + $0x28] sm:$0xff] %v604_v32  ;;  %v609_v38 = vsel %vm545_vm0, %v449_v23, %v577_v30  ;;  %v452_v40 = vadd.f32 %v806_v36, %v962_v24  ;;  %v516_v41 = vadd.f32 %v822_v37, %v962_v24 }
 0x102   : > { %652 = vst [vmem:[%s970_s14 + $0xa8] sm:$0xff] %v620_v33  ;;  %v625_v39 = vsel %vm561_vm1, %v513_v25, %v593_v31  ;;  %641 = vst [vmem:[%s970_s14 + $0x50] sm:$0xff] %v609_v38  ;;  %vm543_vm2 = vcmp.gt.f32.partialorder %v441_v34, 0.0  ;;  %v575_v42 = vmul.f32 0.2, %v441_v34  ;;  %vm559_vm3 = vcmp.gt.f32.partialorder %v505_v35, 0.0  ;;  %v443_v44 = vpop.f32.mrf.mxu0  ;;  %v507_v45 = vpop.f32.mrf.mxu1 }
 0x103   : > { %657 = vst [vmem:[%s970_s14 + $0xd0] sm:$0xff] %v625_v39  ;;  %v591_v43 = vmul.f32 0.2, %v505_v35  ;;  %vm546_vm4 = vcmp.gt.f32.partialorder %v452_v40, 0.0  ;;  %v578_v46 = vmul.f32 0.2, %v452_v40  ;;  %v444_v50 = vadd.f32 %v962_v24, %v443_v44 }
 0x104   : > { %vm562_vm5 = vcmp.gt.f32.partialorder %v516_v41, 0.0  ;;  %v594_v47 = vmul.f32 0.2, %v516_v41  ;;  %v607_v48 = vsel %vm543_vm2, %v441_v34, %v575_v42  ;;  %v508_v51 = vadd.f32 %v962_v24, %v507_v45  ;;  %v809_v52 = vpop.f32.mrf.mxu0  ;;  %v825_v53 = vpop.f32.mrf.mxu1 }
 0x105   : > { %v623_v49 = vsel %vm559_vm3, %v505_v35, %v591_v43  ;;  %639 = vst [vmem:[%s970_s14 + $0x40] sm:$0xff] %v607_v48  ;;  %v610_v54 = vsel %vm546_vm4, %v452_v40, %v578_v46  ;;  %v465_v56 = vadd.f32 %v809_v52, %v962_v24  ;;  %v529_v57 = vadd.f32 %v825_v53, %v962_v24 }
 0x106   : > { %655 = vst [vmem:[%s970_s14 + $0xc0] sm:$0xff] %v623_v49  ;;  %v626_v55 = vsel %vm562_vm5, %v516_v41, %v594_v47  ;;  %642 = vst [vmem:[%s970_s14 + $0x58] sm:$0xff] %v610_v54  ;;  %vm544_vm6 = vcmp.gt.f32.partialorder %v444_v50, 0.0  ;;  %v576_v58 = vmul.f32 0.2, %v444_v50  ;;  %vm560_vm7 = vcmp.gt.f32.partialorder %v508_v51, 0.0  ;;  %v456_v60 = vpop.f32.mrf.mxu0  ;;  %v520_v61 = vpop.f32.mrf.mxu1 }
 0x107   : > { %658 = vst [vmem:[%s970_s14 + $0xd8] sm:$0xff] %v626_v55  ;;  %v592_v59 = vmul.f32 0.2, %v508_v51  ;;  %vm549_vm8 = vcmp.gt.f32.partialorder %v465_v56, 0.0  ;;  %v581_v62 = vmul.f32 0.2, %v465_v56  ;;  %v457_v2 = vadd.f32 %v962_v24, %v456_v60 }
 0x108   : > { %vm565_vm9 = vcmp.gt.f32.partialorder %v529_v57, 0.0  ;;  %v597_v63 = vmul.f32 0.2, %v529_v57  ;;  %v608_v0 = vsel %vm544_vm6, %v444_v50, %v576_v58  ;;  %v521_v3 = vadd.f32 %v962_v24, %v520_v61  ;;  %v810_v4 = vpop.f32.mrf.mxu0  ;;  %v826_v5 = vpop.f32.mrf.mxu1 }
 0x109   : > { %v624_v1 = vsel %vm560_vm7, %v508_v51, %v592_v59  ;;  %640 = vst [vmem:[%s970_s14 + $0x48] sm:$0xff] %v608_v0  ;;  %v613_v6 = vsel %vm549_vm8, %v465_v56, %v581_v62  ;;  %v468_v8 = vadd.f32 %v810_v4, %v962_v24  ;;  %v532_v9 = vadd.f32 %v826_v5, %v962_v24 }
 0x10a   : > { %656 = vst [vmem:[%s970_s14 + $0xc8] sm:$0xff] %v624_v1  ;;  %v629_v7 = vsel %vm565_vm9, %v529_v57, %v597_v63  ;;  %645 = vst [vmem:[%s970_s14 + $0x70] sm:$0xff] %v613_v6  ;;  %vm547_vm10 = vcmp.gt.f32.partialorder %v457_v2, 0.0  ;;  %v579_v10 = vmul.f32 0.2, %v457_v2  ;;  %vm563_vm11 = vcmp.gt.f32.partialorder %v521_v3, 0.0  ;;  %v459_v12 = vpop.f32.mrf.mxu0  ;;  %v523_v13 = vpop.f32.mrf.mxu1 }
 0x10b   : > { %661 = vst [vmem:[%s970_s14 + $0xf0] sm:$0xff] %v629_v7  ;;  %v595_v11 = vmul.f32 0.2, %v521_v3  ;;  %vm550_vm12 = vcmp.gt.f32.partialorder %v468_v8, 0.0  ;;  %v582_v14 = vmul.f32 0.2, %v468_v8  ;;  %v460_v18 = vadd.f32 %v962_v24, %v459_v12 }
 0x10c   : > { %vm566_vm13 = vcmp.gt.f32.partialorder %v532_v9, 0.0  ;;  %v598_v15 = vmul.f32 0.2, %v532_v9  ;;  %v611_v16 = vsel %vm547_vm10, %v457_v2, %v579_v10  ;;  %v524_v19 = vadd.f32 %v962_v24, %v523_v13 }
 0x10d   : > { %v627_v17 = vsel %vm563_vm11, %v521_v3, %v595_v11  ;;  %643 = vst [vmem:[%s970_s14 + $0x60] sm:$0xff] %v611_v16  ;;  %v614_v20 = vsel %vm550_vm12, %v468_v8, %v582_v14  ;;  %vm548_vm14 = vcmp.gt.f32.partialorder %v460_v18, 0.0  ;;  %v580_v22 = vmul.f32 0.2, %v460_v18 }
 0x10e   : > { %659 = vst [vmem:[%s970_s14 + $0xe0] sm:$0xff] %v627_v17  ;;  %v630_v21 = vsel %vm566_vm13, %v532_v9, %v598_v15  ;;  %646 = vst [vmem:[%s970_s14 + $0x78] sm:$0xff] %v614_v20  ;;  %vm564_vm15 = vcmp.gt.f32.partialorder %v524_v19, 0.0  ;;  %v596_v23 = vmul.f32 0.2, %v524_v19 }
 0x10f   : > { %662 = vst [vmem:[%s970_s14 + $0xf8] sm:$0xff] %v630_v21  ;;  %v612_v25 = vsel %vm548_vm14, %v460_v18, %v580_v22 }
 0x110   : > { %v628_v26 = vsel %vm564_vm15, %v524_v19, %v596_v23  ;;  %644 = vst [vmem:[%s970_s14 + $0x68] sm:$0xff] %v612_v25 }
 0x111   : > { %660 = vst [vmem:[%s970_s14 + $0xe8] sm:$0xff] %v628_v26 }
 0x112 PF: > { %s13_s12 = sadd.s32 1, %s881_s12  }
 0x113   : > { %p10_p4 = scmp.ge.s32.totalorder %s13_s12, 4  }
 0x115   :  { %12 = sbr.rel (!%p10_p4) target bundleno = 1 (0x1), region = 62 }

// kernel: discriminator_forward.6
= control target key start
LH: loop header
LB: loop body
LE: loop exit
PB: predicated region body
PF: predicated region fallthrough
CT: control target
= control target key end

     0   :  { %s2593_s1 = inlined_call_operand.vmem [shape: bf16[1024,128], index: 1, kind: input, shape index: {}]   ;;  %s2594_s0 = inlined_call_operand.vmem [shape: bf16[128,1024], index: 0, kind: input, shape index: {}]   ;;  %s2595_s2 = inlined_call_operand.vmem [shape: f32[1,128], index: 2, kind: input, shape index: {}]   ;;  %s2596_s3 = inlined_call_operand.vmem [shape: f32[128,128], index: 3, kind: output, shape index: {}]  }
   0x1   :  { %v1871_v0 = vld [vmem:[%s2593_s1 + $0x78] sm:$0xff]   ;;  %v1875_v4 = vld [vmem:[%s2593_s1 + $0x70] sm:$0xff]   ;;  %v1879_v8 = vld [vmem:[%s2593_s1 + $0x68] sm:$0xff]  }
   0x2   :  { %v1872_v1 = vld [vmem:[%s2593_s1 + $0xf8] sm:$0xff]   ;;  %1615 = vmatprep.subr.bf16.mxu0 %v1871_v0  ;;  %v1876_v5 = vld [vmem:[%s2593_s1 + $0xf0] sm:$0xff]   ;;  %v1880_v9 = vld [vmem:[%s2593_s1 + $0xe8] sm:$0xff]  }
   0x3   :  { %v1873_v2 = vld [vmem:[%s2593_s1 + $0x38] sm:$0xff]   ;;  %1679 = vmatprep.subr.bf16.mxu1 %v1872_v1  ;;  %v1877_v6 = vld [vmem:[%s2593_s1 + $0x30] sm:$0xff]   ;;  %v1881_v10 = vld [vmem:[%s2593_s1 + $0x28] sm:$0xff]  }
   0x4   :  { %v1874_v3 = vld [vmem:[%s2593_s1 + $0xb8] sm:$0xff]   ;;  %1616 = vmatpush3.bf16.msra.mxu0 %v1873_v2  ;;  %v1878_v7 = vld [vmem:[%s2593_s1 + $0xb0] sm:$0xff]   ;;  %v1882_v11 = vld [vmem:[%s2593_s1 + $0xa8] sm:$0xff]  }
   0x5   :  { %1680 = vmatpush3.bf16.msra.mxu1 %v1874_v3  ;;  %1617 = vmatprep.subr.bf16.mxu0 %v1875_v4  ;;  %v1883_v12 = vld [vmem:[%s2593_s1 + $0x60] sm:$0xff]   ;;  %v1887_v16 = vld [vmem:[%s2593_s1 + $0x58] sm:$0xff]   ;;  %v1891_v20 = vld [vmem:[%s2593_s1 + $0x50] sm:$0xff]  }
   0x6   :  { %1681 = vmatprep.subr.bf16.mxu1 %v1876_v5  ;;  %v1884_v13 = vld [vmem:[%s2593_s1 + $0xe0] sm:$0xff]   ;;  %v1888_v17 = vld [vmem:[%s2593_s1 + $0xd8] sm:$0xff]   ;;  %v1892_v21 = vld [vmem:[%s2593_s1 + $0xd0] sm:$0xff]  }
   0x7   :  { %v1885_v14 = vld [vmem:[%s2593_s1 + $0x20] sm:$0xff]   ;;  %v1889_v18 = vld [vmem:[%s2593_s1 + $0x18] sm:$0xff]   ;;  %v1893_v22 = vld [vmem:[%s2593_s1 + $0x10] sm:$0xff]  }
   0x8   :  { %1618 = vmatpush3.bf16.msra.mxu0 %v1877_v6  ;;  %v1886_v15 = vld [vmem:[%s2593_s1 + $0xa0] sm:$0xff]   ;;  %v1890_v19 = vld [vmem:[%s2593_s1 + $0x98] sm:$0xff]   ;;  %v1894_v23 = vld [vmem:[%s2593_s1 + $0x90] sm:$0xff]  }
   0x9   :  { %1682 = vmatpush3.bf16.msra.mxu1 %v1878_v7  ;;  %1619 = vmatprep.subr.bf16.mxu0 %v1879_v8  ;;  %v1895_v24 = vld [vmem:[%s2593_s1 + $0x48] sm:$0xff]   ;;  %v1899_v28 = vld [vmem:[%s2593_s1 + $0x40] sm:$0xff]   ;;  %v1903_v40 = vld [vmem:[%s2593_s1 + $0x178] sm:$0xff]  }
   0xa   :  { %1683 = vmatprep.subr.bf16.mxu1 %v1880_v9  ;;  %v1896_v25 = vld [vmem:[%s2593_s1 + $0xc8] sm:$0xff]   ;;  %v1900_v29 = vld [vmem:[%s2593_s1 + $0xc0] sm:$0xff]   ;;  %v1904_v41 = vld [vmem:[%s2593_s1 + $0x138] sm:$0xff]  }
   0xb   :  { %v1897_v26 = vld [vmem:[%s2593_s1 + $0x8] sm:$0xff]   ;;  %v1901_v30 = vld [vmem:[%s2593_s1] sm:$0xff]   ;;  %v1905_v42 = vld [vmem:[%s2593_s1 + $0x1f8] sm:$0xff]  }
   0xc   :  { %1620 = vmatpush3.bf16.msra.mxu0 %v1881_v10  ;;  %v1898_v27 = vld [vmem:[%s2593_s1 + $0x88] sm:$0xff]   ;;  %v1902_v31 = vld [vmem:[%s2593_s1 + $0x80] sm:$0xff]   ;;  %v1906_v43 = vld [vmem:[%s2593_s1 + $0x1b8] sm:$0xff]  }
   0xd   :  { %1684 = vmatpush3.bf16.msra.mxu1 %v1882_v11  ;;  %1621 = vmatprep.subr.bf16.mxu0 %v1883_v12  ;;  %v15_v32 = vld [vmem:[%s2594_s0] sm:$0xff]  ;;  %v16_v34 = vld [vmem:[%s2594_s0 + $0x8] sm:$0xff]  ;;  %v1907_v50 = vld [vmem:[%s2593_s1 + $0x170] sm:$0xff]  }
   0xe   :  { %1685 = vmatprep.subr.bf16.mxu1 %v1884_v13  ;;  %v19_v33 = vld [vmem:[%s2594_s0 + $0x20] sm:$0xff]  ;;  %v20_v37 = vld [vmem:[%s2594_s0 + $0x28] sm:$0xff]  ;;  %v1908_v52 = vld [vmem:[%s2593_s1 + $0x130] sm:$0xff]  }
   0xf   :  { %v1487_v35 = vcombine.low %v15_v32, %v19_v33  ;;  %v1488_v36 = vcombine.high %v15_v32, %v19_v33  ;;  %v1489_v38 = vcombine.low %v16_v34, %v20_v37  ;;  %v1490_v39 = vcombine.high %v16_v34, %v20_v37  ;;  %v23_v44 = vld [vmem:[%s2594_s0 + $0x40] sm:$0xff]  ;;  %v24_v47 = vld [vmem:[%s2594_s0 + $0x48] sm:$0xff]  ;;  %v1909_v54 = vld [vmem:[%s2593_s1 + $0x1f0] sm:$0xff]  }
  0x10   :  { %1622 = vmatpush3.bf16.msra.mxu0 %v1885_v14  ;;  %v27_v45 = vld [vmem:[%s2594_s0 + $0x60] sm:$0xff]  ;;  %v28_v48 = vld [vmem:[%s2594_s0 + $0x68] sm:$0xff]  ;;  %v1910_v55 = vld [vmem:[%s2593_s1 + $0x1b0] sm:$0xff]  }
  0x11   :  { %1686 = vmatpush3.bf16.msra.mxu1 %v1886_v15  ;;  %1623 = vmatprep.subr.bf16.mxu0 %v1887_v16  ;;  %v1496_v46 = vcombine.high %v23_v44, %v27_v45  ;;  %v1498_v49 = vcombine.high %v24_v47, %v28_v48  ;;  %v1495_v51 = vcombine.low %v23_v44, %v27_v45  ;;  %v31_v56 = vld [vmem:[%s2594_s0 + $0x80] sm:$0xff]  ;;  %v32_v58 = vld [vmem:[%s2594_s0 + $0x88] sm:$0xff]  ;;  %v1925_v32 = vld [vmem:[%s2593_s1 + $0x1d0] sm:$0xff]  }
  0x12   :  { %1687 = vmatprep.subr.bf16.mxu1 %v1888_v17  ;;  %950 = vmatprep.mubr.bf16.mxu0 %v1488_v36  ;;  %v1497_v53 = vcombine.low %v24_v47, %v28_v48  ;;  %v35_v57 = vld [vmem:[%s2594_s0 + $0xa0] sm:$0xff]  ;;  %v36_v59 = vld [vmem:[%s2594_s0 + $0xa8] sm:$0xff]  ;;  %v1926_v33 = vld [vmem:[%s2593_s1 + $0x190] sm:$0xff]  }
  0x13   :  { %1047 = vmatprep.mubr.bf16.mxu1 %v1490_v39  ;;  %v1504_v60 = vcombine.high %v31_v56, %v35_v57  ;;  %v1506_v61 = vcombine.high %v32_v58, %v36_v59  ;;  %v1911_v62 = vld [vmem:[%s2593_s1 + $0x168] sm:$0xff]   ;;  %v1503_v2 = vcombine.low %v31_v56, %v35_v57  ;;  %v39_v3 = vld [vmem:[%s2594_s0 + $0xc0] sm:$0xff]  ;;  %v1505_v6 = vcombine.low %v32_v58, %v36_v59 }
  0x14   :  { %1624 = vmatpush3.bf16.msra.mxu0 %v1889_v18  ;;  %v1912_v63 = vld [vmem:[%s2593_s1 + $0x128] sm:$0xff]   ;;  %v43_v4 = vld [vmem:[%s2594_s0 + $0xe0] sm:$0xff]  ;;  %v1919_v18 = vld [vmem:[%s2593_s1 + $0x158] sm:$0xff]  }
  0x15   :  { %1688 = vmatpush3.bf16.msra.mxu1 %v1890_v19  ;;  %1625 = vmatprep.subr.bf16.mxu0 %v1891_v20  ;;  %v1913_v0 = vld [vmem:[%s2593_s1 + $0x1e8] sm:$0xff]   ;;  %v1512_v7 = vcombine.high %v39_v3, %v43_v4  ;;  %v1915_v10 = vld [vmem:[%s2593_s1 + $0x160] sm:$0xff]   ;;  %v1511_v19 = vcombine.low %v39_v3, %v43_v4  ;;  %v1920_v20 = vld [vmem:[%s2593_s1 + $0x118] sm:$0xff]  }
  0x16   :  { %1689 = vmatprep.subr.bf16.mxu1 %v1892_v21  ;;  %v1914_v1 = vld [vmem:[%s2593_s1 + $0x1a8] sm:$0xff]   ;;  %v1916_v11 = vld [vmem:[%s2593_s1 + $0x120] sm:$0xff]  }
  0x17   :  { %v40_v5 = vld [vmem:[%s2594_s0 + $0xc8] sm:$0xff]  ;;  %v1917_v12 = vld [vmem:[%s2593_s1 + $0x1e0] sm:$0xff]  }
  0x18   :  { %1626 = vmatpush3.bf16.msra.mxu0 %v1893_v22  ;;  %v44_v8 = vld [vmem:[%s2594_s0 + $0xe8] sm:$0xff]  ;;  %v1918_v13 = vld [vmem:[%s2593_s1 + $0x1a0] sm:$0xff]  }
  0x19   :  { %1690 = vmatpush3.bf16.msra.mxu1 %v1894_v23  ;;  %1627 = vmatprep.subr.bf16.mxu0 %v1895_v24  ;;  %v1514_v9 = vcombine.high %v40_v5, %v44_v8  ;;  %v47_v14 = vld [vmem:[%s2594_s0 + $0x100] sm:$0xff]  ;;  %v48_v16 = vld [vmem:[%s2594_s0 + $0x108] sm:$0xff]  ;;  %v1513_v21 = vcombine.low %v40_v5, %v44_v8  ;;  %v1921_v23 = vld [vmem:[%s2593_s1 + $0x1d8] sm:$0xff]  }
  0x1a   :  { %1691 = vmatprep.subr.bf16.mxu1 %v1896_v25  ;;  %v51_v15 = vld [vmem:[%s2594_s0 + $0x120] sm:$0xff]  ;;  %v52_v17 = vld [vmem:[%s2594_s0 + $0x128] sm:$0xff]  ;;  %v1922_v25 = vld [vmem:[%s2593_s1 + $0x198] sm:$0xff]  }
  0x1b   :  { %v1520_v22 = vcombine.high %v47_v14, %v51_v15  ;;  %v1522_v24 = vcombine.high %v48_v16, %v52_v17  ;;  %v1519_v34 = vcombine.low %v47_v14, %v51_v15  ;;  %v1928_v39 = vld [vmem:[%s2593_s1 + $0x108] sm:$0xff]   ;;  %v1932_v48 = vld [vmem:[%s2593_s1 + $0x100] sm:$0xff]   ;;  %v26_v8 = vld [vmem:[%s2594_s0 + $0x58] sm:$0xff] }
  0x1c   :  { %1628 = vmatpush3.bf16.msra.mxu0 %v1897_v26  ;;  %v55_v26 = vld [vmem:[%s2594_s0 + $0x140] sm:$0xff]  ;;  %v64_v44 = vld [vmem:[%s2594_s0 + $0x188] sm:$0xff]  ;;  %v33_v14 = vld [vmem:[%s2594_s0 + $0x90] sm:$0xff] }
  0x1d   :  { %1692 = vmatpush3.bf16.msra.mxu1 %v1898_v27  ;;  %1629 = vmatprep.subr.bf16.mxu0 %v1899_v28  ;;  %v59_v27 = vld [vmem:[%s2594_s0 + $0x160] sm:$0xff]  ;;  %v1923_v28 = vld [vmem:[%s2593_s1 + $0x150] sm:$0xff]   ;;  %v68_v45 = vld [vmem:[%s2594_s0 + $0x1a8] sm:$0xff] }
  0x1e   :  { %1693 = vmatprep.subr.bf16.mxu1 %v1900_v29  ;;  %v56_v29 = vld [vmem:[%s2594_s0 + $0x148] sm:$0xff]  ;;  %v1528_v36 = vcombine.high %v55_v26, %v59_v27  ;;  %v1527_v47 = vcombine.low %v55_v26, %v59_v27  ;;  %v1537_v59 = vcombine.low %v64_v44, %v68_v45  ;;  %v37_v15 = vld [vmem:[%s2594_s0 + $0xb0] sm:$0xff] }
  0x1f   :  { %v72_v56 = vld [vmem:[%s2594_s0 + $0x1c8] sm:$0xff]  ;;  %v1507_v26 = vcombine.low %v33_v14, %v37_v15 }
  0x20   :  { %1630 = vmatpush3.bf16.msra.mxu0 %v1901_v30  ;;  %v60_v30 = vld [vmem:[%s2594_s0 + $0x168] sm:$0xff] }
  0x21   :  { %1694 = vmatpush3.bf16.msra.mxu1 %v1902_v31  ;;  %1743 = vmatprep.subr.bf16.mxu0 %v1903_v40  ;;  %v1924_v31 = vld [vmem:[%s2593_s1 + $0x110] sm:$0xff]   ;;  %v1530_v37 = vcombine.high %v56_v29, %v60_v30  ;;  %v1929_v40 = vld [vmem:[%s2593_s1 + $0x1c8] sm:$0xff]  }
  0x22   :  { %1807 = vmatprep.subr.bf16.mxu1 %v1905_v42  ;;  %v67_v42 = vld [vmem:[%s2594_s0 + $0x1a0] sm:$0xff]  ;;  %v76_v57 = vld [vmem:[%s2594_s0 + $0x1e8] sm:$0xff] }
  0x23   :  { %951 = vmatmul.mubr.bf16.vlgmr.msra.gmra.mxu0 %v1487_v35  ;;  %v1521_v35 = vcombine.low %v48_v16, %v52_v17  ;;  %v1545_v3 = vcombine.low %v72_v56, %v76_v57  ;;  %v34_v16 = vld [vmem:[%s2594_s0 + $0x98] sm:$0xff] }
  0x24   :  { %1048 = vmatmul.mubr.bf16.vlgmr.msra.gmra.mxu1 %v1489_v38  ;;  %1744 = vmatpush3.bf16.msra.mxu0 %v1904_v41  ;;  %v1927_v38 = vld [vmem:[%s2593_s1 + $0x148] sm:$0xff]   ;;  %v63_v41 = vld [vmem:[%s2594_s0 + $0x180] sm:$0xff]  ;;  %v38_v17 = vld [vmem:[%s2594_s0 + $0xb8] sm:$0xff] }
  0x25   :  { %1808 = vmatpush3.bf16.msra.mxu1 %v1906_v43  ;;  %958 = vmatprep.mubr.bf16.mxu0 %v1496_v46  ;;  %v1930_v43 = vld [vmem:[%s2593_s1 + $0x188] sm:$0xff]   ;;  %v1931_v46 = vld [vmem:[%s2593_s1 + $0x140] sm:$0xff]   ;;  %v1535_v58 = vcombine.low %v63_v41, %v67_v42  ;;  %v1509_v27 = vcombine.low %v34_v16, %v38_v17 }
  0x26   :  { %1055 = vmatprep.mubr.bf16.mxu1 %v1498_v49  ;;  %1745 = vmatprep.subr.bf16.mxu0 %v1907_v50  ;;  %v1529_v49 = vcombine.low %v56_v29, %v60_v30  ;;  %v1536_v50 = vcombine.high %v63_v41, %v67_v42  ;;  %v49_v30 = vld [vmem:[%s2594_s0 + $0x110] sm:$0xff]  ;;  %v62_v41 = vld [vmem:[%s2594_s0 + $0x178] sm:$0xff] }
  0x27   :  { %1809 = vmatprep.subr.bf16.mxu1 %v1909_v54  ;;  %v71_v54 = vld [vmem:[%s2594_s0 + $0x1c0] sm:$0xff] }
  0x28   :  { %1746 = vmatpush3.bf16.msra.mxu0 %v1908_v52  ;;  %v1538_v52 = vcombine.high %v64_v44, %v68_v45 }
  0x29   :  { %1810 = vmatpush3.bf16.msra.mxu1 %v1910_v55  ;;  %1747 = vmatprep.subr.bf16.mxu0 %v1911_v62  ;;  %v75_v55 = vld [vmem:[%s2594_s0 + $0x1e0] sm:$0xff]  ;;  %v17_v62 = vld [vmem:[%s2594_s0 + $0x10] sm:$0xff] }
  0x2a   :  { %1811 = vmatprep.subr.bf16.mxu1 %v1913_v0  ;;  %v18_v0 = vld [vmem:[%s2594_s0 + $0x18] sm:$0xff] }
  0x2b   :  { %959 = vmatmul.mubr.bf16.gmra.mxu0 %v1495_v51  ;;  %v1933_v51 = vld [vmem:[%s2593_s1 + $0x1c0] sm:$0xff]  }
  0x2c   :  { %1056 = vmatmul.mubr.bf16.gmra.mxu1 %v1497_v53  ;;  %966 = vmatprep.mubr.bf16.mxu0 %v1504_v60  ;;  %v1934_v53 = vld [vmem:[%s2593_s1 + $0x180] sm:$0xff]   ;;  %v1544_v60 = vcombine.high %v71_v54, %v75_v55 }
  0x2d   :  { %1063 = vmatprep.mubr.bf16.mxu1 %v1506_v61  ;;  %1748 = vmatpush3.bf16.msra.mxu0 %v1912_v63  ;;  %v1546_v61 = vcombine.high %v72_v56, %v76_v57  ;;  %v21_v63 = vld [vmem:[%s2594_s0 + $0x30] sm:$0xff]  ;;  %v74_v56 = vld [vmem:[%s2594_s0 + $0x1d8] sm:$0xff] }
  0x2e   :  { %1812 = vmatpush3.bf16.msra.mxu1 %v1914_v1  ;;  %1749 = vmatprep.subr.bf16.mxu0 %v1915_v10  ;;  %v22_v1 = vld [vmem:[%s2594_s0 + $0x38] sm:$0xff]  ;;  %v1492_v4 = vcombine.high %v17_v62, %v21_v63  ;;  %v1491_v10 = vcombine.low %v17_v62, %v21_v63 }
  0x2f   :  { %1813 = vmatprep.subr.bf16.mxu1 %v1917_v12  ;;  %v1494_v5 = vcombine.high %v18_v0, %v22_v1  ;;  %v78_v57 = vld [vmem:[%s2594_s0 + $0x1f8] sm:$0xff] }
  0x30   :  { %v1549_v63 = vcombine.low %v74_v56, %v78_v57 }
  0x31   :  { %1750 = vmatpush3.bf16.msra.mxu0 %v1916_v11  ;;  %v1493_v11 = vcombine.low %v18_v0, %v22_v1 }
  0x32   :  { %1814 = vmatpush3.bf16.msra.mxu1 %v1918_v13  ;;  %1751 = vmatprep.subr.bf16.mxu0 %v1919_v18 }
  0x33   :  { %967 = vmatmul.mubr.bf16.gmra.mxu0 %v1503_v2  ;;  %1815 = vmatprep.subr.bf16.mxu1 %v1921_v23  ;;  %v1543_v2 = vcombine.low %v71_v54, %v75_v55  ;;  %v45_v23 = vld [vmem:[%s2594_s0 + $0xf0] sm:$0xff] }
  0x34   :  { %1064 = vmatmul.mubr.bf16.gmra.mxu1 %v1505_v6  ;;  %974 = vmatprep.mubr.bf16.mxu0 %v1512_v7  ;;  %v25_v6 = vld [vmem:[%s2594_s0 + $0x50] sm:$0xff] }
  0x35   :  { %1071 = vmatprep.mubr.bf16.mxu1 %v1514_v9  ;;  %1752 = vmatpush3.bf16.msra.mxu0 %v1920_v20  ;;  %v29_v7 = vld [vmem:[%s2594_s0 + $0x70] sm:$0xff]  ;;  %v30_v9 = vld [vmem:[%s2594_s0 + $0x78] sm:$0xff]  ;;  %v1508_v20 = vcombine.high %v33_v14, %v37_v15 }
  0x36   :  { %1816 = vmatpush3.bf16.msra.mxu1 %v1922_v25  ;;  %1753 = vmatprep.subr.bf16.mxu0 %v1923_v28  ;;  %v1500_v12 = vcombine.high %v25_v6, %v29_v7  ;;  %v1502_v13 = vcombine.high %v26_v8, %v30_v9  ;;  %v1499_v18 = vcombine.low %v25_v6, %v29_v7  ;;  %v46_v25 = vld [vmem:[%s2594_s0 + $0xf8] sm:$0xff]  ;;  %v73_v54 = vld [vmem:[%s2594_s0 + $0x1d0] sm:$0xff] }
  0x37   :  { %1817 = vmatprep.subr.bf16.mxu1 %v1925_v32  ;;  %v50_v32 = vld [vmem:[%s2594_s0 + $0x118] sm:$0xff]  ;;  %v77_v55 = vld [vmem:[%s2594_s0 + $0x1f0] sm:$0xff] }
  0x38   :  { %v1547_v62 = vcombine.low %v73_v54, %v77_v55 }
  0x39   :  { %1754 = vmatpush3.bf16.msra.mxu0 %v1924_v31  ;;  %v53_v31 = vld [vmem:[%s2594_s0 + $0x130] sm:$0xff] }
  0x3a   :  { %1818 = vmatpush3.bf16.msra.mxu1 %v1926_v33  ;;  %1755 = vmatprep.subr.bf16.mxu0 %v1927_v38  ;;  %v54_v33 = vld [vmem:[%s2594_s0 + $0x138] sm:$0xff]  ;;  %v57_v38 = vld [vmem:[%s2594_s0 + $0x150] sm:$0xff]  ;;  %v1523_v42 = vcombine.low %v49_v30, %v53_v31 }
  0x3b   :  { %975 = vmatmul.mubr.bf16.gmra.mxu0 %v1511_v19  ;;  %1819 = vmatprep.subr.bf16.mxu1 %v1929_v40  ;;  %v1501_v19 = vcombine.low %v26_v8, %v30_v9  ;;  %v58_v40 = vld [vmem:[%s2594_s0 + $0x158] sm:$0xff] }
  0x3c   :  { %1072 = vmatmul.mubr.bf16.gmra.mxu1 %v1513_v21  ;;  %982 = vmatprep.mubr.bf16.mxu0 %v1520_v22  ;;  %v1510_v21 = vcombine.high %v34_v16, %v38_v17  ;;  %v41_v22 = vld [vmem:[%s2594_s0 + $0xd0] sm:$0xff]  ;;  %v1534_v45 = vcombine.high %v58_v40, %v62_v41 }
  0x3d   :  { %1079 = vmatprep.mubr.bf16.mxu1 %v1522_v24  ;;  %1756 = vmatpush3.bf16.msra.mxu0 %v1928_v39  ;;  %v42_v24 = vld [vmem:[%s2594_s0 + $0xd8] sm:$0xff]  ;;  %v1516_v28 = vcombine.high %v41_v22, %v45_v23  ;;  %v61_v39 = vld [vmem:[%s2594_s0 + $0x170] sm:$0xff] }
  0x3e   :  { %1820 = vmatpush3.bf16.msra.mxu1 %v1930_v43  ;;  %1757 = vmatprep.subr.bf16.mxu0 %v1931_v46  ;;  %v1518_v29 = vcombine.high %v42_v24, %v46_v25  ;;  %v1525_v43 = vcombine.low %v50_v32, %v54_v33  ;;  %v1532_v44 = vcombine.high %v57_v38, %v61_v39  ;;  %v65_v46 = vld [vmem:[%s2594_s0 + $0x190] sm:$0xff] }
  0x3f   :  { %1821 = vmatprep.subr.bf16.mxu1 %v1933_v51  ;;  %v1533_v51 = vcombine.low %v58_v40, %v62_v41 }
  0x41   :  { %1758 = vmatpush3.bf16.msra.mxu0 %v1932_v48  ;;  %v66_v48 = vld [vmem:[%s2594_s0 + $0x198] sm:$0xff] }
  0x42   :  { %1822 = vmatpush3.bf16.msra.mxu1 %v1934_v53 }
  0x43   :  { %983 = vmatmul.mubr.bf16.gmra.mxu0 %v1519_v34  ;;  %v1515_v34 = vcombine.low %v41_v22, %v45_v23 }
  0x44   :  { %1080 = vmatmul.mubr.bf16.gmra.mxu1 %v1521_v35  ;;  %990 = vmatprep.mubr.bf16.mxu0 %v1528_v36  ;;  %v1517_v35 = vcombine.low %v42_v24, %v46_v25  ;;  %v1524_v36 = vcombine.high %v49_v30, %v53_v31 }
  0x45   :  { %1087 = vmatprep.mubr.bf16.mxu1 %v1530_v37  ;;  %v1526_v37 = vcombine.high %v50_v32, %v54_v33 }
  0x4b   :  { %991 = vmatmul.mubr.bf16.gmra.mxu0 %v1527_v47  ;;  %v69_v47 = vld [vmem:[%s2594_s0 + $0x1b0] sm:$0xff] }
  0x4c   :  { %1088 = vmatmul.mubr.bf16.gmra.mxu1 %v1529_v49  ;;  %998 = vmatprep.mubr.bf16.mxu0 %v1536_v50  ;;  %v70_v49 = vld [vmem:[%s2594_s0 + $0x1b8] sm:$0xff]  ;;  %v1531_v50 = vcombine.low %v57_v38, %v61_v39 }
  0x4d   :  { %1095 = vmatprep.mubr.bf16.mxu1 %v1538_v52  ;;  %v1540_v52 = vcombine.high %v65_v46, %v69_v47  ;;  %v1542_v53 = vcombine.high %v66_v48, %v70_v49 }
  0x53   :  { %999 = vmatmul.mubr.bf16.gmra.mxu0 %v1535_v58  ;;  %v1539_v58 = vcombine.low %v65_v46, %v69_v47 }
  0x54   :  { %1096 = vmatmul.mubr.bf16.gmra.mxu1 %v1537_v59  ;;  %1006 = vmatprep.mubr.bf16.mxu0 %v1544_v60  ;;  %v1541_v59 = vcombine.low %v66_v48, %v70_v49  ;;  %v1548_v60 = vcombine.high %v73_v54, %v77_v55 }
  0x55   :  { %1103 = vmatprep.mubr.bf16.mxu1 %v1546_v61  ;;  %v1550_v61 = vcombine.high %v74_v56, %v78_v57 }
  0x5b   :  { %1007 = vmatmul.mubr.bf16.gmra.mxu0 %v1543_v2  ;;  %v2346_v2 = vld [vmem:[%s2595_s2] ss:$0 sm:$0xff] }
  0x5c   :  { %1104 = vmatmul.mubr.bf16.gmra.mxu1 %v1545_v3  ;;  %1144 = vmatprep.mubr.bf16.mxu0 %v1492_v4 }
  0x5d   :  { %1241 = vmatprep.mubr.bf16.mxu1 %v1494_v5 }
  0x63   :  { %1145 = vmatmul.mubr.bf16.vlgmr.msra.gmra.mxu0 %v1491_v10 }
  0x64   :  { %1242 = vmatmul.mubr.bf16.vlgmr.msra.gmra.mxu1 %v1493_v11  ;;  %1152 = vmatprep.mubr.bf16.mxu0 %v1500_v12 }
  0x65   :  { %1249 = vmatprep.mubr.bf16.mxu1 %v1502_v13 }
  0x6b   :  { %1153 = vmatmul.mubr.bf16.gmra.mxu0 %v1499_v18 }
  0x6c   :  { %1250 = vmatmul.mubr.bf16.gmra.mxu1 %v1501_v19  ;;  %1160 = vmatprep.mubr.bf16.mxu0 %v1508_v20 }
  0x6d   :  { %1257 = vmatprep.mubr.bf16.mxu1 %v1510_v21 }
  0x73   :  { %1161 = vmatmul.mubr.bf16.gmra.mxu0 %v1507_v26 }
  0x74   :  { %1258 = vmatmul.mubr.bf16.gmra.mxu1 %v1509_v27  ;;  %1168 = vmatprep.mubr.bf16.mxu0 %v1516_v28 }
  0x75   :  { %1265 = vmatprep.mubr.bf16.mxu1 %v1518_v29 }
  0x7b   :  { %1169 = vmatmul.mubr.bf16.gmra.mxu0 %v1515_v34 }
  0x7c   :  { %1266 = vmatmul.mubr.bf16.gmra.mxu1 %v1517_v35  ;;  %1176 = vmatprep.mubr.bf16.mxu0 %v1524_v36 }
  0x7d   :  { %1273 = vmatprep.mubr.bf16.mxu1 %v1526_v37 }
  0x83   :  { %1177 = vmatmul.mubr.bf16.gmra.mxu0 %v1523_v42 }
  0x84   :  { %1274 = vmatmul.mubr.bf16.gmra.mxu1 %v1525_v43  ;;  %1184 = vmatprep.mubr.bf16.mxu0 %v1532_v44 }
  0x85   :  { %1281 = vmatprep.mubr.bf16.mxu1 %v1534_v45 }
  0x8b   :  { %1185 = vmatmul.mubr.bf16.gmra.mxu0 %v1531_v50 }
  0x8c   :  { %1282 = vmatmul.mubr.bf16.gmra.mxu1 %v1533_v51  ;;  %1192 = vmatprep.mubr.bf16.mxu0 %v1540_v52 }
  0x8d   :  { %1289 = vmatprep.mubr.bf16.mxu1 %v1542_v53 }
  0x93   :  { %1193 = vmatmul.mubr.bf16.gmra.mxu0 %v1539_v58 }
  0x94   :  { %1290 = vmatmul.mubr.bf16.gmra.mxu1 %v1541_v59  ;;  %1200 = vmatprep.mubr.bf16.mxu0 %v1548_v60 }
  0x95   :  { %1297 = vmatprep.mubr.bf16.mxu1 %v1550_v61 }
  0x9b   :  { %1201 = vmatmul.mubr.bf16.gmra.mxu0 %v1547_v62 }
  0x9c   :  { %1298 = vmatmul.mubr.bf16.gmra.mxu1 %v1549_v63 }
  0xe3   :  { %v1631_v0 = vpop.f32.mrf.mxu0 }
  0xe4   :  { %v1695_v1 = vpop.f32.mrf.mxu1 }
  0xe5   :  { %v1632_v3 = vpop.f32.mrf.mxu0 }
  0xe6   :  { %v1633_v4 = vadd.f32 %v1632_v3, %v1631_v0  ;;  %v1696_v5 = vpop.f32.mrf.mxu1 }
  0xe7   :  { %v1697_v6 = vadd.f32 %v1696_v5, %v1695_v1  ;;  %v1634_v7 = vpop.f32.mrf.mxu0 }
  0xe8   :  { %v953_v8 = vadd.f32 %v1633_v4, %v2346_v2  ;;  %v1698_v9 = vpop.f32.mrf.mxu1 }
  0xe9   :  { %v1635_v10 = vpop.f32.mrf.mxu0 }
  0xea   :  { %v2349_v11 = vadd.f32 %v1697_v6, %v953_v8  ;;  %v1636_v12 = vadd.f32 %v1635_v10, %v1634_v7  ;;  %v1699_v13 = vpop.f32.mrf.mxu1 }
  0xeb   :  { %v1700_v14 = vadd.f32 %v1699_v13, %v1698_v9  ;;  %v1637_v15 = vpop.f32.mrf.mxu0 }
  0xec   :  { %v956_v16 = vadd.f32 %v1636_v12, %v2346_v2  ;;  %v1701_v17 = vpop.f32.mrf.mxu1 }
  0xed   :  { %v1638_v18 = vpop.f32.mrf.mxu0 }
  0xee   :  { %v2352_v19 = vadd.f32 %v1700_v14, %v956_v16  ;;  %v1639_v20 = vadd.f32 %v1638_v18, %v1637_v15  ;;  %v1702_v21 = vpop.f32.mrf.mxu1 }
  0xef   :  { %v1703_v22 = vadd.f32 %v1702_v21, %v1701_v17  ;;  %v1640_v23 = vpop.f32.mrf.mxu0 }
  0xf0   :  { %v961_v24 = vadd.f32 %v1639_v20, %v2346_v2  ;;  %v1704_v25 = vpop.f32.mrf.mxu1 }
  0xf1   :  { %v1641_v26 = vpop.f32.mrf.mxu0 }
  0xf2   :  { %v2355_v27 = vadd.f32 %v1703_v22, %v961_v24  ;;  %v1642_v28 = vadd.f32 %v1641_v26, %v1640_v23  ;;  %v1705_v29 = vpop.f32.mrf.mxu1 }
  0xf3   :  { %v1706_v30 = vadd.f32 %v1705_v29, %v1704_v25  ;;  %v1643_v31 = vpop.f32.mrf.mxu0 }
  0xf4   :  { %v964_v32 = vadd.f32 %v1642_v28, %v2346_v2  ;;  %v1707_v33 = vpop.f32.mrf.mxu1 }
  0xf5   :  { %v1644_v34 = vpop.f32.mrf.mxu0 }
  0xf6   :  { %v2358_v35 = vadd.f32 %v1706_v30, %v964_v32  ;;  %v1645_v36 = vadd.f32 %v1644_v34, %v1643_v31  ;;  %v1708_v37 = vpop.f32.mrf.mxu1 }
  0xf7   :  { %v1709_v38 = vadd.f32 %v1708_v37, %v1707_v33  ;;  %v1646_v39 = vpop.f32.mrf.mxu0 }
  0xf8   :  { %v969_v40 = vadd.f32 %v1645_v36, %v2346_v2  ;;  %v1710_v41 = vpop.f32.mrf.mxu1 }
  0xf9   :  { %v1647_v42 = vpop.f32.mrf.mxu0 }
  0xfa   :  { %v2361_v43 = vadd.f32 %v1709_v38, %v969_v40  ;;  %v1648_v44 = vadd.f32 %v1647_v42, %v1646_v39  ;;  %v1711_v45 = vpop.f32.mrf.mxu1 }
  0xfb   :  { %v1712_v46 = vadd.f32 %v1711_v45, %v1710_v41  ;;  %v1649_v47 = vpop.f32.mrf.mxu0 }
  0xfc   :  { %v972_v48 = vadd.f32 %v1648_v44, %v2346_v2  ;;  %v1713_v49 = vpop.f32.mrf.mxu1 }
  0xfd   :  { %v1650_v50 = vpop.f32.mrf.mxu0 }
  0xfe   :  { %v2364_v51 = vadd.f32 %v1712_v46, %v972_v48  ;;  %v1651_v52 = vadd.f32 %v1650_v50, %v1649_v47  ;;  %v1714_v53 = vpop.f32.mrf.mxu1 }
  0xff   :  { %v2366_v54 = vpop.f32.mrf.mxu0  ;;  %v1715_v56 = vadd.f32 %v1714_v53, %v1713_v49 }
 0x100   :  { %v977_v55 = vadd.f32 %v1651_v52, %v2346_v2  ;;  %v2369_v57 = vpop.f32.mrf.mxu1 }
 0x101   :  { %v2371_v58 = vpop.f32.mrf.mxu0 }
 0x102   :  { %v2373_v59 = vadd.f32 %v1715_v56, %v977_v55  ;;  %v2375_v60 = vpop.f32.mrf.mxu1 }
 0x103   :  { %v1655_v61 = vpop.f32.mrf.mxu0 }
 0x104   :  { %v1719_v62 = vpop.f32.mrf.mxu1 }
 0x105   :  { %v1656_v63 = vpop.f32.mrf.mxu0 }
 0x106   :  { %v1657_v0 = vadd.f32 %v1656_v63, %v1655_v61  ;;  %v1720_v1 = vpop.f32.mrf.mxu1 }
 0x107   :  { %v1721_v3 = vadd.f32 %v1720_v1, %v1719_v62  ;;  %v1658_v4 = vpop.f32.mrf.mxu0 }
 0x108   :  { %v985_v5 = vadd.f32 %v1657_v0, %v2346_v2  ;;  %v1722_v6 = vpop.f32.mrf.mxu1 }
 0x109   :  { %v1659_v7 = vpop.f32.mrf.mxu0 }
 0x10a   :  { %v2378_v8 = vadd.f32 %v1721_v3, %v985_v5  ;;  %v1660_v9 = vadd.f32 %v1659_v7, %v1658_v4  ;;  %v1723_v10 = vpop.f32.mrf.mxu1 }
 0x10b   :  { %v1724_v12 = vadd.f32 %v1723_v10, %v1722_v6  ;;  %v1661_v13 = vpop.f32.mrf.mxu0 }
 0x10c   :  { %v988_v14 = vadd.f32 %v1660_v9, %v2346_v2  ;;  %v1725_v15 = vpop.f32.mrf.mxu1 }
 0x10d   :  { %v1662_v16 = vpop.f32.mrf.mxu0 }
 0x10e   :  { %v2381_v17 = vadd.f32 %v1724_v12, %v988_v14  ;;  %v1663_v18 = vadd.f32 %v1662_v16, %v1661_v13  ;;  %v1726_v20 = vpop.f32.mrf.mxu1 }
 0x10f   :  { %v1727_v21 = vadd.f32 %v1726_v20, %v1725_v15  ;;  %v1664_v22 = vpop.f32.mrf.mxu0 }
 0x110   :  { %v993_v23 = vadd.f32 %v1663_v18, %v2346_v2  ;;  %v1728_v24 = vpop.f32.mrf.mxu1 }
 0x111   :  { %v1665_v25 = vpop.f32.mrf.mxu0 }
 0x112   :  { %v2384_v26 = vadd.f32 %v1727_v21, %v993_v23  ;;  %v1666_v28 = vadd.f32 %v1665_v25, %v1664_v22  ;;  %v1729_v29 = vpop.f32.mrf.mxu1 }
 0x113   :  { %v1730_v30 = vadd.f32 %v1729_v29, %v1728_v24  ;;  %v1667_v31 = vpop.f32.mrf.mxu0 }
 0x114   :  { %v996_v32 = vadd.f32 %v1666_v28, %v2346_v2  ;;  %v1731_v33 = vpop.f32.mrf.mxu1 }
 0x115   :  { %v1668_v34 = vpop.f32.mrf.mxu0 }
 0x116   :  { %v2387_v36 = vadd.f32 %v1730_v30, %v996_v32  ;;  %v1669_v37 = vadd.f32 %v1668_v34, %v1667_v31  ;;  %v1732_v38 = vpop.f32.mrf.mxu1 }
 0x117   :  { %v1733_v39 = vadd.f32 %v1732_v38, %v1731_v33  ;;  %v1670_v40 = vpop.f32.mrf.mxu0 }
 0x118   :  { %v1001_v41 = vadd.f32 %v1669_v37, %v2346_v2  ;;  %v1734_v42 = vpop.f32.mrf.mxu1 }
 0x119   :  { %v1671_v44 = vpop.f32.mrf.mxu0 }
 0x11a   :  { %v2390_v45 = vadd.f32 %v1733_v39, %v1001_v41  ;;  %v1672_v46 = vadd.f32 %v1671_v44, %v1670_v40  ;;  %v1735_v47 = vpop.f32.mrf.mxu1 }
 0x11b   :  { %v1736_v48 = vadd.f32 %v1735_v47, %v1734_v42  ;;  %v1673_v49 = vpop.f32.mrf.mxu0 }
 0x11c   :  { %v1004_v50 = vadd.f32 %v1672_v46, %v2346_v2  ;;  %v1737_v52 = vpop.f32.mrf.mxu1 }
 0x11d   :  { %v1674_v53 = vpop.f32.mrf.mxu0 }
 0x11e   :  { %v2393_v55 = vadd.f32 %v1736_v48, %v1004_v50  ;;  %v1675_v56 = vadd.f32 %v1674_v53, %v1673_v49  ;;  %v1738_v61 = vpop.f32.mrf.mxu1 }
 0x11f   :  { %v1739_v62 = vadd.f32 %v1738_v61, %v1737_v52  ;;  %v1676_v63 = vpop.f32.mrf.mxu0 }
 0x120   :  { %v1009_v0 = vadd.f32 %v1675_v56, %v2346_v2  ;;  %v1740_v1 = vpop.f32.mrf.mxu1 }
 0x121   :  { %v1677_v3 = vpop.f32.mrf.mxu0 }
 0x122   :  { %v2396_v4 = vadd.f32 %v1739_v62, %v1009_v0  ;;  %v1678_v5 = vadd.f32 %v1677_v3, %v1676_v63  ;;  %v1741_v6 = vpop.f32.mrf.mxu1 }
 0x123   :  { %v1742_v7 = vadd.f32 %v1741_v6, %v1740_v1  ;;  %v1759_v9 = vpop.f32.mrf.mxu0 }
 0x124   :  { %v1012_v10 = vadd.f32 %v1678_v5, %v2346_v2  ;;  %v1823_v12 = vpop.f32.mrf.mxu1 }
 0x125   :  { %v1760_v13 = vpop.f32.mrf.mxu0 }
 0x126   :  { %v2399_v14 = vadd.f32 %v1742_v7, %v1012_v10  ;;  %v1761_v15 = vadd.f32 %v1760_v13, %v1759_v9  ;;  %v1824_v16 = vpop.f32.mrf.mxu1 }
 0x127   :  { %v1762_v18 = vpop.f32.mrf.mxu0  ;;  %v1825_v22 = vadd.f32 %v1824_v16, %v1823_v12 }
 0x128   :  { %v1147_v20 = vadd.f32 %v1761_v15, %v2349_v11  ;;  %v1826_v21 = vpop.f32.mrf.mxu1 }
 0x129   :  { %v1763_v23 = vpop.f32.mrf.mxu0 }
 0x12a   :  { %v1764_v24 = vadd.f32 %v1763_v23, %v1762_v18  ;;  %v1827_v25 = vpop.f32.mrf.mxu1  ;;  %v2402_v28 = vadd.f32 %v1825_v22, %v1147_v20 }
 0x12b   :  { %v1765_v29 = vpop.f32.mrf.mxu0  ;;  %v1828_v31 = vadd.f32 %v1827_v25, %v1826_v21 }
 0x12c   :  { %v1150_v30 = vadd.f32 %v1764_v24, %v2352_v19  ;;  %v1829_v32 = vpop.f32.mrf.mxu1  ;;  %v1319_v11 = vmul.f32 %v2402_v28, %v2402_v28 }
 0x12d   :  { %v1766_v33 = vpop.f32.mrf.mxu0 }
 0x12e   :  { %v2405_v34 = vadd.f32 %v1828_v31, %v1150_v30  ;;  %v1767_v37 = vadd.f32 %v1766_v33, %v1765_v29  ;;  %v1830_v38 = vpop.f32.mrf.mxu1 }
 0x12f   :  { %v1768_v39 = vpop.f32.mrf.mxu0  ;;  %v1831_v19 = vadd.f32 %v1830_v38, %v1829_v32 }
 0x130   :  { %v1306_v40 = vadd.f32 %v2405_v34, %v2402_v28  ;;  %v1320_v41 = vmul.f32 %v2405_v34, %v2405_v34  ;;  %v1155_v42 = vadd.f32 %v1767_v37, %v2355_v27  ;;  %v1832_v44 = vpop.f32.mrf.mxu1  ;;  %v1718_v37 = vadd.f32 %v2375_v60, %v2369_v57 }
 0x131   :  { %v1769_v46 = vpop.f32.mrf.mxu0 }
 0x132   :  { %v1327_v47 = vadd.f32 %v1320_v41, %v1319_v11  ;;  %v2414_v48 = vadd.f32 %v1831_v19, %v1155_v42  ;;  %v1770_v49 = vadd.f32 %v1769_v46, %v1768_v39  ;;  %v1833_v50 = vpop.f32.mrf.mxu1 }
 0x133   :  { %v1771_v52 = vpop.f32.mrf.mxu0  ;;  %v1834_v62 = vadd.f32 %v1833_v50, %v1832_v44 }
 0x134   :  { %v1307_v53 = vadd.f32 %v1306_v40, %v2414_v48  ;;  %v1321_v56 = vmul.f32 %v2414_v48, %v2414_v48  ;;  %v1158_v61 = vadd.f32 %v1770_v49, %v2358_v35  ;;  %v1835_v63 = vpop.f32.mrf.mxu1  ;;  %v1654_v35 = vadd.f32 %v2371_v58, %v2366_v54 }
 0x135   :  { %v1772_v0 = vpop.f32.mrf.mxu0 }
 0x136   :  { %v1328_v27 = vadd.f32 %v1327_v47, %v1321_v56  ;;  %v2420_v1 = vadd.f32 %v1834_v62, %v1158_v61  ;;  %v1773_v3 = vadd.f32 %v1772_v0, %v1771_v52  ;;  %v1836_v5 = vpop.f32.mrf.mxu1  ;;  %v980_v31 = vadd.f32 %v1654_v35, %v2346_v2 }
 0x137   :  { %v1774_v6 = vpop.f32.mrf.mxu0  ;;  %v1837_v12 = vadd.f32 %v1836_v5, %v1835_v63 }
 0x138   :  { %v1308_v7 = vadd.f32 %v1307_v53, %v2420_v1  ;;  %v1322_v9 = vmul.f32 %v2420_v1, %v2420_v1  ;;  %v1163_v10 = vadd.f32 %v1773_v3, %v2361_v43  ;;  %v1838_v13 = vpop.f32.mrf.mxu1  ;;  %v1077_v2 = vadd.f32 %v1718_v37, %v980_v31 }
 0x139   :  { %v1775_v15 = vpop.f32.mrf.mxu0 }
 0x13a   :  { %v1329_v16 = vadd.f32 %v1328_v27, %v1322_v9  ;;  %v2428_v18 = vadd.f32 %v1837_v12, %v1163_v10  ;;  %v1776_v20 = vadd.f32 %v1775_v15, %v1774_v6  ;;  %v1839_v21 = vpop.f32.mrf.mxu1 }
 0x13b   :  { %v1777_v22 = vpop.f32.mrf.mxu0  ;;  %v1840_v43 = vadd.f32 %v1839_v21, %v1838_v13 }
 0x13c   :  { %v1309_v23 = vadd.f32 %v1308_v7, %v2428_v18  ;;  %v1323_v24 = vmul.f32 %v2428_v18, %v2428_v18  ;;  %v1166_v25 = vadd.f32 %v1776_v20, %v2364_v51  ;;  %v1841_v29 = vpop.f32.mrf.mxu1 }
 0x13d   :  { %v1778_v30 = vpop.f32.mrf.mxu0 }
 0x13e   :  { %v1330_v32 = vadd.f32 %v1329_v16, %v1323_v24  ;;  %v2435_v54 = vadd.f32 %v1840_v43, %v1166_v25  ;;  %v1779_v58 = vadd.f32 %v1778_v30, %v1777_v22  ;;  %v1842_v33 = vpop.f32.mrf.mxu1 }
 0x13f   :  { %v1780_v38 = vpop.f32.mrf.mxu0  ;;  %v1843_v40 = vadd.f32 %v1842_v33, %v1841_v29 }
 0x140   :  { %v1310_v11 = vadd.f32 %v1309_v23, %v2435_v54  ;;  %v1324_v39 = vmul.f32 %v2435_v54, %v2435_v54  ;;  %v1171_v51 = vadd.f32 %v1779_v58, %v2373_v59  ;;  %v1844_v41 = vpop.f32.mrf.mxu1 }
 0x141   :  { %v1781_v42 = vpop.f32.mrf.mxu0 }
 0x142   :  { %v1331_v19 = vadd.f32 %v1330_v32, %v1324_v39  ;;  %v2443_v44 = vadd.f32 %v1843_v40, %v1171_v51  ;;  %v1782_v46 = vadd.f32 %v1781_v42, %v1780_v38  ;;  %v1845_v47 = vpop.f32.mrf.mxu1 }
 0x143   :  { %v1783_v49 = vpop.f32.mrf.mxu0  ;;  %v1846_v52 = vadd.f32 %v1845_v47, %v1844_v41 }
 0x144   :  { %v1311_v57 = vadd.f32 %v1310_v11, %v2443_v44  ;;  %v1325_v60 = vmul.f32 %v2443_v44, %v2443_v44  ;;  %v1174_v50 = vadd.f32 %v1782_v46, %v1077_v2  ;;  %v1847_v53 = vpop.f32.mrf.mxu1 }
 0x145   :  { %v1784_v56 = vpop.f32.mrf.mxu0 }
 0x146   :  { %v1332_v59 = vadd.f32 %v1331_v19, %v1325_v60  ;;  %v2448_v61 = vadd.f32 %v1846_v52, %v1174_v50  ;;  %v1785_v62 = vadd.f32 %v1784_v56, %v1783_v49  ;;  %v1848_v63 = vpop.f32.mrf.mxu1 }
 0x147   :  { %v1786_v0 = vpop.f32.mrf.mxu0  ;;  %v1849_v7 = vadd.f32 %v1848_v63, %v1847_v53 }
 0x148   :  { %v1312_v27 = vadd.f32 %v1311_v57, %v2448_v61  ;;  %v1326_v3 = vmul.f32 %v2448_v61, %v2448_v61  ;;  %v1179_v5 = vadd.f32 %v1785_v62, %v2378_v8  ;;  %v1850_v6 = vpop.f32.mrf.mxu1 }
 0x149   :  { %v1787_v9 = vpop.f32.mrf.mxu0 }
 0x14a   :  { %v1313_v10 = vrot.slane %v1312_v27, 4  ;;  %v1333_v12 = vadd.f32 %v1332_v59, %v1326_v3  ;;  %v1788_v13 = vadd.f32 %v1787_v9, %v1786_v0  ;;  %v1851_v15 = vpop.f32.mrf.mxu1  ;;  %v2454_v35 = vadd.f32 %v1849_v7, %v1179_v5 }
 0x14b   :  { %v1789_v16 = vpop.f32.mrf.mxu0  ;;  %v1852_v23 = vadd.f32 %v1851_v15, %v1850_v6 }
 0x14c   :  { %v1314_v20 = vadd.f32 %v1313_v10, %v1312_v27  ;;  %v1334_v21 = vrot.slane %v1333_v12, 4  ;;  %v1182_v22 = vadd.f32 %v1788_v13, %v2381_v17  ;;  %v1853_v24 = vpop.f32.mrf.mxu1  ;;  %v1407_v32 = vmul.f32 %v2454_v35, %v2454_v35 }
 0x14d   :  { %v1790_v25 = vpop.f32.mrf.mxu0 }
 0x14e   :  { %v1315_v43 = vrot.slane %v1314_v20, 2  ;;  %v1335_v29 = vadd.f32 %v1334_v21, %v1333_v12  ;;  %v2457_v8 = vadd.f32 %v1852_v23, %v1182_v22  ;;  %v1791_v30 = vadd.f32 %v1790_v25, %v1789_v16  ;;  %v1854_v31 = vpop.f32.mrf.mxu1 }
 0x14f   :  { %v1792_v58 = vpop.f32.mrf.mxu0  ;;  %v1855_v51 = vadd.f32 %v1854_v31, %v1853_v24 }
 0x150   :  { %v1316_v33 = vadd.f32 %v1315_v43, %v1314_v20  ;;  %v1336_v37 = vrot.slane %v1335_v29, 2  ;;  %v1394_v38 = vadd.f32 %v2457_v8, %v2454_v35  ;;  %v1408_v17 = vmul.f32 %v2457_v8, %v2457_v8  ;;  %v1856_v11 = vpop.f32.mrf.mxu1 }
 0x151   :  { %v1187_v39 = vadd.f32 %v1791_v30, %v2384_v26  ;;  %v1793_v40 = vpop.f32.mrf.mxu0 }
 0x152   :  { %v1317_v41 = vrot.slane %v1316_v33, 1  ;;  %v1337_v42 = vadd.f32 %v1336_v37, %v1335_v29  ;;  %v1415_v2 = vadd.f32 %v1408_v17, %v1407_v32  ;;  %v1794_v19 = vadd.f32 %v1793_v40, %v1792_v58  ;;  %v1857_v46 = vpop.f32.mrf.mxu1 }
 0x153   :  { %v2466_v47 = vadd.f32 %v1855_v51, %v1187_v39  ;;  %v1795_v49 = vpop.f32.mrf.mxu0  ;;  %v1858_v52 = vadd.f32 %v1857_v46, %v1856_v11 }
 0x154   :  { %v1318_v57 = vadd.f32 %v1317_v41, %v1316_v33  ;;  %v1338_v60 = vrot.slane %v1337_v42, 1  ;;  %v1190_v50 = vadd.f32 %v1794_v19, %v2387_v36  ;;  %v1859_v53 = vpop.f32.mrf.mxu1 }
 0x155   :  { %v1395_v56 = vadd.f32 %v1394_v38, %v2466_v47  ;;  %v1409_v26 = vmul.f32 %v2466_v47, %v2466_v47  ;;  %v1796_v59 = vpop.f32.mrf.mxu0 }
 0x156   :  { %v1339_v62 = vadd.f32 %v1338_v60, %v1337_v42  ;;  %v2472_v63 = vmul.f32 0.015625, %v1318_v57  ;;  %v2474_v0 = vadd.f32 %v1858_v52, %v1190_v50  ;;  %v1860_v27 = vpop.f32.mrf.mxu1  ;;  %v1797_v5 = vadd.f32 %v1796_v59, %v1795_v49 }
 0x157   :  { %v1416_v3 = vadd.f32 %v1415_v2, %v1409_v26  ;;  %v1798_v6 = vpop.f32.mrf.mxu0 }
 0x158   :  { %v1341_v7 = vmul.f32 0.015625, %v1339_v62  ;;  %v1342_v36 = vmul.f32 %v2472_v63, %v2472_v63  ;;  %v1344_v9 = vsub.f32 %v2402_v28, %v2472_v63  ;;  %v1345_v10 = vsub.f32 %v2405_v34, %v2472_v63  ;;  %v1862_v12 = vpop.f32.mrf.mxu1 }
 0x159   :  { %v1346_v13 = vsub.f32 %v2414_v48, %v2472_v63  ;;  %v1347_v15 = vsub.f32 %v2420_v1, %v2472_v63  ;;  %v1348_v16 = vsub.f32 %v2428_v18, %v2472_v63  ;;  %v1349_v20 = vsub.f32 %v2435_v54, %v2472_v63  ;;  %v1799_v21 = vpop.f32.mrf.mxu0 }
 0x15a   :  { %v1343_v22 = vsub.f32 %v1341_v7, %v1342_v36  ;;  %v1350_v28 = vsub.f32 %v2443_v44, %v2472_v63  ;;  %v1396_v34 = vadd.f32 %v1395_v56, %v2474_v0  ;;  %v1863_v23 = vpop.f32.mrf.mxu1  ;;  %v1410_v48 = vmul.f32 %v2474_v0, %v2474_v0 }
 0x15b   :  { %v1195_v24 = vadd.f32 %v1797_v5, %v2390_v45  ;;  %v1861_v1 = vadd.f32 %v1860_v27, %v1859_v53  ;;  %v1800_v25 = vadd.f32 %v1799_v21, %v1798_v6  ;;  %v1801_v43 = vpop.f32.mrf.mxu0  ;;  %v1864_v32 = vadd.f32 %v1863_v23, %v1862_v12 }
 0x15c   :  { %v1352_v18 = vadd.f32 1e-05, %v1343_v22  ;;  %v1865_v29 = vpop.f32.mrf.mxu1  ;;  %v1417_v30 = vadd.f32 %v1416_v3, %v1410_v48  ;;  %v1351_v27 = vsub.f32 %v2448_v61, %v2472_v63 }
 0x15d   :  { %v2496_v54 = vadd.f32 %v1861_v1, %v1195_v24  ;;  %v1198_v31 = vadd.f32 %v1800_v25, %v2393_v55  ;;  %v1802_v44 = vpop.f32.mrf.mxu0 }
 0x15e   :  { %1935 = vrsqrt.f32 %v1352_v18  ;;  %v1803_v58 = vadd.f32 %v1802_v44, %v1801_v43  ;;  %v1866_v33 = vpop.f32.mrf.mxu1 }
 0x15f   :  { %v1397_v37 = vadd.f32 %v1396_v34, %v2496_v54  ;;  %v1411_v45 = vmul.f32 %v2496_v54, %v2496_v54  ;;  %v2502_v38 = vadd.f32 %v1864_v32, %v1198_v31  ;;  %v1804_v17 = vpop.f32.mrf.mxu0  ;;  %v1867_v39 = vadd.f32 %v1866_v33, %v1865_v29 }
 0x160   :  { %v1203_v11 = vadd.f32 %v1803_v58, %v2396_v4  ;;  %v1868_v51 = vpop.f32.mrf.mxu1 }
 0x161   :  { %v1418_v40 = vadd.f32 %v1417_v30, %v1411_v45  ;;  %v1398_v55 = vadd.f32 %v1397_v37, %v2502_v38  ;;  %v1412_v41 = vmul.f32 %v2502_v38, %v2502_v38  ;;  %v1805_v42 = vpop.f32.mrf.mxu0 }
 0x162   :  { %v2508_v2 = vadd.f32 %v1867_v39, %v1203_v11  ;;  %v1806_v19 = vadd.f32 %v1805_v42, %v1804_v17  ;;  %v1869_v46 = vpop.f32.mrf.mxu1 }
 0x163   :  { %v1419_v49 = vadd.f32 %v1418_v40, %v1412_v41  ;;  %v1870_v50 = vadd.f32 %v1869_v46, %v1868_v51 }
 0x164   :  { %v1399_v57 = vadd.f32 %v1398_v55, %v2508_v2  ;;  %v1413_v60 = vmul.f32 %v2508_v2, %v2508_v2  ;;  %v1206_v4 = vadd.f32 %v1806_v19, %v2399_v14 }
 0x166   :  { %v1420_v52 = vadd.f32 %v1419_v49, %v1413_v60  ;;  %v2514_v53 = vadd.f32 %v1870_v50, %v1206_v4 }
 0x168   :  { %v1400_v56 = vadd.f32 %v1399_v57, %v2514_v53  ;;  %v1414_v26 = vmul.f32 %v2514_v53, %v2514_v53 }
 0x16a   :  { %v1421_v59 = vadd.f32 %v1420_v52, %v1414_v26  ;;  %v1401_v3 = vrot.slane %v1400_v56, 4 }
 0x16b   :  { %v1936_v62 = vpop.eup %1935 }
 0x16c   :  { %v1354_v5 = vmul.f32 %v1936_v62, %v1344_v9  ;;  %v1355_v6 = vmul.f32 %v1936_v62, %v1345_v10  ;;  %v1356_v7 = vmul.f32 %v1936_v62, %v1346_v13  ;;  %v1357_v36 = vmul.f32 %v1936_v62, %v1347_v15 }
 0x16d   :  { %v1358_v14 = vmul.f32 %v1936_v62, %v1348_v16  ;;  %v1359_v12 = vmul.f32 %v1936_v62, %v1349_v20  ;;  %v1360_v21 = vmul.f32 %v1936_v62, %v1350_v28  ;;  %v1361_v22 = vmul.f32 %v1936_v62, %v1351_v27 }
 0x16e   :  { %vm1362_vm0 = vcmp.gt.f32.partialorder %v1354_v5, 0.0  ;;  %vm1363_vm1 = vcmp.gt.f32.partialorder %v1355_v6, 0.0  ;;  %vm1364_vm2 = vcmp.gt.f32.partialorder %v1356_v7, 0.0  ;;  %vm1365_vm3 = vcmp.gt.f32.partialorder %v1357_v36, 0.0 }
 0x16f   :  { %vm1366_vm4 = vcmp.gt.f32.partialorder %v1358_v14, 0.0  ;;  %vm1367_vm5 = vcmp.gt.f32.partialorder %v1359_v12, 0.0  ;;  %vm1368_vm6 = vcmp.gt.f32.partialorder %v1360_v21, 0.0  ;;  %vm1369_vm7 = vcmp.gt.f32.partialorder %v1361_v22, 0.0 }
 0x170   :  { %v1370_v34 = vmul.f32 0.2, %v1354_v5  ;;  %v1371_v23 = vmul.f32 0.2, %v1355_v6  ;;  %v1372_v61 = vmul.f32 0.2, %v1356_v7  ;;  %v1402_v63 = vadd.f32 %v1401_v3, %v1400_v56 }
 0x171   :  { %v1373_v9 = vmul.f32 0.2, %v1357_v36  ;;  %v1374_v10 = vmul.f32 0.2, %v1358_v14  ;;  %v1375_v13 = vmul.f32 0.2, %v1359_v12 }
 0x172   :  { %v1376_v15 = vmul.f32 0.2, %v1360_v21  ;;  %v1377_v16 = vmul.f32 0.2, %v1361_v22  ;;  %v1378_v20 = vsel %vm1362_vm0, %v1354_v5, %v1370_v34  ;;  %v1379_v28 = vsel %vm1363_vm1, %v1355_v6, %v1371_v23 }
 0x173   :  { %v1380_v48 = vsel %vm1364_vm2, %v1356_v7, %v1372_v61  ;;  %v1381_v24 = vsel %vm1365_vm3, %v1357_v36, %v1373_v9  ;;  %v1382_v1 = vsel %vm1366_vm4, %v1358_v14, %v1374_v10  ;;  %v1383_v25 = vsel %vm1367_vm5, %v1359_v12, %v1375_v13  ;;  %1386 = vst [vmem:[%s2596_s3] sm:$0xff] %v1378_v20 }
 0x174   :  { %1387 = vst [vmem:[%s2596_s3 + $0x8] sm:$0xff] %v1379_v28  ;;  %v1384_v43 = vsel %vm1368_vm6, %v1360_v21, %v1376_v15  ;;  %v1385_v18 = vsel %vm1369_vm7, %v1361_v22, %v1377_v16  ;;  %1388 = vst [vmem:[%s2596_s3 + $0x10] sm:$0xff] %v1380_v48  ;;  %v1403_v29 = vrot.slane %v1402_v63, 2  ;;  %v1422_v30 = vrot.slane %v1421_v59, 4 }
 0x175   :  { %1389 = vst [vmem:[%s2596_s3 + $0x18] sm:$0xff] %v1381_v24  ;;  %1390 = vst [vmem:[%s2596_s3 + $0x20] sm:$0xff] %v1382_v1 }
 0x176   :  { %1391 = vst [vmem:[%s2596_s3 + $0x28] sm:$0xff] %v1383_v25  ;;  %1392 = vst [vmem:[%s2596_s3 + $0x30] sm:$0xff] %v1384_v43  ;;  %v1404_v31 = vadd.f32 %v1403_v29, %v1402_v63  ;;  %v1423_v32 = vadd.f32 %v1422_v30, %v1421_v59 }
 0x177   :  { %1393 = vst [vmem:[%s2596_s3 + $0x38] sm:$0xff] %v1385_v18 }
 0x178   :  { %v1405_v44 = vrot.slane %v1404_v31, 1  ;;  %v1424_v58 = vrot.slane %v1423_v32, 2 }
 0x17a   :  { %v1406_v33 = vadd.f32 %v1405_v44, %v1404_v31  ;;  %v1425_v37 = vadd.f32 %v1424_v58, %v1423_v32 }
 0x17c   :  { %v1426_v45 = vrot.slane %v1425_v37, 1  ;;  %v1428_v17 = vmul.f32 0.015625, %v1406_v33 }
 0x17e   :  { %v1427_v11 = vadd.f32 %v1426_v45, %v1425_v37  ;;  %v1430_v39 = vmul.f32 %v1428_v17, %v1428_v17  ;;  %v1432_v51 = vsub.f32 %v2454_v35, %v1428_v17  ;;  %v1433_v40 = vsub.f32 %v2457_v8, %v1428_v17 }
 0x17f   :  { %v1434_v55 = vsub.f32 %v2466_v47, %v1428_v17  ;;  %v1435_v41 = vsub.f32 %v2474_v0, %v1428_v17  ;;  %v1436_v42 = vsub.f32 %v2496_v54, %v1428_v17  ;;  %v1437_v19 = vsub.f32 %v2502_v38, %v1428_v17 }
 0x180   :  { %v1429_v46 = vmul.f32 0.015625, %v1427_v11  ;;  %v1438_v49 = vsub.f32 %v2508_v2, %v1428_v17  ;;  %v1439_v57 = vsub.f32 %v2514_v53, %v1428_v17 }
 0x182   :  { %v1431_v60 = vsub.f32 %v1429_v46, %v1430_v39 }
 0x184   :  { %v1440_v4 = vadd.f32 1e-05, %v1431_v60 }
 0x186   :  { %1937 = vrsqrt.f32 %v1440_v4 }
 0x193   :  { %v1938_v50 = vpop.eup %1937 }
 0x194   :  { %v1442_v35 = vmul.f32 %v1938_v50, %v1432_v51  ;;  %v1443_v52 = vmul.f32 %v1938_v50, %v1433_v40  ;;  %v1444_v8 = vmul.f32 %v1938_v50, %v1434_v55  ;;  %v1445_v56 = vmul.f32 %v1938_v50, %v1435_v41 }
 0x195   :  { %v1446_v47 = vmul.f32 %v1938_v50, %v1436_v42  ;;  %v1447_v26 = vmul.f32 %v1938_v50, %v1437_v19  ;;  %v1448_v0 = vmul.f32 %v1938_v50, %v1438_v49  ;;  %v1449_v59 = vmul.f32 %v1938_v50, %v1439_v57 }
 0x196   :  { %vm1450_vm8 = vcmp.gt.f32.partialorder %v1442_v35, 0.0  ;;  %vm1451_vm9 = vcmp.gt.f32.partialorder %v1443_v52, 0.0  ;;  %vm1452_vm10 = vcmp.gt.f32.partialorder %v1444_v8, 0.0  ;;  %vm1453_vm11 = vcmp.gt.f32.partialorder %v1445_v56, 0.0 }
 0x197   :  { %vm1454_vm12 = vcmp.gt.f32.partialorder %v1446_v47, 0.0  ;;  %vm1455_vm13 = vcmp.gt.f32.partialorder %v1447_v26, 0.0  ;;  %vm1456_vm14 = vcmp.gt.f32.partialorder %v1448_v0, 0.0  ;;  %vm1457_vm15 = vcmp.gt.f32.partialorder %v1449_v59, 0.0 }
 0x198   :  { %v1458_v54 = vmul.f32 0.2, %v1442_v35  ;;  %v1459_v38 = vmul.f32 0.2, %v1443_v52  ;;  %v1460_v2 = vmul.f32 0.2, %v1444_v8 }
 0x199   :  { %v1461_v53 = vmul.f32 0.2, %v1445_v56  ;;  %v1462_v62 = vmul.f32 0.2, %v1446_v47  ;;  %v1463_v27 = vmul.f32 0.2, %v1447_v26 }
 0x19a   :  { %v1464_v3 = vmul.f32 0.2, %v1448_v0  ;;  %v1465_v5 = vmul.f32 0.2, %v1449_v59  ;;  %v1466_v6 = vsel %vm1450_vm8, %v1442_v35, %v1458_v54  ;;  %v1467_v7 = vsel %vm1451_vm9, %v1443_v52, %v1459_v38 }
 0x19b   :  { %v1468_v36 = vsel %vm1452_vm10, %v1444_v8, %v1460_v2  ;;  %v1469_v14 = vsel %vm1453_vm11, %v1445_v56, %v1461_v53  ;;  %v1470_v12 = vsel %vm1454_vm12, %v1446_v47, %v1462_v62  ;;  %v1471_v21 = vsel %vm1455_vm13, %v1447_v26, %v1463_v27  ;;  %1474 = vst [vmem:[%s2596_s3 + $0x40] sm:$0xff] %v1466_v6 }
 0x19c   :  { %1475 = vst [vmem:[%s2596_s3 + $0x48] sm:$0xff] %v1467_v7  ;;  %v1472_v22 = vsel %vm1456_vm14, %v1448_v0, %v1464_v3  ;;  %v1473_v34 = vsel %vm1457_vm15, %v1449_v59, %v1465_v5  ;;  %1476 = vst [vmem:[%s2596_s3 + $0x50] sm:$0xff] %v1468_v36 }
 0x19d   :  { %1477 = vst [vmem:[%s2596_s3 + $0x58] sm:$0xff] %v1469_v14  ;;  %1478 = vst [vmem:[%s2596_s3 + $0x60] sm:$0xff] %v1470_v12 }
 0x19e   :  { %1479 = vst [vmem:[%s2596_s3 + $0x68] sm:$0xff] %v1471_v21  ;;  %1480 = vst [vmem:[%s2596_s3 + $0x70] sm:$0xff] %v1472_v22 }
 0x19f   :  { %1481 = vst [vmem:[%s2596_s3 + $0x78] sm:$0xff] %v1473_v34 }

// kernel: discriminator_forward.7
= control target key start
LH: loop header
LB: loop body
LE: loop exit
PB: predicated region body
PF: predicated region fallthrough
CT: control target
= control target key end

     0   :  { %s4038_s1 = inlined_call_operand.vmem [shape: bf16[2048,256], index: 1, kind: input, shape index: {}]   ;;  %s4039_s0 = inlined_call_operand.vmem [shape: bf16[32,2048], index: 0, kind: input, shape index: {}]   ;;  %s4040_s2 = inlined_call_operand.vmem [shape: f32[1,256], index: 2, kind: input, shape index: {}]   ;;  %s4041_s3 = inlined_call_operand.vmem [shape: f32[32,256], index: 3, kind: output, shape index: {}]  }
   0x1   :  { %v2606_v0 = vld [vmem:[%s4038_s1 + $0x74] ss:$8 sps:$4 sm:$0xff]   ;;  %v2610_v2 = vld [vmem:[%s4038_s1 + $0x70] ss:$8 sps:$4 sm:$0xff]   ;;  %v2612_v4 = vld [vmem:[%s4038_s1 + $0x64] ss:$8 sps:$4 sm:$0xff]  }
   0x2   :  { %v2608_v1 = vld [vmem:[%s4038_s1 + $0x174] ss:$8 sps:$4 sm:$0xff]   ;;  %1754 = vmatprep.subr.bf16.mxu0 %v2606_v0  ;;  %v2611_v3 = vld [vmem:[%s4038_s1 + $0x170] ss:$8 sps:$4 sm:$0xff]   ;;  %v2614_v5 = vld [vmem:[%s4038_s1 + $0x164] ss:$8 sps:$4 sm:$0xff]  }
   0x3   :  { %1807 = vmatprep.subr.bf16.mxu1 %v2608_v1  ;;  %1755 = vmatpush1.bf16.msra.mxu0 %v2610_v2  ;;  %v2616_v6 = vld [vmem:[%s4038_s1 + $0x60] ss:$8 sps:$4 sm:$0xff]   ;;  %v2618_v8 = vld [vmem:[%s4038_s1 + $0x54] ss:$8 sps:$4 sm:$0xff]   ;;  %v2622_v10 = vld [vmem:[%s4038_s1 + $0x50] ss:$8 sps:$4 sm:$0xff]  }
   0x4   :  { %1808 = vmatpush1.bf16.msra.mxu1 %v2611_v3  ;;  %1756 = vmatprep.subr.bf16.mxu0 %v2612_v4  ;;  %v2617_v7 = vld [vmem:[%s4038_s1 + $0x160] ss:$8 sps:$4 sm:$0xff]   ;;  %v2620_v9 = vld [vmem:[%s4038_s1 + $0x154] ss:$8 sps:$4 sm:$0xff]   ;;  %v2623_v11 = vld [vmem:[%s4038_s1 + $0x150] ss:$8 sps:$4 sm:$0xff]  }
   0x5   :  { %1809 = vmatprep.subr.bf16.mxu1 %v2614_v5  ;;  %v2624_v12 = vld [vmem:[%s4038_s1 + $0x44] ss:$8 sps:$4 sm:$0xff]   ;;  %v2628_v14 = vld [vmem:[%s4038_s1 + $0x40] ss:$8 sps:$4 sm:$0xff]   ;;  %v2630_v16 = vld [vmem:[%s4038_s1 + $0x34] ss:$8 sps:$4 sm:$0xff]  }
   0x6   :  { %v2626_v13 = vld [vmem:[%s4038_s1 + $0x144] ss:$8 sps:$4 sm:$0xff]   ;;  %v2629_v15 = vld [vmem:[%s4038_s1 + $0x140] ss:$8 sps:$4 sm:$0xff]   ;;  %v2632_v17 = vld [vmem:[%s4038_s1 + $0x134] ss:$8 sps:$4 sm:$0xff]  }
   0x7   :  { %1757 = vmatpush1.bf16.msra.mxu0 %v2616_v6  ;;  %v2634_v18 = vld [vmem:[%s4038_s1 + $0x30] ss:$8 sps:$4 sm:$0xff]   ;;  %v2636_v20 = vld [vmem:[%s4038_s1 + $0x24] ss:$8 sps:$4 sm:$0xff]   ;;  %v2640_v22 = vld [vmem:[%s4038_s1 + $0x20] ss:$8 sps:$4 sm:$0xff]  }
   0x8   :  { %1810 = vmatpush1.bf16.msra.mxu1 %v2617_v7  ;;  %1758 = vmatprep.subr.bf16.mxu0 %v2618_v8  ;;  %v2635_v19 = vld [vmem:[%s4038_s1 + $0x130] ss:$8 sps:$4 sm:$0xff]   ;;  %v2638_v21 = vld [vmem:[%s4038_s1 + $0x124] ss:$8 sps:$4 sm:$0xff]   ;;  %v2641_v23 = vld [vmem:[%s4038_s1 + $0x120] ss:$8 sps:$4 sm:$0xff]  }
   0x9   :  { %1811 = vmatprep.subr.bf16.mxu1 %v2620_v9  ;;  %v2642_v24 = vld [vmem:[%s4038_s1 + $0x14] ss:$8 sps:$4 sm:$0xff]   ;;  %v2646_v26 = vld [vmem:[%s4038_s1 + $0x10] ss:$8 sps:$4 sm:$0xff]   ;;  %v2648_v28 = vld [vmem:[%s4038_s1 + $0x4] ss:$8 sps:$4 sm:$0xff]  }
   0xa   :  { %v2644_v25 = vld [vmem:[%s4038_s1 + $0x114] ss:$8 sps:$4 sm:$0xff]   ;;  %v2647_v27 = vld [vmem:[%s4038_s1 + $0x110] ss:$8 sps:$4 sm:$0xff]   ;;  %v2650_v29 = vld [vmem:[%s4038_s1 + $0x104] ss:$8 sps:$4 sm:$0xff]  }
   0xb   :  { %1759 = vmatpush1.bf16.msra.mxu0 %v2622_v10  ;;  %v2652_v30 = vld [vmem:[%s4038_s1] ss:$8 sps:$4 sm:$0xff]   ;;  %v2654_v32 = vld [vmem:[%s4038_s1 + $0xf4] ss:$8 sps:$4 sm:$0xff]   ;;  %v2658_v34 = vld [vmem:[%s4038_s1 + $0xf0] ss:$8 sps:$4 sm:$0xff]  }
   0xc   :  { %1812 = vmatpush1.bf16.msra.mxu1 %v2623_v11  ;;  %1760 = vmatprep.subr.bf16.mxu0 %v2624_v12  ;;  %v2653_v31 = vld [vmem:[%s4038_s1 + $0x100] ss:$8 sps:$4 sm:$0xff]   ;;  %v2656_v33 = vld [vmem:[%s4038_s1 + $0x1f4] ss:$8 sps:$4 sm:$0xff]   ;;  %v2659_v35 = vld [vmem:[%s4038_s1 + $0x1f0] ss:$8 sps:$4 sm:$0xff]  }
   0xd   :  { %1813 = vmatprep.subr.bf16.mxu1 %v2626_v13  ;;  %v2660_v36 = vld [vmem:[%s4038_s1 + $0xe4] ss:$8 sps:$4 sm:$0xff]   ;;  %v2664_v38 = vld [vmem:[%s4038_s1 + $0xe0] ss:$8 sps:$4 sm:$0xff]   ;;  %v2666_v40 = vld [vmem:[%s4038_s1 + $0xd4] ss:$8 sps:$4 sm:$0xff]  }
   0xe   :  { %v2662_v37 = vld [vmem:[%s4038_s1 + $0x1e4] ss:$8 sps:$4 sm:$0xff]   ;;  %v2665_v39 = vld [vmem:[%s4038_s1 + $0x1e0] ss:$8 sps:$4 sm:$0xff]   ;;  %v2668_v41 = vld [vmem:[%s4038_s1 + $0x1d4] ss:$8 sps:$4 sm:$0xff]  }
   0xf   :  { %1761 = vmatpush1.bf16.msra.mxu0 %v2628_v14  ;;  %v2670_v42 = vld [vmem:[%s4038_s1 + $0xd0] ss:$8 sps:$4 sm:$0xff]   ;;  %v2672_v44 = vld [vmem:[%s4038_s1 + $0xc4] ss:$8 sps:$4 sm:$0xff]   ;;  %v2676_v46 = vld [vmem:[%s4038_s1 + $0xc0] ss:$8 sps:$4 sm:$0xff]  }
  0x10   :  { %1814 = vmatpush1.bf16.msra.mxu1 %v2629_v15  ;;  %1762 = vmatprep.subr.bf16.mxu0 %v2630_v16  ;;  %v2671_v43 = vld [vmem:[%s4038_s1 + $0x1d0] ss:$8 sps:$4 sm:$0xff]   ;;  %v2674_v45 = vld [vmem:[%s4038_s1 + $0x1c4] ss:$8 sps:$4 sm:$0xff]   ;;  %v2677_v47 = vld [vmem:[%s4038_s1 + $0x1c0] ss:$8 sps:$4 sm:$0xff]  }
  0x11   :  { %1815 = vmatprep.subr.bf16.mxu1 %v2632_v17  ;;  %v14_v48 = vld [vmem:[%s4039_s0] sm:$0xff]  ;;  %v15_v50 = vld [vmem:[%s4039_s0 + $0x8] sm:$0xff]  ;;  %v2678_v52 = vld [vmem:[%s4038_s1 + $0xb4] ss:$8 sps:$4 sm:$0xff]  }
  0x12   :  { %v22_v49 = vld [vmem:[%s4039_s0 + $0x40] sm:$0xff]  ;;  %v23_v51 = vld [vmem:[%s4039_s0 + $0x48] sm:$0xff]  ;;  %v2680_v54 = vld [vmem:[%s4038_s1 + $0x1b4] ss:$8 sps:$4 sm:$0xff]  }
  0x13   :  { %1763 = vmatpush1.bf16.msra.mxu0 %v2634_v18  ;;  %v2319_v53 = vcombine.high %v14_v48, %v22_v49  ;;  %v2321_v55 = vcombine.high %v15_v50, %v23_v51  ;;  %v2682_v56 = vld [vmem:[%s4038_s1 + $0xb0] ss:$8 sps:$4 sm:$0xff]   ;;  %v2684_v58 = vld [vmem:[%s4038_s1 + $0xa4] ss:$8 sps:$4 sm:$0xff]   ;;  %v2688_v60 = vld [vmem:[%s4038_s1 + $0xa0] ss:$8 sps:$4 sm:$0xff]   ;;  %v2318_v8 = vcombine.low %v14_v48, %v22_v49  ;;  %v2320_v9 = vcombine.low %v15_v50, %v23_v51 }
  0x14   :  { %1816 = vmatpush1.bf16.msra.mxu1 %v2635_v19  ;;  %1764 = vmatprep.subr.bf16.mxu0 %v2636_v20  ;;  %v2683_v57 = vld [vmem:[%s4038_s1 + $0x1b0] ss:$8 sps:$4 sm:$0xff]   ;;  %v2686_v59 = vld [vmem:[%s4038_s1 + $0x1a4] ss:$8 sps:$4 sm:$0xff]   ;;  %v2689_v61 = vld [vmem:[%s4038_s1 + $0x1a0] ss:$8 sps:$4 sm:$0xff]  }
  0x15   :  { %1817 = vmatprep.subr.bf16.mxu1 %v2638_v21  ;;  %1786 = vmatprep.mubr.bf16.mxu0 %v2319_v53  ;;  %v2690_v62 = vld [vmem:[%s4038_s1 + $0x94] ss:$8 sps:$4 sm:$0xff]   ;;  %v2694_v0 = vld [vmem:[%s4038_s1 + $0x90] ss:$8 sps:$4 sm:$0xff]   ;;  %v2696_v2 = vld [vmem:[%s4038_s1 + $0x84] ss:$8 sps:$4 sm:$0xff]  }
  0x16   :  { %1839 = vmatprep.mubr.bf16.mxu1 %v2321_v55  ;;  %v2692_v63 = vld [vmem:[%s4038_s1 + $0x194] ss:$8 sps:$4 sm:$0xff]   ;;  %v2695_v1 = vld [vmem:[%s4038_s1 + $0x190] ss:$8 sps:$4 sm:$0xff]   ;;  %v2698_v3 = vld [vmem:[%s4038_s1 + $0x184] ss:$8 sps:$4 sm:$0xff]  }
  0x17   :  { %1765 = vmatpush1.bf16.msra.mxu0 %v2640_v22  ;;  %v2700_v4 = vld [vmem:[%s4038_s1 + $0x80] ss:$8 sps:$4 sm:$0xff]   ;;  %v2704_v6 = vld [vmem:[%s4038_s1 + $0x274] ss:$8 sps:$4 sm:$0xff]   ;;  %v2702_v10 = vld [vmem:[%s4038_s1 + $0x270] ss:$8 sps:$4 sm:$0xff]  }
  0x18   :  { %1818 = vmatpush1.bf16.msra.mxu1 %v2641_v23  ;;  %1766 = vmatprep.subr.bf16.mxu0 %v2642_v24  ;;  %v2701_v5 = vld [vmem:[%s4038_s1 + $0x180] ss:$8 sps:$4 sm:$0xff]   ;;  %v2707_v7 = vld [vmem:[%s4038_s1 + $0x374] ss:$8 sps:$4 sm:$0xff]   ;;  %v2705_v11 = vld [vmem:[%s4038_s1 + $0x370] ss:$8 sps:$4 sm:$0xff]  }
  0x19   :  { %1819 = vmatprep.subr.bf16.mxu1 %v2644_v25  ;;  %v2710_v12 = vld [vmem:[%s4038_s1 + $0x264] ss:$8 sps:$4 sm:$0xff]   ;;  %v2708_v14 = vld [vmem:[%s4038_s1 + $0x260] ss:$8 sps:$4 sm:$0xff]   ;;  %v2716_v16 = vld [vmem:[%s4038_s1 + $0x254] ss:$8 sps:$4 sm:$0xff]  }
  0x1a   :  { %v2713_v13 = vld [vmem:[%s4038_s1 + $0x364] ss:$8 sps:$4 sm:$0xff]   ;;  %v2711_v15 = vld [vmem:[%s4038_s1 + $0x360] ss:$8 sps:$4 sm:$0xff]   ;;  %v2719_v17 = vld [vmem:[%s4038_s1 + $0x354] ss:$8 sps:$4 sm:$0xff]  }
  0x1b   :  { %1767 = vmatpush1.bf16.msra.mxu0 %v2646_v26  ;;  %v2714_v18 = vld [vmem:[%s4038_s1 + $0x250] ss:$8 sps:$4 sm:$0xff]   ;;  %v2722_v20 = vld [vmem:[%s4038_s1 + $0x244] ss:$8 sps:$4 sm:$0xff]   ;;  %v2720_v22 = vld [vmem:[%s4038_s1 + $0x240] ss:$8 sps:$4 sm:$0xff]  }
  0x1c   :  { %1820 = vmatpush1.bf16.msra.mxu1 %v2647_v27  ;;  %1768 = vmatprep.subr.bf16.mxu0 %v2648_v28  ;;  %v2717_v19 = vld [vmem:[%s4038_s1 + $0x350] ss:$8 sps:$4 sm:$0xff]   ;;  %v2725_v21 = vld [vmem:[%s4038_s1 + $0x344] ss:$8 sps:$4 sm:$0xff]   ;;  %v2723_v23 = vld [vmem:[%s4038_s1 + $0x340] ss:$8 sps:$4 sm:$0xff]  }
  0x1d   :  { %1821 = vmatprep.subr.bf16.mxu1 %v2650_v29  ;;  %v2728_v24 = vld [vmem:[%s4038_s1 + $0x234] ss:$8 sps:$4 sm:$0xff]   ;;  %v2726_v26 = vld [vmem:[%s4038_s1 + $0x230] ss:$8 sps:$4 sm:$0xff]   ;;  %v30_v28 = vld [vmem:[%s4039_s0 + $0x80] sm:$0xff] }
  0x1e   :  { %v2731_v25 = vld [vmem:[%s4038_s1 + $0x334] ss:$8 sps:$4 sm:$0xff]   ;;  %v2729_v27 = vld [vmem:[%s4038_s1 + $0x330] ss:$8 sps:$4 sm:$0xff]   ;;  %v38_v29 = vld [vmem:[%s4039_s0 + $0xc0] sm:$0xff] }
  0x1f   :  { %1769 = vmatpush1.bf16.msra.mxu0 %v2652_v30  ;;  %v31_v30 = vld [vmem:[%s4039_s0 + $0x88] sm:$0xff]  ;;  %v3337_v48 = vld [vmem:[%s4039_s0 + $0x18] sm:$0xff] }
  0x20   :  { %1822 = vmatpush1.bf16.msra.mxu1 %v2653_v31  ;;  %1770 = vmatprep.subr.bf16.mxu0 %v2654_v32  ;;  %v39_v31 = vld [vmem:[%s4039_s0 + $0xc8] sm:$0xff]  ;;  %v3344_v50 = vld [vmem:[%s4039_s0 + $0x58] sm:$0xff] }
  0x21   :  { %1823 = vmatprep.subr.bf16.mxu1 %v2656_v33  ;;  %v2734_v32 = vld [vmem:[%s4038_s1 + $0x224] ss:$8 sps:$4 sm:$0xff]   ;;  %v2335_v33 = vcombine.high %v30_v28, %v38_v29  ;;  %v2325_v51 = vcombine.high %v3337_v48, %v3344_v50  ;;  %v2747_v53 = vld [vmem:[%s4038_s1 + $0x300] ss:$8 sps:$4 sm:$0xff]   ;;  %v2755_v55 = vld [vmem:[%s4038_s1 + $0x3f4] ss:$8 sps:$4 sm:$0xff]  }
  0x23   :  { %1771 = vmatpush2.bf16.msra.mxu0 %v2658_v34  ;;  %v2334_v34 = vcombine.low %v30_v28, %v38_v29  ;;  %v2324_v29 = vcombine.low %v3337_v48, %v3344_v50  ;;  %v2818_v48 = vld [vmem:[%s4038_s1 + $0x444] ss:$8 sps:$4 sm:$0xff]  }
  0x24   :  { %1824 = vmatpush2.bf16.msra.mxu1 %v2659_v35  ;;  %1772 = vmatprep.subr.bf16.mxu0 %v2660_v36  ;;  %v2337_v35 = vcombine.high %v31_v30, %v39_v31  ;;  %v2737_v36 = vld [vmem:[%s4038_s1 + $0x324] ss:$8 sps:$4 sm:$0xff]  }
  0x25   :  { %1825 = vmatprep.subr.bf16.mxu1 %v2662_v37  ;;  %v2336_v37 = vcombine.low %v31_v30, %v39_v31  ;;  %v33_v30 = vld [vmem:[%s4039_s0 + $0x98] sm:$0xff] }
  0x26   :  { %v41_v31 = vld [vmem:[%s4039_s0 + $0xd8] sm:$0xff] }
  0x27   :  { %1773 = vmatpush2.bf16.msra.mxu0 %v2664_v38  ;;  %v2732_v38 = vld [vmem:[%s4038_s1 + $0x220] ss:$8 sps:$4 sm:$0xff]  }
  0x28   :  { %1826 = vmatpush2.bf16.msra.mxu1 %v2665_v39  ;;  %1774 = vmatprep.subr.bf16.mxu0 %v2666_v40  ;;  %v2735_v39 = vld [vmem:[%s4038_s1 + $0x320] ss:$8 sps:$4 sm:$0xff]   ;;  %v2740_v40 = vld [vmem:[%s4038_s1 + $0x214] ss:$8 sps:$4 sm:$0xff]  }
  0x29   :  { %1827 = vmatprep.subr.bf16.mxu1 %v2668_v41  ;;  %v2743_v41 = vld [vmem:[%s4038_s1 + $0x314] ss:$8 sps:$4 sm:$0xff]  }
  0x2b   :  { %1775 = vmatpush2.bf16.msra.mxu0 %v2670_v42  ;;  %v2738_v42 = vld [vmem:[%s4038_s1 + $0x210] ss:$8 sps:$4 sm:$0xff]  }
  0x2c   :  { %1828 = vmatpush2.bf16.msra.mxu1 %v2671_v43  ;;  %1776 = vmatprep.subr.bf16.mxu0 %v2672_v44  ;;  %v2741_v43 = vld [vmem:[%s4038_s1 + $0x310] ss:$8 sps:$4 sm:$0xff]   ;;  %v2746_v44 = vld [vmem:[%s4038_s1 + $0x204] ss:$8 sps:$4 sm:$0xff]  }
  0x2d   :  { %1829 = vmatprep.subr.bf16.mxu1 %v2674_v45  ;;  %v2749_v45 = vld [vmem:[%s4038_s1 + $0x304] ss:$8 sps:$4 sm:$0xff]  }
  0x2f   :  { %1777 = vmatpush2.bf16.msra.mxu0 %v2676_v46  ;;  %v3327_v46 = vld [vmem:[%s4039_s0 + $0x10] sm:$0xff] }
  0x30   :  { %1830 = vmatpush2.bf16.msra.mxu1 %v2677_v47  ;;  %1778 = vmatprep.subr.bf16.mxu0 %v2678_v52  ;;  %v3332_v47 = vld [vmem:[%s4039_s0 + $0x50] sm:$0xff]  ;;  %v2744_v52 = vld [vmem:[%s4038_s1 + $0x200] ss:$8 sps:$4 sm:$0xff]  }
  0x31   :  { %1831 = vmatprep.subr.bf16.mxu1 %v2680_v54  ;;  %v2323_v49 = vcombine.high %v3327_v46, %v3332_v47  ;;  %v2752_v54 = vld [vmem:[%s4038_s1 + $0x2f4] ss:$8 sps:$4 sm:$0xff]   ;;  %v2322_v28 = vcombine.low %v3327_v46, %v3332_v47  ;;  %v3515_v46 = vld [vmem:[%s4039_s0 + $0x28] sm:$0xff] }
  0x32   :  { %v3520_v47 = vld [vmem:[%s4039_s0 + $0x68] sm:$0xff] }
  0x33   :  { %1779 = vmatpush2.bf16.msra.mxu0 %v2682_v56  ;;  %v2750_v56 = vld [vmem:[%s4038_s1 + $0x2f0] ss:$8 sps:$4 sm:$0xff]  }
  0x34   :  { %1832 = vmatpush2.bf16.msra.mxu1 %v2683_v57  ;;  %1780 = vmatprep.subr.bf16.mxu0 %v2684_v58  ;;  %v2753_v57 = vld [vmem:[%s4038_s1 + $0x3f0] ss:$8 sps:$4 sm:$0xff]   ;;  %v2758_v58 = vld [vmem:[%s4038_s1 + $0x2e4] ss:$8 sps:$4 sm:$0xff]  }
  0x35   :  { %1833 = vmatprep.subr.bf16.mxu1 %v2686_v59  ;;  %v2761_v59 = vld [vmem:[%s4038_s1 + $0x3e4] ss:$8 sps:$4 sm:$0xff]  }
  0x37   :  { %1781 = vmatpush2.bf16.msra.mxu0 %v2688_v60  ;;  %v2756_v60 = vld [vmem:[%s4038_s1 + $0x2e0] ss:$8 sps:$4 sm:$0xff]  }
  0x38   :  { %1834 = vmatpush2.bf16.msra.mxu1 %v2689_v61  ;;  %1782 = vmatprep.subr.bf16.mxu0 %v2690_v62  ;;  %v2759_v61 = vld [vmem:[%s4038_s1 + $0x3e0] ss:$8 sps:$4 sm:$0xff]   ;;  %v2764_v62 = vld [vmem:[%s4038_s1 + $0x2d4] ss:$8 sps:$4 sm:$0xff]  }
  0x39   :  { %1835 = vmatprep.subr.bf16.mxu1 %v2692_v63  ;;  %v2767_v63 = vld [vmem:[%s4038_s1 + $0x3d4] ss:$8 sps:$4 sm:$0xff]  }
  0x3b   :  { %1783 = vmatpush2.bf16.msra.mxu0 %v2694_v0  ;;  %v2762_v0 = vld [vmem:[%s4038_s1 + $0x2d0] ss:$8 sps:$4 sm:$0xff]  }
  0x3c   :  { %1836 = vmatpush2.bf16.msra.mxu1 %v2695_v1  ;;  %1784 = vmatprep.subr.bf16.mxu0 %v2696_v2  ;;  %v2765_v1 = vld [vmem:[%s4038_s1 + $0x3d0] ss:$8 sps:$4 sm:$0xff]   ;;  %v2770_v2 = vld [vmem:[%s4038_s1 + $0x2c4] ss:$8 sps:$4 sm:$0xff]  }
  0x3d   :  { %1837 = vmatprep.subr.bf16.mxu1 %v2698_v3  ;;  %v2773_v3 = vld [vmem:[%s4038_s1 + $0x3c4] ss:$8 sps:$4 sm:$0xff]  }
  0x3f   :  { %1785 = vmatpush2.bf16.msra.mxu0 %v2700_v4  ;;  %v2768_v4 = vld [vmem:[%s4038_s1 + $0x2c0] ss:$8 sps:$4 sm:$0xff]  }
  0x40   :  { %1838 = vmatpush2.bf16.msra.mxu1 %v2701_v5  ;;  %1860 = vmatprep.subr.bf16.mxu0 %v2704_v6  ;;  %v2771_v5 = vld [vmem:[%s4038_s1 + $0x3c0] ss:$8 sps:$4 sm:$0xff]   ;;  %v2776_v6 = vld [vmem:[%s4038_s1 + $0x2b4] ss:$8 sps:$4 sm:$0xff]  }
  0x41   :  { %1913 = vmatprep.subr.bf16.mxu1 %v2707_v7  ;;  %v2779_v7 = vld [vmem:[%s4038_s1 + $0x3b4] ss:$8 sps:$4 sm:$0xff]  }
  0x42   :  { %1787 = vmatmul.mubr.bf16.vlgmr.msra.gmra.mxu0 %v2318_v8  ;;  %v2774_v8 = vld [vmem:[%s4038_s1 + $0x2b0] ss:$8 sps:$4 sm:$0xff]  }
  0x43   :  { %1840 = vmatmul.mubr.bf16.vlgmr.msra.gmra.mxu1 %v2320_v9  ;;  %1861 = vmatpush1.bf16.msra.mxu0 %v2702_v10  ;;  %v2777_v9 = vld [vmem:[%s4038_s1 + $0x3b0] ss:$8 sps:$4 sm:$0xff]   ;;  %v2782_v10 = vld [vmem:[%s4038_s1 + $0x2a4] ss:$8 sps:$4 sm:$0xff]  }
  0x44   :  { %1914 = vmatpush1.bf16.msra.mxu1 %v2705_v11  ;;  %1862 = vmatprep.subr.bf16.mxu0 %v2710_v12  ;;  %v2785_v11 = vld [vmem:[%s4038_s1 + $0x3a4] ss:$8 sps:$4 sm:$0xff]   ;;  %v2780_v12 = vld [vmem:[%s4038_s1 + $0x2a0] ss:$8 sps:$4 sm:$0xff]  }
  0x45   :  { %1915 = vmatprep.subr.bf16.mxu1 %v2713_v13  ;;  %1796 = vmatprep.mubr.bf16.mxu0 %v2335_v33  ;;  %v2783_v13 = vld [vmem:[%s4038_s1 + $0x3a0] ss:$8 sps:$4 sm:$0xff]   ;;  %v2809_v33 = vld [vmem:[%s4038_s1 + $0x564] ss:$8 sps:$4 sm:$0xff]  }
  0x46   :  { %1849 = vmatprep.mubr.bf16.mxu1 %v2337_v35  ;;  %v2341_v35 = vcombine.high %v33_v30, %v41_v31 }
  0x47   :  { %1863 = vmatpush1.bf16.msra.mxu0 %v2708_v14  ;;  %v2788_v14 = vld [vmem:[%s4038_s1 + $0x294] ss:$8 sps:$4 sm:$0xff]  }
  0x48   :  { %1916 = vmatpush1.bf16.msra.mxu1 %v2711_v15  ;;  %1864 = vmatprep.subr.bf16.mxu0 %v2716_v16  ;;  %v2791_v15 = vld [vmem:[%s4038_s1 + $0x394] ss:$8 sps:$4 sm:$0xff]   ;;  %v2786_v16 = vld [vmem:[%s4038_s1 + $0x290] ss:$8 sps:$4 sm:$0xff]  }
  0x49   :  { %1917 = vmatprep.subr.bf16.mxu1 %v2719_v17  ;;  %v2789_v17 = vld [vmem:[%s4038_s1 + $0x390] ss:$8 sps:$4 sm:$0xff]  }
  0x4a   :  { %1797 = vmatmul.mubr.bf16.gmra.mxu0 %v2334_v34 }
  0x4b   :  { %1865 = vmatpush1.bf16.msra.mxu0 %v2714_v18  ;;  %1850 = vmatmul.mubr.bf16.gmra.mxu1 %v2336_v37  ;;  %v2794_v18 = vld [vmem:[%s4038_s1 + $0x284] ss:$8 sps:$4 sm:$0xff]   ;;  %v2807_v37 = vld [vmem:[%s4038_s1 + $0x560] ss:$8 sps:$4 sm:$0xff]  }
  0x4c   :  { %1918 = vmatpush1.bf16.msra.mxu1 %v2717_v19  ;;  %1866 = vmatprep.subr.bf16.mxu0 %v2722_v20  ;;  %v2797_v19 = vld [vmem:[%s4038_s1 + $0x384] ss:$8 sps:$4 sm:$0xff]   ;;  %v2792_v20 = vld [vmem:[%s4038_s1 + $0x280] ss:$8 sps:$4 sm:$0xff]  }
  0x4d   :  { %1919 = vmatprep.subr.bf16.mxu1 %v2725_v21  ;;  %1892 = vmatprep.mubr.bf16.mxu0 %v2323_v49  ;;  %v2795_v21 = vld [vmem:[%s4038_s1 + $0x380] ss:$8 sps:$4 sm:$0xff]   ;;  %v2821_v49 = vld [vmem:[%s4038_s1 + $0x544] ss:$8 sps:$4 sm:$0xff]  }
  0x4e   :  { %1945 = vmatprep.mubr.bf16.mxu1 %v2325_v51  ;;  %v2329_v51 = vcombine.high %v3515_v46, %v3520_v47 }
  0x4f   :  { %1867 = vmatpush1.bf16.msra.mxu0 %v2720_v22  ;;  %v2800_v22 = vld [vmem:[%s4038_s1 + $0x474] ss:$8 sps:$4 sm:$0xff]  }
  0x50   :  { %1920 = vmatpush1.bf16.msra.mxu1 %v2723_v23  ;;  %1868 = vmatprep.subr.bf16.mxu0 %v2728_v24  ;;  %v2803_v23 = vld [vmem:[%s4038_s1 + $0x574] ss:$8 sps:$4 sm:$0xff]   ;;  %v2798_v24 = vld [vmem:[%s4038_s1 + $0x470] ss:$8 sps:$4 sm:$0xff]  }
  0x51   :  { %1921 = vmatprep.subr.bf16.mxu1 %v2731_v25  ;;  %v2801_v25 = vld [vmem:[%s4038_s1 + $0x570] ss:$8 sps:$4 sm:$0xff]  }
  0x53   :  { %1869 = vmatpush1.bf16.msra.mxu0 %v2726_v26  ;;  %v32_v26 = vld [vmem:[%s4039_s0 + $0x90] sm:$0xff] }
  0x54   :  { %1922 = vmatpush1.bf16.msra.mxu1 %v2729_v27  ;;  %1870 = vmatprep.subr.bf16.mxu0 %v2734_v32  ;;  %v40_v27 = vld [vmem:[%s4039_s0 + $0xd0] sm:$0xff]  ;;  %v2806_v32 = vld [vmem:[%s4038_s1 + $0x464] ss:$8 sps:$4 sm:$0xff]  }
  0x55   :  { %1923 = vmatprep.subr.bf16.mxu1 %v2737_v36  ;;  %v2339_v34 = vcombine.high %v32_v26, %v40_v27  ;;  %v2804_v36 = vld [vmem:[%s4038_s1 + $0x460] ss:$8 sps:$4 sm:$0xff]  }
  0x57   :  { %1871 = vmatpush1.bf16.msra.mxu0 %v2732_v38  ;;  %v2812_v38 = vld [vmem:[%s4038_s1 + $0x454] ss:$8 sps:$4 sm:$0xff]  }
  0x58   :  { %1924 = vmatpush1.bf16.msra.mxu1 %v2735_v39  ;;  %1872 = vmatprep.subr.bf16.mxu0 %v2740_v40  ;;  %v2815_v39 = vld [vmem:[%s4038_s1 + $0x554] ss:$8 sps:$4 sm:$0xff]   ;;  %v2810_v40 = vld [vmem:[%s4038_s1 + $0x450] ss:$8 sps:$4 sm:$0xff]  }
  0x59   :  { %1925 = vmatprep.subr.bf16.mxu1 %v2743_v41  ;;  %v2813_v41 = vld [vmem:[%s4038_s1 + $0x550] ss:$8 sps:$4 sm:$0xff]  }
  0x5b   :  { %1873 = vmatpush1.bf16.msra.mxu0 %v2738_v42  ;;  %v3505_v42 = vld [vmem:[%s4039_s0 + $0x20] sm:$0xff] }
  0x5c   :  { %1926 = vmatpush1.bf16.msra.mxu1 %v2741_v43  ;;  %1874 = vmatprep.subr.bf16.mxu0 %v2746_v44  ;;  %v3510_v43 = vld [vmem:[%s4039_s0 + $0x60] sm:$0xff]  ;;  %v2338_v44 = vcombine.low %v32_v26, %v40_v27 }
  0x5d   :  { %1927 = vmatprep.subr.bf16.mxu1 %v2749_v45  ;;  %v2340_v45 = vcombine.low %v33_v30, %v41_v31  ;;  %v2327_v50 = vcombine.high %v3505_v42, %v3510_v43  ;;  %v2878_v26 = vld [vmem:[%s4038_s1 + $0x4a4] ss:$8 sps:$4 sm:$0xff]   ;;  %v2884_v30 = vld [vmem:[%s4038_s1 + $0x494] ss:$8 sps:$4 sm:$0xff]  }
  0x5e   :  { %v2881_v27 = vld [vmem:[%s4038_s1 + $0x5a4] ss:$8 sps:$4 sm:$0xff]   ;;  %v2887_v31 = vld [vmem:[%s4038_s1 + $0x594] ss:$8 sps:$4 sm:$0xff]  }
  0x5f   :  { %1875 = vmatpush1.bf16.msra.mxu0 %v2744_v52  ;;  %v2816_v52 = vld [vmem:[%s4038_s1 + $0x440] ss:$8 sps:$4 sm:$0xff]  }
  0x60   :  { %1928 = vmatpush1.bf16.msra.mxu1 %v2747_v53  ;;  %1876 = vmatprep.subr.bf16.mxu0 %v2752_v54  ;;  %v2819_v53 = vld [vmem:[%s4038_s1 + $0x540] ss:$8 sps:$4 sm:$0xff]   ;;  %v2824_v54 = vld [vmem:[%s4038_s1 + $0x434] ss:$8 sps:$4 sm:$0xff]  }
  0x61   :  { %1929 = vmatprep.subr.bf16.mxu1 %v2755_v55  ;;  %v2827_v55 = vld [vmem:[%s4038_s1 + $0x534] ss:$8 sps:$4 sm:$0xff]  }
  0x63   :  { %1877 = vmatpush2.bf16.msra.mxu0 %v2750_v56  ;;  %v2822_v56 = vld [vmem:[%s4038_s1 + $0x430] ss:$8 sps:$4 sm:$0xff]  }
  0x64   :  { %1930 = vmatpush2.bf16.msra.mxu1 %v2753_v57  ;;  %1878 = vmatprep.subr.bf16.mxu0 %v2758_v58  ;;  %v2825_v57 = vld [vmem:[%s4038_s1 + $0x530] ss:$8 sps:$4 sm:$0xff]   ;;  %v2830_v58 = vld [vmem:[%s4038_s1 + $0x424] ss:$8 sps:$4 sm:$0xff]  }
  0x65   :  { %1931 = vmatprep.subr.bf16.mxu1 %v2761_v59  ;;  %v2833_v59 = vld [vmem:[%s4038_s1 + $0x524] ss:$8 sps:$4 sm:$0xff]  }
  0x67   :  { %1879 = vmatpush2.bf16.msra.mxu0 %v2756_v60  ;;  %v2828_v60 = vld [vmem:[%s4038_s1 + $0x420] ss:$8 sps:$4 sm:$0xff]  }
  0x68   :  { %1932 = vmatpush2.bf16.msra.mxu1 %v2759_v61  ;;  %1880 = vmatprep.subr.bf16.mxu0 %v2764_v62  ;;  %v2831_v61 = vld [vmem:[%s4038_s1 + $0x520] ss:$8 sps:$4 sm:$0xff]   ;;  %v2836_v62 = vld [vmem:[%s4038_s1 + $0x414] ss:$8 sps:$4 sm:$0xff]  }
  0x69   :  { %1933 = vmatprep.subr.bf16.mxu1 %v2767_v63  ;;  %v2839_v63 = vld [vmem:[%s4038_s1 + $0x514] ss:$8 sps:$4 sm:$0xff]  }
  0x6b   :  { %1881 = vmatpush2.bf16.msra.mxu0 %v2762_v0  ;;  %v2834_v0 = vld [vmem:[%s4038_s1 + $0x410] ss:$8 sps:$4 sm:$0xff]  }
  0x6c   :  { %1934 = vmatpush2.bf16.msra.mxu1 %v2765_v1  ;;  %1882 = vmatprep.subr.bf16.mxu0 %v2770_v2  ;;  %v2837_v1 = vld [vmem:[%s4038_s1 + $0x510] ss:$8 sps:$4 sm:$0xff]   ;;  %v2842_v2 = vld [vmem:[%s4038_s1 + $0x404] ss:$8 sps:$4 sm:$0xff]  }
  0x6d   :  { %1935 = vmatprep.subr.bf16.mxu1 %v2773_v3  ;;  %v2845_v3 = vld [vmem:[%s4038_s1 + $0x504] ss:$8 sps:$4 sm:$0xff]  }
  0x6f   :  { %1883 = vmatpush2.bf16.msra.mxu0 %v2768_v4  ;;  %v2840_v4 = vld [vmem:[%s4038_s1 + $0x400] ss:$8 sps:$4 sm:$0xff]  }
  0x70   :  { %1936 = vmatpush2.bf16.msra.mxu1 %v2771_v5  ;;  %1884 = vmatprep.subr.bf16.mxu0 %v2776_v6  ;;  %v2843_v5 = vld [vmem:[%s4038_s1 + $0x500] ss:$8 sps:$4 sm:$0xff]   ;;  %v2848_v6 = vld [vmem:[%s4038_s1 + $0x4f4] ss:$8 sps:$4 sm:$0xff]  }
  0x71   :  { %1937 = vmatprep.subr.bf16.mxu1 %v2779_v7  ;;  %v2851_v7 = vld [vmem:[%s4038_s1 + $0x5f4] ss:$8 sps:$4 sm:$0xff]  }
  0x73   :  { %1885 = vmatpush2.bf16.msra.mxu0 %v2774_v8  ;;  %v2846_v8 = vld [vmem:[%s4038_s1 + $0x4f0] ss:$8 sps:$4 sm:$0xff]  }
  0x74   :  { %1938 = vmatpush2.bf16.msra.mxu1 %v2777_v9  ;;  %1886 = vmatprep.subr.bf16.mxu0 %v2782_v10  ;;  %v2849_v9 = vld [vmem:[%s4038_s1 + $0x5f0] ss:$8 sps:$4 sm:$0xff]   ;;  %v2854_v10 = vld [vmem:[%s4038_s1 + $0x4e4] ss:$8 sps:$4 sm:$0xff]  }
  0x75   :  { %1939 = vmatprep.subr.bf16.mxu1 %v2785_v11  ;;  %v2857_v11 = vld [vmem:[%s4038_s1 + $0x5e4] ss:$8 sps:$4 sm:$0xff]  }
  0x77   :  { %1887 = vmatpush2.bf16.msra.mxu0 %v2780_v12  ;;  %v2852_v12 = vld [vmem:[%s4038_s1 + $0x4e0] ss:$8 sps:$4 sm:$0xff]  }
  0x78   :  { %1940 = vmatpush2.bf16.msra.mxu1 %v2783_v13  ;;  %1888 = vmatprep.subr.bf16.mxu0 %v2788_v14  ;;  %v2855_v13 = vld [vmem:[%s4038_s1 + $0x5e0] ss:$8 sps:$4 sm:$0xff]   ;;  %v2860_v14 = vld [vmem:[%s4038_s1 + $0x4d4] ss:$8 sps:$4 sm:$0xff]  }
  0x79   :  { %1941 = vmatprep.subr.bf16.mxu1 %v2791_v15  ;;  %v2863_v15 = vld [vmem:[%s4038_s1 + $0x5d4] ss:$8 sps:$4 sm:$0xff]  }
  0x7b   :  { %1889 = vmatpush2.bf16.msra.mxu0 %v2786_v16  ;;  %v2858_v16 = vld [vmem:[%s4038_s1 + $0x4d0] ss:$8 sps:$4 sm:$0xff]  }
  0x7c   :  { %1942 = vmatpush2.bf16.msra.mxu1 %v2789_v17  ;;  %1890 = vmatprep.subr.bf16.mxu0 %v2794_v18  ;;  %v2861_v17 = vld [vmem:[%s4038_s1 + $0x5d0] ss:$8 sps:$4 sm:$0xff]   ;;  %v2866_v18 = vld [vmem:[%s4038_s1 + $0x4c4] ss:$8 sps:$4 sm:$0xff]  }
  0x7d   :  { %1943 = vmatprep.subr.bf16.mxu1 %v2797_v19  ;;  %v2869_v19 = vld [vmem:[%s4038_s1 + $0x5c4] ss:$8 sps:$4 sm:$0xff]  }
  0x7f   :  { %1891 = vmatpush2.bf16.msra.mxu0 %v2792_v20  ;;  %v2864_v20 = vld [vmem:[%s4038_s1 + $0x4c0] ss:$8 sps:$4 sm:$0xff]  }
  0x80   :  { %1944 = vmatpush2.bf16.msra.mxu1 %v2795_v21  ;;  %1966 = vmatprep.subr.bf16.mxu0 %v2800_v22  ;;  %v2867_v21 = vld [vmem:[%s4038_s1 + $0x5c0] ss:$8 sps:$4 sm:$0xff]   ;;  %v2872_v22 = vld [vmem:[%s4038_s1 + $0x4b4] ss:$8 sps:$4 sm:$0xff]  }
  0x81   :  { %2019 = vmatprep.subr.bf16.mxu1 %v2803_v23  ;;  %v2875_v23 = vld [vmem:[%s4038_s1 + $0x5b4] ss:$8 sps:$4 sm:$0xff]  }
  0x82   :  { %1893 = vmatmul.mubr.bf16.vlgmr.msra.gmra.mxu0 %v2322_v28  ;;  %v2876_v28 = vld [vmem:[%s4038_s1 + $0x4a0] ss:$8 sps:$4 sm:$0xff]  }
  0x83   :  { %1946 = vmatmul.mubr.bf16.vlgmr.msra.gmra.mxu1 %v2324_v29  ;;  %1967 = vmatpush1.bf16.msra.mxu0 %v2798_v24  ;;  %v2870_v24 = vld [vmem:[%s4038_s1 + $0x4b0] ss:$8 sps:$4 sm:$0xff]   ;;  %v2879_v29 = vld [vmem:[%s4038_s1 + $0x5a0] ss:$8 sps:$4 sm:$0xff]  }
  0x84   :  { %2020 = vmatpush1.bf16.msra.mxu1 %v2801_v25  ;;  %1968 = vmatprep.subr.bf16.mxu0 %v2806_v32  ;;  %v2873_v25 = vld [vmem:[%s4038_s1 + $0x5b0] ss:$8 sps:$4 sm:$0xff]  }
  0x85   :  { %2021 = vmatprep.subr.bf16.mxu1 %v2809_v33  ;;  %1902 = vmatprep.mubr.bf16.mxu0 %v2339_v34  ;;  %v2882_v32 = vld [vmem:[%s4038_s1 + $0x490] ss:$8 sps:$4 sm:$0xff]   ;;  %v2890_v34 = vld [vmem:[%s4038_s1 + $0x484] ss:$8 sps:$4 sm:$0xff]  }
  0x86   :  { %1955 = vmatprep.mubr.bf16.mxu1 %v2341_v35  ;;  %v2885_v33 = vld [vmem:[%s4038_s1 + $0x590] ss:$8 sps:$4 sm:$0xff]   ;;  %v2893_v35 = vld [vmem:[%s4038_s1 + $0x584] ss:$8 sps:$4 sm:$0xff]  }
  0x87   :  { %1969 = vmatpush1.bf16.msra.mxu0 %v2804_v36  ;;  %v2888_v36 = vld [vmem:[%s4038_s1 + $0x480] ss:$8 sps:$4 sm:$0xff]  }
  0x88   :  { %2022 = vmatpush1.bf16.msra.mxu1 %v2807_v37  ;;  %1970 = vmatprep.subr.bf16.mxu0 %v2812_v38  ;;  %v2891_v37 = vld [vmem:[%s4038_s1 + $0x580] ss:$8 sps:$4 sm:$0xff]   ;;  %v2896_v38 = vld [vmem:[%s4038_s1 + $0x674] ss:$8 sps:$4 sm:$0xff]  }
  0x89   :  { %2023 = vmatprep.subr.bf16.mxu1 %v2815_v39  ;;  %v2899_v39 = vld [vmem:[%s4038_s1 + $0x774] ss:$8 sps:$4 sm:$0xff]  }
  0x8a   :  { %1903 = vmatmul.mubr.bf16.gmra.mxu0 %v2338_v44  ;;  %v2328_v44 = vcombine.low %v3515_v46, %v3520_v47  ;;  %v2902_v46 = vld [vmem:[%s4038_s1 + $0x664] ss:$8 sps:$4 sm:$0xff]  }
  0x8b   :  { %1956 = vmatmul.mubr.bf16.gmra.mxu1 %v2340_v45  ;;  %1971 = vmatpush1.bf16.msra.mxu0 %v2810_v40  ;;  %v34_v40 = vld [vmem:[%s4039_s0 + $0xa0] sm:$0xff] }
  0x8c   :  { %2024 = vmatpush1.bf16.msra.mxu1 %v2813_v41  ;;  %1972 = vmatprep.subr.bf16.mxu0 %v2818_v48  ;;  %v2326_v41 = vcombine.low %v3505_v42, %v3510_v43  ;;  %v42_v45 = vld [vmem:[%s4039_s0 + $0xe0] sm:$0xff]  ;;  %v35_v48 = vld [vmem:[%s4039_s0 + $0xa8] sm:$0xff]  ;;  %v2894_v42 = vld [vmem:[%s4038_s1 + $0x670] ss:$8 sps:$4 sm:$0xff]  }
  0x8d   :  { %2025 = vmatprep.subr.bf16.mxu1 %v2821_v49  ;;  %1998 = vmatprep.mubr.bf16.mxu0 %v2327_v50  ;;  %v43_v49 = vld [vmem:[%s4039_s0 + $0xe8] sm:$0xff]  ;;  %v2897_v43 = vld [vmem:[%s4038_s1 + $0x770] ss:$8 sps:$4 sm:$0xff]   ;;  %v2343_v50 = vcombine.high %v34_v40, %v42_v45 }
  0x8e   :  { %2051 = vmatprep.mubr.bf16.mxu1 %v2329_v51  ;;  %v2905_v47 = vld [vmem:[%s4038_s1 + $0x764] ss:$8 sps:$4 sm:$0xff]   ;;  %v2345_v51 = vcombine.high %v35_v48, %v43_v49 }
  0x8f   :  { %1973 = vmatpush1.bf16.msra.mxu0 %v2816_v52  ;;  %v2900_v52 = vld [vmem:[%s4038_s1 + $0x660] ss:$8 sps:$4 sm:$0xff]  }
  0x90   :  { %2026 = vmatpush1.bf16.msra.mxu1 %v2819_v53  ;;  %1974 = vmatprep.subr.bf16.mxu0 %v2824_v54  ;;  %v2903_v53 = vld [vmem:[%s4038_s1 + $0x760] ss:$8 sps:$4 sm:$0xff]   ;;  %v2908_v54 = vld [vmem:[%s4038_s1 + $0x654] ss:$8 sps:$4 sm:$0xff]  }
  0x91   :  { %2027 = vmatprep.subr.bf16.mxu1 %v2827_v55  ;;  %v2911_v55 = vld [vmem:[%s4038_s1 + $0x754] ss:$8 sps:$4 sm:$0xff]  }
  0x93   :  { %1975 = vmatpush1.bf16.msra.mxu0 %v2822_v56  ;;  %v3731_v56 = vld [vmem:[%s4039_s0 + $0x30] sm:$0xff] }
  0x94   :  { %2028 = vmatpush1.bf16.msra.mxu1 %v2825_v57  ;;  %1976 = vmatprep.subr.bf16.mxu0 %v2830_v58  ;;  %v2342_v57 = vcombine.low %v34_v40, %v42_v45  ;;  %v2344_v58 = vcombine.low %v35_v48, %v43_v49  ;;  %v2966_v40 = vld [vmem:[%s4038_s1 + $0x6b0] ss:$8 sps:$4 sm:$0xff]   ;;  %v2977_v45 = vld [vmem:[%s4038_s1 + $0x7a4] ss:$8 sps:$4 sm:$0xff]   ;;  %v2972_v48 = vld [vmem:[%s4038_s1 + $0x6a0] ss:$8 sps:$4 sm:$0xff]  }
  0x95   :  { %2029 = vmatprep.subr.bf16.mxu1 %v2833_v59  ;;  %v3736_v59 = vld [vmem:[%s4039_s0 + $0x70] sm:$0xff]  ;;  %v2975_v49 = vld [vmem:[%s4038_s1 + $0x7a0] ss:$8 sps:$4 sm:$0xff]  }
  0x97   :  { %1977 = vmatpush1.bf16.msra.mxu0 %v2828_v60  ;;  %v3741_v60 = vld [vmem:[%s4039_s0 + $0x38] sm:$0xff] }
  0x98   :  { %2030 = vmatpush1.bf16.msra.mxu1 %v2831_v61  ;;  %1978 = vmatprep.subr.bf16.mxu0 %v2836_v62  ;;  %v3746_v61 = vld [vmem:[%s4039_s0 + $0x78] sm:$0xff] }
  0x99   :  { %2031 = vmatprep.subr.bf16.mxu1 %v2839_v63  ;;  %v2906_v62 = vld [vmem:[%s4038_s1 + $0x650] ss:$8 sps:$4 sm:$0xff]  }
  0x9a   :  { %v2909_v63 = vld [vmem:[%s4038_s1 + $0x750] ss:$8 sps:$4 sm:$0xff]  }
  0x9b   :  { %1979 = vmatpush1.bf16.msra.mxu0 %v2834_v0  ;;  %v2914_v0 = vld [vmem:[%s4038_s1 + $0x644] ss:$8 sps:$4 sm:$0xff]  }
  0x9c   :  { %2032 = vmatpush1.bf16.msra.mxu1 %v2837_v1  ;;  %1980 = vmatprep.subr.bf16.mxu0 %v2842_v2  ;;  %v2917_v1 = vld [vmem:[%s4038_s1 + $0x744] ss:$8 sps:$4 sm:$0xff]   ;;  %v2331_v2 = vcombine.high %v3731_v56, %v3736_v59 }
  0x9d   :  { %2033 = vmatprep.subr.bf16.mxu1 %v2845_v3  ;;  %v2333_v3 = vcombine.high %v3741_v60, %v3746_v61 }
  0x9f   :  { %1981 = vmatpush1.bf16.msra.mxu0 %v2840_v4  ;;  %v2912_v4 = vld [vmem:[%s4038_s1 + $0x640] ss:$8 sps:$4 sm:$0xff]  }
  0xa0   :  { %2034 = vmatpush1.bf16.msra.mxu1 %v2843_v5  ;;  %1982 = vmatprep.subr.bf16.mxu0 %v2848_v6  ;;  %v2915_v5 = vld [vmem:[%s4038_s1 + $0x740] ss:$8 sps:$4 sm:$0xff]   ;;  %v2920_v6 = vld [vmem:[%s4038_s1 + $0x634] ss:$8 sps:$4 sm:$0xff]  }
  0xa1   :  { %2035 = vmatprep.subr.bf16.mxu1 %v2851_v7  ;;  %v2923_v7 = vld [vmem:[%s4038_s1 + $0x734] ss:$8 sps:$4 sm:$0xff]  }
  0xa3   :  { %1983 = vmatpush2.bf16.msra.mxu0 %v2846_v8  ;;  %v2918_v8 = vld [vmem:[%s4038_s1 + $0x630] ss:$8 sps:$4 sm:$0xff]  }
  0xa4   :  { %2036 = vmatpush2.bf16.msra.mxu1 %v2849_v9  ;;  %1984 = vmatprep.subr.bf16.mxu0 %v2854_v10  ;;  %v2921_v9 = vld [vmem:[%s4038_s1 + $0x730] ss:$8 sps:$4 sm:$0xff]   ;;  %v2926_v10 = vld [vmem:[%s4038_s1 + $0x624] ss:$8 sps:$4 sm:$0xff]  }
  0xa5   :  { %2037 = vmatprep.subr.bf16.mxu1 %v2857_v11  ;;  %v2929_v11 = vld [vmem:[%s4038_s1 + $0x724] ss:$8 sps:$4 sm:$0xff]  }
  0xa7   :  { %1985 = vmatpush2.bf16.msra.mxu0 %v2852_v12  ;;  %v2924_v12 = vld [vmem:[%s4038_s1 + $0x620] ss:$8 sps:$4 sm:$0xff]  }
  0xa8   :  { %2038 = vmatpush2.bf16.msra.mxu1 %v2855_v13  ;;  %1986 = vmatprep.subr.bf16.mxu0 %v2860_v14  ;;  %v2927_v13 = vld [vmem:[%s4038_s1 + $0x720] ss:$8 sps:$4 sm:$0xff]   ;;  %v2932_v14 = vld [vmem:[%s4038_s1 + $0x614] ss:$8 sps:$4 sm:$0xff]  }
  0xa9   :  { %2039 = vmatprep.subr.bf16.mxu1 %v2863_v15  ;;  %v2935_v15 = vld [vmem:[%s4038_s1 + $0x714] ss:$8 sps:$4 sm:$0xff]  }
  0xab   :  { %1987 = vmatpush2.bf16.msra.mxu0 %v2858_v16  ;;  %v2930_v16 = vld [vmem:[%s4038_s1 + $0x610] ss:$8 sps:$4 sm:$0xff]  }
  0xac   :  { %2040 = vmatpush2.bf16.msra.mxu1 %v2861_v17  ;;  %1988 = vmatprep.subr.bf16.mxu0 %v2866_v18  ;;  %v2933_v17 = vld [vmem:[%s4038_s1 + $0x710] ss:$8 sps:$4 sm:$0xff]   ;;  %v2938_v18 = vld [vmem:[%s4038_s1 + $0x604] ss:$8 sps:$4 sm:$0xff]  }
  0xad   :  { %2041 = vmatprep.subr.bf16.mxu1 %v2869_v19  ;;  %v2941_v19 = vld [vmem:[%s4038_s1 + $0x704] ss:$8 sps:$4 sm:$0xff]  }
  0xaf   :  { %1989 = vmatpush2.bf16.msra.mxu0 %v2864_v20  ;;  %v2936_v20 = vld [vmem:[%s4038_s1 + $0x600] ss:$8 sps:$4 sm:$0xff]  }
  0xb0   :  { %2042 = vmatpush2.bf16.msra.mxu1 %v2867_v21  ;;  %1990 = vmatprep.subr.bf16.mxu0 %v2872_v22  ;;  %v2939_v21 = vld [vmem:[%s4038_s1 + $0x700] ss:$8 sps:$4 sm:$0xff]   ;;  %v2944_v22 = vld [vmem:[%s4038_s1 + $0x6f4] ss:$8 sps:$4 sm:$0xff]  }
  0xb1   :  { %2043 = vmatprep.subr.bf16.mxu1 %v2875_v23  ;;  %v2947_v23 = vld [vmem:[%s4038_s1 + $0x7f4] ss:$8 sps:$4 sm:$0xff]  }
  0xb3   :  { %1991 = vmatpush2.bf16.msra.mxu0 %v2870_v24  ;;  %v2942_v24 = vld [vmem:[%s4038_s1 + $0x6f0] ss:$8 sps:$4 sm:$0xff]  }
  0xb4   :  { %2044 = vmatpush2.bf16.msra.mxu1 %v2873_v25  ;;  %1992 = vmatprep.subr.bf16.mxu0 %v2878_v26  ;;  %v2945_v25 = vld [vmem:[%s4038_s1 + $0x7f0] ss:$8 sps:$4 sm:$0xff]   ;;  %v2950_v26 = vld [vmem:[%s4038_s1 + $0x6e4] ss:$8 sps:$4 sm:$0xff]  }
  0xb5   :  { %2045 = vmatprep.subr.bf16.mxu1 %v2881_v27  ;;  %v2953_v27 = vld [vmem:[%s4038_s1 + $0x7e4] ss:$8 sps:$4 sm:$0xff]  }
  0xb7   :  { %1993 = vmatpush2.bf16.msra.mxu0 %v2876_v28  ;;  %v2948_v28 = vld [vmem:[%s4038_s1 + $0x6e0] ss:$8 sps:$4 sm:$0xff]  }
  0xb8   :  { %2046 = vmatpush2.bf16.msra.mxu1 %v2879_v29  ;;  %1994 = vmatprep.subr.bf16.mxu0 %v2884_v30  ;;  %v2951_v29 = vld [vmem:[%s4038_s1 + $0x7e0] ss:$8 sps:$4 sm:$0xff]   ;;  %v2956_v30 = vld [vmem:[%s4038_s1 + $0x6d4] ss:$8 sps:$4 sm:$0xff]  }
  0xb9   :  { %2047 = vmatprep.subr.bf16.mxu1 %v2887_v31  ;;  %v2959_v31 = vld [vmem:[%s4038_s1 + $0x7d4] ss:$8 sps:$4 sm:$0xff]  }
  0xbb   :  { %1995 = vmatpush2.bf16.msra.mxu0 %v2882_v32  ;;  %v2954_v32 = vld [vmem:[%s4038_s1 + $0x6d0] ss:$8 sps:$4 sm:$0xff]  }
  0xbc   :  { %2048 = vmatpush2.bf16.msra.mxu1 %v2885_v33  ;;  %1996 = vmatprep.subr.bf16.mxu0 %v2890_v34  ;;  %v2957_v33 = vld [vmem:[%s4038_s1 + $0x7d0] ss:$8 sps:$4 sm:$0xff]   ;;  %v2962_v34 = vld [vmem:[%s4038_s1 + $0x6c4] ss:$8 sps:$4 sm:$0xff]  }
  0xbd   :  { %2049 = vmatprep.subr.bf16.mxu1 %v2893_v35  ;;  %v2965_v35 = vld [vmem:[%s4038_s1 + $0x7c4] ss:$8 sps:$4 sm:$0xff]  }
  0xbf   :  { %1997 = vmatpush2.bf16.msra.mxu0 %v2888_v36  ;;  %v2960_v36 = vld [vmem:[%s4038_s1 + $0x6c0] ss:$8 sps:$4 sm:$0xff]  }
  0xc0   :  { %2050 = vmatpush2.bf16.msra.mxu1 %v2891_v37  ;;  %2072 = vmatprep.subr.bf16.mxu0 %v2896_v38  ;;  %v2963_v37 = vld [vmem:[%s4038_s1 + $0x7c0] ss:$8 sps:$4 sm:$0xff]   ;;  %v2968_v38 = vld [vmem:[%s4038_s1 + $0x6b4] ss:$8 sps:$4 sm:$0xff]  }
  0xc1   :  { %2125 = vmatprep.subr.bf16.mxu1 %v2899_v39  ;;  %v2971_v39 = vld [vmem:[%s4038_s1 + $0x7b4] ss:$8 sps:$4 sm:$0xff]  }
  0xc2   :  { %1999 = vmatmul.mubr.bf16.vlgmr.msra.gmra.mxu0 %v2326_v41  ;;  %v2969_v41 = vld [vmem:[%s4038_s1 + $0x7b0] ss:$8 sps:$4 sm:$0xff]  }
  0xc3   :  { %2052 = vmatmul.mubr.bf16.vlgmr.msra.gmra.mxu1 %v2328_v44  ;;  %2073 = vmatpush1.bf16.msra.mxu0 %v2894_v42  ;;  %v2974_v44 = vld [vmem:[%s4038_s1 + $0x6a4] ss:$8 sps:$4 sm:$0xff]   ;;  %v2980_v42 = vld [vmem:[%s4038_s1 + $0x694] ss:$8 sps:$4 sm:$0xff]  }
  0xc4   :  { %2126 = vmatpush1.bf16.msra.mxu1 %v2897_v43  ;;  %2074 = vmatprep.subr.bf16.mxu0 %v2902_v46  ;;  %v2983_v43 = vld [vmem:[%s4038_s1 + $0x794] ss:$8 sps:$4 sm:$0xff]   ;;  %v2978_v46 = vld [vmem:[%s4038_s1 + $0x690] ss:$8 sps:$4 sm:$0xff]  }
  0xc5   :  { %2127 = vmatprep.subr.bf16.mxu1 %v2905_v47  ;;  %2008 = vmatprep.mubr.bf16.mxu0 %v2343_v50  ;;  %v2981_v47 = vld [vmem:[%s4038_s1 + $0x790] ss:$8 sps:$4 sm:$0xff]   ;;  %v2986_v50 = vld [vmem:[%s4038_s1 + $0x684] ss:$8 sps:$4 sm:$0xff]  }
  0xc6   :  { %2061 = vmatprep.mubr.bf16.mxu1 %v2345_v51  ;;  %v2989_v51 = vld [vmem:[%s4038_s1 + $0x784] ss:$8 sps:$4 sm:$0xff]  }
  0xc7   :  { %2075 = vmatpush1.bf16.msra.mxu0 %v2900_v52  ;;  %v2984_v52 = vld [vmem:[%s4038_s1 + $0x680] ss:$8 sps:$4 sm:$0xff]  }
  0xc8   :  { %2128 = vmatpush1.bf16.msra.mxu1 %v2903_v53  ;;  %2076 = vmatprep.subr.bf16.mxu0 %v2908_v54  ;;  %v2987_v53 = vld [vmem:[%s4038_s1 + $0x780] ss:$8 sps:$4 sm:$0xff]   ;;  %v36_v54 = vld [vmem:[%s4039_s0 + $0xb0] sm:$0xff] }
  0xc9   :  { %2129 = vmatprep.subr.bf16.mxu1 %v2911_v55  ;;  %v44_v55 = vld [vmem:[%s4039_s0 + $0xf0] sm:$0xff] }
  0xca   :  { %2009 = vmatmul.mubr.bf16.gmra.mxu0 %v2342_v57  ;;  %v37_v57 = vld [vmem:[%s4039_s0 + $0xb8] sm:$0xff] }
  0xcb   :  { %2062 = vmatmul.mubr.bf16.gmra.mxu1 %v2344_v58  ;;  %2077 = vmatpush1.bf16.msra.mxu0 %v2906_v62  ;;  %v45_v58 = vld [vmem:[%s4039_s0 + $0xf8] sm:$0xff]  ;;  %v2330_v62 = vcombine.low %v3731_v56, %v3736_v59 }
  0xcc   :  { %2130 = vmatpush1.bf16.msra.mxu1 %v2909_v63  ;;  %2078 = vmatprep.subr.bf16.mxu0 %v2914_v0  ;;  %v2332_v63 = vcombine.low %v3741_v60, %v3746_v61  ;;  %v2347_v0 = vcombine.high %v36_v54, %v44_v55 }
  0xcd   :  { %2131 = vmatprep.subr.bf16.mxu1 %v2917_v1  ;;  %2104 = vmatprep.mubr.bf16.mxu0 %v2331_v2  ;;  %v2349_v1 = vcombine.high %v37_v57, %v45_v58  ;;  %v2346_v2 = vcombine.low %v36_v54, %v44_v55 }
  0xce   :  { %2157 = vmatprep.mubr.bf16.mxu1 %v2333_v3  ;;  %v2348_v3 = vcombine.low %v37_v57, %v45_v58 }
  0xcf   :  { %2079 = vmatpush1.bf16.msra.mxu0 %v2912_v4 }
  0xd0   :  { %2132 = vmatpush1.bf16.msra.mxu1 %v2915_v5  ;;  %2080 = vmatprep.subr.bf16.mxu0 %v2920_v6 }
  0xd1   :  { %2133 = vmatprep.subr.bf16.mxu1 %v2923_v7 }
  0xd3   :  { %2081 = vmatpush1.bf16.msra.mxu0 %v2918_v8 }
  0xd4   :  { %2134 = vmatpush1.bf16.msra.mxu1 %v2921_v9  ;;  %2082 = vmatprep.subr.bf16.mxu0 %v2926_v10 }
  0xd5   :  { %2135 = vmatprep.subr.bf16.mxu1 %v2929_v11 }
  0xd7   :  { %2083 = vmatpush1.bf16.msra.mxu0 %v2924_v12 }
  0xd8   :  { %2136 = vmatpush1.bf16.msra.mxu1 %v2927_v13  ;;  %2084 = vmatprep.subr.bf16.mxu0 %v2932_v14 }
  0xd9   :  { %2137 = vmatprep.subr.bf16.mxu1 %v2935_v15 }
  0xdb   :  { %2085 = vmatpush1.bf16.msra.mxu0 %v2930_v16 }
  0xdc   :  { %2138 = vmatpush1.bf16.msra.mxu1 %v2933_v17  ;;  %2086 = vmatprep.subr.bf16.mxu0 %v2938_v18 }
  0xdd   :  { %2139 = vmatprep.subr.bf16.mxu1 %v2941_v19 }
  0xdf   :  { %2087 = vmatpush1.bf16.msra.mxu0 %v2936_v20 }
  0xe0   :  { %2140 = vmatpush1.bf16.msra.mxu1 %v2939_v21  ;;  %2088 = vmatprep.subr.bf16.mxu0 %v2944_v22 }
  0xe1   :  { %2141 = vmatprep.subr.bf16.mxu1 %v2947_v23 }
  0xe3   :  { %2089 = vmatpush2.bf16.msra.mxu0 %v2942_v24 }
  0xe4   :  { %2142 = vmatpush2.bf16.msra.mxu1 %v2945_v25  ;;  %2090 = vmatprep.subr.bf16.mxu0 %v2950_v26 }
  0xe5   :  { %2143 = vmatprep.subr.bf16.mxu1 %v2953_v27 }
  0xe7   :  { %2091 = vmatpush2.bf16.msra.mxu0 %v2948_v28 }
  0xe8   :  { %2144 = vmatpush2.bf16.msra.mxu1 %v2951_v29  ;;  %2092 = vmatprep.subr.bf16.mxu0 %v2956_v30  ;;  %v304_v30 = vlaneseq }
  0xe9   :  { %2145 = vmatprep.subr.bf16.mxu1 %v2959_v31 }
  0xeb   :  { %2093 = vmatpush2.bf16.msra.mxu0 %v2954_v32 }
  0xec   :  { %2146 = vmatpush2.bf16.msra.mxu1 %v2957_v33  ;;  %2094 = vmatprep.subr.bf16.mxu0 %v2962_v34  ;;  %v305_v34 = vshrl.u32 %v304_v30, 7 }
  0xed   :  { %2147 = vmatprep.subr.bf16.mxu1 %v2965_v35 }
  0xef   :  { %2095 = vmatpush2.bf16.msra.mxu0 %v2960_v36 }
  0xf0   :  { %2148 = vmatpush2.bf16.msra.mxu1 %v2963_v37  ;;  %2096 = vmatprep.subr.bf16.mxu0 %v2968_v38  ;;  %v306_v37 = vsub.s32 0, %v305_v34  ;;  %v302_v38 = vld [vmem:[%s4040_s2] sm:$0x3] }
  0xf1   :  { %2149 = vmatprep.subr.bf16.mxu1 %v2971_v39 }
  0xf3   :  { %2097 = vmatpush2.bf16.msra.mxu0 %v2966_v40  ;;  %v310_v40 = vsub.s32 1, %v305_v34 }
  0xf4   :  { %2150 = vmatpush2.bf16.msra.mxu1 %v2969_v41  ;;  %2098 = vmatprep.subr.bf16.mxu0 %v2974_v44  ;;  %v307_v44 = vrot.slane %v302_v38, %v306_v37 }
  0xf5   :  { %2151 = vmatprep.subr.bf16.mxu1 %v2977_v45 }
  0xf7   :  { %2099 = vmatpush2.bf16.msra.mxu0 %v2972_v48  ;;  %v311_v48 = vrot.slane %v302_v38, %v310_v40 }
  0xf8   :  { %2152 = vmatpush2.bf16.msra.mxu1 %v2975_v49  ;;  %2100 = vmatprep.subr.bf16.mxu0 %v2980_v42 }
  0xf9   :  { %2153 = vmatprep.subr.bf16.mxu1 %v2983_v43 }
  0xfb   :  { %2101 = vmatpush2.bf16.msra.mxu0 %v2978_v46 }
  0xfc   :  { %2154 = vmatpush2.bf16.msra.mxu1 %v2981_v47  ;;  %2102 = vmatprep.subr.bf16.mxu0 %v2986_v50 }
  0xfd   :  { %2155 = vmatprep.subr.bf16.mxu1 %v2989_v51 }
  0xff   :  { %2103 = vmatpush2.bf16.msra.mxu0 %v2984_v52 }
 0x100   :  { %2156 = vmatpush2.bf16.msra.mxu1 %v2987_v53 }
 0x102   :  { %2105 = vmatmul.mubr.bf16.vlgmr.msra.gmra.mxu0 %v2330_v62  ;;  %v1788_v4 = vpop.f32.mrf.mxu0 }
 0x103   :  { %2158 = vmatmul.mubr.bf16.vlgmr.msra.gmra.mxu1 %v2332_v63  ;;  %2114 = vmatprep.mubr.bf16.mxu0 %v2347_v0  ;;  %v1841_v5 = vpop.f32.mrf.mxu1  ;;  %v1789_v42 = vadd.f32 %v1788_v4, %v307_v44 }
 0x104   :  { %2167 = vmatprep.mubr.bf16.mxu1 %v2349_v1  ;;  %v1790_v6 = vpop.f32.mrf.mxu0 }
 0x105   :  { %v1843_v7 = vpop.f32.mrf.mxu1  ;;  %v1791_v46 = vadd.f32 %v1790_v6, %v311_v48  ;;  %v1842_v51 = vadd.f32 %v1841_v5, %v1789_v42 }
 0x106   :  { %v1792_v56 = vpop.f32.mrf.mxu0 }
 0x107   :  { %v1845_v59 = vpop.f32.mrf.mxu1  ;;  %v1793_v52 = vadd.f32 %v1792_v56, %v307_v44  ;;  %v1844_v53 = vadd.f32 %v1843_v7, %v1791_v46 }
 0x108   :  { %v1794_v8 = vpop.f32.mrf.mxu0 }
 0x109   :  { %v1847_v61 = vpop.f32.mrf.mxu1  ;;  %v1795_v54 = vadd.f32 %v1794_v8, %v311_v48  ;;  %v1846_v62 = vadd.f32 %v1845_v59, %v1793_v52 }
 0x10a   :  { %2115 = vmatmul.mubr.bf16.gmra.mxu0 %v2346_v2  ;;  %v1798_v60 = vpop.f32.mrf.mxu0 }
 0x10b   :  { %2168 = vmatmul.mubr.bf16.gmra.mxu1 %v2348_v3  ;;  %v1851_v10 = vpop.f32.mrf.mxu1  ;;  %v1799_v63 = vadd.f32 %v1798_v60, %v307_v44  ;;  %v1848_v1 = vadd.f32 %v1847_v61, %v1795_v54 }
 0x10c   :  { %v1800_v9 = vpop.f32.mrf.mxu0 }
 0x10d   :  { %v3930_v12 = vpop.f32.mrf.mxu1  ;;  %v1801_v30 = vadd.f32 %v1800_v9, %v311_v48  ;;  %v1852_v6 = vadd.f32 %v1851_v10, %v1799_v63 }
 0x10e   :  { %v1802_v11 = vpop.f32.mrf.mxu0 }
 0x10f   :  { %v3934_v14 = vpop.f32.mrf.mxu1  ;;  %v1803_v7 = vadd.f32 %v1802_v11, %v307_v44  ;;  %v1854_v40 = vadd.f32 %v3930_v12, %v1801_v30 }
 0x110   :  { %v3932_v13 = vpop.f32.mrf.mxu0 }
 0x111   :  { %v3936_v16 = vpop.f32.mrf.mxu1  ;;  %v1805_v59 = vadd.f32 %v3932_v13, %v311_v48 }
 0x142   :  { %v1894_v15 = vpop.f32.mrf.mxu0 }
 0x143   :  { %v1947_v17 = vpop.f32.mrf.mxu1  ;;  %v1895_v55 = vadd.f32 %v1894_v15, %v1842_v51 }
 0x144   :  { %v1896_v18 = vpop.f32.mrf.mxu0 }
 0x145   :  { %v1949_v19 = vpop.f32.mrf.mxu1  ;;  %v1897_v0 = vadd.f32 %v1896_v18, %v1844_v53  ;;  %v1948_v2 = vadd.f32 %v1947_v17, %v1895_v55 }
 0x146   :  { %v1898_v20 = vpop.f32.mrf.mxu0 }
 0x147   :  { %v1951_v21 = vpop.f32.mrf.mxu1  ;;  %v1899_v3 = vadd.f32 %v1898_v20, %v1846_v62  ;;  %v1950_v37 = vadd.f32 %v1949_v19, %v1897_v0  ;;  %v1856_v20 = vadd.f32 %v3934_v14, %v1803_v7 }
 0x148   :  { %v1900_v22 = vpop.f32.mrf.mxu0 }
 0x149   :  { %v1953_v23 = vpop.f32.mrf.mxu1  ;;  %v1901_v5 = vadd.f32 %v1900_v22, %v1848_v1  ;;  %v1952_v8 = vadd.f32 %v1951_v21, %v1899_v3 }
 0x14a   :  { %v1904_v24 = vpop.f32.mrf.mxu0 }
 0x14b   :  { %v1957_v25 = vpop.f32.mrf.mxu1  ;;  %v1905_v15 = vadd.f32 %v1904_v24, %v1852_v6  ;;  %v1954_v17 = vadd.f32 %v1953_v23, %v1901_v5  ;;  %v1858_v24 = vadd.f32 %v3936_v16, %v1805_v59 }
 0x14c   :  { %v1906_v26 = vpop.f32.mrf.mxu0 }
 0x14d   :  { %v3938_v27 = vpop.f32.mrf.mxu1  ;;  %v1907_v42 = vadd.f32 %v1906_v26, %v1854_v40  ;;  %v1958_v22 = vadd.f32 %v1957_v25, %v1905_v15 }
 0x14e   :  { %v3940_v28 = vpop.f32.mrf.mxu0 }
 0x14f   :  { %v3942_v29 = vpop.f32.mrf.mxu1  ;;  %v1909_v12 = vadd.f32 %v3940_v28, %v1856_v20 }
 0x150   :  { %v3944_v31 = vpop.f32.mrf.mxu0 }
 0x151   :  { %v3946_v32 = vpop.f32.mrf.mxu1  ;;  %v1911_v14 = vadd.f32 %v3944_v31, %v1858_v24  ;;  %v1962_v46 = vadd.f32 %v3942_v29, %v1909_v12 }
 0x182   :  { %v2000_v33 = vpop.f32.mrf.mxu0 }
 0x183   :  { %v2053_v35 = vpop.f32.mrf.mxu1  ;;  %v2001_v56 = vadd.f32 %v2000_v33, %v1948_v2 }
 0x184   :  { %v2002_v36 = vpop.f32.mrf.mxu0 }
 0x185   :  { %v2055_v39 = vpop.f32.mrf.mxu1  ;;  %v2003_v38 = vadd.f32 %v2002_v36, %v1950_v37  ;;  %v2054_v18 = vadd.f32 %v2053_v35, %v2001_v56  ;;  %v1960_v35 = vadd.f32 %v3938_v27, %v1907_v42  ;;  %v1964_v27 = vadd.f32 %v3946_v32, %v1911_v14 }
 0x186   :  { %v2004_v41 = vpop.f32.mrf.mxu0 }
 0x187   :  { %v2057_v45 = vpop.f32.mrf.mxu1  ;;  %v2005_v9 = vadd.f32 %v2004_v41, %v1952_v8  ;;  %v2056_v33 = vadd.f32 %v2055_v39, %v2003_v38 }
 0x188   :  { %v2006_v49 = vpop.f32.mrf.mxu0 }
 0x189   :  { %v2059_v43 = vpop.f32.mrf.mxu1  ;;  %v2007_v11 = vadd.f32 %v2006_v49, %v1954_v17  ;;  %v2058_v44 = vadd.f32 %v2057_v45, %v2005_v9 }
 0x18a   :  { %v2010_v47 = vpop.f32.mrf.mxu0 }
 0x18b   :  { %v2063_v50 = vpop.f32.mrf.mxu1  ;;  %v2011_v48 = vadd.f32 %v2010_v47, %v1958_v22  ;;  %v2060_v39 = vadd.f32 %v2059_v43, %v2007_v11 }
 0x18c   :  { %v2012_v57 = vpop.f32.mrf.mxu0 }
 0x18d   :  { %v3951_v58 = vpop.f32.mrf.mxu1  ;;  %v2013_v16 = vadd.f32 %v2012_v57, %v1960_v35  ;;  %v2064_v45 = vadd.f32 %v2063_v50, %v2011_v48 }
 0x18e   :  { %v2014_v4 = vpop.f32.mrf.mxu0 }
 0x18f   :  { %v3953_v34 = vpop.f32.mrf.mxu1  ;;  %v2015_v31 = vadd.f32 %v2014_v4, %v1962_v46  ;;  %v2066_v63 = vadd.f32 %v3951_v58, %v2013_v16 }
 0x190   :  { %v2016_v60 = vpop.f32.mrf.mxu0 }
 0x191   :  { %v2069_v61 = vpop.f32.mrf.mxu1  ;;  %v2017_v0 = vadd.f32 %v2016_v60, %v1964_v27  ;;  %v2068_v37 = vadd.f32 %v3953_v34, %v2015_v31 }
 0x193   :  { %v2070_v59 = vadd.f32 %v2069_v61, %v2017_v0 }
 0x1c2   :  { %v2106_v10 = vpop.f32.mrf.mxu0 }
 0x1c3   :  { %v2159_v19 = vpop.f32.mrf.mxu1  ;;  %v2107_v21 = vadd.f32 %v2106_v10, %v2054_v18 }
 0x1c4   :  { %v2108_v36 = vpop.f32.mrf.mxu0 }
 0x1c5   :  { %v2161_v13 = vpop.f32.mrf.mxu1  ;;  %v2109_v23 = vadd.f32 %v2108_v36, %v2056_v33  ;;  %v3962_v26 = vadd.f32 %v2159_v19, %v2107_v21 }
 0x1c6   :  { %v2110_v41 = vpop.f32.mrf.mxu0 }
 0x1c7   :  { %v2163_v25 = vpop.f32.mrf.mxu1  ;;  %v2111_v49 = vadd.f32 %v2110_v41, %v2058_v44  ;;  %v3965_v51 = vadd.f32 %v2161_v13, %v2109_v23  ;;  %v2192_v54 = vmul.f32 %v3962_v26, %v3962_v26 }
 0x1c8   :  { %v2112_v28 = vpop.f32.mrf.mxu0 }
 0x1c9   :  { %v2165_v52 = vpop.f32.mrf.mxu1  ;;  %v3967_v47 = vadd.f32 %v2163_v25, %v2111_v49  ;;  %v2113_v53 = vadd.f32 %v2112_v28, %v2060_v39  ;;  %v2193_v32 = vmul.f32 %v3965_v51, %v3965_v51 }
 0x1ca   :  { %v2116_v55 = vpop.f32.mrf.mxu0 }
 0x1cb   :  { %v2169_v43 = vpop.f32.mrf.mxu1  ;;  %v2178_v29 = vadd.f32 %v3967_v47, %v3962_v26  ;;  %v2194_v57 = vmul.f32 %v3967_v47, %v3967_v47  ;;  %v3976_v62 = vadd.f32 %v2165_v52, %v2113_v53  ;;  %v2117_v50 = vadd.f32 %v2116_v55, %v2064_v45 }
 0x1cc   :  { %v2118_v1 = vpop.f32.mrf.mxu0 }
 0x1cd   :  { %v2171_v2 = vpop.f32.mrf.mxu1  ;;  %v2179_v3 = vrot.slane %v2178_v29, 4  ;;  %v2196_v30 = vadd.f32 %v2194_v57, %v2192_v54  ;;  %v2185_v4 = vadd.f32 %v3976_v62, %v3965_v51  ;;  %v2195_v6 = vmul.f32 %v3976_v62, %v3976_v62 }
 0x1ce   :  { %v3986_v5 = vadd.f32 %v2169_v43, %v2117_v50  ;;  %v2119_v56 = vadd.f32 %v2118_v1, %v2066_v63  ;;  %v2120_v58 = vpop.f32.mrf.mxu0 }
 0x1cf   :  { %v2180_v7 = vadd.f32 %v2179_v3, %v2178_v29  ;;  %v2197_v8 = vrot.slane %v2196_v30, 4  ;;  %v2186_v15 = vrot.slane %v2185_v4, 4  ;;  %v2203_v38 = vadd.f32 %v2195_v6, %v2193_v32  ;;  %v2173_v40 = vpop.f32.mrf.mxu1 }
 0x1d0   :  { %v3988_v60 = vadd.f32 %v2171_v2, %v2119_v56  ;;  %v2121_v17 = vadd.f32 %v2120_v58, %v2068_v37  ;;  %v2122_v18 = vpop.f32.mrf.mxu0  ;;  %v2260_v34 = vmul.f32 %v3986_v5, %v3986_v5 }
 0x1d1   :  { %v2181_v9 = vrot.slane %v2180_v7, 2  ;;  %v2198_v20 = vadd.f32 %v2197_v8, %v2196_v30  ;;  %v2187_v42 = vadd.f32 %v2186_v15, %v2185_v4  ;;  %v2204_v10 = vrot.slane %v2203_v38, 4  ;;  %v2175_v12 = vpop.f32.mrf.mxu1 }
 0x1d2   :  { %v3992_v19 = vadd.f32 %v2173_v40, %v2121_v17  ;;  %v2123_v22 = vadd.f32 %v2122_v18, %v2070_v59  ;;  %v2261_v61 = vmul.f32 %v3988_v60, %v3988_v60 }
 0x1d3   :  { %v2182_v33 = vadd.f32 %v2181_v9, %v2180_v7  ;;  %v2199_v11 = vrot.slane %v2198_v20, 2  ;;  %v2188_v21 = vrot.slane %v2187_v42, 2  ;;  %v2205_v24 = vadd.f32 %v2204_v10, %v2203_v38 }
 0x1d4   :  { %v2246_v36 = vadd.f32 %v3992_v19, %v3986_v5  ;;  %v2262_v13 = vmul.f32 %v3992_v19, %v3992_v19  ;;  %v4000_v44 = vadd.f32 %v2175_v12, %v2123_v22 }
 0x1d5   :  { %v2183_v48 = vrot.slane %v2182_v33, 1  ;;  %v2200_v23 = vadd.f32 %v2199_v11, %v2198_v20  ;;  %v2189_v35 = vadd.f32 %v2188_v21, %v2187_v42  ;;  %v2206_v14 = vrot.slane %v2205_v24, 2 }
 0x1d6   :  { %v2247_v41 = vrot.slane %v2246_v36, 4  ;;  %v2264_v25 = vadd.f32 %v2262_v13, %v2260_v34  ;;  %v2253_v39 = vadd.f32 %v4000_v44, %v3988_v60  ;;  %v2263_v49 = vmul.f32 %v4000_v44, %v4000_v44 }
 0x1d7   :  { %v2184_v46 = vadd.f32 %v2183_v48, %v2182_v33  ;;  %v2201_v16 = vrot.slane %v2200_v23, 1  ;;  %v2190_v28 = vrot.slane %v2189_v35, 1  ;;  %v2207_v52 = vadd.f32 %v2206_v14, %v2205_v24 }
 0x1d8   :  { %v2248_v45 = vadd.f32 %v2247_v41, %v2246_v36  ;;  %v2265_v53 = vrot.slane %v2264_v25, 4  ;;  %v2254_v27 = vrot.slane %v2253_v39, 4  ;;  %v2271_v31 = vadd.f32 %v2263_v49, %v2261_v61 }
 0x1d9   :  { %v2202_v54 = vadd.f32 %v2201_v16, %v2200_v23  ;;  %v2210_v55 = vmul.f32 0.0625, %v2184_v46  ;;  %v2191_v43 = vadd.f32 %v2190_v28, %v2189_v35  ;;  %v2208_v29 = vrot.slane %v2207_v52, 1 }
 0x1da   :  { %v2249_v57 = vrot.slane %v2248_v45, 2  ;;  %v2266_v50 = vadd.f32 %v2265_v53, %v2264_v25  ;;  %v2255_v63 = vadd.f32 %v2254_v27, %v2253_v39  ;;  %v2272_v0 = vrot.slane %v2271_v31, 4 }
 0x1db   :  { %v2212_v32 = vmul.f32 0.0625, %v2202_v54  ;;  %v2214_v1 = vmul.f32 %v2210_v55, %v2210_v55  ;;  %v2209_v2 = vadd.f32 %v2208_v29, %v2207_v52  ;;  %v2211_v3 = vmul.f32 0.0625, %v2191_v43 }
 0x1dc   :  { %v2250_v30 = vadd.f32 %v2249_v57, %v2248_v45  ;;  %v2267_v4 = vrot.slane %v2266_v50, 2  ;;  %v2256_v37 = vrot.slane %v2255_v63, 2  ;;  %v2273_v56 = vadd.f32 %v2272_v0, %v2271_v31 }
 0x1dd   :  { %v2216_v6 = vsub.f32 %v2212_v32, %v2214_v1  ;;  %v2213_v58 = vmul.f32 0.0625, %v2209_v2  ;;  %v2215_v7 = vmul.f32 %v2211_v3, %v2211_v3  ;;  %v2218_v41 = vsub.f32 %v3962_v26, %v2210_v55 }
 0x1de   :  { %v2251_v15 = vrot.slane %v2250_v30, 1  ;;  %v2268_v38 = vadd.f32 %v2267_v4, %v2266_v50  ;;  %v2257_v40 = vadd.f32 %v2256_v37, %v2255_v63  ;;  %v2274_v17 = vrot.slane %v2273_v56, 2 }
 0x1df   :  { %v2222_v8 = vadd.f32 1e-05, %v2216_v6  ;;  %v2217_v59 = vsub.f32 %v2213_v58, %v2215_v7  ;;  %v2220_v25 = vsub.f32 %v3967_v47, %v2210_v55  ;;  %v2219_v16 = vsub.f32 %v3965_v51, %v2211_v3 }
 0x1e0   :  { %v2252_v18 = vadd.f32 %v2251_v15, %v2250_v30  ;;  %v2269_v9 = vrot.slane %v2268_v38, 1  ;;  %v2258_v20 = vrot.slane %v2257_v40, 1  ;;  %v2275_v10 = vadd.f32 %v2274_v17, %v2273_v56 }
 0x1e1   :  { %2990 = vrsqrt.f32 %v2222_v8  ;;  %v2223_v42 = vadd.f32 1e-05, %v2217_v59  ;;  %v2221_v28 = vsub.f32 %v3976_v62, %v2211_v3 }
 0x1e2   :  { %v2270_v34 = vadd.f32 %v2269_v9, %v2268_v38  ;;  %v2278_v22 = vmul.f32 0.0625, %v2252_v18  ;;  %v2259_v33 = vadd.f32 %v2258_v20, %v2257_v40  ;;  %v2276_v11 = vrot.slane %v2275_v10, 1 }
 0x1e3   :  { %2992 = vrsqrt.f32 %v2223_v42 }
 0x1e4   :  { %v2280_v21 = vmul.f32 0.0625, %v2270_v34  ;;  %v2282_v24 = vmul.f32 %v2278_v22, %v2278_v22  ;;  %v2277_v12 = vadd.f32 %v2276_v11, %v2275_v10  ;;  %v2279_v61 = vmul.f32 0.0625, %v2259_v33 }
 0x1e5   :  { %v2286_v55 = vsub.f32 %v3986_v5, %v2278_v22  ;;  %v2288_v29 = vsub.f32 %v3992_v19, %v2278_v22 }
 0x1e6   :  { %v2284_v36 = vsub.f32 %v2280_v21, %v2282_v24  ;;  %v2281_v13 = vmul.f32 0.0625, %v2277_v12  ;;  %v2283_v48 = vmul.f32 %v2279_v61, %v2279_v61  ;;  %v2287_v0 = vsub.f32 %v3988_v60, %v2279_v61 }
 0x1e7   :  { %v2289_v32 = vsub.f32 %v4000_v44, %v2279_v61 }
 0x1e8   :  { %v2290_v23 = vadd.f32 1e-05, %v2284_v36  ;;  %v2285_v35 = vsub.f32 %v2281_v13, %v2283_v48 }
 0x1ea   :  { %2994 = vrsqrt.f32 %v2290_v23  ;;  %v2291_v14 = vadd.f32 1e-05, %v2285_v35 }
 0x1ec   :  { %2996 = vrsqrt.f32 %v2291_v14 }
 0x1ee   :  { %v2991_v39 = vpop.eup %2990 }
 0x1ef   :  { %v2226_v49 = vmul.f32 %v2991_v39, %v2218_v41  ;;  %v2228_v46 = vmul.f32 %v2991_v39, %v2220_v25 }
 0x1f0   :  { %v2993_v52 = vpop.eup %2992 }
 0x1f1   :  { %vm2230_vm0 = vcmp.gt.f32.partialorder %v2226_v49, 0.0  ;;  %vm2232_vm1 = vcmp.gt.f32.partialorder %v2228_v46, 0.0  ;;  %v2234_v45 = vmul.f32 0.2, %v2226_v49  ;;  %v2236_v53 = vmul.f32 0.2, %v2228_v46 }
 0x1f2   :  { %v2227_v27 = vmul.f32 %v2993_v52, %v2219_v16  ;;  %v2229_v31 = vmul.f32 %v2993_v52, %v2221_v28 }
 0x1f3   :  { %v2238_v54 = vsel %vm2230_vm0, %v2226_v49, %v2234_v45  ;;  %v2240_v43 = vsel %vm2232_vm1, %v2228_v46, %v2236_v53 }
 0x1f4   :  { %2242 = vst [vmem:[%s4041_s3] sm:$0xff] %v2238_v54  ;;  %2244 = vst [vmem:[%s4041_s3 + $0x10] sm:$0xff] %v2240_v43  ;;  %vm2231_vm2 = vcmp.gt.f32.partialorder %v2227_v27, 0.0  ;;  %vm2233_vm3 = vcmp.gt.f32.partialorder %v2229_v31, 0.0  ;;  %v2235_v26 = vmul.f32 0.2, %v2227_v27 }
 0x1f5   :  { %v2237_v51 = vmul.f32 0.2, %v2229_v31 }
 0x1f6   :  { %v2239_v47 = vsel %vm2231_vm2, %v2227_v27, %v2235_v26 }
 0x1f7   :  { %v2241_v62 = vsel %vm2233_vm3, %v2229_v31, %v2237_v51  ;;  %2243 = vst [vmem:[%s4041_s3 + $0x8] sm:$0xff] %v2239_v47  ;;  %v2995_v57 = vpop.eup %2994 }
 0x1f8   :  { %2245 = vst [vmem:[%s4041_s3 + $0x18] sm:$0xff] %v2241_v62  ;;  %v2294_v50 = vmul.f32 %v2995_v57, %v2286_v55  ;;  %v2296_v63 = vmul.f32 %v2995_v57, %v2288_v29 }
 0x1f9   :  { %v2997_v1 = vpop.eup %2996 }
 0x1fa   :  { %vm2298_vm4 = vcmp.gt.f32.partialorder %v2294_v50, 0.0  ;;  %vm2300_vm5 = vcmp.gt.f32.partialorder %v2296_v63, 0.0  ;;  %v2302_v2 = vmul.f32 0.2, %v2294_v50  ;;  %v2304_v3 = vmul.f32 0.2, %v2296_v63 }
 0x1fb   :  { %v2295_v30 = vmul.f32 %v2997_v1, %v2287_v0  ;;  %v2297_v4 = vmul.f32 %v2997_v1, %v2289_v32 }
 0x1fc   :  { %v2306_v6 = vsel %vm2298_vm4, %v2294_v50, %v2302_v2  ;;  %v2308_v37 = vsel %vm2300_vm5, %v2296_v63, %v2304_v3 }
 0x1fd   :  { %2310 = vst [vmem:[%s4041_s3 + $0x20] sm:$0xff] %v2306_v6  ;;  %2312 = vst [vmem:[%s4041_s3 + $0x30] sm:$0xff] %v2308_v37  ;;  %vm2299_vm6 = vcmp.gt.f32.partialorder %v2295_v30, 0.0  ;;  %vm2301_vm7 = vcmp.gt.f32.partialorder %v2297_v4, 0.0  ;;  %v2303_v5 = vmul.f32 0.2, %v2295_v30 }
 0x1fe   :  { %v2305_v60 = vmul.f32 0.2, %v2297_v4 }
 0x1ff   :  { %v2307_v19 = vsel %vm2299_vm6, %v2295_v30, %v2303_v5 }
 0x200   :  { %v2309_v44 = vsel %vm2301_vm7, %v2297_v4, %v2305_v60  ;;  %2311 = vst [vmem:[%s4041_s3 + $0x28] sm:$0xff] %v2307_v19 }
 0x201   :  { %2313 = vst [vmem:[%s4041_s3 + $0x38] sm:$0xff] %v2309_v44 }

// kernel: discriminator_forward.8
= control target key start
LH: loop header
LB: loop body
LE: loop exit
PB: predicated region body
PF: predicated region fallthrough
CT: control target
= control target key end

     0   :  { %vm7620_vm0 = vcmask 1043456   ;;  %s14027_s1 = inlined_call_operand.vmem [shape: bf16[4096,512], index: 1, kind: input, shape index: {}]   ;;  %s14028_s0 = inlined_call_operand.vmem [shape: bf16[8,4096], index: 0, kind: input, shape index: {}]   ;;  %s14029_s2 = inlined_call_operand.vmem [shape: f32[1,512], index: 2, kind: input, shape index: {}]   ;;  %s14030_s3 = inlined_call_operand.vmem [shape: f32[8,512], index: 3, kind: output, shape index: {}]  }
   0x1   :  { %v8917_v0 = vld [vmem:[%s14027_s1 + $0xe4] ss:$16 sps:$4 sm:$0xff]   ;;  %v8921_v2 = vld [vmem:[%s14027_s1 + $0xe0] ss:$16 sps:$4 sm:$0xff]   ;;  %v15_v48 = vld [vmem:[%s14028_s0 + $0x8] sm:$0xff] }
   0x2   :  { %v8919_v1 = vld [vmem:[%s14027_s1 + $0x2e4] ss:$16 sps:$4 sm:$0xff]   ;;  %6308 = vmatprep.subr.bf16.mxu0 %v8917_v0  ;;  %v8922_v3 = vld [vmem:[%s14027_s1 + $0x2e0] ss:$16 sps:$4 sm:$0xff]   ;;  %v10674_v51 = vcombine.high %v15_v48, %v15_v48 }
   0x3   :  { %6349 = vmatprep.subr.bf16.mxu1 %v8919_v1  ;;  %v8923_v4 = vld [vmem:[%s14027_s1 + $0xc4] ss:$16 sps:$4 sm:$0xff]   ;;  %6309 = vmatpush1.bf16.msra.mxu0 %v8921_v2  ;;  %v8927_v6 = vld [vmem:[%s14027_s1 + $0xc0] ss:$16 sps:$4 sm:$0xff]  }
   0x4   :  { %6350 = vmatpush1.bf16.msra.mxu1 %v8922_v3  ;;  %v8925_v5 = vld [vmem:[%s14027_s1 + $0x2c4] ss:$16 sps:$4 sm:$0xff]   ;;  %6310 = vmatprep.subr.bf16.mxu0 %v8923_v4  ;;  %v8928_v7 = vld [vmem:[%s14027_s1 + $0x2c0] ss:$16 sps:$4 sm:$0xff]  }
   0x5   :  { %6351 = vmatprep.subr.bf16.mxu1 %v8925_v5  ;;  %v8929_v8 = vld [vmem:[%s14027_s1 + $0xa4] ss:$16 sps:$4 sm:$0xff]   ;;  %v8933_v10 = vld [vmem:[%s14027_s1 + $0xa0] ss:$16 sps:$4 sm:$0xff]   ;;  %6381 = vmatprep.mubr.bf16.mxu1 %v10674_v51 }
   0x6   :  { %v8931_v9 = vld [vmem:[%s14027_s1 + $0x2a4] ss:$16 sps:$4 sm:$0xff]   ;;  %v8934_v11 = vld [vmem:[%s14027_s1 + $0x2a0] ss:$16 sps:$4 sm:$0xff]  }
   0x7   :  { %6311 = vmatpush1.bf16.msra.mxu0 %v8927_v6  ;;  %v8935_v12 = vld [vmem:[%s14027_s1 + $0x84] ss:$16 sps:$4 sm:$0xff]   ;;  %v8939_v14 = vld [vmem:[%s14027_s1 + $0x80] ss:$16 sps:$4 sm:$0xff]  }
   0x8   :  { %6352 = vmatpush1.bf16.msra.mxu1 %v8928_v7  ;;  %6312 = vmatprep.subr.bf16.mxu0 %v8929_v8  ;;  %v8937_v13 = vld [vmem:[%s14027_s1 + $0x284] ss:$16 sps:$4 sm:$0xff]   ;;  %v8940_v15 = vld [vmem:[%s14027_s1 + $0x280] ss:$16 sps:$4 sm:$0xff]   ;;  %v10734_v7 = vcombine.low %v15_v48, %v15_v48 }
   0x9   :  { %6353 = vmatprep.subr.bf16.mxu1 %v8931_v9  ;;  %v8941_v16 = vld [vmem:[%s14027_s1 + $0x64] ss:$16 sps:$4 sm:$0xff]   ;;  %v8945_v18 = vld [vmem:[%s14027_s1 + $0x60] ss:$16 sps:$4 sm:$0xff]  }
   0xa   :  { %v8943_v17 = vld [vmem:[%s14027_s1 + $0x264] ss:$16 sps:$4 sm:$0xff]   ;;  %v8946_v19 = vld [vmem:[%s14027_s1 + $0x260] ss:$16 sps:$4 sm:$0xff]  }
   0xb   :  { %6313 = vmatpush1.bf16.msra.mxu0 %v8933_v10  ;;  %v8947_v20 = vld [vmem:[%s14027_s1 + $0x44] ss:$16 sps:$4 sm:$0xff]   ;;  %v8951_v22 = vld [vmem:[%s14027_s1 + $0x40] ss:$16 sps:$4 sm:$0xff]  }
   0xc   :  { %6354 = vmatpush1.bf16.msra.mxu1 %v8934_v11  ;;  %6314 = vmatprep.subr.bf16.mxu0 %v8935_v12  ;;  %v8949_v21 = vld [vmem:[%s14027_s1 + $0x244] ss:$16 sps:$4 sm:$0xff]   ;;  %v8952_v23 = vld [vmem:[%s14027_s1 + $0x240] ss:$16 sps:$4 sm:$0xff]  }
   0xd   :  { %6355 = vmatprep.subr.bf16.mxu1 %v8937_v13  ;;  %v8953_v24 = vld [vmem:[%s14027_s1 + $0x24] ss:$16 sps:$4 sm:$0xff]   ;;  %v8957_v26 = vld [vmem:[%s14027_s1 + $0x20] ss:$16 sps:$4 sm:$0xff]  }
   0xe   :  { %v8955_v25 = vld [vmem:[%s14027_s1 + $0x224] ss:$16 sps:$4 sm:$0xff]   ;;  %v8958_v27 = vld [vmem:[%s14027_s1 + $0x220] ss:$16 sps:$4 sm:$0xff]  }
   0xf   :  { %6315 = vmatpush1.bf16.msra.mxu0 %v8939_v14  ;;  %v8959_v28 = vld [vmem:[%s14027_s1 + $0x4] ss:$16 sps:$4 sm:$0xff]   ;;  %v8963_v30 = vld [vmem:[%s14027_s1] ss:$16 sps:$4 sm:$0xff]  }
  0x10   :  { %6356 = vmatpush1.bf16.msra.mxu1 %v8940_v15  ;;  %6316 = vmatprep.subr.bf16.mxu0 %v8941_v16  ;;  %v8961_v29 = vld [vmem:[%s14027_s1 + $0x204] ss:$16 sps:$4 sm:$0xff]   ;;  %v8964_v31 = vld [vmem:[%s14027_s1 + $0x200] ss:$16 sps:$4 sm:$0xff]  }
  0x11   :  { %6357 = vmatprep.subr.bf16.mxu1 %v8943_v17  ;;  %v8965_v32 = vld [vmem:[%s14027_s1 + $0x1e4] ss:$16 sps:$4 sm:$0xff]   ;;  %v8969_v34 = vld [vmem:[%s14027_s1 + $0x1e0] ss:$16 sps:$4 sm:$0xff]  }
  0x12   :  { %v8967_v33 = vld [vmem:[%s14027_s1 + $0x3e4] ss:$16 sps:$4 sm:$0xff]   ;;  %v8970_v35 = vld [vmem:[%s14027_s1 + $0x3e0] ss:$16 sps:$4 sm:$0xff]  }
  0x13   :  { %6317 = vmatpush1.bf16.msra.mxu0 %v8945_v18  ;;  %v8971_v36 = vld [vmem:[%s14027_s1 + $0x1c4] ss:$16 sps:$4 sm:$0xff]   ;;  %v8975_v38 = vld [vmem:[%s14027_s1 + $0x1c0] ss:$16 sps:$4 sm:$0xff]  }
  0x14   :  { %6358 = vmatpush1.bf16.msra.mxu1 %v8946_v19  ;;  %6318 = vmatprep.subr.bf16.mxu0 %v8947_v20  ;;  %v8973_v37 = vld [vmem:[%s14027_s1 + $0x3c4] ss:$16 sps:$4 sm:$0xff]   ;;  %v8976_v39 = vld [vmem:[%s14027_s1 + $0x3c0] ss:$16 sps:$4 sm:$0xff]  }
  0x15   :  { %6359 = vmatprep.subr.bf16.mxu1 %v8949_v21  ;;  %v8977_v40 = vld [vmem:[%s14027_s1 + $0x1a4] ss:$16 sps:$4 sm:$0xff]   ;;  %v8981_v42 = vld [vmem:[%s14027_s1 + $0x1a0] ss:$16 sps:$4 sm:$0xff]  }
  0x16   :  { %v8979_v41 = vld [vmem:[%s14027_s1 + $0x3a4] ss:$16 sps:$4 sm:$0xff]   ;;  %v8982_v43 = vld [vmem:[%s14027_s1 + $0x3a0] ss:$16 sps:$4 sm:$0xff]  }
  0x17   :  { %6319 = vmatpush1.bf16.msra.mxu0 %v8951_v22  ;;  %v8983_v44 = vld [vmem:[%s14027_s1 + $0x184] ss:$16 sps:$4 sm:$0xff]   ;;  %v8987_v49 = vld [vmem:[%s14027_s1 + $0x180] ss:$16 sps:$4 sm:$0xff]  }
  0x18   :  { %6360 = vmatpush1.bf16.msra.mxu1 %v8952_v23  ;;  %6320 = vmatprep.subr.bf16.mxu0 %v8953_v24  ;;  %v8985_v45 = vld [vmem:[%s14027_s1 + $0x384] ss:$16 sps:$4 sm:$0xff]   ;;  %v8988_v50 = vld [vmem:[%s14027_s1 + $0x380] ss:$16 sps:$4 sm:$0xff]  }
  0x19   :  { %6361 = vmatprep.subr.bf16.mxu1 %v8955_v25  ;;  %v14_v46 = vld [vmem:[%s14028_s0] sm:$0xff] }
  0x1a   :  { %v10663_v47 = vcombine.high %v14_v46, %v14_v46  ;;  %v8989_v52 = vld [vmem:[%s14027_s1 + $0x164] ss:$16 sps:$4 sm:$0xff]   ;;  %v8993_v54 = vld [vmem:[%s14027_s1 + $0x160] ss:$16 sps:$4 sm:$0xff]   ;;  %v10732_v6 = vcombine.low %v14_v46, %v14_v46 }
  0x1b   :  { %6321 = vmatpush1.bf16.msra.mxu0 %v8957_v26  ;;  %v8991_v53 = vld [vmem:[%s14027_s1 + $0x364] ss:$16 sps:$4 sm:$0xff]   ;;  %v8994_v55 = vld [vmem:[%s14027_s1 + $0x360] ss:$16 sps:$4 sm:$0xff]  }
  0x1c   :  { %6362 = vmatpush1.bf16.msra.mxu1 %v8958_v27  ;;  %6322 = vmatprep.subr.bf16.mxu0 %v8959_v28  ;;  %v8995_v56 = vld [vmem:[%s14027_s1 + $0x144] ss:$16 sps:$4 sm:$0xff]   ;;  %v8999_v58 = vld [vmem:[%s14027_s1 + $0x140] ss:$16 sps:$4 sm:$0xff]  }
  0x1d   :  { %6363 = vmatprep.subr.bf16.mxu1 %v8961_v29  ;;  %6340 = vmatprep.mubr.bf16.mxu0 %v10663_v47  ;;  %v8997_v57 = vld [vmem:[%s14027_s1 + $0x344] ss:$16 sps:$4 sm:$0xff]   ;;  %v9000_v59 = vld [vmem:[%s14027_s1 + $0x340] ss:$16 sps:$4 sm:$0xff]  }
  0x1e   :  { %v9001_v60 = vld [vmem:[%s14027_s1 + $0x124] ss:$16 sps:$4 sm:$0xff]   ;;  %v9005_v62 = vld [vmem:[%s14027_s1 + $0x120] ss:$16 sps:$4 sm:$0xff]  }
  0x1f   :  { %6323 = vmatpush1.bf16.msra.mxu0 %v8963_v30  ;;  %v9003_v61 = vld [vmem:[%s14027_s1 + $0x324] ss:$16 sps:$4 sm:$0xff]   ;;  %v9006_v63 = vld [vmem:[%s14027_s1 + $0x320] ss:$16 sps:$4 sm:$0xff]  }
  0x20   :  { %6364 = vmatpush1.bf16.msra.mxu1 %v8964_v31  ;;  %6324 = vmatprep.subr.bf16.mxu0 %v8965_v32  ;;  %v9007_v0 = vld [vmem:[%s14027_s1 + $0x104] ss:$16 sps:$4 sm:$0xff]   ;;  %v9011_v2 = vld [vmem:[%s14027_s1 + $0x100] ss:$16 sps:$4 sm:$0xff]  }
  0x21   :  { %6365 = vmatprep.subr.bf16.mxu1 %v8967_v33  ;;  %v9009_v1 = vld [vmem:[%s14027_s1 + $0x304] ss:$16 sps:$4 sm:$0xff]   ;;  %v9012_v3 = vld [vmem:[%s14027_s1 + $0x300] ss:$16 sps:$4 sm:$0xff]   ;;  %v10818_v33 = vld [vmem:[%s14028_s0 + $0x18] sm:$0xff] }
  0x22   :  { %v9019_v4 = vld [vmem:[%s14027_s1 + $0x4e4] ss:$16 sps:$4 sm:$0xff]   ;;  %v9017_v8 = vld [vmem:[%s14027_s1 + $0x4e0] ss:$16 sps:$4 sm:$0xff]  }
  0x23   :  { %6325 = vmatpush2.bf16.msra.mxu0 %v8969_v34  ;;  %v9022_v5 = vld [vmem:[%s14027_s1 + $0x6e4] ss:$16 sps:$4 sm:$0xff]   ;;  %v9020_v9 = vld [vmem:[%s14027_s1 + $0x6e0] ss:$16 sps:$4 sm:$0xff]  }
  0x24   :  { %6366 = vmatpush2.bf16.msra.mxu1 %v8970_v35  ;;  %6326 = vmatprep.subr.bf16.mxu0 %v8971_v36  ;;  %v9025_v10 = vld [vmem:[%s14027_s1 + $0x4c4] ss:$16 sps:$4 sm:$0xff]   ;;  %v9023_v12 = vld [vmem:[%s14027_s1 + $0x4c0] ss:$16 sps:$4 sm:$0xff]  }
  0x25   :  { %6367 = vmatprep.subr.bf16.mxu1 %v8973_v37  ;;  %v9028_v11 = vld [vmem:[%s14027_s1 + $0x6c4] ss:$16 sps:$4 sm:$0xff]   ;;  %v9026_v13 = vld [vmem:[%s14027_s1 + $0x6c0] ss:$16 sps:$4 sm:$0xff]   ;;  %v10832_v37 = vcombine.high %v10818_v33, %v10818_v33 }
  0x26   :  { %v9031_v14 = vld [vmem:[%s14027_s1 + $0x4a4] ss:$16 sps:$4 sm:$0xff]   ;;  %v9029_v16 = vld [vmem:[%s14027_s1 + $0x4a0] ss:$16 sps:$4 sm:$0xff]  }
  0x27   :  { %6327 = vmatpush2.bf16.msra.mxu0 %v8975_v38  ;;  %v9034_v15 = vld [vmem:[%s14027_s1 + $0x6a4] ss:$16 sps:$4 sm:$0xff]   ;;  %v9032_v17 = vld [vmem:[%s14027_s1 + $0x6a0] ss:$16 sps:$4 sm:$0xff]  }
  0x28   :  { %6368 = vmatpush2.bf16.msra.mxu1 %v8976_v39  ;;  %6328 = vmatprep.subr.bf16.mxu0 %v8977_v40  ;;  %v9037_v18 = vld [vmem:[%s14027_s1 + $0x484] ss:$16 sps:$4 sm:$0xff]   ;;  %v9035_v20 = vld [vmem:[%s14027_s1 + $0x480] ss:$16 sps:$4 sm:$0xff]  }
  0x29   :  { %6369 = vmatprep.subr.bf16.mxu1 %v8979_v41  ;;  %v9040_v19 = vld [vmem:[%s14027_s1 + $0x684] ss:$16 sps:$4 sm:$0xff]   ;;  %v9038_v21 = vld [vmem:[%s14027_s1 + $0x680] ss:$16 sps:$4 sm:$0xff]  }
  0x2a   :  { %v9043_v22 = vld [vmem:[%s14027_s1 + $0x464] ss:$16 sps:$4 sm:$0xff]   ;;  %v9041_v24 = vld [vmem:[%s14027_s1 + $0x460] ss:$16 sps:$4 sm:$0xff]  }
  0x2b   :  { %6329 = vmatpush2.bf16.msra.mxu0 %v8981_v42  ;;  %v9046_v23 = vld [vmem:[%s14027_s1 + $0x664] ss:$16 sps:$4 sm:$0xff]   ;;  %v9044_v25 = vld [vmem:[%s14027_s1 + $0x660] ss:$16 sps:$4 sm:$0xff]  }
  0x2c   :  { %6370 = vmatpush2.bf16.msra.mxu1 %v8982_v43  ;;  %6330 = vmatprep.subr.bf16.mxu0 %v8983_v44  ;;  %v9049_v26 = vld [vmem:[%s14027_s1 + $0x444] ss:$16 sps:$4 sm:$0xff]   ;;  %v9047_v28 = vld [vmem:[%s14027_s1 + $0x440] ss:$16 sps:$4 sm:$0xff]  }
  0x2d   :  { %6371 = vmatprep.subr.bf16.mxu1 %v8985_v45  ;;  %v9052_v27 = vld [vmem:[%s14027_s1 + $0x644] ss:$16 sps:$4 sm:$0xff]   ;;  %v9050_v29 = vld [vmem:[%s14027_s1 + $0x640] ss:$16 sps:$4 sm:$0xff]  }
  0x2e   :  { %v9055_v30 = vld [vmem:[%s14027_s1 + $0x424] ss:$16 sps:$4 sm:$0xff]   ;;  %v9053_v34 = vld [vmem:[%s14027_s1 + $0x420] ss:$16 sps:$4 sm:$0xff]  }
  0x2f   :  { %6331 = vmatpush2.bf16.msra.mxu0 %v8987_v49  ;;  %v9058_v31 = vld [vmem:[%s14027_s1 + $0x624] ss:$16 sps:$4 sm:$0xff]   ;;  %v9056_v35 = vld [vmem:[%s14027_s1 + $0x620] ss:$16 sps:$4 sm:$0xff]  }
  0x30   :  { %6372 = vmatpush2.bf16.msra.mxu1 %v8988_v50  ;;  %6332 = vmatprep.subr.bf16.mxu0 %v8989_v52  ;;  %v10813_v32 = vld [vmem:[%s14028_s0 + $0x10] sm:$0xff] }
  0x31   :  { %6373 = vmatprep.subr.bf16.mxu1 %v8991_v53  ;;  %v10828_v36 = vcombine.high %v10813_v32, %v10813_v32  ;;  %v9061_v38 = vld [vmem:[%s14027_s1 + $0x404] ss:$16 sps:$4 sm:$0xff]   ;;  %v9059_v40 = vld [vmem:[%s14027_s1 + $0x400] ss:$16 sps:$4 sm:$0xff]  }
  0x32   :  { %v9064_v39 = vld [vmem:[%s14027_s1 + $0x604] ss:$16 sps:$4 sm:$0xff]   ;;  %v9062_v41 = vld [vmem:[%s14027_s1 + $0x600] ss:$16 sps:$4 sm:$0xff]  }
  0x33   :  { %6333 = vmatpush2.bf16.msra.mxu0 %v8993_v54  ;;  %v9067_v42 = vld [vmem:[%s14027_s1 + $0x5e4] ss:$16 sps:$4 sm:$0xff]   ;;  %v9065_v44 = vld [vmem:[%s14027_s1 + $0x5e0] ss:$16 sps:$4 sm:$0xff]  }
  0x34   :  { %6374 = vmatpush2.bf16.msra.mxu1 %v8994_v55  ;;  %6334 = vmatprep.subr.bf16.mxu0 %v8995_v56  ;;  %v9070_v43 = vld [vmem:[%s14027_s1 + $0x7e4] ss:$16 sps:$4 sm:$0xff]   ;;  %v9068_v45 = vld [vmem:[%s14027_s1 + $0x7e0] ss:$16 sps:$4 sm:$0xff]  }
  0x35   :  { %6375 = vmatprep.subr.bf16.mxu1 %v8997_v57  ;;  %v9073_v46 = vld [vmem:[%s14027_s1 + $0x5c4] ss:$16 sps:$4 sm:$0xff]   ;;  %v9071_v49 = vld [vmem:[%s14027_s1 + $0x5c0] ss:$16 sps:$4 sm:$0xff]  }
  0x36   :  { %v9076_v48 = vld [vmem:[%s14027_s1 + $0x7c4] ss:$16 sps:$4 sm:$0xff]   ;;  %v9074_v50 = vld [vmem:[%s14027_s1 + $0x7c0] ss:$16 sps:$4 sm:$0xff]  }
  0x37   :  { %6335 = vmatpush2.bf16.msra.mxu0 %v8999_v58  ;;  %v9079_v52 = vld [vmem:[%s14027_s1 + $0x5a4] ss:$16 sps:$4 sm:$0xff]   ;;  %v9077_v54 = vld [vmem:[%s14027_s1 + $0x5a0] ss:$16 sps:$4 sm:$0xff]  }
  0x38   :  { %6376 = vmatpush2.bf16.msra.mxu1 %v9000_v59  ;;  %6336 = vmatprep.subr.bf16.mxu0 %v9001_v60  ;;  %v9082_v53 = vld [vmem:[%s14027_s1 + $0x7a4] ss:$16 sps:$4 sm:$0xff]   ;;  %v9080_v55 = vld [vmem:[%s14027_s1 + $0x7a0] ss:$16 sps:$4 sm:$0xff]  }
  0x39   :  { %6377 = vmatprep.subr.bf16.mxu1 %v9003_v61  ;;  %v9085_v56 = vld [vmem:[%s14027_s1 + $0x584] ss:$16 sps:$4 sm:$0xff]   ;;  %v9083_v58 = vld [vmem:[%s14027_s1 + $0x580] ss:$16 sps:$4 sm:$0xff]  }
  0x3a   :  { %v9088_v57 = vld [vmem:[%s14027_s1 + $0x784] ss:$16 sps:$4 sm:$0xff]   ;;  %v9086_v59 = vld [vmem:[%s14027_s1 + $0x780] ss:$16 sps:$4 sm:$0xff]  }
  0x3b   :  { %6337 = vmatpush2.bf16.msra.mxu0 %v9005_v62  ;;  %v9091_v60 = vld [vmem:[%s14027_s1 + $0x564] ss:$16 sps:$4 sm:$0xff]   ;;  %v9089_v62 = vld [vmem:[%s14027_s1 + $0x560] ss:$16 sps:$4 sm:$0xff]  }
  0x3c   :  { %6378 = vmatpush2.bf16.msra.mxu1 %v9006_v63  ;;  %6338 = vmatprep.subr.bf16.mxu0 %v9007_v0  ;;  %v9094_v61 = vld [vmem:[%s14027_s1 + $0x764] ss:$16 sps:$4 sm:$0xff]   ;;  %v9092_v63 = vld [vmem:[%s14027_s1 + $0x760] ss:$16 sps:$4 sm:$0xff]  }
  0x3d   :  { %6379 = vmatprep.subr.bf16.mxu1 %v9009_v1  ;;  %v9097_v0 = vld [vmem:[%s14027_s1 + $0x544] ss:$16 sps:$4 sm:$0xff]  }
  0x3e   :  { %v9100_v1 = vld [vmem:[%s14027_s1 + $0x744] ss:$16 sps:$4 sm:$0xff]  }
  0x3f   :  { %6339 = vmatpush2.bf16.msra.mxu0 %v9011_v2  ;;  %v9095_v2 = vld [vmem:[%s14027_s1 + $0x540] ss:$16 sps:$4 sm:$0xff]  }
  0x40   :  { %6380 = vmatpush2.bf16.msra.mxu1 %v9012_v3  ;;  %6390 = vmatprep.subr.bf16.mxu0 %v9019_v4  ;;  %v9098_v3 = vld [vmem:[%s14027_s1 + $0x740] ss:$16 sps:$4 sm:$0xff]   ;;  %v9103_v4 = vld [vmem:[%s14027_s1 + $0x524] ss:$16 sps:$4 sm:$0xff]  }
  0x41   :  { %6431 = vmatprep.subr.bf16.mxu1 %v9022_v5  ;;  %v9106_v5 = vld [vmem:[%s14027_s1 + $0x724] ss:$16 sps:$4 sm:$0xff]  }
  0x42   :  { %6341 = vmatmul.mubr.bf16.vlgmr.msra.gmra.mxu0 %v10732_v6 }
  0x43   :  { %6382 = vmatmul.mubr.bf16.vlgmr.msra.gmra.mxu1 %v10734_v7  ;;  %6391 = vmatpush1.bf16.msra.mxu0 %v9017_v8  ;;  %v9101_v8 = vld [vmem:[%s14027_s1 + $0x520] ss:$16 sps:$4 sm:$0xff]  }
  0x44   :  { %6432 = vmatpush1.bf16.msra.mxu1 %v9020_v9  ;;  %6392 = vmatprep.subr.bf16.mxu0 %v9025_v10  ;;  %v9104_v9 = vld [vmem:[%s14027_s1 + $0x720] ss:$16 sps:$4 sm:$0xff]   ;;  %v9109_v10 = vld [vmem:[%s14027_s1 + $0x504] ss:$16 sps:$4 sm:$0xff]  }
  0x45   :  { %6433 = vmatprep.subr.bf16.mxu1 %v9028_v11  ;;  %6422 = vmatprep.mubr.bf16.mxu0 %v10828_v36  ;;  %v9112_v11 = vld [vmem:[%s14027_s1 + $0x704] ss:$16 sps:$4 sm:$0xff]  }
  0x46   :  { %6463 = vmatprep.mubr.bf16.mxu1 %v10832_v37 }
  0x47   :  { %6393 = vmatpush1.bf16.msra.mxu0 %v9023_v12  ;;  %v9107_v12 = vld [vmem:[%s14027_s1 + $0x500] ss:$16 sps:$4 sm:$0xff]  }
  0x48   :  { %6434 = vmatpush1.bf16.msra.mxu1 %v9026_v13  ;;  %6394 = vmatprep.subr.bf16.mxu0 %v9031_v14  ;;  %v9110_v13 = vld [vmem:[%s14027_s1 + $0x700] ss:$16 sps:$4 sm:$0xff]   ;;  %v9119_v14 = vld [vmem:[%s14027_s1 + $0x8e4] ss:$16 sps:$4 sm:$0xff]  }
  0x49   :  { %6435 = vmatprep.subr.bf16.mxu1 %v9034_v15  ;;  %v9122_v15 = vld [vmem:[%s14027_s1 + $0xae4] ss:$16 sps:$4 sm:$0xff]  }
  0x4b   :  { %6395 = vmatpush1.bf16.msra.mxu0 %v9029_v16  ;;  %v10952_v16 = vcombine.low %v10813_v32, %v10813_v32  ;;  %v9137_v32 = vld [vmem:[%s14027_s1 + $0x884] ss:$16 sps:$4 sm:$0xff]  }
  0x4c   :  { %6436 = vmatpush1.bf16.msra.mxu1 %v9032_v17  ;;  %6396 = vmatprep.subr.bf16.mxu0 %v9037_v18  ;;  %v10956_v17 = vcombine.low %v10818_v33, %v10818_v33  ;;  %v9117_v18 = vld [vmem:[%s14027_s1 + $0x8e0] ss:$16 sps:$4 sm:$0xff]   ;;  %v9140_v33 = vld [vmem:[%s14027_s1 + $0xa84] ss:$16 sps:$4 sm:$0xff]  }
  0x4d   :  { %6437 = vmatprep.subr.bf16.mxu1 %v9040_v19  ;;  %v9120_v19 = vld [vmem:[%s14027_s1 + $0xae0] ss:$16 sps:$4 sm:$0xff]  }
  0x4f   :  { %6397 = vmatpush1.bf16.msra.mxu0 %v9035_v20  ;;  %v9125_v20 = vld [vmem:[%s14027_s1 + $0x8c4] ss:$16 sps:$4 sm:$0xff]  }
  0x50   :  { %6438 = vmatpush1.bf16.msra.mxu1 %v9038_v21  ;;  %6398 = vmatprep.subr.bf16.mxu0 %v9043_v22  ;;  %v9128_v21 = vld [vmem:[%s14027_s1 + $0xac4] ss:$16 sps:$4 sm:$0xff]  }
  0x51   :  { %6439 = vmatprep.subr.bf16.mxu1 %v9046_v23  ;;  %v10973_v22 = vld [vmem:[%s14028_s0 + $0x20] sm:$0xff]  ;;  %v10978_v23 = vld [vmem:[%s14028_s0 + $0x28] sm:$0xff] }
  0x53   :  { %6399 = vmatpush1.bf16.msra.mxu0 %v9041_v24  ;;  %v10982_v24 = vcombine.high %v10973_v22, %v10973_v22 }
  0x54   :  { %6440 = vmatpush1.bf16.msra.mxu1 %v9044_v25  ;;  %6400 = vmatprep.subr.bf16.mxu0 %v9049_v26  ;;  %v10986_v25 = vcombine.high %v10978_v23, %v10978_v23  ;;  %v9123_v26 = vld [vmem:[%s14027_s1 + $0x8c0] ss:$16 sps:$4 sm:$0xff]  }
  0x55   :  { %6441 = vmatprep.subr.bf16.mxu1 %v9052_v27  ;;  %v9126_v27 = vld [vmem:[%s14027_s1 + $0xac0] ss:$16 sps:$4 sm:$0xff]  }
  0x57   :  { %6401 = vmatpush1.bf16.msra.mxu0 %v9047_v28  ;;  %v9131_v28 = vld [vmem:[%s14027_s1 + $0x8a4] ss:$16 sps:$4 sm:$0xff]  }
  0x58   :  { %6442 = vmatpush1.bf16.msra.mxu1 %v9050_v29  ;;  %6402 = vmatprep.subr.bf16.mxu0 %v9055_v30  ;;  %v9134_v29 = vld [vmem:[%s14027_s1 + $0xaa4] ss:$16 sps:$4 sm:$0xff]   ;;  %v9129_v30 = vld [vmem:[%s14027_s1 + $0x8a0] ss:$16 sps:$4 sm:$0xff]  }
  0x59   :  { %6443 = vmatprep.subr.bf16.mxu1 %v9058_v31  ;;  %v9132_v31 = vld [vmem:[%s14027_s1 + $0xaa0] ss:$16 sps:$4 sm:$0xff]  }
  0x5b   :  { %6403 = vmatpush1.bf16.msra.mxu0 %v9053_v34  ;;  %v9135_v34 = vld [vmem:[%s14027_s1 + $0x880] ss:$16 sps:$4 sm:$0xff]  }
  0x5c   :  { %6444 = vmatpush1.bf16.msra.mxu1 %v9056_v35  ;;  %6404 = vmatprep.subr.bf16.mxu0 %v9061_v38  ;;  %v9138_v35 = vld [vmem:[%s14027_s1 + $0xa80] ss:$16 sps:$4 sm:$0xff]   ;;  %v9143_v38 = vld [vmem:[%s14027_s1 + $0x864] ss:$16 sps:$4 sm:$0xff]  }
  0x5d   :  { %6445 = vmatprep.subr.bf16.mxu1 %v9064_v39  ;;  %v9146_v39 = vld [vmem:[%s14027_s1 + $0xa64] ss:$16 sps:$4 sm:$0xff]  }
  0x5f   :  { %6405 = vmatpush1.bf16.msra.mxu0 %v9059_v40  ;;  %v9141_v40 = vld [vmem:[%s14027_s1 + $0x860] ss:$16 sps:$4 sm:$0xff]  }
  0x60   :  { %6446 = vmatpush1.bf16.msra.mxu1 %v9062_v41  ;;  %6406 = vmatprep.subr.bf16.mxu0 %v9067_v42  ;;  %v9144_v41 = vld [vmem:[%s14027_s1 + $0xa60] ss:$16 sps:$4 sm:$0xff]   ;;  %v9149_v42 = vld [vmem:[%s14027_s1 + $0x844] ss:$16 sps:$4 sm:$0xff]  }
  0x61   :  { %6447 = vmatprep.subr.bf16.mxu1 %v9070_v43  ;;  %v9152_v43 = vld [vmem:[%s14027_s1 + $0xa44] ss:$16 sps:$4 sm:$0xff]  }
  0x63   :  { %6407 = vmatpush2.bf16.msra.mxu0 %v9065_v44  ;;  %v9147_v44 = vld [vmem:[%s14027_s1 + $0x840] ss:$16 sps:$4 sm:$0xff]  }
  0x64   :  { %6448 = vmatpush2.bf16.msra.mxu1 %v9068_v45  ;;  %6408 = vmatprep.subr.bf16.mxu0 %v9073_v46  ;;  %v9150_v45 = vld [vmem:[%s14027_s1 + $0xa40] ss:$16 sps:$4 sm:$0xff]   ;;  %v9155_v46 = vld [vmem:[%s14027_s1 + $0x824] ss:$16 sps:$4 sm:$0xff]  }
  0x65   :  { %6449 = vmatprep.subr.bf16.mxu1 %v9076_v48  ;;  %v9158_v48 = vld [vmem:[%s14027_s1 + $0xa24] ss:$16 sps:$4 sm:$0xff]  }
  0x67   :  { %6409 = vmatpush2.bf16.msra.mxu0 %v9071_v49  ;;  %v9153_v49 = vld [vmem:[%s14027_s1 + $0x820] ss:$16 sps:$4 sm:$0xff]  }
  0x68   :  { %6450 = vmatpush2.bf16.msra.mxu1 %v9074_v50  ;;  %6410 = vmatprep.subr.bf16.mxu0 %v9079_v52  ;;  %v9156_v50 = vld [vmem:[%s14027_s1 + $0xa20] ss:$16 sps:$4 sm:$0xff]   ;;  %v9161_v52 = vld [vmem:[%s14027_s1 + $0x804] ss:$16 sps:$4 sm:$0xff]  }
  0x69   :  { %6451 = vmatprep.subr.bf16.mxu1 %v9082_v53  ;;  %v9164_v53 = vld [vmem:[%s14027_s1 + $0xa04] ss:$16 sps:$4 sm:$0xff]  }
  0x6b   :  { %6411 = vmatpush2.bf16.msra.mxu0 %v9077_v54  ;;  %v9159_v54 = vld [vmem:[%s14027_s1 + $0x800] ss:$16 sps:$4 sm:$0xff]  }
  0x6c   :  { %6452 = vmatpush2.bf16.msra.mxu1 %v9080_v55  ;;  %6412 = vmatprep.subr.bf16.mxu0 %v9085_v56  ;;  %v9162_v55 = vld [vmem:[%s14027_s1 + $0xa00] ss:$16 sps:$4 sm:$0xff]   ;;  %v9167_v56 = vld [vmem:[%s14027_s1 + $0x9e4] ss:$16 sps:$4 sm:$0xff]  }
  0x6d   :  { %6453 = vmatprep.subr.bf16.mxu1 %v9088_v57  ;;  %v9170_v57 = vld [vmem:[%s14027_s1 + $0xbe4] ss:$16 sps:$4 sm:$0xff]  }
  0x6f   :  { %6413 = vmatpush2.bf16.msra.mxu0 %v9083_v58  ;;  %v9165_v58 = vld [vmem:[%s14027_s1 + $0x9e0] ss:$16 sps:$4 sm:$0xff]  }
  0x70   :  { %6454 = vmatpush2.bf16.msra.mxu1 %v9086_v59  ;;  %6414 = vmatprep.subr.bf16.mxu0 %v9091_v60  ;;  %v9168_v59 = vld [vmem:[%s14027_s1 + $0xbe0] ss:$16 sps:$4 sm:$0xff]   ;;  %v9173_v60 = vld [vmem:[%s14027_s1 + $0x9c4] ss:$16 sps:$4 sm:$0xff]  }
  0x71   :  { %6455 = vmatprep.subr.bf16.mxu1 %v9094_v61  ;;  %v9176_v61 = vld [vmem:[%s14027_s1 + $0xbc4] ss:$16 sps:$4 sm:$0xff]  }
  0x73   :  { %6415 = vmatpush2.bf16.msra.mxu0 %v9089_v62  ;;  %v9171_v62 = vld [vmem:[%s14027_s1 + $0x9c0] ss:$16 sps:$4 sm:$0xff]  }
  0x74   :  { %6456 = vmatpush2.bf16.msra.mxu1 %v9092_v63  ;;  %6416 = vmatprep.subr.bf16.mxu0 %v9097_v0  ;;  %v9174_v63 = vld [vmem:[%s14027_s1 + $0xbc0] ss:$16 sps:$4 sm:$0xff]   ;;  %v9179_v0 = vld [vmem:[%s14027_s1 + $0x9a4] ss:$16 sps:$4 sm:$0xff]  }
  0x75   :  { %6457 = vmatprep.subr.bf16.mxu1 %v9100_v1  ;;  %v9182_v1 = vld [vmem:[%s14027_s1 + $0xba4] ss:$16 sps:$4 sm:$0xff]  }
  0x77   :  { %6417 = vmatpush2.bf16.msra.mxu0 %v9095_v2  ;;  %v9177_v2 = vld [vmem:[%s14027_s1 + $0x9a0] ss:$16 sps:$4 sm:$0xff]  }
  0x78   :  { %6458 = vmatpush2.bf16.msra.mxu1 %v9098_v3  ;;  %6418 = vmatprep.subr.bf16.mxu0 %v9103_v4  ;;  %v9180_v3 = vld [vmem:[%s14027_s1 + $0xba0] ss:$16 sps:$4 sm:$0xff]   ;;  %v9185_v4 = vld [vmem:[%s14027_s1 + $0x984] ss:$16 sps:$4 sm:$0xff]  }
  0x79   :  { %6459 = vmatprep.subr.bf16.mxu1 %v9106_v5  ;;  %v9188_v5 = vld [vmem:[%s14027_s1 + $0xb84] ss:$16 sps:$4 sm:$0xff]  }
  0x7b   :  { %6419 = vmatpush2.bf16.msra.mxu0 %v9101_v8  ;;  %v9183_v8 = vld [vmem:[%s14027_s1 + $0x980] ss:$16 sps:$4 sm:$0xff]  }
  0x7c   :  { %6460 = vmatpush2.bf16.msra.mxu1 %v9104_v9  ;;  %6420 = vmatprep.subr.bf16.mxu0 %v9109_v10  ;;  %v9186_v9 = vld [vmem:[%s14027_s1 + $0xb80] ss:$16 sps:$4 sm:$0xff]   ;;  %v9191_v10 = vld [vmem:[%s14027_s1 + $0x964] ss:$16 sps:$4 sm:$0xff]  }
  0x7d   :  { %6461 = vmatprep.subr.bf16.mxu1 %v9112_v11  ;;  %v9194_v11 = vld [vmem:[%s14027_s1 + $0xb64] ss:$16 sps:$4 sm:$0xff]  }
  0x7f   :  { %6421 = vmatpush2.bf16.msra.mxu0 %v9107_v12  ;;  %v9189_v12 = vld [vmem:[%s14027_s1 + $0x960] ss:$16 sps:$4 sm:$0xff]  }
  0x80   :  { %6462 = vmatpush2.bf16.msra.mxu1 %v9110_v13  ;;  %6472 = vmatprep.subr.bf16.mxu0 %v9119_v14  ;;  %v9192_v13 = vld [vmem:[%s14027_s1 + $0xb60] ss:$16 sps:$4 sm:$0xff]   ;;  %v9197_v14 = vld [vmem:[%s14027_s1 + $0x944] ss:$16 sps:$4 sm:$0xff]  }
  0x81   :  { %6513 = vmatprep.subr.bf16.mxu1 %v9122_v15  ;;  %v9200_v15 = vld [vmem:[%s14027_s1 + $0xb44] ss:$16 sps:$4 sm:$0xff]  }
  0x82   :  { %6423 = vmatmul.mubr.bf16.vlgmr.msra.gmra.mxu0 %v10952_v16 }
  0x83   :  { %6464 = vmatmul.mubr.bf16.vlgmr.msra.gmra.mxu1 %v10956_v17  ;;  %6473 = vmatpush1.bf16.msra.mxu0 %v9117_v18  ;;  %v9195_v18 = vld [vmem:[%s14027_s1 + $0x940] ss:$16 sps:$4 sm:$0xff]  }
  0x84   :  { %6514 = vmatpush1.bf16.msra.mxu1 %v9120_v19  ;;  %6474 = vmatprep.subr.bf16.mxu0 %v9125_v20  ;;  %v9198_v19 = vld [vmem:[%s14027_s1 + $0xb40] ss:$16 sps:$4 sm:$0xff]   ;;  %v9203_v20 = vld [vmem:[%s14027_s1 + $0x924] ss:$16 sps:$4 sm:$0xff]  }
  0x85   :  { %6515 = vmatprep.subr.bf16.mxu1 %v9128_v21  ;;  %6504 = vmatprep.mubr.bf16.mxu0 %v10982_v24  ;;  %v9206_v21 = vld [vmem:[%s14027_s1 + $0xb24] ss:$16 sps:$4 sm:$0xff]  }
  0x86   :  { %6545 = vmatprep.mubr.bf16.mxu1 %v10986_v25 }
  0x87   :  { %6475 = vmatpush1.bf16.msra.mxu0 %v9123_v26  ;;  %v9201_v26 = vld [vmem:[%s14027_s1 + $0x920] ss:$16 sps:$4 sm:$0xff]  }
  0x88   :  { %6516 = vmatpush1.bf16.msra.mxu1 %v9126_v27  ;;  %6476 = vmatprep.subr.bf16.mxu0 %v9131_v28  ;;  %v9204_v27 = vld [vmem:[%s14027_s1 + $0xb20] ss:$16 sps:$4 sm:$0xff]   ;;  %v9209_v28 = vld [vmem:[%s14027_s1 + $0x904] ss:$16 sps:$4 sm:$0xff]  }
  0x89   :  { %6517 = vmatprep.subr.bf16.mxu1 %v9134_v29  ;;  %v9212_v29 = vld [vmem:[%s14027_s1 + $0xb04] ss:$16 sps:$4 sm:$0xff]  }
  0x8b   :  { %6477 = vmatpush1.bf16.msra.mxu0 %v9129_v30  ;;  %v9207_v30 = vld [vmem:[%s14027_s1 + $0x900] ss:$16 sps:$4 sm:$0xff]  }
  0x8c   :  { %6518 = vmatpush1.bf16.msra.mxu1 %v9132_v31  ;;  %6478 = vmatprep.subr.bf16.mxu0 %v9137_v32  ;;  %v9210_v31 = vld [vmem:[%s14027_s1 + $0xb00] ss:$16 sps:$4 sm:$0xff]   ;;  %v9219_v32 = vld [vmem:[%s14027_s1 + $0xce4] ss:$16 sps:$4 sm:$0xff]  }
  0x8d   :  { %6519 = vmatprep.subr.bf16.mxu1 %v9140_v33  ;;  %v9222_v33 = vld [vmem:[%s14027_s1 + $0xee4] ss:$16 sps:$4 sm:$0xff]  }
  0x8f   :  { %6479 = vmatpush1.bf16.msra.mxu0 %v9135_v34  ;;  %v9217_v34 = vld [vmem:[%s14027_s1 + $0xce0] ss:$16 sps:$4 sm:$0xff]  }
  0x90   :  { %6520 = vmatpush1.bf16.msra.mxu1 %v9138_v35  ;;  %6480 = vmatprep.subr.bf16.mxu0 %v9143_v38  ;;  %v11178_v35 = vld [vmem:[%s14028_s0 + $0x30] sm:$0xff]  ;;  %v11182_v38 = vcombine.low %v10973_v22, %v10973_v22 }
  0x91   :  { %6521 = vmatprep.subr.bf16.mxu1 %v9146_v39  ;;  %v11186_v39 = vcombine.low %v10978_v23, %v10978_v23  ;;  %v9225_v22 = vld [vmem:[%s14027_s1 + $0xcc4] ss:$16 sps:$4 sm:$0xff]  }
  0x92   :  { %v9228_v23 = vld [vmem:[%s14027_s1 + $0xec4] ss:$16 sps:$4 sm:$0xff]  }
  0x93   :  { %6481 = vmatpush1.bf16.msra.mxu0 %v9141_v40  ;;  %v11191_v40 = vld [vmem:[%s14028_s0 + $0x38] sm:$0xff] }
  0x94   :  { %6522 = vmatpush1.bf16.msra.mxu1 %v9144_v41  ;;  %6482 = vmatprep.subr.bf16.mxu0 %v9149_v42  ;;  %v9220_v41 = vld [vmem:[%s14027_s1 + $0xee0] ss:$16 sps:$4 sm:$0xff]   ;;  %v11204_v42 = vcombine.high %v11178_v35, %v11178_v35 }
  0x95   :  { %6523 = vmatprep.subr.bf16.mxu1 %v9152_v43  ;;  %v11208_v43 = vcombine.high %v11191_v40, %v11191_v40 }
  0x97   :  { %6483 = vmatpush1.bf16.msra.mxu0 %v9147_v44  ;;  %v9223_v44 = vld [vmem:[%s14027_s1 + $0xcc0] ss:$16 sps:$4 sm:$0xff]  }
  0x98   :  { %6524 = vmatpush1.bf16.msra.mxu1 %v9150_v45  ;;  %6484 = vmatprep.subr.bf16.mxu0 %v9155_v46  ;;  %v9226_v45 = vld [vmem:[%s14027_s1 + $0xec0] ss:$16 sps:$4 sm:$0xff]   ;;  %v9231_v46 = vld [vmem:[%s14027_s1 + $0xca4] ss:$16 sps:$4 sm:$0xff]  }
  0x99   :  { %6525 = vmatprep.subr.bf16.mxu1 %v9158_v48  ;;  %v9234_v48 = vld [vmem:[%s14027_s1 + $0xea4] ss:$16 sps:$4 sm:$0xff]  }
  0x9b   :  { %6485 = vmatpush1.bf16.msra.mxu0 %v9153_v49  ;;  %v9229_v49 = vld [vmem:[%s14027_s1 + $0xca0] ss:$16 sps:$4 sm:$0xff]  }
  0x9c   :  { %6526 = vmatpush1.bf16.msra.mxu1 %v9156_v50  ;;  %6486 = vmatprep.subr.bf16.mxu0 %v9161_v52  ;;  %v9232_v50 = vld [vmem:[%s14027_s1 + $0xea0] ss:$16 sps:$4 sm:$0xff]   ;;  %v9237_v52 = vld [vmem:[%s14027_s1 + $0xc84] ss:$16 sps:$4 sm:$0xff]  }
  0x9d   :  { %6527 = vmatprep.subr.bf16.mxu1 %v9164_v53  ;;  %v9240_v53 = vld [vmem:[%s14027_s1 + $0xe84] ss:$16 sps:$4 sm:$0xff]  }
  0x9f   :  { %6487 = vmatpush1.bf16.msra.mxu0 %v9159_v54  ;;  %v9235_v54 = vld [vmem:[%s14027_s1 + $0xc80] ss:$16 sps:$4 sm:$0xff]  }
  0xa0   :  { %6528 = vmatpush1.bf16.msra.mxu1 %v9162_v55  ;;  %6488 = vmatprep.subr.bf16.mxu0 %v9167_v56  ;;  %v9238_v55 = vld [vmem:[%s14027_s1 + $0xe80] ss:$16 sps:$4 sm:$0xff]   ;;  %v9243_v56 = vld [vmem:[%s14027_s1 + $0xc64] ss:$16 sps:$4 sm:$0xff]  }
  0xa1   :  { %6529 = vmatprep.subr.bf16.mxu1 %v9170_v57  ;;  %v9246_v57 = vld [vmem:[%s14027_s1 + $0xe64] ss:$16 sps:$4 sm:$0xff]  }
  0xa3   :  { %6489 = vmatpush2.bf16.msra.mxu0 %v9165_v58  ;;  %v9241_v58 = vld [vmem:[%s14027_s1 + $0xc60] ss:$16 sps:$4 sm:$0xff]  }
  0xa4   :  { %6530 = vmatpush2.bf16.msra.mxu1 %v9168_v59  ;;  %6490 = vmatprep.subr.bf16.mxu0 %v9173_v60  ;;  %v9244_v59 = vld [vmem:[%s14027_s1 + $0xe60] ss:$16 sps:$4 sm:$0xff]   ;;  %v9249_v60 = vld [vmem:[%s14027_s1 + $0xc44] ss:$16 sps:$4 sm:$0xff]  }
  0xa5   :  { %6531 = vmatprep.subr.bf16.mxu1 %v9176_v61  ;;  %v9252_v61 = vld [vmem:[%s14027_s1 + $0xe44] ss:$16 sps:$4 sm:$0xff]  }
  0xa7   :  { %6491 = vmatpush2.bf16.msra.mxu0 %v9171_v62  ;;  %v9247_v62 = vld [vmem:[%s14027_s1 + $0xc40] ss:$16 sps:$4 sm:$0xff]  }
  0xa8   :  { %6532 = vmatpush2.bf16.msra.mxu1 %v9174_v63  ;;  %6492 = vmatprep.subr.bf16.mxu0 %v9179_v0  ;;  %v9250_v63 = vld [vmem:[%s14027_s1 + $0xe40] ss:$16 sps:$4 sm:$0xff]   ;;  %v9255_v0 = vld [vmem:[%s14027_s1 + $0xc24] ss:$16 sps:$4 sm:$0xff]  }
  0xa9   :  { %6533 = vmatprep.subr.bf16.mxu1 %v9182_v1  ;;  %v9258_v1 = vld [vmem:[%s14027_s1 + $0xe24] ss:$16 sps:$4 sm:$0xff]  }
  0xab   :  { %6493 = vmatpush2.bf16.msra.mxu0 %v9177_v2  ;;  %v9253_v2 = vld [vmem:[%s14027_s1 + $0xc20] ss:$16 sps:$4 sm:$0xff]  }
  0xac   :  { %6534 = vmatpush2.bf16.msra.mxu1 %v9180_v3  ;;  %6494 = vmatprep.subr.bf16.mxu0 %v9185_v4  ;;  %v9256_v3 = vld [vmem:[%s14027_s1 + $0xe20] ss:$16 sps:$4 sm:$0xff]   ;;  %v9261_v4 = vld [vmem:[%s14027_s1 + $0xc04] ss:$16 sps:$4 sm:$0xff]  }
  0xad   :  { %6535 = vmatprep.subr.bf16.mxu1 %v9188_v5  ;;  %v9264_v5 = vld [vmem:[%s14027_s1 + $0xe04] ss:$16 sps:$4 sm:$0xff]  }
  0xaf   :  { %6495 = vmatpush2.bf16.msra.mxu0 %v9183_v8  ;;  %v9259_v8 = vld [vmem:[%s14027_s1 + $0xc00] ss:$16 sps:$4 sm:$0xff]  }
  0xb0   :  { %6536 = vmatpush2.bf16.msra.mxu1 %v9186_v9  ;;  %6496 = vmatprep.subr.bf16.mxu0 %v9191_v10  ;;  %v9262_v9 = vld [vmem:[%s14027_s1 + $0xe00] ss:$16 sps:$4 sm:$0xff]   ;;  %v9267_v10 = vld [vmem:[%s14027_s1 + $0xde4] ss:$16 sps:$4 sm:$0xff]  }
  0xb1   :  { %6537 = vmatprep.subr.bf16.mxu1 %v9194_v11  ;;  %v9270_v11 = vld [vmem:[%s14027_s1 + $0xfe4] ss:$16 sps:$4 sm:$0xff]  }
  0xb3   :  { %6497 = vmatpush2.bf16.msra.mxu0 %v9189_v12  ;;  %v9265_v12 = vld [vmem:[%s14027_s1 + $0xde0] ss:$16 sps:$4 sm:$0xff]  }
  0xb4   :  { %6538 = vmatpush2.bf16.msra.mxu1 %v9192_v13  ;;  %6498 = vmatprep.subr.bf16.mxu0 %v9197_v14  ;;  %v9268_v13 = vld [vmem:[%s14027_s1 + $0xfe0] ss:$16 sps:$4 sm:$0xff]   ;;  %v9273_v14 = vld [vmem:[%s14027_s1 + $0xdc4] ss:$16 sps:$4 sm:$0xff]  }
  0xb5   :  { %6539 = vmatprep.subr.bf16.mxu1 %v9200_v15  ;;  %v9276_v15 = vld [vmem:[%s14027_s1 + $0xfc4] ss:$16 sps:$4 sm:$0xff]  }
  0xb7   :  { %6499 = vmatpush2.bf16.msra.mxu0 %v9195_v18  ;;  %v9271_v18 = vld [vmem:[%s14027_s1 + $0xdc0] ss:$16 sps:$4 sm:$0xff]  }
  0xb8   :  { %6540 = vmatpush2.bf16.msra.mxu1 %v9198_v19  ;;  %6500 = vmatprep.subr.bf16.mxu0 %v9203_v20  ;;  %v9274_v19 = vld [vmem:[%s14027_s1 + $0xfc0] ss:$16 sps:$4 sm:$0xff]   ;;  %v9279_v20 = vld [vmem:[%s14027_s1 + $0xda4] ss:$16 sps:$4 sm:$0xff]  }
  0xb9   :  { %6541 = vmatprep.subr.bf16.mxu1 %v9206_v21  ;;  %v9282_v21 = vld [vmem:[%s14027_s1 + $0xfa4] ss:$16 sps:$4 sm:$0xff]  }
  0xbb   :  { %6501 = vmatpush2.bf16.msra.mxu0 %v9201_v26  ;;  %v9277_v26 = vld [vmem:[%s14027_s1 + $0xda0] ss:$16 sps:$4 sm:$0xff]  }
  0xbc   :  { %6542 = vmatpush2.bf16.msra.mxu1 %v9204_v27  ;;  %6502 = vmatprep.subr.bf16.mxu0 %v9209_v28  ;;  %v9280_v27 = vld [vmem:[%s14027_s1 + $0xfa0] ss:$16 sps:$4 sm:$0xff]   ;;  %v9285_v28 = vld [vmem:[%s14027_s1 + $0xd84] ss:$16 sps:$4 sm:$0xff]  }
  0xbd   :  { %6543 = vmatprep.subr.bf16.mxu1 %v9212_v29  ;;  %v9288_v29 = vld [vmem:[%s14027_s1 + $0xf84] ss:$16 sps:$4 sm:$0xff]  }
  0xbf   :  { %6503 = vmatpush2.bf16.msra.mxu0 %v9207_v30  ;;  %v9283_v30 = vld [vmem:[%s14027_s1 + $0xd80] ss:$16 sps:$4 sm:$0xff]  }
  0xc0   :  { %6544 = vmatpush2.bf16.msra.mxu1 %v9210_v31  ;;  %6554 = vmatprep.subr.bf16.mxu0 %v9219_v32  ;;  %v9286_v31 = vld [vmem:[%s14027_s1 + $0xf80] ss:$16 sps:$4 sm:$0xff]   ;;  %v9291_v32 = vld [vmem:[%s14027_s1 + $0xd64] ss:$16 sps:$4 sm:$0xff]  }
  0xc1   :  { %6595 = vmatprep.subr.bf16.mxu1 %v9222_v33  ;;  %v9294_v33 = vld [vmem:[%s14027_s1 + $0xf64] ss:$16 sps:$4 sm:$0xff]  }
  0xc2   :  { %6505 = vmatmul.mubr.bf16.vlgmr.msra.gmra.mxu0 %v11182_v38 }
  0xc3   :  { %6546 = vmatmul.mubr.bf16.vlgmr.msra.gmra.mxu1 %v11186_v39  ;;  %6555 = vmatpush1.bf16.msra.mxu0 %v9217_v34  ;;  %v9289_v34 = vld [vmem:[%s14027_s1 + $0xd60] ss:$16 sps:$4 sm:$0xff]  }
  0xc4   :  { %6596 = vmatpush1.bf16.msra.mxu1 %v9220_v41  ;;  %6556 = vmatprep.subr.bf16.mxu0 %v9225_v22  ;;  %v9292_v41 = vld [vmem:[%s14027_s1 + $0xf60] ss:$16 sps:$4 sm:$0xff]   ;;  %v9297_v22 = vld [vmem:[%s14027_s1 + $0xd44] ss:$16 sps:$4 sm:$0xff]  }
  0xc5   :  { %6597 = vmatprep.subr.bf16.mxu1 %v9228_v23  ;;  %6586 = vmatprep.mubr.bf16.mxu0 %v11204_v42  ;;  %v9300_v23 = vld [vmem:[%s14027_s1 + $0xf44] ss:$16 sps:$4 sm:$0xff]  }
  0xc6   :  { %6627 = vmatprep.mubr.bf16.mxu1 %v11208_v43 }
  0xc7   :  { %6557 = vmatpush1.bf16.msra.mxu0 %v9223_v44  ;;  %v9295_v44 = vld [vmem:[%s14027_s1 + $0xd40] ss:$16 sps:$4 sm:$0xff]  }
  0xc8   :  { %6598 = vmatpush1.bf16.msra.mxu1 %v9226_v45  ;;  %6558 = vmatprep.subr.bf16.mxu0 %v9231_v46  ;;  %v9298_v45 = vld [vmem:[%s14027_s1 + $0xf40] ss:$16 sps:$4 sm:$0xff]   ;;  %v9303_v46 = vld [vmem:[%s14027_s1 + $0xd24] ss:$16 sps:$4 sm:$0xff]  }
  0xc9   :  { %6599 = vmatprep.subr.bf16.mxu1 %v9234_v48  ;;  %v1056_v48 = vlaneseq }
  0xcb   :  { %6559 = vmatpush1.bf16.msra.mxu0 %v9229_v49  ;;  %v9306_v49 = vld [vmem:[%s14027_s1 + $0xf24] ss:$16 sps:$4 sm:$0xff]  }
  0xcc   :  { %6600 = vmatpush1.bf16.msra.mxu1 %v9232_v50  ;;  %6560 = vmatprep.subr.bf16.mxu0 %v9237_v52  ;;  %v9301_v50 = vld [vmem:[%s14027_s1 + $0xd20] ss:$16 sps:$4 sm:$0xff]  }
  0xcd   :  { %6601 = vmatprep.subr.bf16.mxu1 %v9240_v53  ;;  %v9304_v52 = vld [vmem:[%s14027_s1 + $0xf20] ss:$16 sps:$4 sm:$0xff]   ;;  %v9309_v53 = vld [vmem:[%s14027_s1 + $0xd04] ss:$16 sps:$4 sm:$0xff]  }
  0xcf   :  { %6561 = vmatpush1.bf16.msra.mxu0 %v9235_v54  ;;  %v11379_v54 = vshrl.u32 %v1056_v48, 7  ;;  %v9341_v48 = vld [vmem:[%s14027_s1 + $0x1060] ss:$16 sps:$4 sm:$0xff]  }
  0xd0   :  { %6602 = vmatpush1.bf16.msra.mxu1 %v9238_v55  ;;  %6562 = vmatprep.subr.bf16.mxu0 %v9243_v56  ;;  %v9312_v55 = vld [vmem:[%s14027_s1 + $0xf04] ss:$16 sps:$4 sm:$0xff]   ;;  %v9307_v56 = vld [vmem:[%s14027_s1 + $0xd00] ss:$16 sps:$4 sm:$0xff]  }
  0xd1   :  { %6603 = vmatprep.subr.bf16.mxu1 %v9246_v57  ;;  %v9310_v57 = vld [vmem:[%s14027_s1 + $0xf00] ss:$16 sps:$4 sm:$0xff]  }
  0xd3   :  { %6563 = vmatpush1.bf16.msra.mxu0 %v9241_v58  ;;  %v1054_v58 = vld [vmem:[%s14029_s2] sm:$0xf] }
  0xd4   :  { %6604 = vmatpush1.bf16.msra.mxu1 %v9244_v59  ;;  %6564 = vmatprep.subr.bf16.mxu0 %v9249_v60  ;;  %v1058_v59 = vsub.s32 0, %v11379_v54  ;;  %v9319_v60 = vld [vmem:[%s14027_s1 + $0x10e4] ss:$16 sps:$4 sm:$0xff]  }
  0xd5   :  { %6605 = vmatprep.subr.bf16.mxu1 %v9252_v61  ;;  %v9322_v61 = vld [vmem:[%s14027_s1 + $0x12e4] ss:$16 sps:$4 sm:$0xff]  }
  0xd7   :  { %6565 = vmatpush1.bf16.msra.mxu0 %v9247_v62  ;;  %v9317_v62 = vld [vmem:[%s14027_s1 + $0x10e0] ss:$16 sps:$4 sm:$0xff]  }
  0xd8   :  { %6606 = vmatpush1.bf16.msra.mxu1 %v9250_v63  ;;  %6566 = vmatprep.subr.bf16.mxu0 %v9255_v0  ;;  %v1062_v63 = vsub.s32 1, %v11379_v54  ;;  %v11406_v0 = vcombine.low %v11178_v35, %v11178_v35  ;;  %v9320_v35 = vld [vmem:[%s14027_s1 + $0x12e0] ss:$16 sps:$4 sm:$0xff]  }
  0xd9   :  { %6607 = vmatprep.subr.bf16.mxu1 %v9258_v1  ;;  %v11410_v1 = vcombine.low %v11191_v40, %v11191_v40  ;;  %v9325_v40 = vld [vmem:[%s14027_s1 + $0x10c4] ss:$16 sps:$4 sm:$0xff]  }
  0xdb   :  { %6567 = vmatpush1.bf16.msra.mxu0 %v9253_v2  ;;  %v11415_v2 = vld [vmem:[%s14028_s0 + $0x40] sm:$0xff] }
  0xdc   :  { %6608 = vmatpush1.bf16.msra.mxu1 %v9256_v3  ;;  %6568 = vmatprep.subr.bf16.mxu0 %v9261_v4  ;;  %v11420_v3 = vld [vmem:[%s14028_s0 + $0x48] sm:$0xff]  ;;  %v1059_v4 = vrot.slane %v1054_v58, %v1058_v59  ;;  %v9356_v59 = vld [vmem:[%s14027_s1 + $0x1220] ss:$16 sps:$4 sm:$0xff]  }
  0xdd   :  { %6609 = vmatprep.subr.bf16.mxu1 %v9264_v5  ;;  %v9328_v5 = vld [vmem:[%s14027_s1 + $0x12c4] ss:$16 sps:$4 sm:$0xff]  }
  0xdf   :  { %6569 = vmatpush1.bf16.msra.mxu0 %v9259_v8  ;;  %v1063_v8 = vrot.slane %v1054_v58, %v1062_v63  ;;  %v9353_v58 = vld [vmem:[%s14027_s1 + $0x1020] ss:$16 sps:$4 sm:$0xff]  }
  0xe0   :  { %6610 = vmatpush1.bf16.msra.mxu1 %v9262_v9  ;;  %6570 = vmatprep.subr.bf16.mxu0 %v9267_v10  ;;  %v11433_v9 = vcombine.high %v11415_v2, %v11415_v2  ;;  %v11437_v10 = vcombine.high %v11420_v3, %v11420_v3  ;;  %v9362_v63 = vld [vmem:[%s14027_s1 + $0x1200] ss:$16 sps:$4 sm:$0xff]  }
  0xe1   :  { %6611 = vmatprep.subr.bf16.mxu1 %v9270_v11 }
  0xe3   :  { %6571 = vmatpush2.bf16.msra.mxu0 %v9265_v12 }
  0xe4   :  { %6612 = vmatpush2.bf16.msra.mxu1 %v9268_v13  ;;  %6572 = vmatprep.subr.bf16.mxu0 %v9273_v14  ;;  %v9323_v13 = vld [vmem:[%s14027_s1 + $0x10c0] ss:$16 sps:$4 sm:$0xff]  }
  0xe5   :  { %6613 = vmatprep.subr.bf16.mxu1 %v9276_v15  ;;  %v9326_v15 = vld [vmem:[%s14027_s1 + $0x12c0] ss:$16 sps:$4 sm:$0xff]  }
  0xe7   :  { %6573 = vmatpush2.bf16.msra.mxu0 %v9271_v18 }
  0xe8   :  { %6614 = vmatpush2.bf16.msra.mxu1 %v9274_v19  ;;  %6574 = vmatprep.subr.bf16.mxu0 %v9279_v20  ;;  %v9331_v20 = vld [vmem:[%s14027_s1 + $0x10a4] ss:$16 sps:$4 sm:$0xff]  }
  0xe9   :  { %6615 = vmatprep.subr.bf16.mxu1 %v9282_v21  ;;  %v9334_v21 = vld [vmem:[%s14027_s1 + $0x12a4] ss:$16 sps:$4 sm:$0xff]  }
  0xeb   :  { %6575 = vmatpush2.bf16.msra.mxu0 %v9277_v26 }
  0xec   :  { %6616 = vmatpush2.bf16.msra.mxu1 %v9280_v27  ;;  %6576 = vmatprep.subr.bf16.mxu0 %v9285_v28 }
  0xed   :  { %6617 = vmatprep.subr.bf16.mxu1 %v9288_v29 }
  0xef   :  { %6577 = vmatpush2.bf16.msra.mxu0 %v9283_v30  ;;  %v9329_v30 = vld [vmem:[%s14027_s1 + $0x10a0] ss:$16 sps:$4 sm:$0xff]  }
  0xf0   :  { %6618 = vmatpush2.bf16.msra.mxu1 %v9286_v31  ;;  %6578 = vmatprep.subr.bf16.mxu0 %v9291_v32  ;;  %v9332_v32 = vld [vmem:[%s14027_s1 + $0x12a0] ss:$16 sps:$4 sm:$0xff]  }
  0xf1   :  { %6619 = vmatprep.subr.bf16.mxu1 %v9294_v33 }
  0xf3   :  { %6579 = vmatpush2.bf16.msra.mxu0 %v9289_v34 }
  0xf4   :  { %6620 = vmatpush2.bf16.msra.mxu1 %v9292_v41  ;;  %6580 = vmatprep.subr.bf16.mxu0 %v9297_v22  ;;  %v9337_v41 = vld [vmem:[%s14027_s1 + $0x1084] ss:$16 sps:$4 sm:$0xff]  }
  0xf5   :  { %6621 = vmatprep.subr.bf16.mxu1 %v9300_v23  ;;  %v9340_v22 = vld [vmem:[%s14027_s1 + $0x1284] ss:$16 sps:$4 sm:$0xff]   ;;  %v9335_v23 = vld [vmem:[%s14027_s1 + $0x1080] ss:$16 sps:$4 sm:$0xff]  }
  0xf7   :  { %6581 = vmatpush2.bf16.msra.mxu0 %v9295_v44  ;;  %v9338_v44 = vld [vmem:[%s14027_s1 + $0x1280] ss:$16 sps:$4 sm:$0xff]  }
  0xf8   :  { %6622 = vmatpush2.bf16.msra.mxu1 %v9298_v45  ;;  %6582 = vmatprep.subr.bf16.mxu0 %v9303_v46  ;;  %v9343_v45 = vld [vmem:[%s14027_s1 + $0x1064] ss:$16 sps:$4 sm:$0xff]  }
  0xf9   :  { %6623 = vmatprep.subr.bf16.mxu1 %v9306_v49  ;;  %v9346_v46 = vld [vmem:[%s14027_s1 + $0x1264] ss:$16 sps:$4 sm:$0xff]   ;;  %v9344_v49 = vld [vmem:[%s14027_s1 + $0x1260] ss:$16 sps:$4 sm:$0xff]  }
  0xfb   :  { %6583 = vmatpush2.bf16.msra.mxu0 %v9301_v50  ;;  %v9349_v50 = vld [vmem:[%s14027_s1 + $0x1044] ss:$16 sps:$4 sm:$0xff]  }
  0xfc   :  { %6624 = vmatpush2.bf16.msra.mxu1 %v9304_v52  ;;  %6584 = vmatprep.subr.bf16.mxu0 %v9309_v53  ;;  %v9352_v52 = vld [vmem:[%s14027_s1 + $0x1244] ss:$16 sps:$4 sm:$0xff]   ;;  %v9347_v53 = vld [vmem:[%s14027_s1 + $0x1040] ss:$16 sps:$4 sm:$0xff]  }
  0xfd   :  { %6625 = vmatprep.subr.bf16.mxu1 %v9312_v55  ;;  %v9350_v55 = vld [vmem:[%s14027_s1 + $0x1240] ss:$16 sps:$4 sm:$0xff]  }
  0xff   :  { %6585 = vmatpush2.bf16.msra.mxu0 %v9307_v56  ;;  %v9355_v56 = vld [vmem:[%s14027_s1 + $0x1024] ss:$16 sps:$4 sm:$0xff]  }
 0x100   :  { %6626 = vmatpush2.bf16.msra.mxu1 %v9310_v57  ;;  %6636 = vmatprep.subr.bf16.mxu0 %v9319_v60  ;;  %v9358_v57 = vld [vmem:[%s14027_s1 + $0x1224] ss:$16 sps:$4 sm:$0xff]  }
 0x101   :  { %6677 = vmatprep.subr.bf16.mxu1 %v9322_v61  ;;  %v9361_v60 = vld [vmem:[%s14027_s1 + $0x1004] ss:$16 sps:$4 sm:$0xff]  }
 0x102   :  { %v6342_v11 = vpop.f32.mrf.mxu0  ;;  %6587 = vmatmul.mubr.bf16.vlgmr.msra.gmra.mxu0 %v11406_v0  ;;  %v9364_v61 = vld [vmem:[%s14027_s1 + $0x1204] ss:$16 sps:$4 sm:$0xff]  }
 0x103   :  { %v6383_v12 = vpop.f32.mrf.mxu1  ;;  %6628 = vmatmul.mubr.bf16.vlgmr.msra.gmra.mxu1 %v11410_v1  ;;  %v6343_v14 = vadd.f32 %v6342_v11, %v1059_v4  ;;  %6637 = vmatpush1.bf16.msra.mxu0 %v9317_v62  ;;  %v9359_v62 = vld [vmem:[%s14027_s1 + $0x1000] ss:$16 sps:$4 sm:$0xff]   ;;  %v9367_v4 = vld [vmem:[%s14027_s1 + $0x11e4] ss:$16 sps:$4 sm:$0xff]  }
 0x104   :  { %6678 = vmatpush1.bf16.msra.mxu1 %v9320_v35  ;;  %v6344_v18 = vpop.f32.mrf.mxu0  ;;  %6638 = vmatprep.subr.bf16.mxu0 %v9325_v40  ;;  %v9370_v35 = vld [vmem:[%s14027_s1 + $0x13e4] ss:$16 sps:$4 sm:$0xff]   ;;  %v9365_v40 = vld [vmem:[%s14027_s1 + $0x11e0] ss:$16 sps:$4 sm:$0xff]  }
 0x105   :  { %v6385_v19 = vpop.f32.mrf.mxu1  ;;  %6679 = vmatprep.subr.bf16.mxu1 %v9328_v5  ;;  %v11453_v26 = vadd.f32 %v6383_v12, %v6343_v14  ;;  %v6345_v27 = vadd.f32 %v6344_v18, %v1063_v8  ;;  %6668 = vmatprep.mubr.bf16.mxu0 %v11433_v9  ;;  %v9368_v5 = vld [vmem:[%s14027_s1 + $0x13e0] ss:$16 sps:$4 sm:$0xff]   ;;  %v9373_v8 = vld [vmem:[%s14027_s1 + $0x11c4] ss:$16 sps:$4 sm:$0xff]  }
 0x106   :  { %6709 = vmatprep.mubr.bf16.mxu1 %v11437_v10  ;;  %v6346_v28 = vpop.f32.mrf.mxu0  ;;  %v9376_v11 = vld [vmem:[%s14027_s1 + $0x13c4] ss:$16 sps:$4 sm:$0xff]   ;;  %v9371_v12 = vld [vmem:[%s14027_s1 + $0x11c0] ss:$16 sps:$4 sm:$0xff]  }
 0x107   :  { %v6387_v29 = vpop.f32.mrf.mxu1  ;;  %v11460_v31 = vadd.f32 %v6385_v19, %v6345_v27  ;;  %6639 = vmatpush1.bf16.msra.mxu0 %v9323_v13  ;;  %v9374_v13 = vld [vmem:[%s14027_s1 + $0x13c0] ss:$16 sps:$4 sm:$0xff]   ;;  %v9379_v14 = vld [vmem:[%s14027_s1 + $0x11a4] ss:$16 sps:$4 sm:$0xff]  }
 0x108   :  { %6680 = vmatpush1.bf16.msra.mxu1 %v9326_v15  ;;  %v6347_v33 = vpop.f32.mrf.mxu0  ;;  %6640 = vmatprep.subr.bf16.mxu0 %v9331_v20  ;;  %v9382_v15 = vld [vmem:[%s14027_s1 + $0x13a4] ss:$16 sps:$4 sm:$0xff]   ;;  %v9377_v18 = vld [vmem:[%s14027_s1 + $0x11a0] ss:$16 sps:$4 sm:$0xff]  }
 0x109   :  { %v6388_v34 = vpop.f32.mrf.mxu1  ;;  %6681 = vmatprep.subr.bf16.mxu1 %v9334_v21  ;;  %v9380_v19 = vld [vmem:[%s14027_s1 + $0x13a0] ss:$16 sps:$4 sm:$0xff]   ;;  %v9385_v20 = vld [vmem:[%s14027_s1 + $0x1184] ss:$16 sps:$4 sm:$0xff]  }
 0x10a   :  { %v9388_v21 = vld [vmem:[%s14027_s1 + $0x1384] ss:$16 sps:$4 sm:$0xff]   ;;  %v9383_v27 = vld [vmem:[%s14027_s1 + $0x1180] ss:$16 sps:$4 sm:$0xff]  }
 0x10b   :  { %6641 = vmatpush1.bf16.msra.mxu0 %v9329_v30  ;;  %v9386_v28 = vld [vmem:[%s14027_s1 + $0x1380] ss:$16 sps:$4 sm:$0xff]   ;;  %v9391_v29 = vld [vmem:[%s14027_s1 + $0x1164] ss:$16 sps:$4 sm:$0xff]  }
 0x10c   :  { %6682 = vmatpush1.bf16.msra.mxu1 %v9332_v32  ;;  %6642 = vmatprep.subr.bf16.mxu0 %v9337_v41  ;;  %v9394_v30 = vld [vmem:[%s14027_s1 + $0x1364] ss:$16 sps:$4 sm:$0xff]   ;;  %v9389_v32 = vld [vmem:[%s14027_s1 + $0x1160] ss:$16 sps:$4 sm:$0xff]  }
 0x10d   :  { %6683 = vmatprep.subr.bf16.mxu1 %v9340_v22  ;;  %v9392_v33 = vld [vmem:[%s14027_s1 + $0x1360] ss:$16 sps:$4 sm:$0xff]   ;;  %v9397_v34 = vld [vmem:[%s14027_s1 + $0x1144] ss:$16 sps:$4 sm:$0xff]  }
 0x10e   :  { %v9400_v41 = vld [vmem:[%s14027_s1 + $0x1344] ss:$16 sps:$4 sm:$0xff]   ;;  %v9395_v22 = vld [vmem:[%s14027_s1 + $0x1140] ss:$16 sps:$4 sm:$0xff]  }
 0x10f   :  { %6643 = vmatpush1.bf16.msra.mxu0 %v9335_v23  ;;  %v9398_v23 = vld [vmem:[%s14027_s1 + $0x1340] ss:$16 sps:$4 sm:$0xff]  }
 0x110   :  { %6684 = vmatpush1.bf16.msra.mxu1 %v9338_v44  ;;  %6644 = vmatprep.subr.bf16.mxu0 %v9343_v45  ;;  %v9403_v44 = vld [vmem:[%s14027_s1 + $0x1124] ss:$16 sps:$4 sm:$0xff]  }
 0x111   :  { %6685 = vmatprep.subr.bf16.mxu1 %v9346_v46  ;;  %v9406_v45 = vld [vmem:[%s14027_s1 + $0x1324] ss:$16 sps:$4 sm:$0xff]   ;;  %v9401_v46 = vld [vmem:[%s14027_s1 + $0x1120] ss:$16 sps:$4 sm:$0xff]  }
 0x113   :  { %6645 = vmatpush1.bf16.msra.mxu0 %v9341_v48  ;;  %v9404_v48 = vld [vmem:[%s14027_s1 + $0x1320] ss:$16 sps:$4 sm:$0xff]  }
 0x114   :  { %6686 = vmatpush1.bf16.msra.mxu1 %v9344_v49  ;;  %6646 = vmatprep.subr.bf16.mxu0 %v9349_v50  ;;  %v9409_v49 = vld [vmem:[%s14027_s1 + $0x1104] ss:$16 sps:$4 sm:$0xff]  }
 0x115   :  { %6687 = vmatprep.subr.bf16.mxu1 %v9352_v52  ;;  %v9412_v50 = vld [vmem:[%s14027_s1 + $0x1304] ss:$16 sps:$4 sm:$0xff]   ;;  %v9407_v52 = vld [vmem:[%s14027_s1 + $0x1100] ss:$16 sps:$4 sm:$0xff]  }
 0x117   :  { %6647 = vmatpush1.bf16.msra.mxu0 %v9347_v53  ;;  %v9410_v53 = vld [vmem:[%s14027_s1 + $0x1300] ss:$16 sps:$4 sm:$0xff]  }
 0x118   :  { %6688 = vmatpush1.bf16.msra.mxu1 %v9350_v55  ;;  %6648 = vmatprep.subr.bf16.mxu0 %v9355_v56  ;;  %v9419_v55 = vld [vmem:[%s14027_s1 + $0x14e4] ss:$16 sps:$4 sm:$0xff]  }
 0x119   :  { %6689 = vmatprep.subr.bf16.mxu1 %v9358_v57  ;;  %v9422_v56 = vld [vmem:[%s14027_s1 + $0x16e4] ss:$16 sps:$4 sm:$0xff]   ;;  %v9417_v57 = vld [vmem:[%s14027_s1 + $0x14e0] ss:$16 sps:$4 sm:$0xff]  }
 0x11b   :  { %6649 = vmatpush1.bf16.msra.mxu0 %v9353_v58  ;;  %v9420_v58 = vld [vmem:[%s14027_s1 + $0x16e0] ss:$16 sps:$4 sm:$0xff]  }
 0x11c   :  { %6690 = vmatpush1.bf16.msra.mxu1 %v9356_v59  ;;  %6650 = vmatprep.subr.bf16.mxu0 %v9361_v60  ;;  %v11635_v59 = vcombine.low %v11415_v2, %v11415_v2  ;;  %v11639_v60 = vcombine.low %v11420_v3, %v11420_v3  ;;  %v9425_v2 = vld [vmem:[%s14027_s1 + $0x14c4] ss:$16 sps:$4 sm:$0xff]  }
 0x11d   :  { %6691 = vmatprep.subr.bf16.mxu1 %v9364_v61  ;;  %v11644_v61 = vld [vmem:[%s14028_s0 + $0x50] sm:$0xff] }
 0x11e   :  { %v9428_v3 = vld [vmem:[%s14027_s1 + $0x16c4] ss:$16 sps:$4 sm:$0xff]  }
 0x11f   :  { %6651 = vmatpush1.bf16.msra.mxu0 %v9359_v62  ;;  %v11649_v62 = vld [vmem:[%s14028_s0 + $0x58] sm:$0xff] }
 0x120   :  { %6692 = vmatpush1.bf16.msra.mxu1 %v9362_v63  ;;  %6652 = vmatprep.subr.bf16.mxu0 %v9367_v4  ;;  %v9423_v63 = vld [vmem:[%s14027_s1 + $0x14c0] ss:$16 sps:$4 sm:$0xff]  }
 0x121   :  { %6693 = vmatprep.subr.bf16.mxu1 %v9370_v35  ;;  %v9426_v4 = vld [vmem:[%s14027_s1 + $0x16c0] ss:$16 sps:$4 sm:$0xff]   ;;  %v11665_v35 = vcombine.high %v11644_v61, %v11644_v61 }
 0x123   :  { %6653 = vmatpush2.bf16.msra.mxu0 %v9365_v40  ;;  %v11669_v40 = vcombine.high %v11649_v62, %v11649_v62 }
 0x124   :  { %6694 = vmatpush2.bf16.msra.mxu1 %v9368_v5  ;;  %6654 = vmatprep.subr.bf16.mxu0 %v9373_v8 }
 0x125   :  { %6695 = vmatprep.subr.bf16.mxu1 %v9376_v11 }
 0x127   :  { %6655 = vmatpush2.bf16.msra.mxu0 %v9371_v12 }
 0x128   :  { %6696 = vmatpush2.bf16.msra.mxu1 %v9374_v13  ;;  %6656 = vmatprep.subr.bf16.mxu0 %v9379_v14  ;;  %v9431_v14 = vld [vmem:[%s14027_s1 + $0x14a4] ss:$16 sps:$4 sm:$0xff]  }
 0x129   :  { %6697 = vmatprep.subr.bf16.mxu1 %v9382_v15  ;;  %v9434_v15 = vld [vmem:[%s14027_s1 + $0x16a4] ss:$16 sps:$4 sm:$0xff]  }
 0x12b   :  { %6657 = vmatpush2.bf16.msra.mxu0 %v9377_v18 }
 0x12c   :  { %6698 = vmatpush2.bf16.msra.mxu1 %v9380_v19  ;;  %6658 = vmatprep.subr.bf16.mxu0 %v9385_v20  ;;  %v9432_v20 = vld [vmem:[%s14027_s1 + $0x16a0] ss:$16 sps:$4 sm:$0xff]  }
 0x12d   :  { %6699 = vmatprep.subr.bf16.mxu1 %v9388_v21 }
 0x12f   :  { %6659 = vmatpush2.bf16.msra.mxu0 %v9383_v27 }
 0x130   :  { %6700 = vmatpush2.bf16.msra.mxu1 %v9386_v28  ;;  %6660 = vmatprep.subr.bf16.mxu0 %v9391_v29 }
 0x131   :  { %6701 = vmatprep.subr.bf16.mxu1 %v9394_v30  ;;  %v9437_v30 = vld [vmem:[%s14027_s1 + $0x1484] ss:$16 sps:$4 sm:$0xff]  }
 0x133   :  { %6661 = vmatpush2.bf16.msra.mxu0 %v9389_v32  ;;  %v9440_v32 = vld [vmem:[%s14027_s1 + $0x1684] ss:$16 sps:$4 sm:$0xff]  }
 0x134   :  { %6702 = vmatpush2.bf16.msra.mxu1 %v9392_v33  ;;  %6662 = vmatprep.subr.bf16.mxu0 %v9397_v34  ;;  %v9435_v33 = vld [vmem:[%s14027_s1 + $0x1480] ss:$16 sps:$4 sm:$0xff]  }
 0x135   :  { %6703 = vmatprep.subr.bf16.mxu1 %v9400_v41  ;;  %v9438_v34 = vld [vmem:[%s14027_s1 + $0x1680] ss:$16 sps:$4 sm:$0xff]   ;;  %v9443_v41 = vld [vmem:[%s14027_s1 + $0x1464] ss:$16 sps:$4 sm:$0xff]  }
 0x137   :  { %6663 = vmatpush2.bf16.msra.mxu0 %v9395_v22  ;;  %v9446_v22 = vld [vmem:[%s14027_s1 + $0x1664] ss:$16 sps:$4 sm:$0xff]  }
 0x138   :  { %6704 = vmatpush2.bf16.msra.mxu1 %v9398_v23  ;;  %6664 = vmatprep.subr.bf16.mxu0 %v9403_v44  ;;  %v9441_v23 = vld [vmem:[%s14027_s1 + $0x1460] ss:$16 sps:$4 sm:$0xff]  }
 0x139   :  { %6705 = vmatprep.subr.bf16.mxu1 %v9406_v45  ;;  %v9444_v44 = vld [vmem:[%s14027_s1 + $0x1660] ss:$16 sps:$4 sm:$0xff]   ;;  %v9449_v45 = vld [vmem:[%s14027_s1 + $0x1444] ss:$16 sps:$4 sm:$0xff]  }
 0x13b   :  { %6665 = vmatpush2.bf16.msra.mxu0 %v9401_v46  ;;  %v9452_v46 = vld [vmem:[%s14027_s1 + $0x1644] ss:$16 sps:$4 sm:$0xff]  }
 0x13c   :  { %6706 = vmatpush2.bf16.msra.mxu1 %v9404_v48  ;;  %6666 = vmatprep.subr.bf16.mxu0 %v9409_v49  ;;  %v9447_v48 = vld [vmem:[%s14027_s1 + $0x1440] ss:$16 sps:$4 sm:$0xff]  }
 0x13d   :  { %6707 = vmatprep.subr.bf16.mxu1 %v9412_v50  ;;  %v9450_v49 = vld [vmem:[%s14027_s1 + $0x1640] ss:$16 sps:$4 sm:$0xff]   ;;  %v9455_v50 = vld [vmem:[%s14027_s1 + $0x1424] ss:$16 sps:$4 sm:$0xff]  }
 0x13f   :  { %6667 = vmatpush2.bf16.msra.mxu0 %v9407_v52  ;;  %v9458_v52 = vld [vmem:[%s14027_s1 + $0x1624] ss:$16 sps:$4 sm:$0xff]  }
 0x140   :  { %6708 = vmatpush2.bf16.msra.mxu1 %v9410_v53  ;;  %6718 = vmatprep.subr.bf16.mxu0 %v9419_v55  ;;  %v9453_v53 = vld [vmem:[%s14027_s1 + $0x1420] ss:$16 sps:$4 sm:$0xff]  }
 0x141   :  { %6759 = vmatprep.subr.bf16.mxu1 %v9422_v56  ;;  %v9456_v55 = vld [vmem:[%s14027_s1 + $0x1620] ss:$16 sps:$4 sm:$0xff]   ;;  %v9461_v56 = vld [vmem:[%s14027_s1 + $0x1404] ss:$16 sps:$4 sm:$0xff]  }
 0x142   :  { %v6424_v5 = vpop.f32.mrf.mxu0  ;;  %6669 = vmatmul.mubr.bf16.vlgmr.msra.gmra.mxu0 %v11635_v59 }
 0x143   :  { %v6465_v8 = vpop.f32.mrf.mxu1  ;;  %6710 = vmatmul.mubr.bf16.vlgmr.msra.gmra.mxu1 %v11639_v60  ;;  %v6425_v11 = vadd.f32 %v6424_v5, %v11453_v26  ;;  %6719 = vmatpush1.bf16.msra.mxu0 %v9417_v57  ;;  %v9429_v26 = vld [vmem:[%s14027_s1 + $0x14a0] ss:$16 sps:$4 sm:$0xff]   ;;  %v9464_v57 = vld [vmem:[%s14027_s1 + $0x1604] ss:$16 sps:$4 sm:$0xff]  }
 0x144   :  { %6760 = vmatpush1.bf16.msra.mxu1 %v9420_v58  ;;  %v6426_v12 = vpop.f32.mrf.mxu0  ;;  %6720 = vmatprep.subr.bf16.mxu0 %v9425_v2  ;;  %v9459_v58 = vld [vmem:[%s14027_s1 + $0x1400] ss:$16 sps:$4 sm:$0xff]  }
 0x145   :  { %v6467_v13 = vpop.f32.mrf.mxu1  ;;  %6761 = vmatprep.subr.bf16.mxu1 %v9428_v3  ;;  %v11680_v18 = vadd.f32 %v6465_v8, %v6425_v11  ;;  %v6427_v19 = vadd.f32 %v6426_v12, %v11460_v31  ;;  %6750 = vmatprep.mubr.bf16.mxu0 %v11665_v35  ;;  %v9462_v2 = vld [vmem:[%s14027_s1 + $0x1600] ss:$16 sps:$4 sm:$0xff]   ;;  %v9467_v3 = vld [vmem:[%s14027_s1 + $0x15e4] ss:$16 sps:$4 sm:$0xff]  }
 0x146   :  { %6791 = vmatprep.mubr.bf16.mxu1 %v11669_v40  ;;  %v6428_v21 = vpop.f32.mrf.mxu0  ;;  %v9468_v5 = vld [vmem:[%s14027_s1 + $0x17e0] ss:$16 sps:$4 sm:$0xff]   ;;  %v9473_v8 = vld [vmem:[%s14027_s1 + $0x15c4] ss:$16 sps:$4 sm:$0xff]  }
 0x147   :  { %v6469_v27 = vpop.f32.mrf.mxu1  ;;  %v11691_v28 = vadd.f32 %v6467_v13, %v6427_v19  ;;  %6721 = vmatpush1.bf16.msra.mxu0 %v9423_v63  ;;  %v9470_v63 = vld [vmem:[%s14027_s1 + $0x17e4] ss:$16 sps:$4 sm:$0xff]   ;;  %v9471_v12 = vld [vmem:[%s14027_s1 + $0x15c0] ss:$16 sps:$4 sm:$0xff]  }
 0x148   :  { %6762 = vmatpush1.bf16.msra.mxu1 %v9426_v4  ;;  %v6429_v29 = vpop.f32.mrf.mxu0  ;;  %6722 = vmatprep.subr.bf16.mxu0 %v9431_v14  ;;  %v9465_v4 = vld [vmem:[%s14027_s1 + $0x15e0] ss:$16 sps:$4 sm:$0xff]   ;;  %v9476_v11 = vld [vmem:[%s14027_s1 + $0x17c4] ss:$16 sps:$4 sm:$0xff]  }
 0x149   :  { %v6470_v31 = vpop.f32.mrf.mxu1  ;;  %6763 = vmatprep.subr.bf16.mxu1 %v9434_v15  ;;  %v9474_v13 = vld [vmem:[%s14027_s1 + $0x17c0] ss:$16 sps:$4 sm:$0xff]   ;;  %v9479_v14 = vld [vmem:[%s14027_s1 + $0x15a4] ss:$16 sps:$4 sm:$0xff]  }
 0x14a   :  { %v9482_v15 = vld [vmem:[%s14027_s1 + $0x17a4] ss:$16 sps:$4 sm:$0xff]   ;;  %v9477_v19 = vld [vmem:[%s14027_s1 + $0x15a0] ss:$16 sps:$4 sm:$0xff]  }
 0x14b   :  { %6723 = vmatpush1.bf16.msra.mxu0 %v9429_v26  ;;  %v9480_v26 = vld [vmem:[%s14027_s1 + $0x17a0] ss:$16 sps:$4 sm:$0xff]   ;;  %v9488_v21 = vld [vmem:[%s14027_s1 + $0x1784] ss:$16 sps:$4 sm:$0xff]  }
 0x14c   :  { %6764 = vmatpush1.bf16.msra.mxu1 %v9432_v20  ;;  %6724 = vmatprep.subr.bf16.mxu0 %v9437_v30  ;;  %v9485_v20 = vld [vmem:[%s14027_s1 + $0x1584] ss:$16 sps:$4 sm:$0xff]   ;;  %v9483_v27 = vld [vmem:[%s14027_s1 + $0x1580] ss:$16 sps:$4 sm:$0xff]  }
 0x14d   :  { %6765 = vmatprep.subr.bf16.mxu1 %v9440_v32  ;;  %v9486_v29 = vld [vmem:[%s14027_s1 + $0x1780] ss:$16 sps:$4 sm:$0xff]   ;;  %v9491_v31 = vld [vmem:[%s14027_s1 + $0x1564] ss:$16 sps:$4 sm:$0xff]  }
 0x14e   :  { %v9494_v30 = vld [vmem:[%s14027_s1 + $0x1764] ss:$16 sps:$4 sm:$0xff]   ;;  %v9489_v32 = vld [vmem:[%s14027_s1 + $0x1560] ss:$16 sps:$4 sm:$0xff]  }
 0x14f   :  { %6725 = vmatpush1.bf16.msra.mxu0 %v9435_v33  ;;  %v9492_v33 = vld [vmem:[%s14027_s1 + $0x1760] ss:$16 sps:$4 sm:$0xff]  }
 0x150   :  { %6766 = vmatpush1.bf16.msra.mxu1 %v9438_v34  ;;  %6726 = vmatprep.subr.bf16.mxu0 %v9443_v41  ;;  %v9497_v34 = vld [vmem:[%s14027_s1 + $0x1544] ss:$16 sps:$4 sm:$0xff]  }
 0x151   :  { %6767 = vmatprep.subr.bf16.mxu1 %v9446_v22  ;;  %v9500_v41 = vld [vmem:[%s14027_s1 + $0x1744] ss:$16 sps:$4 sm:$0xff]   ;;  %v9495_v22 = vld [vmem:[%s14027_s1 + $0x1540] ss:$16 sps:$4 sm:$0xff]  }
 0x153   :  { %6727 = vmatpush1.bf16.msra.mxu0 %v9441_v23  ;;  %v9498_v23 = vld [vmem:[%s14027_s1 + $0x1740] ss:$16 sps:$4 sm:$0xff]  }
 0x154   :  { %6768 = vmatpush1.bf16.msra.mxu1 %v9444_v44  ;;  %6728 = vmatprep.subr.bf16.mxu0 %v9449_v45  ;;  %v9503_v44 = vld [vmem:[%s14027_s1 + $0x1524] ss:$16 sps:$4 sm:$0xff]  }
 0x155   :  { %6769 = vmatprep.subr.bf16.mxu1 %v9452_v46  ;;  %v9506_v45 = vld [vmem:[%s14027_s1 + $0x1724] ss:$16 sps:$4 sm:$0xff]   ;;  %v9501_v46 = vld [vmem:[%s14027_s1 + $0x1520] ss:$16 sps:$4 sm:$0xff]  }
 0x157   :  { %6729 = vmatpush1.bf16.msra.mxu0 %v9447_v48  ;;  %v9504_v48 = vld [vmem:[%s14027_s1 + $0x1720] ss:$16 sps:$4 sm:$0xff]  }
 0x158   :  { %6770 = vmatpush1.bf16.msra.mxu1 %v9450_v49  ;;  %6730 = vmatprep.subr.bf16.mxu0 %v9455_v50  ;;  %v9509_v49 = vld [vmem:[%s14027_s1 + $0x1504] ss:$16 sps:$4 sm:$0xff]  }
 0x159   :  { %6771 = vmatprep.subr.bf16.mxu1 %v9458_v52  ;;  %v9512_v50 = vld [vmem:[%s14027_s1 + $0x1704] ss:$16 sps:$4 sm:$0xff]   ;;  %v9507_v52 = vld [vmem:[%s14027_s1 + $0x1500] ss:$16 sps:$4 sm:$0xff]  }
 0x15b   :  { %6731 = vmatpush1.bf16.msra.mxu0 %v9453_v53  ;;  %v9510_v53 = vld [vmem:[%s14027_s1 + $0x1700] ss:$16 sps:$4 sm:$0xff]  }
 0x15c   :  { %6772 = vmatpush1.bf16.msra.mxu1 %v9456_v55  ;;  %6732 = vmatprep.subr.bf16.mxu0 %v9461_v56  ;;  %v9519_v55 = vld [vmem:[%s14027_s1 + $0x18e4] ss:$16 sps:$4 sm:$0xff]  }
 0x15d   :  { %6773 = vmatprep.subr.bf16.mxu1 %v9464_v57  ;;  %v9522_v56 = vld [vmem:[%s14027_s1 + $0x1ae4] ss:$16 sps:$4 sm:$0xff]   ;;  %v9517_v57 = vld [vmem:[%s14027_s1 + $0x18e0] ss:$16 sps:$4 sm:$0xff]  }
 0x15f   :  { %6733 = vmatpush1.bf16.msra.mxu0 %v9459_v58  ;;  %v9520_v58 = vld [vmem:[%s14027_s1 + $0x1ae0] ss:$16 sps:$4 sm:$0xff]  }
 0x160   :  { %6774 = vmatpush1.bf16.msra.mxu1 %v9462_v2  ;;  %6734 = vmatprep.subr.bf16.mxu0 %v9467_v3  ;;  %v11863_v2 = vcombine.low %v11644_v61, %v11644_v61  ;;  %v11867_v3 = vcombine.low %v11649_v62, %v11649_v62  ;;  %v9525_v61 = vld [vmem:[%s14027_s1 + $0x18c4] ss:$16 sps:$4 sm:$0xff]  }
 0x161   :  { %6775 = vmatprep.subr.bf16.mxu1 %v9470_v63  ;;  %v11872_v63 = vld [vmem:[%s14028_s0 + $0x60] sm:$0xff] }
 0x162   :  { %v9528_v62 = vld [vmem:[%s14027_s1 + $0x1ac4] ss:$16 sps:$4 sm:$0xff]  }
 0x163   :  { %6735 = vmatpush2.bf16.msra.mxu0 %v9465_v4  ;;  %v11877_v4 = vld [vmem:[%s14028_s0 + $0x68] sm:$0xff] }
 0x164   :  { %6776 = vmatpush2.bf16.msra.mxu1 %v9468_v5  ;;  %6736 = vmatprep.subr.bf16.mxu0 %v9473_v8  ;;  %v9523_v5 = vld [vmem:[%s14027_s1 + $0x18c0] ss:$16 sps:$4 sm:$0xff]  }
 0x165   :  { %6777 = vmatprep.subr.bf16.mxu1 %v9476_v11  ;;  %v9526_v8 = vld [vmem:[%s14027_s1 + $0x1ac0] ss:$16 sps:$4 sm:$0xff]   ;;  %v11893_v11 = vcombine.high %v11872_v63, %v11872_v63 }
 0x167   :  { %6737 = vmatpush2.bf16.msra.mxu0 %v9471_v12  ;;  %v11897_v12 = vcombine.high %v11877_v4, %v11877_v4 }
 0x168   :  { %6778 = vmatpush2.bf16.msra.mxu1 %v9474_v13  ;;  %6738 = vmatprep.subr.bf16.mxu0 %v9479_v14 }
 0x169   :  { %6779 = vmatprep.subr.bf16.mxu1 %v9482_v15 }
 0x16b   :  { %6739 = vmatpush2.bf16.msra.mxu0 %v9477_v19 }
 0x16c   :  { %6780 = vmatpush2.bf16.msra.mxu1 %v9480_v26  ;;  %6740 = vmatprep.subr.bf16.mxu0 %v9485_v20  ;;  %v9531_v20 = vld [vmem:[%s14027_s1 + $0x18a4] ss:$16 sps:$4 sm:$0xff]  }
 0x16d   :  { %6781 = vmatprep.subr.bf16.mxu1 %v9488_v21  ;;  %v9534_v21 = vld [vmem:[%s14027_s1 + $0x1aa4] ss:$16 sps:$4 sm:$0xff]  }
 0x16f   :  { %6741 = vmatpush2.bf16.msra.mxu0 %v9483_v27 }
 0x170   :  { %6782 = vmatpush2.bf16.msra.mxu1 %v9486_v29  ;;  %6742 = vmatprep.subr.bf16.mxu0 %v9491_v31  ;;  %v9532_v31 = vld [vmem:[%s14027_s1 + $0x1aa0] ss:$16 sps:$4 sm:$0xff]  }
 0x171   :  { %6783 = vmatprep.subr.bf16.mxu1 %v9494_v30 }
 0x173   :  { %6743 = vmatpush2.bf16.msra.mxu0 %v9489_v32 }
 0x174   :  { %6784 = vmatpush2.bf16.msra.mxu1 %v9492_v33  ;;  %6744 = vmatprep.subr.bf16.mxu0 %v9497_v34 }
 0x175   :  { %6785 = vmatprep.subr.bf16.mxu1 %v9500_v41  ;;  %v9537_v41 = vld [vmem:[%s14027_s1 + $0x1884] ss:$16 sps:$4 sm:$0xff]  }
 0x177   :  { %6745 = vmatpush2.bf16.msra.mxu0 %v9495_v22  ;;  %v9540_v22 = vld [vmem:[%s14027_s1 + $0x1a84] ss:$16 sps:$4 sm:$0xff]  }
 0x178   :  { %6786 = vmatpush2.bf16.msra.mxu1 %v9498_v23  ;;  %6746 = vmatprep.subr.bf16.mxu0 %v9503_v44  ;;  %v9535_v23 = vld [vmem:[%s14027_s1 + $0x1880] ss:$16 sps:$4 sm:$0xff]  }
 0x179   :  { %6787 = vmatprep.subr.bf16.mxu1 %v9506_v45  ;;  %v9538_v44 = vld [vmem:[%s14027_s1 + $0x1a80] ss:$16 sps:$4 sm:$0xff]   ;;  %v9543_v45 = vld [vmem:[%s14027_s1 + $0x1864] ss:$16 sps:$4 sm:$0xff]  }
 0x17b   :  { %6747 = vmatpush2.bf16.msra.mxu0 %v9501_v46  ;;  %v9546_v46 = vld [vmem:[%s14027_s1 + $0x1a64] ss:$16 sps:$4 sm:$0xff]  }
 0x17c   :  { %6788 = vmatpush2.bf16.msra.mxu1 %v9504_v48  ;;  %6748 = vmatprep.subr.bf16.mxu0 %v9509_v49  ;;  %v9541_v48 = vld [vmem:[%s14027_s1 + $0x1860] ss:$16 sps:$4 sm:$0xff]  }
 0x17d   :  { %6789 = vmatprep.subr.bf16.mxu1 %v9512_v50  ;;  %v9544_v49 = vld [vmem:[%s14027_s1 + $0x1a60] ss:$16 sps:$4 sm:$0xff]   ;;  %v9549_v50 = vld [vmem:[%s14027_s1 + $0x1844] ss:$16 sps:$4 sm:$0xff]  }
 0x17f   :  { %6749 = vmatpush2.bf16.msra.mxu0 %v9507_v52  ;;  %v9552_v52 = vld [vmem:[%s14027_s1 + $0x1a44] ss:$16 sps:$4 sm:$0xff]  }
 0x180   :  { %6790 = vmatpush2.bf16.msra.mxu1 %v9510_v53  ;;  %6800 = vmatprep.subr.bf16.mxu0 %v9519_v55  ;;  %v9547_v53 = vld [vmem:[%s14027_s1 + $0x1840] ss:$16 sps:$4 sm:$0xff]  }
 0x181   :  { %6841 = vmatprep.subr.bf16.mxu1 %v9522_v56  ;;  %v9550_v55 = vld [vmem:[%s14027_s1 + $0x1a40] ss:$16 sps:$4 sm:$0xff]   ;;  %v9555_v56 = vld [vmem:[%s14027_s1 + $0x1824] ss:$16 sps:$4 sm:$0xff]  }
 0x182   :  { %v6506_v13 = vpop.f32.mrf.mxu0  ;;  %6751 = vmatmul.mubr.bf16.vlgmr.msra.gmra.mxu0 %v11863_v2 }
 0x183   :  { %v6547_v14 = vpop.f32.mrf.mxu1  ;;  %6792 = vmatmul.mubr.bf16.vlgmr.msra.gmra.mxu1 %v11867_v3  ;;  %v6507_v15 = vadd.f32 %v6506_v13, %v11680_v18  ;;  %6801 = vmatpush1.bf16.msra.mxu0 %v9517_v57  ;;  %v9529_v18 = vld [vmem:[%s14027_s1 + $0x18a0] ss:$16 sps:$4 sm:$0xff]   ;;  %v9558_v57 = vld [vmem:[%s14027_s1 + $0x1a24] ss:$16 sps:$4 sm:$0xff]  }
 0x184   :  { %6842 = vmatpush1.bf16.msra.mxu1 %v9520_v58  ;;  %v6508_v19 = vpop.f32.mrf.mxu0  ;;  %6802 = vmatprep.subr.bf16.mxu0 %v9525_v61  ;;  %v9553_v58 = vld [vmem:[%s14027_s1 + $0x1820] ss:$16 sps:$4 sm:$0xff]  }
 0x185   :  { %v6549_v26 = vpop.f32.mrf.mxu1  ;;  %6843 = vmatprep.subr.bf16.mxu1 %v9528_v62  ;;  %v11908_v27 = vadd.f32 %v6547_v14, %v6507_v15  ;;  %v6509_v29 = vadd.f32 %v6508_v19, %v11691_v28  ;;  %6832 = vmatprep.mubr.bf16.mxu0 %v11893_v11  ;;  %v9556_v61 = vld [vmem:[%s14027_s1 + $0x1a20] ss:$16 sps:$4 sm:$0xff]   ;;  %v9561_v62 = vld [vmem:[%s14027_s1 + $0x1804] ss:$16 sps:$4 sm:$0xff]  }
 0x186   :  { %6873 = vmatprep.mubr.bf16.mxu1 %v11897_v12  ;;  %v6510_v30 = vpop.f32.mrf.mxu0  ;;  %v9562_v13 = vld [vmem:[%s14027_s1 + $0x1a00] ss:$16 sps:$4 sm:$0xff]   ;;  %v9567_v14 = vld [vmem:[%s14027_s1 + $0x19e4] ss:$16 sps:$4 sm:$0xff]  }
 0x187   :  { %v6551_v32 = vpop.f32.mrf.mxu1  ;;  %v11919_v33 = vadd.f32 %v6549_v26, %v6509_v29  ;;  %6803 = vmatpush1.bf16.msra.mxu0 %v9523_v5  ;;  %v9564_v5 = vld [vmem:[%s14027_s1 + $0x1a04] ss:$16 sps:$4 sm:$0xff]   ;;  %v9565_v19 = vld [vmem:[%s14027_s1 + $0x19e0] ss:$16 sps:$4 sm:$0xff]  }
 0x188   :  { %6844 = vmatpush1.bf16.msra.mxu1 %v9526_v8  ;;  %v6511_v34 = vpop.f32.mrf.mxu0  ;;  %6804 = vmatprep.subr.bf16.mxu0 %v9531_v20  ;;  %v9559_v8 = vld [vmem:[%s14027_s1 + $0x1800] ss:$16 sps:$4 sm:$0xff]   ;;  %v9570_v15 = vld [vmem:[%s14027_s1 + $0x1be4] ss:$16 sps:$4 sm:$0xff]  }
 0x189   :  { %v6552_v28 = vpop.f32.mrf.mxu1  ;;  %6845 = vmatprep.subr.bf16.mxu1 %v9534_v21  ;;  %v9568_v26 = vld [vmem:[%s14027_s1 + $0x1be0] ss:$16 sps:$4 sm:$0xff]   ;;  %v9573_v20 = vld [vmem:[%s14027_s1 + $0x19c4] ss:$16 sps:$4 sm:$0xff]  }
 0x18a   :  { %v9576_v21 = vld [vmem:[%s14027_s1 + $0x1bc4] ss:$16 sps:$4 sm:$0xff]   ;;  %v9571_v29 = vld [vmem:[%s14027_s1 + $0x19c0] ss:$16 sps:$4 sm:$0xff]  }
 0x18b   :  { %6805 = vmatpush1.bf16.msra.mxu0 %v9529_v18  ;;  %v9574_v18 = vld [vmem:[%s14027_s1 + $0x1bc0] ss:$16 sps:$4 sm:$0xff]   ;;  %v9582_v30 = vld [vmem:[%s14027_s1 + $0x1ba4] ss:$16 sps:$4 sm:$0xff]  }
 0x18c   :  { %6846 = vmatpush1.bf16.msra.mxu1 %v9532_v31  ;;  %6806 = vmatprep.subr.bf16.mxu0 %v9537_v41  ;;  %v9579_v31 = vld [vmem:[%s14027_s1 + $0x19a4] ss:$16 sps:$4 sm:$0xff]   ;;  %v9577_v32 = vld [vmem:[%s14027_s1 + $0x19a0] ss:$16 sps:$4 sm:$0xff]  }
 0x18d   :  { %6847 = vmatprep.subr.bf16.mxu1 %v9540_v22  ;;  %v9580_v34 = vld [vmem:[%s14027_s1 + $0x1ba0] ss:$16 sps:$4 sm:$0xff]   ;;  %v9585_v28 = vld [vmem:[%s14027_s1 + $0x1984] ss:$16 sps:$4 sm:$0xff]  }
 0x18e   :  { %v9588_v41 = vld [vmem:[%s14027_s1 + $0x1b84] ss:$16 sps:$4 sm:$0xff]   ;;  %v9583_v22 = vld [vmem:[%s14027_s1 + $0x1980] ss:$16 sps:$4 sm:$0xff]  }
 0x18f   :  { %6807 = vmatpush1.bf16.msra.mxu0 %v9535_v23  ;;  %v9586_v23 = vld [vmem:[%s14027_s1 + $0x1b80] ss:$16 sps:$4 sm:$0xff]  }
 0x190   :  { %6848 = vmatpush1.bf16.msra.mxu1 %v9538_v44  ;;  %6808 = vmatprep.subr.bf16.mxu0 %v9543_v45  ;;  %v9591_v44 = vld [vmem:[%s14027_s1 + $0x1964] ss:$16 sps:$4 sm:$0xff]  }
 0x191   :  { %6849 = vmatprep.subr.bf16.mxu1 %v9546_v46  ;;  %v9594_v45 = vld [vmem:[%s14027_s1 + $0x1b64] ss:$16 sps:$4 sm:$0xff]   ;;  %v9589_v46 = vld [vmem:[%s14027_s1 + $0x1960] ss:$16 sps:$4 sm:$0xff]  }
 0x193   :  { %6809 = vmatpush1.bf16.msra.mxu0 %v9541_v48  ;;  %v9592_v48 = vld [vmem:[%s14027_s1 + $0x1b60] ss:$16 sps:$4 sm:$0xff]  }
 0x194   :  { %6850 = vmatpush1.bf16.msra.mxu1 %v9544_v49  ;;  %6810 = vmatprep.subr.bf16.mxu0 %v9549_v50  ;;  %v9597_v49 = vld [vmem:[%s14027_s1 + $0x1944] ss:$16 sps:$4 sm:$0xff]  }
 0x195   :  { %6851 = vmatprep.subr.bf16.mxu1 %v9552_v52  ;;  %v9600_v50 = vld [vmem:[%s14027_s1 + $0x1b44] ss:$16 sps:$4 sm:$0xff]   ;;  %v9595_v52 = vld [vmem:[%s14027_s1 + $0x1940] ss:$16 sps:$4 sm:$0xff]  }
 0x197   :  { %6811 = vmatpush1.bf16.msra.mxu0 %v9547_v53  ;;  %v9598_v53 = vld [vmem:[%s14027_s1 + $0x1b40] ss:$16 sps:$4 sm:$0xff]  }
 0x198   :  { %6852 = vmatpush1.bf16.msra.mxu1 %v9550_v55  ;;  %6812 = vmatprep.subr.bf16.mxu0 %v9555_v56  ;;  %v9603_v55 = vld [vmem:[%s14027_s1 + $0x1924] ss:$16 sps:$4 sm:$0xff]  }
 0x199   :  { %6853 = vmatprep.subr.bf16.mxu1 %v9558_v57  ;;  %v9606_v56 = vld [vmem:[%s14027_s1 + $0x1b24] ss:$16 sps:$4 sm:$0xff]   ;;  %v9601_v57 = vld [vmem:[%s14027_s1 + $0x1920] ss:$16 sps:$4 sm:$0xff]  }
 0x19b   :  { %6813 = vmatpush1.bf16.msra.mxu0 %v9553_v58  ;;  %v9604_v58 = vld [vmem:[%s14027_s1 + $0x1b20] ss:$16 sps:$4 sm:$0xff]  }
 0x19c   :  { %6854 = vmatpush1.bf16.msra.mxu1 %v9556_v61  ;;  %6814 = vmatprep.subr.bf16.mxu0 %v9561_v62  ;;  %v9609_v61 = vld [vmem:[%s14027_s1 + $0x1904] ss:$16 sps:$4 sm:$0xff]  }
 0x19d   :  { %6855 = vmatprep.subr.bf16.mxu1 %v9564_v5  ;;  %v9612_v62 = vld [vmem:[%s14027_s1 + $0x1b04] ss:$16 sps:$4 sm:$0xff]   ;;  %v9607_v5 = vld [vmem:[%s14027_s1 + $0x1900] ss:$16 sps:$4 sm:$0xff]  }
 0x19f   :  { %6815 = vmatpush1.bf16.msra.mxu0 %v9559_v8  ;;  %v9610_v8 = vld [vmem:[%s14027_s1 + $0x1b00] ss:$16 sps:$4 sm:$0xff]  }
 0x1a0   :  { %6856 = vmatpush1.bf16.msra.mxu1 %v9562_v13  ;;  %6816 = vmatprep.subr.bf16.mxu0 %v9567_v14  ;;  %v9619_v13 = vld [vmem:[%s14027_s1 + $0x1ce4] ss:$16 sps:$4 sm:$0xff]  }
 0x1a1   :  { %6857 = vmatprep.subr.bf16.mxu1 %v9570_v15  ;;  %v9622_v14 = vld [vmem:[%s14027_s1 + $0x1ee4] ss:$16 sps:$4 sm:$0xff]  }
 0x1a2   :  { %v12086_v15 = vld [vmem:[%s14028_s0 + $0x70] sm:$0xff] }
 0x1a3   :  { %6817 = vmatpush2.bf16.msra.mxu0 %v9565_v19  ;;  %v12091_v19 = vld [vmem:[%s14028_s0 + $0x78] sm:$0xff] }
 0x1a4   :  { %6858 = vmatpush2.bf16.msra.mxu1 %v9568_v26  ;;  %6818 = vmatprep.subr.bf16.mxu0 %v9573_v20  ;;  %v9617_v26 = vld [vmem:[%s14027_s1 + $0x1ce0] ss:$16 sps:$4 sm:$0xff]  }
 0x1a5   :  { %6859 = vmatprep.subr.bf16.mxu1 %v9576_v21  ;;  %v9620_v20 = vld [vmem:[%s14027_s1 + $0x1ee0] ss:$16 sps:$4 sm:$0xff]   ;;  %v12101_v21 = vcombine.low %v11872_v63, %v11872_v63 }
 0x1a6   :  { %v9623_v63 = vld [vmem:[%s14027_s1 + $0x1cc0] ss:$16 sps:$4 sm:$0xff]  }
 0x1a7   :  { %6819 = vmatpush2.bf16.msra.mxu0 %v9571_v29  ;;  %v12105_v29 = vcombine.low %v11877_v4, %v11877_v4  ;;  %v9626_v4 = vld [vmem:[%s14027_s1 + $0x1ec0] ss:$16 sps:$4 sm:$0xff]  }
 0x1a8   :  { %6860 = vmatpush2.bf16.msra.mxu1 %v9574_v18  ;;  %6820 = vmatprep.subr.bf16.mxu0 %v9579_v31  ;;  %v9625_v18 = vld [vmem:[%s14027_s1 + $0x1cc4] ss:$16 sps:$4 sm:$0xff]  }
 0x1a9   :  { %6861 = vmatprep.subr.bf16.mxu1 %v9582_v30  ;;  %v9628_v31 = vld [vmem:[%s14027_s1 + $0x1ec4] ss:$16 sps:$4 sm:$0xff]   ;;  %v12121_v30 = vcombine.high %v12086_v15, %v12086_v15 }
 0x1ab   :  { %6821 = vmatpush2.bf16.msra.mxu0 %v9577_v32  ;;  %v12125_v32 = vcombine.high %v12091_v19, %v12091_v19 }
 0x1ac   :  { %6862 = vmatpush2.bf16.msra.mxu1 %v9580_v34  ;;  %6822 = vmatprep.subr.bf16.mxu0 %v9585_v28 }
 0x1ad   :  { %6863 = vmatprep.subr.bf16.mxu1 %v9588_v41 }
 0x1af   :  { %6823 = vmatpush2.bf16.msra.mxu0 %v9583_v22 }
 0x1b0   :  { %6864 = vmatpush2.bf16.msra.mxu1 %v9586_v23  ;;  %6824 = vmatprep.subr.bf16.mxu0 %v9591_v44  ;;  %v9631_v44 = vld [vmem:[%s14027_s1 + $0x1ca4] ss:$16 sps:$4 sm:$0xff]  }
 0x1b1   :  { %6865 = vmatprep.subr.bf16.mxu1 %v9594_v45  ;;  %v9634_v45 = vld [vmem:[%s14027_s1 + $0x1ea4] ss:$16 sps:$4 sm:$0xff]  }
 0x1b3   :  { %6825 = vmatpush2.bf16.msra.mxu0 %v9589_v46 }
 0x1b4   :  { %6866 = vmatpush2.bf16.msra.mxu1 %v9592_v48  ;;  %6826 = vmatprep.subr.bf16.mxu0 %v9597_v49  ;;  %v9632_v49 = vld [vmem:[%s14027_s1 + $0x1ea0] ss:$16 sps:$4 sm:$0xff]  }
 0x1b5   :  { %6867 = vmatprep.subr.bf16.mxu1 %v9600_v50 }
 0x1b7   :  { %6827 = vmatpush2.bf16.msra.mxu0 %v9595_v52 }
 0x1b8   :  { %6868 = vmatpush2.bf16.msra.mxu1 %v9598_v53  ;;  %6828 = vmatprep.subr.bf16.mxu0 %v9603_v55 }
 0x1b9   :  { %6869 = vmatprep.subr.bf16.mxu1 %v9606_v56  ;;  %v9637_v56 = vld [vmem:[%s14027_s1 + $0x1c84] ss:$16 sps:$4 sm:$0xff]  }
 0x1bb   :  { %6829 = vmatpush2.bf16.msra.mxu0 %v9601_v57  ;;  %v9640_v57 = vld [vmem:[%s14027_s1 + $0x1e84] ss:$16 sps:$4 sm:$0xff]  }
 0x1bc   :  { %6870 = vmatpush2.bf16.msra.mxu1 %v9604_v58  ;;  %6830 = vmatprep.subr.bf16.mxu0 %v9609_v61  ;;  %v9635_v58 = vld [vmem:[%s14027_s1 + $0x1c80] ss:$16 sps:$4 sm:$0xff]  }
 0x1bd   :  { %6871 = vmatprep.subr.bf16.mxu1 %v9612_v62  ;;  %v9638_v61 = vld [vmem:[%s14027_s1 + $0x1e80] ss:$16 sps:$4 sm:$0xff]   ;;  %v9643_v62 = vld [vmem:[%s14027_s1 + $0x1c64] ss:$16 sps:$4 sm:$0xff]  }
 0x1bf   :  { %6831 = vmatpush2.bf16.msra.mxu0 %v9607_v5  ;;  %v9646_v5 = vld [vmem:[%s14027_s1 + $0x1e64] ss:$16 sps:$4 sm:$0xff]  }
 0x1c0   :  { %6872 = vmatpush2.bf16.msra.mxu1 %v9610_v8  ;;  %6882 = vmatprep.subr.bf16.mxu0 %v9619_v13  ;;  %v9641_v8 = vld [vmem:[%s14027_s1 + $0x1c60] ss:$16 sps:$4 sm:$0xff]  }
 0x1c1   :  { %6923 = vmatprep.subr.bf16.mxu1 %v9622_v14  ;;  %v9644_v13 = vld [vmem:[%s14027_s1 + $0x1e60] ss:$16 sps:$4 sm:$0xff]   ;;  %v9649_v14 = vld [vmem:[%s14027_s1 + $0x1c44] ss:$16 sps:$4 sm:$0xff]  }
 0x1c2   :  { %v6588_v34 = vpop.f32.mrf.mxu0  ;;  %6833 = vmatmul.mubr.bf16.vlgmr.msra.gmra.mxu0 %v12101_v21 }
 0x1c3   :  { %v6629_v28 = vpop.f32.mrf.mxu1  ;;  %6874 = vmatmul.mubr.bf16.vlgmr.msra.gmra.mxu1 %v12105_v29  ;;  %v6589_v41 = vadd.f32 %v6588_v34, %v11908_v27  ;;  %6883 = vmatpush1.bf16.msra.mxu0 %v9617_v26  ;;  %v9629_v27 = vld [vmem:[%s14027_s1 + $0x1ca0] ss:$16 sps:$4 sm:$0xff]   ;;  %v9652_v26 = vld [vmem:[%s14027_s1 + $0x1e44] ss:$16 sps:$4 sm:$0xff]  }
 0x1c4   :  { %6924 = vmatpush1.bf16.msra.mxu1 %v9620_v20  ;;  %v6590_v22 = vpop.f32.mrf.mxu0  ;;  %6884 = vmatprep.subr.bf16.mxu0 %v9625_v18  ;;  %v9647_v20 = vld [vmem:[%s14027_s1 + $0x1c40] ss:$16 sps:$4 sm:$0xff]  }
 0x1c5   :  { %v6631_v23 = vpop.f32.mrf.mxu1  ;;  %6925 = vmatprep.subr.bf16.mxu1 %v9628_v31  ;;  %v12136_v46 = vadd.f32 %v6629_v28, %v6589_v41  ;;  %v6591_v48 = vadd.f32 %v6590_v22, %v11919_v33  ;;  %6914 = vmatprep.mubr.bf16.mxu0 %v12121_v30  ;;  %v9650_v18 = vld [vmem:[%s14027_s1 + $0x1e40] ss:$16 sps:$4 sm:$0xff]   ;;  %v9655_v31 = vld [vmem:[%s14027_s1 + $0x1c24] ss:$16 sps:$4 sm:$0xff]  }
 0x1c6   :  { %6955 = vmatprep.mubr.bf16.mxu1 %v12125_v32  ;;  %v6592_v50 = vpop.f32.mrf.mxu0  ;;  %v9656_v34 = vld [vmem:[%s14027_s1 + $0x1e20] ss:$16 sps:$4 sm:$0xff]   ;;  %v9661_v28 = vld [vmem:[%s14027_s1 + $0x1c04] ss:$16 sps:$4 sm:$0xff]  }
 0x1c7   :  { %v6633_v52 = vpop.f32.mrf.mxu1  ;;  %v12147_v53 = vadd.f32 %v6631_v23, %v6591_v48  ;;  %6885 = vmatpush1.bf16.msra.mxu0 %v9623_v63  ;;  %v9658_v63 = vld [vmem:[%s14027_s1 + $0x1e24] ss:$16 sps:$4 sm:$0xff]   ;;  %v9659_v22 = vld [vmem:[%s14027_s1 + $0x1c00] ss:$16 sps:$4 sm:$0xff]  }
 0x1c8   :  { %6926 = vmatpush1.bf16.msra.mxu1 %v9626_v4  ;;  %v6593_v55 = vpop.f32.mrf.mxu0  ;;  %6886 = vmatprep.subr.bf16.mxu0 %v9631_v44  ;;  %v9653_v4 = vld [vmem:[%s14027_s1 + $0x1c20] ss:$16 sps:$4 sm:$0xff]   ;;  %v9664_v41 = vld [vmem:[%s14027_s1 + $0x1e04] ss:$16 sps:$4 sm:$0xff]  }
 0x1c9   :  { %v6634_v33 = vpop.f32.mrf.mxu1  ;;  %6927 = vmatprep.subr.bf16.mxu1 %v9634_v45  ;;  %v9662_v23 = vld [vmem:[%s14027_s1 + $0x1e00] ss:$16 sps:$4 sm:$0xff]   ;;  %v9667_v44 = vld [vmem:[%s14027_s1 + $0x1de4] ss:$16 sps:$4 sm:$0xff]  }
 0x1ca   :  { %v9670_v45 = vld [vmem:[%s14027_s1 + $0x1fe4] ss:$16 sps:$4 sm:$0xff]   ;;  %v9665_v48 = vld [vmem:[%s14027_s1 + $0x1de0] ss:$16 sps:$4 sm:$0xff]  }
 0x1cb   :  { %6887 = vmatpush1.bf16.msra.mxu0 %v9629_v27  ;;  %v9668_v27 = vld [vmem:[%s14027_s1 + $0x1fe0] ss:$16 sps:$4 sm:$0xff]   ;;  %v9676_v50 = vld [vmem:[%s14027_s1 + $0x1fc4] ss:$16 sps:$4 sm:$0xff]  }
 0x1cc   :  { %6928 = vmatpush1.bf16.msra.mxu1 %v9632_v49  ;;  %6888 = vmatprep.subr.bf16.mxu0 %v9637_v56  ;;  %v9673_v49 = vld [vmem:[%s14027_s1 + $0x1dc4] ss:$16 sps:$4 sm:$0xff]   ;;  %v9671_v52 = vld [vmem:[%s14027_s1 + $0x1dc0] ss:$16 sps:$4 sm:$0xff]  }
 0x1cd   :  { %6929 = vmatprep.subr.bf16.mxu1 %v9640_v57  ;;  %v9674_v55 = vld [vmem:[%s14027_s1 + $0x1fc0] ss:$16 sps:$4 sm:$0xff]   ;;  %v9679_v33 = vld [vmem:[%s14027_s1 + $0x1da4] ss:$16 sps:$4 sm:$0xff]  }
 0x1ce   :  { %v9682_v56 = vld [vmem:[%s14027_s1 + $0x1fa4] ss:$16 sps:$4 sm:$0xff]   ;;  %v9677_v57 = vld [vmem:[%s14027_s1 + $0x1da0] ss:$16 sps:$4 sm:$0xff]  }
 0x1cf   :  { %6889 = vmatpush1.bf16.msra.mxu0 %v9635_v58  ;;  %v9680_v58 = vld [vmem:[%s14027_s1 + $0x1fa0] ss:$16 sps:$4 sm:$0xff]  }
 0x1d0   :  { %6930 = vmatpush1.bf16.msra.mxu1 %v9638_v61  ;;  %6890 = vmatprep.subr.bf16.mxu0 %v9643_v62  ;;  %v9685_v61 = vld [vmem:[%s14027_s1 + $0x1d84] ss:$16 sps:$4 sm:$0xff]  }
 0x1d1   :  { %6931 = vmatprep.subr.bf16.mxu1 %v9646_v5  ;;  %v9688_v62 = vld [vmem:[%s14027_s1 + $0x1f84] ss:$16 sps:$4 sm:$0xff]   ;;  %v9683_v5 = vld [vmem:[%s14027_s1 + $0x1d80] ss:$16 sps:$4 sm:$0xff]  }
 0x1d3   :  { %6891 = vmatpush1.bf16.msra.mxu0 %v9641_v8  ;;  %v9686_v8 = vld [vmem:[%s14027_s1 + $0x1f80] ss:$16 sps:$4 sm:$0xff]  }
 0x1d4   :  { %6932 = vmatpush1.bf16.msra.mxu1 %v9644_v13  ;;  %6892 = vmatprep.subr.bf16.mxu0 %v9649_v14  ;;  %v9691_v13 = vld [vmem:[%s14027_s1 + $0x1d64] ss:$16 sps:$4 sm:$0xff]  }
 0x1d5   :  { %6933 = vmatprep.subr.bf16.mxu1 %v9652_v26  ;;  %v9694_v14 = vld [vmem:[%s14027_s1 + $0x1f64] ss:$16 sps:$4 sm:$0xff]   ;;  %v9689_v26 = vld [vmem:[%s14027_s1 + $0x1d60] ss:$16 sps:$4 sm:$0xff]  }
 0x1d7   :  { %6893 = vmatpush1.bf16.msra.mxu0 %v9647_v20  ;;  %v9692_v20 = vld [vmem:[%s14027_s1 + $0x1f60] ss:$16 sps:$4 sm:$0xff]  }
 0x1d8   :  { %6934 = vmatpush1.bf16.msra.mxu1 %v9650_v18  ;;  %6894 = vmatprep.subr.bf16.mxu0 %v9655_v31  ;;  %v9697_v18 = vld [vmem:[%s14027_s1 + $0x1d44] ss:$16 sps:$4 sm:$0xff]  }
 0x1d9   :  { %6935 = vmatprep.subr.bf16.mxu1 %v9658_v63  ;;  %v9700_v31 = vld [vmem:[%s14027_s1 + $0x1f44] ss:$16 sps:$4 sm:$0xff]   ;;  %v9695_v63 = vld [vmem:[%s14027_s1 + $0x1d40] ss:$16 sps:$4 sm:$0xff]  }
 0x1db   :  { %6895 = vmatpush1.bf16.msra.mxu0 %v9653_v4  ;;  %v9698_v4 = vld [vmem:[%s14027_s1 + $0x1f40] ss:$16 sps:$4 sm:$0xff]  }
 0x1dc   :  { %6936 = vmatpush1.bf16.msra.mxu1 %v9656_v34  ;;  %6896 = vmatprep.subr.bf16.mxu0 %v9661_v28  ;;  %v9703_v34 = vld [vmem:[%s14027_s1 + $0x1d24] ss:$16 sps:$4 sm:$0xff]  }
 0x1dd   :  { %6937 = vmatprep.subr.bf16.mxu1 %v9664_v41  ;;  %v9706_v28 = vld [vmem:[%s14027_s1 + $0x1f24] ss:$16 sps:$4 sm:$0xff]   ;;  %v9701_v41 = vld [vmem:[%s14027_s1 + $0x1d20] ss:$16 sps:$4 sm:$0xff]  }
 0x1df   :  { %6897 = vmatpush1.bf16.msra.mxu0 %v9659_v22  ;;  %v9704_v22 = vld [vmem:[%s14027_s1 + $0x1f20] ss:$16 sps:$4 sm:$0xff]  }
 0x1e0   :  { %6938 = vmatpush1.bf16.msra.mxu1 %v9662_v23  ;;  %6898 = vmatprep.subr.bf16.mxu0 %v9667_v44  ;;  %v9709_v23 = vld [vmem:[%s14027_s1 + $0x1d04] ss:$16 sps:$4 sm:$0xff]  }
 0x1e1   :  { %6939 = vmatprep.subr.bf16.mxu1 %v9670_v45  ;;  %v9712_v44 = vld [vmem:[%s14027_s1 + $0x1f04] ss:$16 sps:$4 sm:$0xff]   ;;  %v9707_v45 = vld [vmem:[%s14027_s1 + $0x1d00] ss:$16 sps:$4 sm:$0xff]  }
 0x1e3   :  { %6899 = vmatpush2.bf16.msra.mxu0 %v9665_v48  ;;  %v9710_v48 = vld [vmem:[%s14027_s1 + $0x1f00] ss:$16 sps:$4 sm:$0xff]  }
 0x1e4   :  { %6940 = vmatpush2.bf16.msra.mxu1 %v9668_v27  ;;  %6900 = vmatprep.subr.bf16.mxu0 %v9673_v49  ;;  %v9719_v27 = vld [vmem:[%s14027_s1 + $0xec] ss:$16 sps:$4 sm:$0xff]  }
 0x1e5   :  { %6941 = vmatprep.subr.bf16.mxu1 %v9676_v50  ;;  %v9722_v49 = vld [vmem:[%s14027_s1 + $0x2ec] ss:$16 sps:$4 sm:$0xff]   ;;  %v9717_v50 = vld [vmem:[%s14027_s1 + $0xe8] ss:$16 sps:$4 sm:$0xff]  }
 0x1e7   :  { %6901 = vmatpush2.bf16.msra.mxu0 %v9671_v52  ;;  %v9720_v52 = vld [vmem:[%s14027_s1 + $0x2e8] ss:$16 sps:$4 sm:$0xff]  }
 0x1e8   :  { %6942 = vmatpush2.bf16.msra.mxu1 %v9674_v55  ;;  %6902 = vmatprep.subr.bf16.mxu0 %v9679_v33  ;;  %v12319_v55 = vcombine.low %v12086_v15, %v12086_v15  ;;  %v12323_v33 = vcombine.low %v12091_v19, %v12091_v19  ;;  %v9723_v15 = vld [vmem:[%s14027_s1 + $0xc8] ss:$16 sps:$4 sm:$0xff]  }
 0x1e9   :  { %6943 = vmatprep.subr.bf16.mxu1 %v9682_v56  ;;  %v9725_v56 = vld [vmem:[%s14027_s1 + $0xcc] ss:$16 sps:$4 sm:$0xff]   ;;  %v9726_v19 = vld [vmem:[%s14027_s1 + $0x2c8] ss:$16 sps:$4 sm:$0xff]  }
 0x1eb   :  { %6903 = vmatpush2.bf16.msra.mxu0 %v9677_v57  ;;  %v9728_v57 = vld [vmem:[%s14027_s1 + $0x2cc] ss:$16 sps:$4 sm:$0xff]  }
 0x1ec   :  { %6944 = vmatpush2.bf16.msra.mxu1 %v9680_v58  ;;  %6904 = vmatprep.subr.bf16.mxu0 %v9685_v61 }
 0x1ed   :  { %6945 = vmatprep.subr.bf16.mxu1 %v9688_v62 }
 0x1ef   :  { %6905 = vmatpush2.bf16.msra.mxu0 %v9683_v5 }
 0x1f0   :  { %6946 = vmatpush2.bf16.msra.mxu1 %v9686_v8  ;;  %6906 = vmatprep.subr.bf16.mxu0 %v9691_v13  ;;  %v9731_v13 = vld [vmem:[%s14027_s1 + $0xac] ss:$16 sps:$4 sm:$0xff]  }
 0x1f1   :  { %6947 = vmatprep.subr.bf16.mxu1 %v9694_v14  ;;  %v9734_v14 = vld [vmem:[%s14027_s1 + $0x2ac] ss:$16 sps:$4 sm:$0xff]  }
 0x1f3   :  { %6907 = vmatpush2.bf16.msra.mxu0 %v9689_v26 }
 0x1f4   :  { %6948 = vmatpush2.bf16.msra.mxu1 %v9692_v20  ;;  %6908 = vmatprep.subr.bf16.mxu0 %v9697_v18  ;;  %v9732_v18 = vld [vmem:[%s14027_s1 + $0x2a8] ss:$16 sps:$4 sm:$0xff]  }
 0x1f5   :  { %6949 = vmatprep.subr.bf16.mxu1 %v9700_v31 }
 0x1f7   :  { %6909 = vmatpush2.bf16.msra.mxu0 %v9695_v63 }
 0x1f8   :  { %6950 = vmatpush2.bf16.msra.mxu1 %v9698_v4  ;;  %6910 = vmatprep.subr.bf16.mxu0 %v9703_v34 }
 0x1f9   :  { %6951 = vmatprep.subr.bf16.mxu1 %v9706_v28  ;;  %v9737_v28 = vld [vmem:[%s14027_s1 + $0x8c] ss:$16 sps:$4 sm:$0xff]  }
 0x1fb   :  { %6911 = vmatpush2.bf16.msra.mxu0 %v9701_v41  ;;  %v9738_v41 = vld [vmem:[%s14027_s1 + $0x288] ss:$16 sps:$4 sm:$0xff]  }
 0x1fc   :  { %6952 = vmatpush2.bf16.msra.mxu1 %v9704_v22  ;;  %6912 = vmatprep.subr.bf16.mxu0 %v9709_v23  ;;  %v9743_v22 = vld [vmem:[%s14027_s1 + $0x6c] ss:$16 sps:$4 sm:$0xff]  }
 0x1fd   :  { %6953 = vmatprep.subr.bf16.mxu1 %v9712_v44  ;;  %v9746_v23 = vld [vmem:[%s14027_s1 + $0x26c] ss:$16 sps:$4 sm:$0xff]   ;;  %v9741_v44 = vld [vmem:[%s14027_s1 + $0x68] ss:$16 sps:$4 sm:$0xff]  }
 0x1ff   :  { %6913 = vmatpush2.bf16.msra.mxu0 %v9707_v45  ;;  %v9744_v45 = vld [vmem:[%s14027_s1 + $0x268] ss:$16 sps:$4 sm:$0xff]  }
 0x200   :  { %6954 = vmatpush2.bf16.msra.mxu1 %v9710_v48  ;;  %6964 = vmatprep.subr.bf16.mxu0 %v9719_v27  ;;  %v9749_v48 = vld [vmem:[%s14027_s1 + $0x4c] ss:$16 sps:$4 sm:$0xff]  }
 0x201   :  { %7005 = vmatprep.subr.bf16.mxu1 %v9722_v49  ;;  %v9752_v27 = vld [vmem:[%s14027_s1 + $0x24c] ss:$16 sps:$4 sm:$0xff]   ;;  %v9747_v49 = vld [vmem:[%s14027_s1 + $0x48] ss:$16 sps:$4 sm:$0xff]  }
 0x202   :  { %v6670_v58 = vpop.f32.mrf.mxu0  ;;  %6915 = vmatmul.mubr.bf16.vlgmr.msra.gmra.mxu0 %v12319_v55 }
 0x203   :  { %v6711_v61 = vpop.f32.mrf.mxu1  ;;  %6956 = vmatmul.mubr.bf16.vlgmr.msra.gmra.mxu1 %v12323_v33  ;;  %v6671_v62 = vadd.f32 %v6670_v58, %v12136_v46  ;;  %6965 = vmatpush1.bf16.msra.mxu0 %v9717_v50  ;;  %v9729_v46 = vld [vmem:[%s14027_s1 + $0xa8] ss:$16 sps:$4 sm:$0xff]   ;;  %v9764_v58 = vld [vmem:[%s14027_s1 + $0x20c] ss:$16 sps:$4 sm:$0xff]  }
 0x204   :  { %7006 = vmatpush1.bf16.msra.mxu1 %v9720_v52  ;;  %v6672_v5 = vpop.f32.mrf.mxu0  ;;  %6966 = vmatprep.subr.bf16.mxu0 %v9725_v56  ;;  %v9750_v50 = vld [vmem:[%s14027_s1 + $0x248] ss:$16 sps:$4 sm:$0xff]   ;;  %v9755_v52 = vld [vmem:[%s14027_s1 + $0x2c] ss:$16 sps:$4 sm:$0xff]  }
 0x205   :  { %v6713_v8 = vpop.f32.mrf.mxu1  ;;  %7007 = vmatprep.subr.bf16.mxu1 %v9728_v57  ;;  %v12346_v26 = vadd.f32 %v6711_v61, %v6671_v62  ;;  %v6673_v20 = vadd.f32 %v6672_v5, %v12147_v53  ;;  %6996 = vmatprep.mubr.bf16.mxu0 %v10663_v47  ;;  %v9740_v47 = vld [vmem:[%s14027_s1 + $0x28c] ss:$16 sps:$4 sm:$0xff]   ;;  %v9753_v57 = vld [vmem:[%s14027_s1 + $0x28] ss:$16 sps:$4 sm:$0xff]  }
 0x206   :  { %7037 = vmatprep.mubr.bf16.mxu1 %v10674_v51  ;;  %v6674_v31 = vpop.f32.mrf.mxu0  ;;  %v9735_v51 = vld [vmem:[%s14027_s1 + $0x88] ss:$16 sps:$4 sm:$0xff]   ;;  %v9758_v56 = vld [vmem:[%s14027_s1 + $0x22c] ss:$16 sps:$4 sm:$0xff]  }
 0x207   :  { %v6715_v63 = vpop.f32.mrf.mxu1  ;;  %v12357_v4 = vadd.f32 %v6713_v8, %v6673_v20  ;;  %6967 = vmatpush1.bf16.msra.mxu0 %v9723_v15  ;;  %v9756_v15 = vld [vmem:[%s14027_s1 + $0x228] ss:$16 sps:$4 sm:$0xff]   ;;  %v9767_v5 = vld [vmem:[%s14027_s1 + $0x1ec] ss:$16 sps:$4 sm:$0xff]  }
 0x208   :  { %7008 = vmatpush1.bf16.msra.mxu1 %v9726_v19  ;;  %v6675_v34 = vpop.f32.mrf.mxu0  ;;  %6968 = vmatprep.subr.bf16.mxu0 %v9731_v13  ;;  %v9761_v19 = vld [vmem:[%s14027_s1 + $0xc] ss:$16 sps:$4 sm:$0xff]   ;;  %v9759_v61 = vld [vmem:[%s14027_s1 + $0x8] ss:$16 sps:$4 sm:$0xff]  }
 0x209   :  { %v6716_v53 = vpop.f32.mrf.mxu1  ;;  %7009 = vmatprep.subr.bf16.mxu1 %v9734_v14  ;;  %v9762_v62 = vld [vmem:[%s14027_s1 + $0x208] ss:$16 sps:$4 sm:$0xff]   ;;  %v9770_v8 = vld [vmem:[%s14027_s1 + $0x3ec] ss:$16 sps:$4 sm:$0xff]  }
 0x20a   :  { %v9765_v13 = vld [vmem:[%s14027_s1 + $0x1e8] ss:$16 sps:$4 sm:$0xff]   ;;  %v9773_v20 = vld [vmem:[%s14027_s1 + $0x1cc] ss:$16 sps:$4 sm:$0xff]  }
 0x20b   :  { %6969 = vmatpush1.bf16.msra.mxu0 %v9729_v46  ;;  %v9768_v14 = vld [vmem:[%s14027_s1 + $0x3e8] ss:$16 sps:$4 sm:$0xff]   ;;  %v9776_v46 = vld [vmem:[%s14027_s1 + $0x3cc] ss:$16 sps:$4 sm:$0xff]  }
 0x20c   :  { %7010 = vmatpush1.bf16.msra.mxu1 %v9732_v18  ;;  %6970 = vmatprep.subr.bf16.mxu0 %v9737_v28  ;;  %v9771_v18 = vld [vmem:[%s14027_s1 + $0x1c8] ss:$16 sps:$4 sm:$0xff]   ;;  %v9779_v63 = vld [vmem:[%s14027_s1 + $0x1ac] ss:$16 sps:$4 sm:$0xff]  }
 0x20d   :  { %7011 = vmatprep.subr.bf16.mxu1 %v9740_v47  ;;  %v9774_v31 = vld [vmem:[%s14027_s1 + $0x3c8] ss:$16 sps:$4 sm:$0xff]   ;;  %v9782_v34 = vld [vmem:[%s14027_s1 + $0x3ac] ss:$16 sps:$4 sm:$0xff]  }
 0x20e   :  { %v9777_v53 = vld [vmem:[%s14027_s1 + $0x1a8] ss:$16 sps:$4 sm:$0xff]   ;;  %v9785_v47 = vld [vmem:[%s14027_s1 + $0x18c] ss:$16 sps:$4 sm:$0xff]  }
 0x20f   :  { %6971 = vmatpush1.bf16.msra.mxu0 %v9735_v51  ;;  %v9780_v28 = vld [vmem:[%s14027_s1 + $0x3a8] ss:$16 sps:$4 sm:$0xff]   ;;  %v9788_v51 = vld [vmem:[%s14027_s1 + $0x38c] ss:$16 sps:$4 sm:$0xff]  }
 0x210   :  { %7012 = vmatpush1.bf16.msra.mxu1 %v9738_v41  ;;  %6972 = vmatprep.subr.bf16.mxu0 %v9743_v22  ;;  %v9783_v41 = vld [vmem:[%s14027_s1 + $0x188] ss:$16 sps:$4 sm:$0xff]  }
 0x211   :  { %7013 = vmatprep.subr.bf16.mxu1 %v9746_v23  ;;  %v9786_v22 = vld [vmem:[%s14027_s1 + $0x388] ss:$16 sps:$4 sm:$0xff]   ;;  %v9791_v23 = vld [vmem:[%s14027_s1 + $0x16c] ss:$16 sps:$4 sm:$0xff]  }
 0x213   :  { %6973 = vmatpush1.bf16.msra.mxu0 %v9741_v44  ;;  %v9794_v44 = vld [vmem:[%s14027_s1 + $0x36c] ss:$16 sps:$4 sm:$0xff]  }
 0x214   :  { %7014 = vmatpush1.bf16.msra.mxu1 %v9744_v45  ;;  %6974 = vmatprep.subr.bf16.mxu0 %v9749_v48  ;;  %v9789_v45 = vld [vmem:[%s14027_s1 + $0x168] ss:$16 sps:$4 sm:$0xff]  }
 0x215   :  { %7015 = vmatprep.subr.bf16.mxu1 %v9752_v27  ;;  %v9792_v48 = vld [vmem:[%s14027_s1 + $0x368] ss:$16 sps:$4 sm:$0xff]   ;;  %v9797_v27 = vld [vmem:[%s14027_s1 + $0x14c] ss:$16 sps:$4 sm:$0xff]  }
 0x217   :  { %6975 = vmatpush1.bf16.msra.mxu0 %v9747_v49  ;;  %v9800_v49 = vld [vmem:[%s14027_s1 + $0x34c] ss:$16 sps:$4 sm:$0xff]  }
 0x218   :  { %7016 = vmatpush1.bf16.msra.mxu1 %v9750_v50  ;;  %6976 = vmatprep.subr.bf16.mxu0 %v9755_v52  ;;  %v9795_v50 = vld [vmem:[%s14027_s1 + $0x148] ss:$16 sps:$4 sm:$0xff]  }
 0x219   :  { %7017 = vmatprep.subr.bf16.mxu1 %v9758_v56  ;;  %v9798_v52 = vld [vmem:[%s14027_s1 + $0x348] ss:$16 sps:$4 sm:$0xff]   ;;  %v9803_v56 = vld [vmem:[%s14027_s1 + $0x12c] ss:$16 sps:$4 sm:$0xff]  }
 0x21b   :  { %6977 = vmatpush1.bf16.msra.mxu0 %v9753_v57  ;;  %v9806_v57 = vld [vmem:[%s14027_s1 + $0x32c] ss:$16 sps:$4 sm:$0xff]  }
 0x21c   :  { %7018 = vmatpush1.bf16.msra.mxu1 %v9756_v15  ;;  %6978 = vmatprep.subr.bf16.mxu0 %v9761_v19  ;;  %v9801_v15 = vld [vmem:[%s14027_s1 + $0x128] ss:$16 sps:$4 sm:$0xff]  }
 0x21d   :  { %7019 = vmatprep.subr.bf16.mxu1 %v9764_v58  ;;  %v9804_v19 = vld [vmem:[%s14027_s1 + $0x328] ss:$16 sps:$4 sm:$0xff]   ;;  %v9809_v58 = vld [vmem:[%s14027_s1 + $0x10c] ss:$16 sps:$4 sm:$0xff]  }
 0x21f   :  { %6979 = vmatpush1.bf16.msra.mxu0 %v9759_v61  ;;  %v9812_v61 = vld [vmem:[%s14027_s1 + $0x30c] ss:$16 sps:$4 sm:$0xff]  }
 0x220   :  { %7020 = vmatpush1.bf16.msra.mxu1 %v9762_v62  ;;  %6980 = vmatprep.subr.bf16.mxu0 %v9767_v5  ;;  %v9807_v62 = vld [vmem:[%s14027_s1 + $0x108] ss:$16 sps:$4 sm:$0xff]  }
 0x221   :  { %7021 = vmatprep.subr.bf16.mxu1 %v9770_v8  ;;  %v9810_v5 = vld [vmem:[%s14027_s1 + $0x308] ss:$16 sps:$4 sm:$0xff]   ;;  %v9815_v8 = vld [vmem:[%s14027_s1 + $0x4ec] ss:$16 sps:$4 sm:$0xff]  }
 0x223   :  { %6981 = vmatpush2.bf16.msra.mxu0 %v9765_v13  ;;  %v9818_v13 = vld [vmem:[%s14027_s1 + $0x6ec] ss:$16 sps:$4 sm:$0xff]  }
 0x224   :  { %7022 = vmatpush2.bf16.msra.mxu1 %v9768_v14  ;;  %6982 = vmatprep.subr.bf16.mxu0 %v9773_v20  ;;  %v9813_v14 = vld [vmem:[%s14027_s1 + $0x4e8] ss:$16 sps:$4 sm:$0xff]  }
 0x225   :  { %7023 = vmatprep.subr.bf16.mxu1 %v9776_v46  ;;  %v9816_v20 = vld [vmem:[%s14027_s1 + $0x6e8] ss:$16 sps:$4 sm:$0xff]   ;;  %v9821_v46 = vld [vmem:[%s14027_s1 + $0x4cc] ss:$16 sps:$4 sm:$0xff]  }
 0x227   :  { %6983 = vmatpush2.bf16.msra.mxu0 %v9771_v18  ;;  %v9824_v18 = vld [vmem:[%s14027_s1 + $0x6cc] ss:$16 sps:$4 sm:$0xff]  }
 0x228   :  { %7024 = vmatpush2.bf16.msra.mxu1 %v9774_v31  ;;  %6984 = vmatprep.subr.bf16.mxu0 %v9779_v63  ;;  %v9819_v31 = vld [vmem:[%s14027_s1 + $0x4c8] ss:$16 sps:$4 sm:$0xff]  }
 0x229   :  { %7025 = vmatprep.subr.bf16.mxu1 %v9782_v34  ;;  %v9822_v63 = vld [vmem:[%s14027_s1 + $0x6c8] ss:$16 sps:$4 sm:$0xff]  }
 0x22b   :  { %6985 = vmatpush2.bf16.msra.mxu0 %v9777_v53 }
 0x22c   :  { %7026 = vmatpush2.bf16.msra.mxu1 %v9780_v28  ;;  %6986 = vmatprep.subr.bf16.mxu0 %v9785_v47  ;;  %v9827_v28 = vld [vmem:[%s14027_s1 + $0x4ac] ss:$16 sps:$4 sm:$0xff]  }
 0x22d   :  { %7027 = vmatprep.subr.bf16.mxu1 %v9788_v51  ;;  %v9830_v47 = vld [vmem:[%s14027_s1 + $0x6ac] ss:$16 sps:$4 sm:$0xff]  }
 0x22f   :  { %6987 = vmatpush2.bf16.msra.mxu0 %v9783_v41 }
 0x230   :  { %7028 = vmatpush2.bf16.msra.mxu1 %v9786_v22  ;;  %6988 = vmatprep.subr.bf16.mxu0 %v9791_v23 }
 0x231   :  { %7029 = vmatprep.subr.bf16.mxu1 %v9794_v44 }
 0x233   :  { %6989 = vmatpush2.bf16.msra.mxu0 %v9789_v45 }
 0x234   :  { %7030 = vmatpush2.bf16.msra.mxu1 %v9792_v48  ;;  %6990 = vmatprep.subr.bf16.mxu0 %v9797_v27  ;;  %v9828_v48 = vld [vmem:[%s14027_s1 + $0x6a8] ss:$16 sps:$4 sm:$0xff]  }
 0x235   :  { %7031 = vmatprep.subr.bf16.mxu1 %v9800_v49  ;;  %v9831_v49 = vld [vmem:[%s14027_s1 + $0x488] ss:$16 sps:$4 sm:$0xff]  }
 0x237   :  { %6991 = vmatpush2.bf16.msra.mxu0 %v9795_v50  ;;  %v9834_v50 = vld [vmem:[%s14027_s1 + $0x688] ss:$16 sps:$4 sm:$0xff]  }
 0x238   :  { %7032 = vmatpush2.bf16.msra.mxu1 %v9798_v52  ;;  %6992 = vmatprep.subr.bf16.mxu0 %v9803_v56  ;;  %v9839_v52 = vld [vmem:[%s14027_s1 + $0x46c] ss:$16 sps:$4 sm:$0xff]  }
 0x239   :  { %7033 = vmatprep.subr.bf16.mxu1 %v9806_v57  ;;  %v9842_v56 = vld [vmem:[%s14027_s1 + $0x66c] ss:$16 sps:$4 sm:$0xff]   ;;  %v9837_v57 = vld [vmem:[%s14027_s1 + $0x468] ss:$16 sps:$4 sm:$0xff]  }
 0x23b   :  { %6993 = vmatpush2.bf16.msra.mxu0 %v9801_v15  ;;  %v9840_v15 = vld [vmem:[%s14027_s1 + $0x668] ss:$16 sps:$4 sm:$0xff]  }
 0x23c   :  { %7034 = vmatpush2.bf16.msra.mxu1 %v9804_v19  ;;  %6994 = vmatprep.subr.bf16.mxu0 %v9809_v58  ;;  %v9845_v19 = vld [vmem:[%s14027_s1 + $0x44c] ss:$16 sps:$4 sm:$0xff]  }
 0x23d   :  { %7035 = vmatprep.subr.bf16.mxu1 %v9812_v61  ;;  %v9848_v58 = vld [vmem:[%s14027_s1 + $0x64c] ss:$16 sps:$4 sm:$0xff]   ;;  %v9843_v61 = vld [vmem:[%s14027_s1 + $0x448] ss:$16 sps:$4 sm:$0xff]  }
 0x23f   :  { %6995 = vmatpush2.bf16.msra.mxu0 %v9807_v62  ;;  %v9846_v62 = vld [vmem:[%s14027_s1 + $0x648] ss:$16 sps:$4 sm:$0xff]  }
 0x240   :  { %7036 = vmatpush2.bf16.msra.mxu1 %v9810_v5  ;;  %7046 = vmatprep.subr.bf16.mxu0 %v9815_v8  ;;  %v9851_v5 = vld [vmem:[%s14027_s1 + $0x42c] ss:$16 sps:$4 sm:$0xff]  }
 0x241   :  { %7087 = vmatprep.subr.bf16.mxu1 %v9818_v13  ;;  %v9854_v8 = vld [vmem:[%s14027_s1 + $0x62c] ss:$16 sps:$4 sm:$0xff]   ;;  %v9849_v13 = vld [vmem:[%s14027_s1 + $0x428] ss:$16 sps:$4 sm:$0xff]  }
 0x242   :  { %v6752_v34 = vpop.f32.mrf.mxu0  ;;  %6997 = vmatmul.mubr.bf16.vlgmr.msra.gmra.mxu0 %v10732_v6 }
 0x243   :  { %v6793_v53 = vpop.f32.mrf.mxu1  ;;  %7038 = vmatmul.mubr.bf16.vlgmr.msra.gmra.mxu1 %v10734_v7  ;;  %v6753_v51 = vadd.f32 %v6752_v34, %v12346_v26  ;;  %7047 = vmatpush1.bf16.msra.mxu0 %v9813_v14  ;;  %v9825_v26 = vld [vmem:[%s14027_s1 + $0x4a8] ss:$16 sps:$4 sm:$0xff]   ;;  %v9866_v34 = vld [vmem:[%s14027_s1 + $0x7ec] ss:$16 sps:$4 sm:$0xff]  }
 0x244   :  { %7088 = vmatpush1.bf16.msra.mxu1 %v9816_v20  ;;  %v6754_v41 = vpop.f32.mrf.mxu0  ;;  %7048 = vmatprep.subr.bf16.mxu0 %v9821_v46  ;;  %v9852_v14 = vld [vmem:[%s14027_s1 + $0x628] ss:$16 sps:$4 sm:$0xff]   ;;  %v9857_v20 = vld [vmem:[%s14027_s1 + $0x40c] ss:$16 sps:$4 sm:$0xff]  }
 0x245   :  { %v6795_v22 = vpop.f32.mrf.mxu1  ;;  %7089 = vmatprep.subr.bf16.mxu1 %v9824_v18  ;;  %v12548_v23 = vadd.f32 %v6793_v53, %v6753_v51  ;;  %v6755_v6 = vadd.f32 %v6754_v41, %v12357_v4  ;;  %7078 = vmatprep.mubr.bf16.mxu0 %v10828_v36  ;;  %v9833_v36 = vld [vmem:[%s14027_s1 + $0x48c] ss:$16 sps:$4 sm:$0xff]   ;;  %v9855_v18 = vld [vmem:[%s14027_s1 + $0x408] ss:$16 sps:$4 sm:$0xff]  }
 0x246   :  { %7119 = vmatprep.mubr.bf16.mxu1 %v10832_v37  ;;  %v6756_v7 = vpop.f32.mrf.mxu0  ;;  %v9836_v37 = vld [vmem:[%s14027_s1 + $0x68c] ss:$16 sps:$4 sm:$0xff]   ;;  %v9861_v53 = vld [vmem:[%s14027_s1 + $0x5e8] ss:$16 sps:$4 sm:$0xff]  }
 0x247   :  { %v6797_v44 = vpop.f32.mrf.mxu1  ;;  %v12553_v45 = vadd.f32 %v6795_v22, %v6755_v6  ;;  %7049 = vmatpush1.bf16.msra.mxu0 %v9819_v31  ;;  %v9860_v46 = vld [vmem:[%s14027_s1 + $0x60c] ss:$16 sps:$4 sm:$0xff]   ;;  %v9858_v31 = vld [vmem:[%s14027_s1 + $0x608] ss:$16 sps:$4 sm:$0xff]  }
 0x248   :  { %7090 = vmatpush1.bf16.msra.mxu1 %v9822_v63  ;;  %v6757_v27 = vpop.f32.mrf.mxu0  ;;  %7050 = vmatprep.subr.bf16.mxu0 %v9827_v28  ;;  %v9863_v63 = vld [vmem:[%s14027_s1 + $0x5ec] ss:$16 sps:$4 sm:$0xff]   ;;  %v9864_v28 = vld [vmem:[%s14027_s1 + $0x7e8] ss:$16 sps:$4 sm:$0xff]  }
 0x249   :  { %v6798_v4 = vpop.f32.mrf.mxu1  ;;  %7091 = vmatprep.subr.bf16.mxu1 %v9830_v47  ;;  %v9869_v47 = vld [vmem:[%s14027_s1 + $0x5cc] ss:$16 sps:$4 sm:$0xff]   ;;  %v9867_v41 = vld [vmem:[%s14027_s1 + $0x5c8] ss:$16 sps:$4 sm:$0xff]  }
 0x24a   :  { %v9872_v51 = vld [vmem:[%s14027_s1 + $0x7cc] ss:$16 sps:$4 sm:$0xff]   ;;  %v9870_v22 = vld [vmem:[%s14027_s1 + $0x7c8] ss:$16 sps:$4 sm:$0xff]  }
 0x24b   :  { %7051 = vmatpush1.bf16.msra.mxu0 %v9825_v26  ;;  %v9875_v6 = vld [vmem:[%s14027_s1 + $0x5ac] ss:$16 sps:$4 sm:$0xff]   ;;  %v9873_v44 = vld [vmem:[%s14027_s1 + $0x5a8] ss:$16 sps:$4 sm:$0xff]  }
 0x24c   :  { %7092 = vmatpush1.bf16.msra.mxu1 %v9828_v48  ;;  %7052 = vmatprep.subr.bf16.mxu0 %v9833_v36  ;;  %v9878_v7 = vld [vmem:[%s14027_s1 + $0x7ac] ss:$16 sps:$4 sm:$0xff]   ;;  %v9876_v26 = vld [vmem:[%s14027_s1 + $0x7a8] ss:$16 sps:$4 sm:$0xff]  }
 0x24d   :  { %7093 = vmatprep.subr.bf16.mxu1 %v9836_v37  ;;  %v9881_v48 = vld [vmem:[%s14027_s1 + $0x58c] ss:$16 sps:$4 sm:$0xff]   ;;  %v9879_v4 = vld [vmem:[%s14027_s1 + $0x588] ss:$16 sps:$4 sm:$0xff]  }
 0x24e   :  { %v9884_v27 = vld [vmem:[%s14027_s1 + $0x78c] ss:$16 sps:$4 sm:$0xff]   ;;  %v9882_v36 = vld [vmem:[%s14027_s1 + $0x788] ss:$16 sps:$4 sm:$0xff]  }
 0x24f   :  { %7053 = vmatpush1.bf16.msra.mxu0 %v9831_v49  ;;  %v9887_v37 = vld [vmem:[%s14027_s1 + $0x56c] ss:$16 sps:$4 sm:$0xff]  }
 0x250   :  { %7094 = vmatpush1.bf16.msra.mxu1 %v9834_v50  ;;  %7054 = vmatprep.subr.bf16.mxu0 %v9839_v52  ;;  %v9890_v49 = vld [vmem:[%s14027_s1 + $0x76c] ss:$16 sps:$4 sm:$0xff]   ;;  %v9885_v50 = vld [vmem:[%s14027_s1 + $0x568] ss:$16 sps:$4 sm:$0xff]  }
 0x251   :  { %7095 = vmatprep.subr.bf16.mxu1 %v9842_v56  ;;  %v9888_v52 = vld [vmem:[%s14027_s1 + $0x768] ss:$16 sps:$4 sm:$0xff]   ;;  %v9893_v56 = vld [vmem:[%s14027_s1 + $0x54c] ss:$16 sps:$4 sm:$0xff]  }
 0x253   :  { %7055 = vmatpush1.bf16.msra.mxu0 %v9837_v57  ;;  %v9896_v57 = vld [vmem:[%s14027_s1 + $0x74c] ss:$16 sps:$4 sm:$0xff]  }
 0x254   :  { %7096 = vmatpush1.bf16.msra.mxu1 %v9840_v15  ;;  %7056 = vmatprep.subr.bf16.mxu0 %v9845_v19  ;;  %v9891_v15 = vld [vmem:[%s14027_s1 + $0x548] ss:$16 sps:$4 sm:$0xff]  }
 0x255   :  { %7097 = vmatprep.subr.bf16.mxu1 %v9848_v58  ;;  %v9894_v19 = vld [vmem:[%s14027_s1 + $0x748] ss:$16 sps:$4 sm:$0xff]   ;;  %v9899_v58 = vld [vmem:[%s14027_s1 + $0x52c] ss:$16 sps:$4 sm:$0xff]  }
 0x257   :  { %7057 = vmatpush1.bf16.msra.mxu0 %v9843_v61  ;;  %v9902_v61 = vld [vmem:[%s14027_s1 + $0x72c] ss:$16 sps:$4 sm:$0xff]  }
 0x258   :  { %7098 = vmatpush1.bf16.msra.mxu1 %v9846_v62  ;;  %7058 = vmatprep.subr.bf16.mxu0 %v9851_v5  ;;  %v9897_v62 = vld [vmem:[%s14027_s1 + $0x528] ss:$16 sps:$4 sm:$0xff]  }
 0x259   :  { %7099 = vmatprep.subr.bf16.mxu1 %v9854_v8  ;;  %v9900_v5 = vld [vmem:[%s14027_s1 + $0x728] ss:$16 sps:$4 sm:$0xff]   ;;  %v9905_v8 = vld [vmem:[%s14027_s1 + $0x50c] ss:$16 sps:$4 sm:$0xff]  }
 0x25b   :  { %7059 = vmatpush1.bf16.msra.mxu0 %v9849_v13  ;;  %v9908_v13 = vld [vmem:[%s14027_s1 + $0x70c] ss:$16 sps:$4 sm:$0xff]  }
 0x25c   :  { %7100 = vmatpush1.bf16.msra.mxu1 %v9852_v14  ;;  %7060 = vmatprep.subr.bf16.mxu0 %v9857_v20  ;;  %v9903_v14 = vld [vmem:[%s14027_s1 + $0x508] ss:$16 sps:$4 sm:$0xff]  }
 0x25d   :  { %7101 = vmatprep.subr.bf16.mxu1 %v9860_v46  ;;  %v9906_v20 = vld [vmem:[%s14027_s1 + $0x708] ss:$16 sps:$4 sm:$0xff]   ;;  %v9911_v46 = vld [vmem:[%s14027_s1 + $0x8ec] ss:$16 sps:$4 sm:$0xff]  }
 0x25f   :  { %7061 = vmatpush1.bf16.msra.mxu0 %v9855_v18  ;;  %v9914_v18 = vld [vmem:[%s14027_s1 + $0xaec] ss:$16 sps:$4 sm:$0xff]  }
 0x260   :  { %7102 = vmatpush1.bf16.msra.mxu1 %v9858_v31  ;;  %7062 = vmatprep.subr.bf16.mxu0 %v9863_v63  ;;  %v9909_v31 = vld [vmem:[%s14027_s1 + $0x8e8] ss:$16 sps:$4 sm:$0xff]  }
 0x261   :  { %7103 = vmatprep.subr.bf16.mxu1 %v9866_v34  ;;  %v9912_v63 = vld [vmem:[%s14027_s1 + $0xae8] ss:$16 sps:$4 sm:$0xff]   ;;  %v9917_v34 = vld [vmem:[%s14027_s1 + $0x8cc] ss:$16 sps:$4 sm:$0xff]  }
 0x263   :  { %7063 = vmatpush2.bf16.msra.mxu0 %v9861_v53  ;;  %v9920_v53 = vld [vmem:[%s14027_s1 + $0xacc] ss:$16 sps:$4 sm:$0xff]  }
 0x264   :  { %7104 = vmatpush2.bf16.msra.mxu1 %v9864_v28  ;;  %7064 = vmatprep.subr.bf16.mxu0 %v9869_v47 }
 0x265   :  { %7105 = vmatprep.subr.bf16.mxu1 %v9872_v51  ;;  %v9915_v51 = vld [vmem:[%s14027_s1 + $0x8c8] ss:$16 sps:$4 sm:$0xff]  }
 0x267   :  { %7065 = vmatpush2.bf16.msra.mxu0 %v9867_v41  ;;  %v9918_v41 = vld [vmem:[%s14027_s1 + $0xac8] ss:$16 sps:$4 sm:$0xff]  }
 0x268   :  { %7106 = vmatpush2.bf16.msra.mxu1 %v9870_v22  ;;  %7066 = vmatprep.subr.bf16.mxu0 %v9875_v6 }
 0x269   :  { %7107 = vmatprep.subr.bf16.mxu1 %v9878_v7 }
 0x26b   :  { %7067 = vmatpush2.bf16.msra.mxu0 %v9873_v44 }
 0x26c   :  { %7108 = vmatpush2.bf16.msra.mxu1 %v9876_v26  ;;  %7068 = vmatprep.subr.bf16.mxu0 %v9881_v48 }
 0x26d   :  { %7109 = vmatprep.subr.bf16.mxu1 %v9884_v27  ;;  %v9921_v27 = vld [vmem:[%s14027_s1 + $0x8a8] ss:$16 sps:$4 sm:$0xff]  }
 0x26f   :  { %7069 = vmatpush2.bf16.msra.mxu0 %v9879_v4  ;;  %v9924_v4 = vld [vmem:[%s14027_s1 + $0xaa8] ss:$16 sps:$4 sm:$0xff]  }
 0x270   :  { %7110 = vmatpush2.bf16.msra.mxu1 %v9882_v36  ;;  %7070 = vmatprep.subr.bf16.mxu0 %v9887_v37  ;;  %v9927_v37 = vld [vmem:[%s14027_s1 + $0x888] ss:$16 sps:$4 sm:$0xff]  }
 0x271   :  { %7111 = vmatprep.subr.bf16.mxu1 %v9890_v49  ;;  %v9930_v49 = vld [vmem:[%s14027_s1 + $0xa88] ss:$16 sps:$4 sm:$0xff]  }
 0x273   :  { %7071 = vmatpush2.bf16.msra.mxu0 %v9885_v50  ;;  %v9935_v50 = vld [vmem:[%s14027_s1 + $0x86c] ss:$16 sps:$4 sm:$0xff]  }
 0x274   :  { %7112 = vmatpush2.bf16.msra.mxu1 %v9888_v52  ;;  %7072 = vmatprep.subr.bf16.mxu0 %v9893_v56  ;;  %v9938_v52 = vld [vmem:[%s14027_s1 + $0xa6c] ss:$16 sps:$4 sm:$0xff]   ;;  %v9933_v56 = vld [vmem:[%s14027_s1 + $0x868] ss:$16 sps:$4 sm:$0xff]  }
 0x275   :  { %7113 = vmatprep.subr.bf16.mxu1 %v9896_v57  ;;  %v9936_v57 = vld [vmem:[%s14027_s1 + $0xa68] ss:$16 sps:$4 sm:$0xff]  }
 0x277   :  { %7073 = vmatpush2.bf16.msra.mxu0 %v9891_v15  ;;  %v9941_v15 = vld [vmem:[%s14027_s1 + $0x84c] ss:$16 sps:$4 sm:$0xff]  }
 0x278   :  { %7114 = vmatpush2.bf16.msra.mxu1 %v9894_v19  ;;  %7074 = vmatprep.subr.bf16.mxu0 %v9899_v58  ;;  %v9944_v19 = vld [vmem:[%s14027_s1 + $0xa4c] ss:$16 sps:$4 sm:$0xff]   ;;  %v9939_v58 = vld [vmem:[%s14027_s1 + $0x848] ss:$16 sps:$4 sm:$0xff]  }
 0x279   :  { %7115 = vmatprep.subr.bf16.mxu1 %v9902_v61  ;;  %v9942_v61 = vld [vmem:[%s14027_s1 + $0xa48] ss:$16 sps:$4 sm:$0xff]  }
 0x27b   :  { %7075 = vmatpush2.bf16.msra.mxu0 %v9897_v62  ;;  %v9947_v62 = vld [vmem:[%s14027_s1 + $0x82c] ss:$16 sps:$4 sm:$0xff]  }
 0x27c   :  { %7116 = vmatpush2.bf16.msra.mxu1 %v9900_v5  ;;  %7076 = vmatprep.subr.bf16.mxu0 %v9905_v8  ;;  %v9950_v5 = vld [vmem:[%s14027_s1 + $0xa2c] ss:$16 sps:$4 sm:$0xff]   ;;  %v9945_v8 = vld [vmem:[%s14027_s1 + $0x828] ss:$16 sps:$4 sm:$0xff]  }
 0x27d   :  { %7117 = vmatprep.subr.bf16.mxu1 %v9908_v13  ;;  %v9948_v13 = vld [vmem:[%s14027_s1 + $0xa28] ss:$16 sps:$4 sm:$0xff]  }
 0x27f   :  { %7077 = vmatpush2.bf16.msra.mxu0 %v9903_v14  ;;  %v9953_v14 = vld [vmem:[%s14027_s1 + $0x80c] ss:$16 sps:$4 sm:$0xff]  }
 0x280   :  { %7118 = vmatpush2.bf16.msra.mxu1 %v9906_v20  ;;  %7128 = vmatprep.subr.bf16.mxu0 %v9911_v46  ;;  %v9956_v20 = vld [vmem:[%s14027_s1 + $0xa0c] ss:$16 sps:$4 sm:$0xff]   ;;  %v9951_v46 = vld [vmem:[%s14027_s1 + $0x808] ss:$16 sps:$4 sm:$0xff]  }
 0x281   :  { %7169 = vmatprep.subr.bf16.mxu1 %v9914_v18  ;;  %v9954_v18 = vld [vmem:[%s14027_s1 + $0xa08] ss:$16 sps:$4 sm:$0xff]  }
 0x282   :  { %v12735_v28 = vpop.f32.mrf.mxu0  ;;  %7079 = vmatmul.mubr.bf16.vlgmr.msra.gmra.mxu0 %v10952_v16  ;;  %v9923_v16 = vld [vmem:[%s14027_s1 + $0x8ac] ss:$16 sps:$4 sm:$0xff]  }
 0x283   :  { %v12737_v47 = vpop.f32.mrf.mxu1  ;;  %7120 = vmatmul.mubr.bf16.vlgmr.msra.gmra.mxu1 %v10956_v17  ;;  %7129 = vmatpush1.bf16.msra.mxu0 %v9909_v31  ;;  %v9926_v17 = vld [vmem:[%s14027_s1 + $0xaac] ss:$16 sps:$4 sm:$0xff]  }
 0x284   :  { %7170 = vmatpush1.bf16.msra.mxu1 %v9912_v63  ;;  %v6836_v22 = vpop.f32.mrf.mxu0  ;;  %7130 = vmatprep.subr.bf16.mxu0 %v9917_v34  ;;  %v9959_v31 = vld [vmem:[%s14027_s1 + $0x9ec] ss:$16 sps:$4 sm:$0xff]   ;;  %v9957_v34 = vld [vmem:[%s14027_s1 + $0x9e8] ss:$16 sps:$4 sm:$0xff]  }
 0x285   :  { %v6877_v6 = vpop.f32.mrf.mxu1  ;;  %7171 = vmatprep.subr.bf16.mxu1 %v9920_v53  ;;  %v6837_v7 = vadd.f32 %v6836_v22, %v12553_v45  ;;  %7160 = vmatprep.mubr.bf16.mxu0 %v10982_v24  ;;  %v9929_v24 = vld [vmem:[%s14027_s1 + $0x88c] ss:$16 sps:$4 sm:$0xff]   ;;  %v9960_v53 = vld [vmem:[%s14027_s1 + $0xbe8] ss:$16 sps:$4 sm:$0xff]  }
 0x286   :  { %7201 = vmatprep.mubr.bf16.mxu1 %v10986_v25  ;;  %v6838_v44 = vpop.f32.mrf.mxu0  ;;  %v9932_v25 = vld [vmem:[%s14027_s1 + $0xa8c] ss:$16 sps:$4 sm:$0xff]   ;;  %v9963_v22 = vld [vmem:[%s14027_s1 + $0x9c8] ss:$16 sps:$4 sm:$0xff]  }
 0x287   :  { %v6879_v26 = vpop.f32.mrf.mxu1  ;;  %v12756_v48 = vadd.f32 %v6877_v6, %v6837_v7  ;;  %7131 = vmatpush1.bf16.msra.mxu0 %v9915_v51  ;;  %v9962_v63 = vld [vmem:[%s14027_s1 + $0xbec] ss:$16 sps:$4 sm:$0xff]   ;;  %v9966_v6 = vld [vmem:[%s14027_s1 + $0xbc8] ss:$16 sps:$4 sm:$0xff]  }
 0x288   :  { %7172 = vmatpush1.bf16.msra.mxu1 %v9918_v41  ;;  %v6839_v36 = vpop.f32.mrf.mxu0  ;;  %7132 = vmatprep.subr.bf16.mxu0 %v9923_v16  ;;  %v9965_v51 = vld [vmem:[%s14027_s1 + $0x9cc] ss:$16 sps:$4 sm:$0xff]   ;;  %v9969_v7 = vld [vmem:[%s14027_s1 + $0x9a8] ss:$16 sps:$4 sm:$0xff]  }
 0x289   :  { %v6880_v45 = vpop.f32.mrf.mxu1  ;;  %7173 = vmatprep.subr.bf16.mxu1 %v9926_v17  ;;  %v9968_v41 = vld [vmem:[%s14027_s1 + $0xbcc] ss:$16 sps:$4 sm:$0xff]   ;;  %v9972_v44 = vld [vmem:[%s14027_s1 + $0xba8] ss:$16 sps:$4 sm:$0xff]  }
 0x28a   :  { %v9971_v16 = vld [vmem:[%s14027_s1 + $0x9ac] ss:$16 sps:$4 sm:$0xff]   ;;  %v9978_v36 = vld [vmem:[%s14027_s1 + $0xb88] ss:$16 sps:$4 sm:$0xff]  }
 0x28b   :  { %7133 = vmatpush1.bf16.msra.mxu0 %v9921_v27  ;;  %v9974_v17 = vld [vmem:[%s14027_s1 + $0xbac] ss:$16 sps:$4 sm:$0xff]  }
 0x28c   :  { %7174 = vmatpush1.bf16.msra.mxu1 %v9924_v4  ;;  %7134 = vmatprep.subr.bf16.mxu0 %v9929_v24  ;;  %v9977_v26 = vld [vmem:[%s14027_s1 + $0x98c] ss:$16 sps:$4 sm:$0xff]   ;;  %v9975_v4 = vld [vmem:[%s14027_s1 + $0x988] ss:$16 sps:$4 sm:$0xff]  }
 0x28d   :  { %7175 = vmatprep.subr.bf16.mxu1 %v9932_v25  ;;  %v9980_v27 = vld [vmem:[%s14027_s1 + $0xb8c] ss:$16 sps:$4 sm:$0xff]   ;;  %v9981_v25 = vld [vmem:[%s14027_s1 + $0x968] ss:$16 sps:$4 sm:$0xff]  }
 0x28e   :  { %v9983_v45 = vld [vmem:[%s14027_s1 + $0x96c] ss:$16 sps:$4 sm:$0xff]  }
 0x28f   :  { %7135 = vmatpush1.bf16.msra.mxu0 %v9927_v37  ;;  %v9986_v24 = vld [vmem:[%s14027_s1 + $0xb6c] ss:$16 sps:$4 sm:$0xff]   ;;  %v9984_v37 = vld [vmem:[%s14027_s1 + $0xb68] ss:$16 sps:$4 sm:$0xff]  }
 0x290   :  { %7176 = vmatpush1.bf16.msra.mxu1 %v9930_v49  ;;  %7136 = vmatprep.subr.bf16.mxu0 %v9935_v50  ;;  %v9989_v49 = vld [vmem:[%s14027_s1 + $0x94c] ss:$16 sps:$4 sm:$0xff]  }
 0x291   :  { %7177 = vmatprep.subr.bf16.mxu1 %v9938_v52  ;;  %v9992_v50 = vld [vmem:[%s14027_s1 + $0xb4c] ss:$16 sps:$4 sm:$0xff]   ;;  %v9987_v52 = vld [vmem:[%s14027_s1 + $0x948] ss:$16 sps:$4 sm:$0xff]  }
 0x293   :  { %7137 = vmatpush1.bf16.msra.mxu0 %v9933_v56  ;;  %v9990_v56 = vld [vmem:[%s14027_s1 + $0xb48] ss:$16 sps:$4 sm:$0xff]  }
 0x294   :  { %7178 = vmatpush1.bf16.msra.mxu1 %v9936_v57  ;;  %7138 = vmatprep.subr.bf16.mxu0 %v9941_v15  ;;  %v9995_v57 = vld [vmem:[%s14027_s1 + $0x92c] ss:$16 sps:$4 sm:$0xff]  }
 0x295   :  { %7179 = vmatprep.subr.bf16.mxu1 %v9944_v19  ;;  %v9998_v15 = vld [vmem:[%s14027_s1 + $0xb2c] ss:$16 sps:$4 sm:$0xff]   ;;  %v9993_v19 = vld [vmem:[%s14027_s1 + $0x928] ss:$16 sps:$4 sm:$0xff]  }
 0x297   :  { %7139 = vmatpush1.bf16.msra.mxu0 %v9939_v58  ;;  %v9996_v58 = vld [vmem:[%s14027_s1 + $0xb28] ss:$16 sps:$4 sm:$0xff]  }
 0x298   :  { %7180 = vmatpush1.bf16.msra.mxu1 %v9942_v61  ;;  %7140 = vmatprep.subr.bf16.mxu0 %v9947_v62  ;;  %v10001_v61 = vld [vmem:[%s14027_s1 + $0x90c] ss:$16 sps:$4 sm:$0xff]  }
 0x299   :  { %7181 = vmatprep.subr.bf16.mxu1 %v9950_v5  ;;  %v10004_v62 = vld [vmem:[%s14027_s1 + $0xb0c] ss:$16 sps:$4 sm:$0xff]   ;;  %v9999_v5 = vld [vmem:[%s14027_s1 + $0x908] ss:$16 sps:$4 sm:$0xff]  }
 0x29b   :  { %7141 = vmatpush1.bf16.msra.mxu0 %v9945_v8  ;;  %v10002_v8 = vld [vmem:[%s14027_s1 + $0xb08] ss:$16 sps:$4 sm:$0xff]  }
 0x29c   :  { %7182 = vmatpush1.bf16.msra.mxu1 %v9948_v13  ;;  %7142 = vmatprep.subr.bf16.mxu0 %v9953_v14  ;;  %v10007_v13 = vld [vmem:[%s14027_s1 + $0xcec] ss:$16 sps:$4 sm:$0xff]  }
 0x29d   :  { %7183 = vmatprep.subr.bf16.mxu1 %v9956_v20  ;;  %v10010_v14 = vld [vmem:[%s14027_s1 + $0xeec] ss:$16 sps:$4 sm:$0xff]   ;;  %v6835_v20 = vadd.f32 %v12735_v28, %v12548_v23 }
 0x29e   :  { %v10016_v23 = vld [vmem:[%s14027_s1 + $0xecc] ss:$16 sps:$4 sm:$0xff]  }
 0x29f   :  { %7143 = vmatpush1.bf16.msra.mxu0 %v9951_v46  ;;  %v10005_v46 = vld [vmem:[%s14027_s1 + $0xce8] ss:$16 sps:$4 sm:$0xff]   ;;  %v6876_v28 = vadd.f32 %v12737_v47, %v6835_v20 }
 0x2a0   :  { %7184 = vmatpush1.bf16.msra.mxu1 %v9954_v18  ;;  %7144 = vmatprep.subr.bf16.mxu0 %v9959_v31  ;;  %v10008_v18 = vld [vmem:[%s14027_s1 + $0xee8] ss:$16 sps:$4 sm:$0xff]   ;;  %v10013_v31 = vld [vmem:[%s14027_s1 + $0xccc] ss:$16 sps:$4 sm:$0xff]  }
 0x2a1   :  { %7185 = vmatprep.subr.bf16.mxu1 %v9962_v63 }
 0x2a3   :  { %7145 = vmatpush2.bf16.msra.mxu0 %v9957_v34 }
 0x2a4   :  { %7186 = vmatpush2.bf16.msra.mxu1 %v9960_v53  ;;  %7146 = vmatprep.subr.bf16.mxu0 %v9965_v51  ;;  %v10011_v51 = vld [vmem:[%s14027_s1 + $0xcc8] ss:$16 sps:$4 sm:$0xff]  }
 0x2a5   :  { %7187 = vmatprep.subr.bf16.mxu1 %v9968_v41  ;;  %v10014_v41 = vld [vmem:[%s14027_s1 + $0xec8] ss:$16 sps:$4 sm:$0xff]  }
 0x2a7   :  { %7147 = vmatpush2.bf16.msra.mxu0 %v9963_v22 }
 0x2a8   :  { %7188 = vmatpush2.bf16.msra.mxu1 %v9966_v6  ;;  %7148 = vmatprep.subr.bf16.mxu0 %v9971_v16 }
 0x2a9   :  { %7189 = vmatprep.subr.bf16.mxu1 %v9974_v17 }
 0x2ab   :  { %7149 = vmatpush2.bf16.msra.mxu0 %v9969_v7 }
 0x2ac   :  { %7190 = vmatpush2.bf16.msra.mxu1 %v9972_v44  ;;  %7150 = vmatprep.subr.bf16.mxu0 %v9977_v26 }
 0x2ad   :  { %7191 = vmatprep.subr.bf16.mxu1 %v9980_v27 }
 0x2af   :  { %7151 = vmatpush2.bf16.msra.mxu0 %v9975_v4 }
 0x2b0   :  { %7192 = vmatpush2.bf16.msra.mxu1 %v9978_v36  ;;  %7152 = vmatprep.subr.bf16.mxu0 %v9983_v45 }
 0x2b1   :  { %7193 = vmatprep.subr.bf16.mxu1 %v9986_v24  ;;  %v10025_v24 = vld [vmem:[%s14027_s1 + $0xc8c] ss:$16 sps:$4 sm:$0xff]  }
 0x2b3   :  { %7153 = vmatpush2.bf16.msra.mxu0 %v9981_v25  ;;  %v10028_v25 = vld [vmem:[%s14027_s1 + $0xe8c] ss:$16 sps:$4 sm:$0xff]  }
 0x2b4   :  { %7194 = vmatpush2.bf16.msra.mxu1 %v9984_v37  ;;  %7154 = vmatprep.subr.bf16.mxu0 %v9989_v49 }
 0x2b5   :  { %7195 = vmatprep.subr.bf16.mxu1 %v9992_v50 }
 0x2b7   :  { %7155 = vmatpush2.bf16.msra.mxu0 %v9987_v52 }
 0x2b8   :  { %7196 = vmatpush2.bf16.msra.mxu1 %v9990_v56  ;;  %7156 = vmatprep.subr.bf16.mxu0 %v9995_v57 }
 0x2b9   :  { %7197 = vmatprep.subr.bf16.mxu1 %v9998_v15 }
 0x2bb   :  { %7157 = vmatpush2.bf16.msra.mxu0 %v9993_v19 }
 0x2bc   :  { %7198 = vmatpush2.bf16.msra.mxu1 %v9996_v58  ;;  %7158 = vmatprep.subr.bf16.mxu0 %v10001_v61 }
 0x2bd   :  { %7199 = vmatprep.subr.bf16.mxu1 %v10004_v62 }
 0x2bf   :  { %7159 = vmatpush2.bf16.msra.mxu0 %v9999_v5  ;;  %v10023_v5 = vld [vmem:[%s14027_s1 + $0xc88] ss:$16 sps:$4 sm:$0xff]  }
 0x2c0   :  { %7200 = vmatpush2.bf16.msra.mxu1 %v10002_v8  ;;  %7210 = vmatprep.subr.bf16.mxu0 %v10007_v13  ;;  %v10026_v8 = vld [vmem:[%s14027_s1 + $0xe88] ss:$16 sps:$4 sm:$0xff]  }
 0x2c1   :  { %7251 = vmatprep.subr.bf16.mxu1 %v10010_v14 }
 0x2c2   :  { %v6916_v63 = vpop.f32.mrf.mxu0  ;;  %7161 = vmatmul.mubr.bf16.vlgmr.msra.gmra.mxu0 %v11182_v38  ;;  %v10019_v38 = vld [vmem:[%s14027_s1 + $0xcac] ss:$16 sps:$4 sm:$0xff]  }
 0x2c3   :  { %v6957_v34 = vpop.f32.mrf.mxu1  ;;  %7202 = vmatmul.mubr.bf16.vlgmr.msra.gmra.mxu1 %v11186_v39  ;;  %v6917_v53 = vadd.f32 %v6916_v63, %v6876_v28  ;;  %7211 = vmatpush1.bf16.msra.mxu0 %v10005_v46  ;;  %v10022_v39 = vld [vmem:[%s14027_s1 + $0xeac] ss:$16 sps:$4 sm:$0xff]  }
 0x2c4   :  { %7252 = vmatpush1.bf16.msra.mxu1 %v10008_v18  ;;  %v6918_v22 = vpop.f32.mrf.mxu0  ;;  %7212 = vmatprep.subr.bf16.mxu0 %v10013_v31  ;;  %v10031_v18 = vld [vmem:[%s14027_s1 + $0xc6c] ss:$16 sps:$4 sm:$0xff]  }
 0x2c5   :  { %v6959_v47 = vpop.f32.mrf.mxu1  ;;  %7253 = vmatprep.subr.bf16.mxu1 %v10016_v23  ;;  %v12955_v6 = vadd.f32 %v6957_v34, %v6917_v53  ;;  %v6919_v16 = vadd.f32 %v6918_v22, %v12756_v48  ;;  %7242 = vmatprep.mubr.bf16.mxu0 %v11204_v42  ;;  %v10017_v42 = vld [vmem:[%s14027_s1 + $0xca8] ss:$16 sps:$4 sm:$0xff]   ;;  %v10034_v31 = vld [vmem:[%s14027_s1 + $0xe6c] ss:$16 sps:$4 sm:$0xff]  }
 0x2c6   :  { %7283 = vmatprep.mubr.bf16.mxu1 %v11208_v43  ;;  %v6920_v17 = vpop.f32.mrf.mxu0  ;;  %v10020_v43 = vld [vmem:[%s14027_s1 + $0xea8] ss:$16 sps:$4 sm:$0xff]  }
 0x2c7   :  { %v6961_v7 = vpop.f32.mrf.mxu1  ;;  %v7621_v44 = vsel %vm7620_vm0, %v12955_v6, 0.0  ;;  %v7649_v26 = vmul.f32 %v12955_v6, %v12955_v6  ;;  %v7733_v27 = vrot.slane %v12955_v6, 4  ;;  %v12965_v4 = vadd.f32 %v6959_v47, %v6919_v16  ;;  %7213 = vmatpush1.bf16.msra.mxu0 %v10011_v51  ;;  %v10029_v47 = vld [vmem:[%s14027_s1 + $0xc68] ss:$16 sps:$4 sm:$0xff]  }
 0x2c8   :  { %7254 = vmatpush1.bf16.msra.mxu1 %v10014_v41  ;;  %v7622_v48 = vrot.slane %v7621_v44, 4  ;;  %v6921_v36 = vpop.f32.mrf.mxu0  ;;  %7214 = vmatprep.subr.bf16.mxu0 %v10019_v38  ;;  %v10032_v7 = vld [vmem:[%s14027_s1 + $0xe68] ss:$16 sps:$4 sm:$0xff]  }
 0x2c9   :  { %v6962_v45 = vpop.f32.mrf.mxu1  ;;  %7255 = vmatprep.subr.bf16.mxu1 %v10022_v39  ;;  %v7653_v37 = vsel %vm7620_vm0, %v7649_v26, 0.0  ;;  %v7741_v49 = vsel %vm7620_vm0, %v7733_v27, 0.0  ;;  %v7773_v50 = vrot.slane %v7649_v26, 4  ;;  %v7628_v52 = vsel %vm7620_vm0, %v12965_v4, 0.0 }
 0x2ca   :  { %v7623_v56 = vadd.f32 %v7622_v48, %v7621_v44  ;;  %v7654_v57 = vrot.slane %v7653_v37, 4  ;;  %v7742_v15 = vrot.slane %v7741_v49, 4  ;;  %v7629_v19 = vrot.slane %v7628_v52, 4  ;;  %v10040_v48 = vld [vmem:[%s14027_s1 + $0xe4c] ss:$16 sps:$4 sm:$0xff]  }
 0x2cb   :  { %v7781_v58 = vsel %vm7620_vm0, %v7773_v50, 0.0  ;;  %v7650_v61 = vmul.f32 %v12965_v4, %v12965_v4  ;;  %v7734_v62 = vrot.slane %v12965_v4, 4  ;;  %7215 = vmatpush1.bf16.msra.mxu0 %v10017_v42 }
 0x2cc   :  { %7256 = vmatpush1.bf16.msra.mxu1 %v10020_v43  ;;  %v7624_v13 = vrot.slane %v7623_v56, 2  ;;  %v7655_v14 = vadd.f32 %v7654_v57, %v7653_v37  ;;  %v7743_v20 = vadd.f32 %v7742_v15, %v7741_v49  ;;  %v7782_v46 = vrot.slane %v7781_v58, 4  ;;  %7216 = vmatprep.subr.bf16.mxu0 %v10025_v24  ;;  %v10037_v43 = vld [vmem:[%s14027_s1 + $0xc4c] ss:$16 sps:$4 sm:$0xff]  }
 0x2cd   :  { %7257 = vmatprep.subr.bf16.mxu1 %v10028_v25  ;;  %v7630_v23 = vadd.f32 %v7629_v19, %v7628_v52  ;;  %v7660_v28 = vsel %vm7620_vm0, %v7650_v61, 0.0  ;;  %v7748_v63 = vsel %vm7620_vm0, %v7734_v62, 0.0  ;;  %v7774_v34 = vrot.slane %v7650_v61, 4  ;;  %v10038_v61 = vld [vmem:[%s14027_s1 + $0xe48] ss:$16 sps:$4 sm:$0xff]  }
 0x2ce   :  { %v7625_v53 = vadd.f32 %v7624_v13, %v7623_v56  ;;  %v7656_v51 = vrot.slane %v7655_v14, 2  ;;  %v7744_v41 = vrot.slane %v7743_v20, 2  ;;  %v7783_v22 = vadd.f32 %v7782_v46, %v7781_v58  ;;  %v10035_v56 = vld [vmem:[%s14027_s1 + $0xc48] ss:$16 sps:$4 sm:$0xff]  }
 0x2cf   :  { %v7631_v38 = vrot.slane %v7630_v23, 2  ;;  %v7661_v39 = vrot.slane %v7660_v28, 4  ;;  %v7749_v16 = vrot.slane %v7748_v63, 4  ;;  %v7788_v17 = vsel %vm7620_vm0, %v7774_v34, 0.0  ;;  %7217 = vmatpush1.bf16.msra.mxu0 %v10023_v5 }
 0x2d0   :  { %7258 = vmatpush1.bf16.msra.mxu1 %v10026_v8  ;;  %v7626_v44 = vrot.slane %v7625_v53, 1  ;;  %v7657_v26 = vadd.f32 %v7656_v51, %v7655_v14  ;;  %v7745_v27 = vadd.f32 %v7744_v41, %v7743_v20  ;;  %v7784_v42 = vrot.slane %v7783_v22, 2  ;;  %7218 = vmatprep.subr.bf16.mxu0 %v10031_v18  ;;  %v10043_v14 = vld [vmem:[%s14027_s1 + $0xc2c] ss:$16 sps:$4 sm:$0xff]  }
 0x2d1   :  { %7259 = vmatprep.subr.bf16.mxu1 %v10034_v31  ;;  %v7632_v36 = vadd.f32 %v7631_v38, %v7630_v23  ;;  %v7662_v45 = vadd.f32 %v7661_v39, %v7660_v28  ;;  %v7750_v24 = vadd.f32 %v7749_v16, %v7748_v63  ;;  %v7789_v25 = vrot.slane %v7788_v17, 4  ;;  %v10046_v20 = vld [vmem:[%s14027_s1 + $0xe2c] ss:$16 sps:$4 sm:$0xff]   ;;  %v10044_v38 = vld [vmem:[%s14027_s1 + $0xe28] ss:$16 sps:$4 sm:$0xff]  }
 0x2d2   :  { %v7627_v37 = vadd.f32 %v7626_v44, %v7625_v53  ;;  %v7658_v49 = vrot.slane %v7657_v26, 1  ;;  %v7746_v50 = vrot.slane %v7745_v27, 1  ;;  %v7785_v52 = vadd.f32 %v7784_v42, %v7783_v22  ;;  %v10041_v53 = vld [vmem:[%s14027_s1 + $0xc28] ss:$16 sps:$4 sm:$0xff]   ;;  %v10052_v44 = vld [vmem:[%s14027_s1 + $0xe0c] ss:$16 sps:$4 sm:$0xff]  }
 0x2d3   :  { %v7633_v57 = vrot.slane %v7632_v36, 1  ;;  %v7663_v15 = vrot.slane %v7662_v45, 2  ;;  %v7751_v19 = vrot.slane %v7750_v24, 2  ;;  %v7790_v58 = vadd.f32 %v7789_v25, %v7788_v17  ;;  %7219 = vmatpush1.bf16.msra.mxu0 %v10029_v47  ;;  %v10047_v25 = vld [vmem:[%s14027_s1 + $0xc08] ss:$16 sps:$4 sm:$0xff]  }
 0x2d4   :  { %7260 = vmatpush1.bf16.msra.mxu1 %v10032_v7  ;;  %v7659_v62 = vadd.f32 %v7658_v49, %v7657_v26  ;;  %v13020_v5 = vmul.f32 0.25, %v7627_v37  ;;  %v7747_v8 = vadd.f32 %v7746_v50, %v7745_v27  ;;  %v7786_v13 = vrot.slane %v7785_v52, 1  ;;  %7220 = vmatprep.subr.bf16.mxu0 %v10037_v43  ;;  %v10049_v7 = vld [vmem:[%s14027_s1 + $0xc0c] ss:$16 sps:$4 sm:$0xff]   ;;  %v10050_v37 = vld [vmem:[%s14027_s1 + $0xe08] ss:$16 sps:$4 sm:$0xff]  }
 0x2d5   :  { %7261 = vmatprep.subr.bf16.mxu1 %v10040_v48  ;;  %v7634_v46 = vadd.f32 %v7633_v57, %v7632_v36  ;;  %v7664_v18 = vadd.f32 %v7663_v15, %v7662_v45  ;;  %v7752_v31 = vadd.f32 %v7751_v19, %v7750_v24  ;;  %v7791_v23 = vrot.slane %v7790_v58, 2 }
 0x2d6   :  { %v7685_v28 = vmul.f32 0.25, %v7659_v62  ;;  %v7689_v63 = vmul.f32 %v13020_v5, %v13020_v5  ;;  %v7787_v34 = vadd.f32 %v7786_v13, %v7785_v52  ;;  %v13033_v51 = vmul.f32 0.25, %v7747_v8  ;;  %v10055_v52 = vld [vmem:[%s14027_s1 + $0xdec] ss:$16 sps:$4 sm:$0xff]   ;;  %v10053_v62 = vld [vmem:[%s14027_s1 + $0xde8] ss:$16 sps:$4 sm:$0xff]  }
 0x2d7   :  { %v7665_v41 = vrot.slane %v7664_v18, 1  ;;  %v13035_v22 = vmul.f32 0.25, %v7634_v46  ;;  %v7753_v47 = vrot.slane %v7752_v31, 1  ;;  %7221 = vmatpush1.bf16.msra.mxu0 %v10035_v56  ;;  %v7792_v17 = vadd.f32 %v7791_v23, %v7790_v58  ;;  %v10058_v56 = vld [vmem:[%s14027_s1 + $0xfec] ss:$16 sps:$4 sm:$0xff]  }
 0x2d8   :  { %7262 = vmatpush1.bf16.msra.mxu1 %v10038_v61  ;;  %v7693_v39 = vsub.f32 %v7685_v28, %v7689_v63  ;;  %v7813_v16 = vmul.f32 0.25, %v7787_v34  ;;  %7222 = vmatprep.subr.bf16.mxu0 %v10043_v14  ;;  %v7817_v26 = vmul.f32 %v13033_v51, %v13033_v51  ;;  %v10056_v8 = vld [vmem:[%s14027_s1 + $0xfe8] ss:$16 sps:$4 sm:$0xff]   ;;  %v10061_v14 = vld [vmem:[%s14027_s1 + $0xdcc] ss:$16 sps:$4 sm:$0xff]  }
 0x2d9   :  { %7263 = vmatprep.subr.bf16.mxu1 %v10046_v20  ;;  %v7666_v27 = vadd.f32 %v7665_v41, %v7664_v18  ;;  %v7690_v42 = vmul.f32 %v13035_v22, %v13035_v22  ;;  %v7754_v48 = vadd.f32 %v7753_v47, %v7752_v31  ;;  %v7793_v36 = vrot.slane %v7792_v17, 1  ;;  %v10064_v20 = vld [vmem:[%s14027_s1 + $0xfcc] ss:$16 sps:$4 sm:$0xff]   ;;  %v10059_v18 = vld [vmem:[%s14027_s1 + $0xdc8] ss:$16 sps:$4 sm:$0xff]  }
 0x2da   :  { %v7701_v43 = vadd.f32 1e-05, %v7693_v39  ;;  %v7821_v45 = vsub.f32 %v7813_v16, %v7817_v26  ;;  %v10062_v31 = vld [vmem:[%s14027_s1 + $0xfc8] ss:$16 sps:$4 sm:$0xff]   ;;  %v10067_v23 = vld [vmem:[%s14027_s1 + $0xdac] ss:$16 sps:$4 sm:$0xff]   ;;  %v7825_v16 = vsub.f32 %v12955_v6, %v13033_v51 }
 0x2db   :  { %v7686_v24 = vmul.f32 0.25, %v7666_v27  ;;  %7223 = vmatpush1.bf16.msra.mxu0 %v10041_v53  ;;  %v7794_v49 = vadd.f32 %v7793_v36, %v7792_v17  ;;  %v13056_v50 = vmul.f32 0.25, %v7754_v48  ;;  %v10070_v28 = vld [vmem:[%s14027_s1 + $0xfac] ss:$16 sps:$4 sm:$0xff]   ;;  %v10065_v63 = vld [vmem:[%s14027_s1 + $0xda8] ss:$16 sps:$4 sm:$0xff]   ;;  %v7697_v53 = vsub.f32 %v12955_v6, %v13020_v5 }
 0x2dc   :  { %7264 = vmatpush1.bf16.msra.mxu1 %v10044_v38  ;;  %10485 = vrsqrt.f32 %v7701_v43  ;;  %7224 = vmatprep.subr.bf16.mxu0 %v10049_v7  ;;  %v7829_v57 = vadd.f32 1e-05, %v7821_v45  ;;  %v10068_v34 = vld [vmem:[%s14027_s1 + $0xfa8] ss:$16 sps:$4 sm:$0xff]   ;;  %v10073_v41 = vld [vmem:[%s14027_s1 + $0xd8c] ss:$16 sps:$4 sm:$0xff]   ;;  %v7698_v27 = vsub.f32 %v12965_v4, %v13035_v22 }
 0x2dd   :  { %7265 = vmatprep.subr.bf16.mxu1 %v10052_v44  ;;  %v7694_v15 = vsub.f32 %v7686_v24, %v7690_v42  ;;  %v7814_v19 = vmul.f32 0.25, %v7794_v49  ;;  %v7818_v58 = vmul.f32 %v13056_v50, %v13056_v50  ;;  %v10076_v47 = vld [vmem:[%s14027_s1 + $0xf8c] ss:$16 sps:$4 sm:$0xff]   ;;  %v10071_v5 = vld [vmem:[%s14027_s1 + $0xd88] ss:$16 sps:$4 sm:$0xff]   ;;  %v7826_v22 = vsub.f32 %v12965_v4, %v13056_v50 }
 0x2de   :  { %10487 = vrsqrt.f32 %v7829_v57  ;;  %v10074_v17 = vld [vmem:[%s14027_s1 + $0xf88] ss:$16 sps:$4 sm:$0xff]   ;;  %v10079_v7 = vld [vmem:[%s14027_s1 + $0xd6c] ss:$16 sps:$4 sm:$0xff]  }
 0x2df   :  { %v7702_v61 = vadd.f32 1e-05, %v7694_v15  ;;  %7225 = vmatpush1.bf16.msra.mxu0 %v10047_v25  ;;  %v7822_v13 = vsub.f32 %v7814_v19, %v7818_v58  ;;  %v10082_v6 = vld [vmem:[%s14027_s1 + $0xf6c] ss:$16 sps:$4 sm:$0xff]   ;;  %v10077_v48 = vld [vmem:[%s14027_s1 + $0xd68] ss:$16 sps:$4 sm:$0xff]  }
 0x2e0   :  { %7266 = vmatpush1.bf16.msra.mxu1 %v10050_v37  ;;  %7226 = vmatprep.subr.bf16.mxu0 %v10055_v52  ;;  %v10080_v24 = vld [vmem:[%s14027_s1 + $0xf68] ss:$16 sps:$4 sm:$0xff]   ;;  %v10085_v25 = vld [vmem:[%s14027_s1 + $0xd4c] ss:$16 sps:$4 sm:$0xff]  }
 0x2e1   :  { %7267 = vmatprep.subr.bf16.mxu1 %v10058_v56  ;;  %10489 = vrsqrt.f32 %v7702_v61  ;;  %v7830_v46 = vadd.f32 1e-05, %v7822_v13  ;;  %v10088_v37 = vld [vmem:[%s14027_s1 + $0xf4c] ss:$16 sps:$4 sm:$0xff]   ;;  %v10083_v50 = vld [vmem:[%s14027_s1 + $0xd48] ss:$16 sps:$4 sm:$0xff]  }
 0x2e2   :  { %v10086_v15 = vld [vmem:[%s14027_s1 + $0xf48] ss:$16 sps:$4 sm:$0xff]   ;;  %v10091_v19 = vld [vmem:[%s14027_s1 + $0xd2c] ss:$16 sps:$4 sm:$0xff]  }
 0x2e3   :  { %7227 = vmatpush2.bf16.msra.mxu0 %v10053_v62  ;;  %10491 = vrsqrt.f32 %v7830_v46  ;;  %v10094_v61 = vld [vmem:[%s14027_s1 + $0xf2c] ss:$16 sps:$4 sm:$0xff]   ;;  %v10092_v13 = vld [vmem:[%s14027_s1 + $0xf28] ss:$16 sps:$4 sm:$0xff]  }
 0x2e4   :  { %7268 = vmatpush2.bf16.msra.mxu1 %v10056_v8  ;;  %7228 = vmatprep.subr.bf16.mxu0 %v10061_v14  ;;  %v10089_v8 = vld [vmem:[%s14027_s1 + $0xd28] ss:$16 sps:$4 sm:$0xff]   ;;  %v10097_v14 = vld [vmem:[%s14027_s1 + $0xd0c] ss:$16 sps:$4 sm:$0xff]  }
 0x2e5   :  { %7269 = vmatprep.subr.bf16.mxu1 %v10064_v20  ;;  %v10100_v20 = vld [vmem:[%s14027_s1 + $0xf0c] ss:$16 sps:$4 sm:$0xff]   ;;  %v10095_v46 = vld [vmem:[%s14027_s1 + $0xd08] ss:$16 sps:$4 sm:$0xff]  }
 0x2e7   :  { %7229 = vmatpush2.bf16.msra.mxu0 %v10059_v18  ;;  %v10098_v18 = vld [vmem:[%s14027_s1 + $0xf08] ss:$16 sps:$4 sm:$0xff]  }
 0x2e8   :  { %7270 = vmatpush2.bf16.msra.mxu1 %v10062_v31  ;;  %7230 = vmatprep.subr.bf16.mxu0 %v10067_v23  ;;  %v1066_v31 = vsub.s32 2, %v11379_v54  ;;  %v10103_v23 = vld [vmem:[%s14027_s1 + $0x10ec] ss:$16 sps:$4 sm:$0xff]  }
 0x2e9   :  { %7271 = vmatprep.subr.bf16.mxu1 %v10070_v28  ;;  %v10486_v38 = vpop.eup %10485  ;;  %v10106_v28 = vld [vmem:[%s14027_s1 + $0x12ec] ss:$16 sps:$4 sm:$0xff]  }
 0x2ea   :  { %v7709_v39 = vmul.f32 %v10486_v38, %v7697_v53  ;;  %v10112_v38 = vld [vmem:[%s14027_s1 + $0x12cc] ss:$16 sps:$4 sm:$0xff]  }
 0x2eb   :  { %7231 = vmatpush2.bf16.msra.mxu0 %v10065_v63  ;;  %v10488_v44 = vpop.eup %10487  ;;  %v1070_v63 = vsub.s32 3, %v11379_v54  ;;  %v10109_v54 = vld [vmem:[%s14027_s1 + $0x10cc] ss:$16 sps:$4 sm:$0xff]  }
 0x2ec   :  { %7272 = vmatpush2.bf16.msra.mxu1 %v10068_v34  ;;  %vm7713_vm1 = vcmp.gt.f32.partialorder %v7709_v39, 0.0  ;;  %v7717_v26 = vmul.f32 0.2, %v7709_v39  ;;  %7232 = vmatprep.subr.bf16.mxu0 %v10073_v41  ;;  %v7837_v51 = vmul.f32 %v10488_v44, %v7825_v16  ;;  %v10501_v34 = vld [vmem:[%s14029_s2] sm:$0xf] }
 0x2ed   :  { %7273 = vmatprep.subr.bf16.mxu1 %v10076_v47  ;;  %v1067_v53 = vrot.slane %v10501_v34, %v1066_v31  ;;  %v10101_v41 = vld [vmem:[%s14027_s1 + $0x10e8] ss:$16 sps:$4 sm:$0xff]   ;;  %v10154_v31 = vld [vmem:[%s14027_s1 + $0x13ec] ss:$16 sps:$4 sm:$0xff]  }
 0x2ee   :  { %v10490_v42 = vpop.eup %10489  ;;  %v7721_v43 = vsel %vm7713_vm1, %v7709_v39, %v7717_v26  ;;  %vm7841_vm2 = vcmp.gt.f32.partialorder %v7837_v51, 0.0  ;;  %v7845_v36 = vmul.f32 0.2, %v7837_v51  ;;  %v10104_v47 = vld [vmem:[%s14027_s1 + $0x12e8] ss:$16 sps:$4 sm:$0xff]   ;;  %v1071_v39 = vrot.slane %v10501_v34, %v1070_v63 }
 0x2ef   :  { %7725 = vst [vmem:[%s14030_s3] sm:$0xf] %v7721_v43  ;;  %v7710_v45 = vmul.f32 %v10490_v42, %v7698_v27  ;;  %7233 = vmatpush2.bf16.msra.mxu0 %v10071_v5  ;;  %v10110_v44 = vld [vmem:[%s14027_s1 + $0x12c8] ss:$16 sps:$4 sm:$0xff]   ;;  %v10157_v63 = vld [vmem:[%s14027_s1 + $0x11cc] ss:$16 sps:$4 sm:$0xff]  }
 0x2f0   :  { %7274 = vmatpush2.bf16.msra.mxu1 %v10074_v17  ;;  %7234 = vmatprep.subr.bf16.mxu0 %v10079_v7  ;;  %v10492_v49 = vpop.eup %10491  ;;  %v7849_v52 = vsel %vm7841_vm2, %v7837_v51, %v7845_v36  ;;  %v10107_v7 = vld [vmem:[%s14027_s1 + $0x10c8] ss:$16 sps:$4 sm:$0xff]   ;;  %v10160_v34 = vld [vmem:[%s14027_s1 + $0x13cc] ss:$16 sps:$4 sm:$0xff]  }
 0x2f1   :  { %7275 = vmatprep.subr.bf16.mxu1 %v10082_v6  ;;  %vm7714_vm3 = vcmp.gt.f32.partialorder %v7710_v45, 0.0  ;;  %v7718_v56 = vmul.f32 0.2, %v7710_v45  ;;  %7853 = vst [vmem:[%s14030_s3] sm:$0xf0] %v7849_v52  ;;  %v7838_v57 = vmul.f32 %v10492_v49, %v7826_v22  ;;  %v10113_v36 = vld [vmem:[%s14027_s1 + $0x10a8] ss:$16 sps:$4 sm:$0xff]  }
 0x2f2   :  { %v10127_v49 = vld [vmem:[%s14027_s1 + $0x106c] ss:$16 sps:$4 sm:$0xff]  }
 0x2f3   :  { %v7722_v4 = vsel %vm7714_vm3, %v7710_v45, %v7718_v56  ;;  %7235 = vmatpush2.bf16.msra.mxu0 %v10077_v48  ;;  %vm7842_vm4 = vcmp.gt.f32.partialorder %v7838_v57, 0.0  ;;  %v7846_v58 = vmul.f32 0.2, %v7838_v57  ;;  %v10116_v45 = vld [vmem:[%s14027_s1 + $0x12a8] ss:$16 sps:$4 sm:$0xff]  }
 0x2f4   :  { %7276 = vmatpush2.bf16.msra.mxu1 %v10080_v24  ;;  %7726 = vst [vmem:[%s14030_s3 + $0x8] sm:$0xf] %v7722_v4  ;;  %7236 = vmatprep.subr.bf16.mxu0 %v10085_v25  ;;  %v10119_v25 = vld [vmem:[%s14027_s1 + $0x1088] ss:$16 sps:$4 sm:$0xff]   ;;  %v10130_v52 = vld [vmem:[%s14027_s1 + $0x126c] ss:$16 sps:$4 sm:$0xff]  }
 0x2f5   :  { %7277 = vmatprep.subr.bf16.mxu1 %v10088_v37  ;;  %v7850_v62 = vsel %vm7842_vm4, %v7838_v57, %v7846_v58  ;;  %v10122_v37 = vld [vmem:[%s14027_s1 + $0x1288] ss:$16 sps:$4 sm:$0xff]   ;;  %v10133_v4 = vld [vmem:[%s14027_s1 + $0x104c] ss:$16 sps:$4 sm:$0xff]  }
 0x2f6   :  { %7854 = vst [vmem:[%s14030_s3 + $0x8] sm:$0xf0] %v7850_v62  ;;  %v10125_v56 = vld [vmem:[%s14027_s1 + $0x1068] ss:$16 sps:$4 sm:$0xff]   ;;  %v10139_v58 = vld [vmem:[%s14027_s1 + $0x102c] ss:$16 sps:$4 sm:$0xff]  }
 0x2f7   :  { %7237 = vmatpush2.bf16.msra.mxu0 %v10083_v50  ;;  %v10128_v57 = vld [vmem:[%s14027_s1 + $0x1268] ss:$16 sps:$4 sm:$0xff]   ;;  %v10136_v50 = vld [vmem:[%s14027_s1 + $0x124c] ss:$16 sps:$4 sm:$0xff]  }
 0x2f8   :  { %7278 = vmatpush2.bf16.msra.mxu1 %v10086_v15  ;;  %7238 = vmatprep.subr.bf16.mxu0 %v10091_v19  ;;  %v10131_v15 = vld [vmem:[%s14027_s1 + $0x1048] ss:$16 sps:$4 sm:$0xff]  }
 0x2f9   :  { %7279 = vmatprep.subr.bf16.mxu1 %v10094_v61  ;;  %v10134_v19 = vld [vmem:[%s14027_s1 + $0x1248] ss:$16 sps:$4 sm:$0xff]   ;;  %v10142_v61 = vld [vmem:[%s14027_s1 + $0x122c] ss:$16 sps:$4 sm:$0xff]  }
 0x2fa   :  { %v10137_v62 = vld [vmem:[%s14027_s1 + $0x1028] ss:$16 sps:$4 sm:$0xff]  }
 0x2fb   :  { %7239 = vmatpush2.bf16.msra.mxu0 %v10089_v8  ;;  %v10140_v8 = vld [vmem:[%s14027_s1 + $0x1228] ss:$16 sps:$4 sm:$0xff]  }
 0x2fc   :  { %7280 = vmatpush2.bf16.msra.mxu1 %v10092_v13  ;;  %7240 = vmatprep.subr.bf16.mxu0 %v10097_v14  ;;  %v10145_v13 = vld [vmem:[%s14027_s1 + $0x100c] ss:$16 sps:$4 sm:$0xff]  }
 0x2fd   :  { %7281 = vmatprep.subr.bf16.mxu1 %v10100_v20  ;;  %v10148_v14 = vld [vmem:[%s14027_s1 + $0x120c] ss:$16 sps:$4 sm:$0xff]   ;;  %v10143_v20 = vld [vmem:[%s14027_s1 + $0x1008] ss:$16 sps:$4 sm:$0xff]  }
 0x2ff   :  { %7241 = vmatpush2.bf16.msra.mxu0 %v10095_v46  ;;  %v10146_v46 = vld [vmem:[%s14027_s1 + $0x1208] ss:$16 sps:$4 sm:$0xff]  }
 0x300   :  { %7282 = vmatpush2.bf16.msra.mxu1 %v10098_v18  ;;  %7292 = vmatprep.subr.bf16.mxu0 %v10103_v23  ;;  %v10151_v18 = vld [vmem:[%s14027_s1 + $0x11ec] ss:$16 sps:$4 sm:$0xff]   ;;  %v10149_v23 = vld [vmem:[%s14027_s1 + $0x11e8] ss:$16 sps:$4 sm:$0xff]  }
 0x301   :  { %7333 = vmatprep.subr.bf16.mxu1 %v10106_v28  ;;  %v10152_v28 = vld [vmem:[%s14027_s1 + $0x13e8] ss:$16 sps:$4 sm:$0xff]  }
 0x302   :  { %v6998_v16 = vpop.f32.mrf.mxu0  ;;  %7243 = vmatmul.mubr.bf16.vlgmr.msra.gmra.mxu0 %v11406_v0  ;;  %v10115_v0 = vld [vmem:[%s14027_s1 + $0x10ac] ss:$16 sps:$4 sm:$0xff]  }
 0x303   :  { %v7039_v5 = vpop.f32.mrf.mxu1  ;;  %7284 = vmatmul.mubr.bf16.vlgmr.msra.gmra.mxu1 %v11410_v1  ;;  %v6999_v17 = vadd.f32 %v6998_v16, %v1067_v53  ;;  %7293 = vmatpush1.bf16.msra.mxu0 %v10101_v41  ;;  %v10118_v1 = vld [vmem:[%s14027_s1 + $0x12ac] ss:$16 sps:$4 sm:$0xff]   ;;  %v10155_v53 = vld [vmem:[%s14027_s1 + $0x11c8] ss:$16 sps:$4 sm:$0xff]  }
 0x304   :  { %7334 = vmatpush1.bf16.msra.mxu1 %v10104_v47  ;;  %v7000_v26 = vpop.f32.mrf.mxu0  ;;  %7294 = vmatprep.subr.bf16.mxu0 %v10109_v54  ;;  %v10158_v41 = vld [vmem:[%s14027_s1 + $0x13c8] ss:$16 sps:$4 sm:$0xff]   ;;  %v10163_v47 = vld [vmem:[%s14027_s1 + $0x11ac] ss:$16 sps:$4 sm:$0xff]  }
 0x305   :  { %v7041_v6 = vpop.f32.mrf.mxu1  ;;  %7335 = vmatprep.subr.bf16.mxu1 %v10112_v38  ;;  %v13213_v51 = vadd.f32 %v7039_v5, %v6999_v17  ;;  %v7001_v27 = vadd.f32 %v7000_v26, %v1071_v39  ;;  %7324 = vmatprep.mubr.bf16.mxu0 %v11433_v9  ;;  %v10121_v9 = vld [vmem:[%s14027_s1 + $0x108c] ss:$16 sps:$4 sm:$0xff]   ;;  %v10161_v38 = vld [vmem:[%s14027_s1 + $0x11a8] ss:$16 sps:$4 sm:$0xff]  }
 0x306   :  { %7365 = vmatprep.mubr.bf16.mxu1 %v11437_v10  ;;  %v7002_v42 = vpop.f32.mrf.mxu0  ;;  %v10124_v10 = vld [vmem:[%s14027_s1 + $0x128c] ss:$16 sps:$4 sm:$0xff]   ;;  %v10164_v39 = vld [vmem:[%s14027_s1 + $0x13a8] ss:$16 sps:$4 sm:$0xff]  }
 0x307   :  { %v7043_v43 = vpop.f32.mrf.mxu1  ;;  %v13217_v48 = vadd.f32 %v7041_v6, %v7001_v27  ;;  %7295 = vmatpush1.bf16.msra.mxu0 %v10107_v7  ;;  %v10166_v54 = vld [vmem:[%s14027_s1 + $0x13ac] ss:$16 sps:$4 sm:$0xff]   ;;  %v10167_v17 = vld [vmem:[%s14027_s1 + $0x1188] ss:$16 sps:$4 sm:$0xff]  }
 0x308   :  { %7336 = vmatpush1.bf16.msra.mxu1 %v10110_v44  ;;  %v7003_v24 = vpop.f32.mrf.mxu0  ;;  %7296 = vmatprep.subr.bf16.mxu0 %v10115_v0  ;;  %v10169_v16 = vld [vmem:[%s14027_s1 + $0x118c] ss:$16 sps:$4 sm:$0xff]   ;;  %v10170_v7 = vld [vmem:[%s14027_s1 + $0x1388] ss:$16 sps:$4 sm:$0xff]  }
 0x309   :  { %v7044_v22 = vpop.f32.mrf.mxu1  ;;  %7337 = vmatprep.subr.bf16.mxu1 %v10118_v1  ;;  %v10172_v5 = vld [vmem:[%s14027_s1 + $0x138c] ss:$16 sps:$4 sm:$0xff]   ;;  %v10173_v6 = vld [vmem:[%s14027_s1 + $0x1168] ss:$16 sps:$4 sm:$0xff]  }
 0x30a   :  { %v10175_v44 = vld [vmem:[%s14027_s1 + $0x116c] ss:$16 sps:$4 sm:$0xff]   ;;  %v10176_v0 = vld [vmem:[%s14027_s1 + $0x1368] ss:$16 sps:$4 sm:$0xff]  }
 0x30b   :  { %7297 = vmatpush1.bf16.msra.mxu0 %v10113_v36  ;;  %v10178_v26 = vld [vmem:[%s14027_s1 + $0x136c] ss:$16 sps:$4 sm:$0xff]   ;;  %v10179_v42 = vld [vmem:[%s14027_s1 + $0x1148] ss:$16 sps:$4 sm:$0xff]  }
 0x30c   :  { %7338 = vmatpush1.bf16.msra.mxu1 %v10116_v45  ;;  %7298 = vmatprep.subr.bf16.mxu0 %v10121_v9  ;;  %v10181_v1 = vld [vmem:[%s14027_s1 + $0x114c] ss:$16 sps:$4 sm:$0xff]   ;;  %v10182_v43 = vld [vmem:[%s14027_s1 + $0x1348] ss:$16 sps:$4 sm:$0xff]  }
 0x30d   :  { %7339 = vmatprep.subr.bf16.mxu1 %v10124_v10  ;;  %v10184_v27 = vld [vmem:[%s14027_s1 + $0x134c] ss:$16 sps:$4 sm:$0xff]   ;;  %v10185_v24 = vld [vmem:[%s14027_s1 + $0x1128] ss:$16 sps:$4 sm:$0xff]  }
 0x30e   :  { %v10187_v36 = vld [vmem:[%s14027_s1 + $0x112c] ss:$16 sps:$4 sm:$0xff]   ;;  %v10188_v22 = vld [vmem:[%s14027_s1 + $0x1328] ss:$16 sps:$4 sm:$0xff]  }
 0x30f   :  { %7299 = vmatpush1.bf16.msra.mxu0 %v10119_v25  ;;  %v10190_v45 = vld [vmem:[%s14027_s1 + $0x132c] ss:$16 sps:$4 sm:$0xff]   ;;  %v10191_v25 = vld [vmem:[%s14027_s1 + $0x1108] ss:$16 sps:$4 sm:$0xff]  }
 0x310   :  { %7340 = vmatpush1.bf16.msra.mxu1 %v10122_v37  ;;  %7300 = vmatprep.subr.bf16.mxu0 %v10127_v49  ;;  %v10193_v9 = vld [vmem:[%s14027_s1 + $0x110c] ss:$16 sps:$4 sm:$0xff]   ;;  %v10194_v37 = vld [vmem:[%s14027_s1 + $0x1308] ss:$16 sps:$4 sm:$0xff]  }
 0x311   :  { %7341 = vmatprep.subr.bf16.mxu1 %v10130_v52  ;;  %v10196_v10 = vld [vmem:[%s14027_s1 + $0x130c] ss:$16 sps:$4 sm:$0xff]  }
 0x312   :  { %v10199_v49 = vld [vmem:[%s14027_s1 + $0x14ec] ss:$16 sps:$4 sm:$0xff]  }
 0x313   :  { %7301 = vmatpush1.bf16.msra.mxu0 %v10125_v56  ;;  %v10202_v52 = vld [vmem:[%s14027_s1 + $0x16ec] ss:$16 sps:$4 sm:$0xff]   ;;  %v10197_v56 = vld [vmem:[%s14027_s1 + $0x14e8] ss:$16 sps:$4 sm:$0xff]  }
 0x314   :  { %7342 = vmatpush1.bf16.msra.mxu1 %v10128_v57  ;;  %7302 = vmatprep.subr.bf16.mxu0 %v10133_v4  ;;  %v10200_v57 = vld [vmem:[%s14027_s1 + $0x16e8] ss:$16 sps:$4 sm:$0xff]   ;;  %v10205_v4 = vld [vmem:[%s14027_s1 + $0x14cc] ss:$16 sps:$4 sm:$0xff]  }
 0x315   :  { %7343 = vmatprep.subr.bf16.mxu1 %v10136_v50  ;;  %v10208_v50 = vld [vmem:[%s14027_s1 + $0x16cc] ss:$16 sps:$4 sm:$0xff]  }
 0x317   :  { %7303 = vmatpush1.bf16.msra.mxu0 %v10131_v15 }
 0x318   :  { %7344 = vmatpush1.bf16.msra.mxu1 %v10134_v19  ;;  %7304 = vmatprep.subr.bf16.mxu0 %v10139_v58 }
 0x319   :  { %7345 = vmatprep.subr.bf16.mxu1 %v10142_v61  ;;  %v10203_v61 = vld [vmem:[%s14027_s1 + $0x14c8] ss:$16 sps:$4 sm:$0xff]  }
 0x31b   :  { %7305 = vmatpush1.bf16.msra.mxu0 %v10137_v62  ;;  %v10206_v62 = vld [vmem:[%s14027_s1 + $0x16c8] ss:$16 sps:$4 sm:$0xff]  }
 0x31c   :  { %7346 = vmatpush1.bf16.msra.mxu1 %v10140_v8  ;;  %7306 = vmatprep.subr.bf16.mxu0 %v10145_v13 }
 0x31d   :  { %7347 = vmatprep.subr.bf16.mxu1 %v10148_v14 }
 0x31f   :  { %7307 = vmatpush1.bf16.msra.mxu0 %v10143_v20 }
 0x320   :  { %7348 = vmatpush1.bf16.msra.mxu1 %v10146_v46  ;;  %7308 = vmatprep.subr.bf16.mxu0 %v10151_v18 }
 0x321   :  { %7349 = vmatprep.subr.bf16.mxu1 %v10154_v31  ;;  %v10209_v31 = vld [vmem:[%s14027_s1 + $0x14a8] ss:$16 sps:$4 sm:$0xff]  }
 0x323   :  { %7309 = vmatpush2.bf16.msra.mxu0 %v10149_v23  ;;  %v10212_v23 = vld [vmem:[%s14027_s1 + $0x16a8] ss:$16 sps:$4 sm:$0xff]  }
 0x324   :  { %7350 = vmatpush2.bf16.msra.mxu1 %v10152_v28  ;;  %7310 = vmatprep.subr.bf16.mxu0 %v10157_v63  ;;  %v10215_v63 = vld [vmem:[%s14027_s1 + $0x1488] ss:$16 sps:$4 sm:$0xff]  }
 0x325   :  { %7351 = vmatprep.subr.bf16.mxu1 %v10160_v34  ;;  %v10218_v34 = vld [vmem:[%s14027_s1 + $0x1688] ss:$16 sps:$4 sm:$0xff]  }
 0x327   :  { %7311 = vmatpush2.bf16.msra.mxu0 %v10155_v53  ;;  %v10223_v53 = vld [vmem:[%s14027_s1 + $0x146c] ss:$16 sps:$4 sm:$0xff]  }
 0x328   :  { %7352 = vmatpush2.bf16.msra.mxu1 %v10158_v41  ;;  %7312 = vmatprep.subr.bf16.mxu0 %v10163_v47  ;;  %v10226_v41 = vld [vmem:[%s14027_s1 + $0x166c] ss:$16 sps:$4 sm:$0xff]   ;;  %v10221_v47 = vld [vmem:[%s14027_s1 + $0x1468] ss:$16 sps:$4 sm:$0xff]  }
 0x329   :  { %7353 = vmatprep.subr.bf16.mxu1 %v10166_v54  ;;  %v10224_v54 = vld [vmem:[%s14027_s1 + $0x1668] ss:$16 sps:$4 sm:$0xff]  }
 0x32b   :  { %7313 = vmatpush2.bf16.msra.mxu0 %v10161_v38  ;;  %v10229_v38 = vld [vmem:[%s14027_s1 + $0x144c] ss:$16 sps:$4 sm:$0xff]  }
 0x32c   :  { %7354 = vmatpush2.bf16.msra.mxu1 %v10164_v39  ;;  %7314 = vmatprep.subr.bf16.mxu0 %v10169_v16  ;;  %v10232_v39 = vld [vmem:[%s14027_s1 + $0x164c] ss:$16 sps:$4 sm:$0xff]   ;;  %v10227_v16 = vld [vmem:[%s14027_s1 + $0x1448] ss:$16 sps:$4 sm:$0xff]  }
 0x32d   :  { %7355 = vmatprep.subr.bf16.mxu1 %v10172_v5  ;;  %v10230_v5 = vld [vmem:[%s14027_s1 + $0x1648] ss:$16 sps:$4 sm:$0xff]  }
 0x32f   :  { %7315 = vmatpush2.bf16.msra.mxu0 %v10167_v17  ;;  %v10235_v17 = vld [vmem:[%s14027_s1 + $0x142c] ss:$16 sps:$4 sm:$0xff]  }
 0x330   :  { %7356 = vmatpush2.bf16.msra.mxu1 %v10170_v7  ;;  %7316 = vmatprep.subr.bf16.mxu0 %v10175_v44  ;;  %v10238_v7 = vld [vmem:[%s14027_s1 + $0x162c] ss:$16 sps:$4 sm:$0xff]   ;;  %v10233_v44 = vld [vmem:[%s14027_s1 + $0x1428] ss:$16 sps:$4 sm:$0xff]  }
 0x331   :  { %7357 = vmatprep.subr.bf16.mxu1 %v10178_v26  ;;  %v10236_v26 = vld [vmem:[%s14027_s1 + $0x1628] ss:$16 sps:$4 sm:$0xff]  }
 0x333   :  { %7317 = vmatpush2.bf16.msra.mxu0 %v10173_v6  ;;  %v10241_v6 = vld [vmem:[%s14027_s1 + $0x140c] ss:$16 sps:$4 sm:$0xff]  }
 0x334   :  { %7358 = vmatpush2.bf16.msra.mxu1 %v10176_v0  ;;  %7318 = vmatprep.subr.bf16.mxu0 %v10181_v1  ;;  %v10244_v0 = vld [vmem:[%s14027_s1 + $0x160c] ss:$16 sps:$4 sm:$0xff]   ;;  %v10239_v1 = vld [vmem:[%s14027_s1 + $0x1408] ss:$16 sps:$4 sm:$0xff]  }
 0x335   :  { %7359 = vmatprep.subr.bf16.mxu1 %v10184_v27  ;;  %v10242_v27 = vld [vmem:[%s14027_s1 + $0x1608] ss:$16 sps:$4 sm:$0xff]  }
 0x337   :  { %7319 = vmatpush2.bf16.msra.mxu0 %v10179_v42  ;;  %v10247_v42 = vld [vmem:[%s14027_s1 + $0x15ec] ss:$16 sps:$4 sm:$0xff]  }
 0x338   :  { %7360 = vmatpush2.bf16.msra.mxu1 %v10182_v43  ;;  %7320 = vmatprep.subr.bf16.mxu0 %v10187_v36  ;;  %v10250_v43 = vld [vmem:[%s14027_s1 + $0x17ec] ss:$16 sps:$4 sm:$0xff]   ;;  %v10245_v36 = vld [vmem:[%s14027_s1 + $0x15e8] ss:$16 sps:$4 sm:$0xff]  }
 0x339   :  { %7361 = vmatprep.subr.bf16.mxu1 %v10190_v45  ;;  %v10248_v45 = vld [vmem:[%s14027_s1 + $0x17e8] ss:$16 sps:$4 sm:$0xff]  }
 0x33b   :  { %7321 = vmatpush2.bf16.msra.mxu0 %v10185_v24  ;;  %v10253_v24 = vld [vmem:[%s14027_s1 + $0x15cc] ss:$16 sps:$4 sm:$0xff]  }
 0x33c   :  { %7362 = vmatpush2.bf16.msra.mxu1 %v10188_v22  ;;  %7322 = vmatprep.subr.bf16.mxu0 %v10193_v9  ;;  %v10256_v22 = vld [vmem:[%s14027_s1 + $0x17cc] ss:$16 sps:$4 sm:$0xff]   ;;  %v10251_v9 = vld [vmem:[%s14027_s1 + $0x15c8] ss:$16 sps:$4 sm:$0xff]  }
 0x33d   :  { %7363 = vmatprep.subr.bf16.mxu1 %v10196_v10  ;;  %v10254_v10 = vld [vmem:[%s14027_s1 + $0x17c8] ss:$16 sps:$4 sm:$0xff]  }
 0x33f   :  { %7323 = vmatpush2.bf16.msra.mxu0 %v10191_v25  ;;  %v10259_v25 = vld [vmem:[%s14027_s1 + $0x15ac] ss:$16 sps:$4 sm:$0xff]  }
 0x340   :  { %7364 = vmatpush2.bf16.msra.mxu1 %v10194_v37  ;;  %7374 = vmatprep.subr.bf16.mxu0 %v10199_v49  ;;  %v10262_v37 = vld [vmem:[%s14027_s1 + $0x17ac] ss:$16 sps:$4 sm:$0xff]   ;;  %v10257_v49 = vld [vmem:[%s14027_s1 + $0x15a8] ss:$16 sps:$4 sm:$0xff]  }
 0x341   :  { %7415 = vmatprep.subr.bf16.mxu1 %v10202_v52  ;;  %v10260_v52 = vld [vmem:[%s14027_s1 + $0x17a8] ss:$16 sps:$4 sm:$0xff]  }
 0x342   :  { %v7080_v15 = vpop.f32.mrf.mxu0  ;;  %7325 = vmatmul.mubr.bf16.vlgmr.msra.gmra.mxu0 %v11635_v59  ;;  %v10211_v59 = vld [vmem:[%s14027_s1 + $0x14ac] ss:$16 sps:$4 sm:$0xff]  }
 0x343   :  { %v7121_v19 = vpop.f32.mrf.mxu1  ;;  %7366 = vmatmul.mubr.bf16.vlgmr.msra.gmra.mxu1 %v11639_v60  ;;  %v7081_v58 = vadd.f32 %v7080_v15, %v13213_v51  ;;  %7375 = vmatpush1.bf16.msra.mxu0 %v10197_v56  ;;  %v10214_v60 = vld [vmem:[%s14027_s1 + $0x16ac] ss:$16 sps:$4 sm:$0xff]  }
 0x344   :  { %7416 = vmatpush1.bf16.msra.mxu1 %v10200_v57  ;;  %v7082_v8 = vpop.f32.mrf.mxu0  ;;  %7376 = vmatprep.subr.bf16.mxu0 %v10205_v4  ;;  %v10265_v56 = vld [vmem:[%s14027_s1 + $0x158c] ss:$16 sps:$4 sm:$0xff]   ;;  %v10263_v4 = vld [vmem:[%s14027_s1 + $0x1588] ss:$16 sps:$4 sm:$0xff]  }
 0x345   :  { %v7123_v13 = vpop.f32.mrf.mxu1  ;;  %7417 = vmatprep.subr.bf16.mxu1 %v10208_v50  ;;  %v13414_v51 = vadd.f32 %v7121_v19, %v7081_v58  ;;  %v7083_v14 = vadd.f32 %v7082_v8, %v13217_v48  ;;  %7406 = vmatprep.mubr.bf16.mxu0 %v11665_v35  ;;  %v10217_v35 = vld [vmem:[%s14027_s1 + $0x148c] ss:$16 sps:$4 sm:$0xff]   ;;  %v10266_v50 = vld [vmem:[%s14027_s1 + $0x1788] ss:$16 sps:$4 sm:$0xff]  }
 0x346   :  { %7447 = vmatprep.mubr.bf16.mxu1 %v11669_v40  ;;  %v7084_v20 = vpop.f32.mrf.mxu0  ;;  %v10220_v40 = vld [vmem:[%s14027_s1 + $0x168c] ss:$16 sps:$4 sm:$0xff]   ;;  %v10269_v58 = vld [vmem:[%s14027_s1 + $0x1568] ss:$16 sps:$4 sm:$0xff]  }
 0x347   :  { %v7125_v46 = vpop.f32.mrf.mxu1  ;;  %v13419_v18 = vadd.f32 %v7123_v13, %v7083_v14  ;;  %7377 = vmatpush1.bf16.msra.mxu0 %v10203_v61  ;;  %v10268_v57 = vld [vmem:[%s14027_s1 + $0x178c] ss:$16 sps:$4 sm:$0xff]   ;;  %v10272_v61 = vld [vmem:[%s14027_s1 + $0x1768] ss:$16 sps:$4 sm:$0xff]  }
 0x348   :  { %7418 = vmatpush1.bf16.msra.mxu1 %v10206_v62  ;;  %v7085_v28 = vpop.f32.mrf.mxu0  ;;  %7378 = vmatprep.subr.bf16.mxu0 %v10211_v59  ;;  %v10271_v15 = vld [vmem:[%s14027_s1 + $0x156c] ss:$16 sps:$4 sm:$0xff]   ;;  %v10275_v13 = vld [vmem:[%s14027_s1 + $0x1548] ss:$16 sps:$4 sm:$0xff]  }
 0x349   :  { %v7126_v48 = vpop.f32.mrf.mxu1  ;;  %7419 = vmatprep.subr.bf16.mxu1 %v10214_v60  ;;  %v10274_v19 = vld [vmem:[%s14027_s1 + $0x176c] ss:$16 sps:$4 sm:$0xff]   ;;  %v10278_v59 = vld [vmem:[%s14027_s1 + $0x1748] ss:$16 sps:$4 sm:$0xff]  }
 0x34a   :  { %v10277_v62 = vld [vmem:[%s14027_s1 + $0x154c] ss:$16 sps:$4 sm:$0xff]   ;;  %v10281_v20 = vld [vmem:[%s14027_s1 + $0x1528] ss:$16 sps:$4 sm:$0xff]  }
 0x34b   :  { %7379 = vmatpush1.bf16.msra.mxu0 %v10209_v31  ;;  %v10280_v8 = vld [vmem:[%s14027_s1 + $0x174c] ss:$16 sps:$4 sm:$0xff]   ;;  %v10284_v46 = vld [vmem:[%s14027_s1 + $0x1728] ss:$16 sps:$4 sm:$0xff]  }
 0x34c   :  { %7420 = vmatpush1.bf16.msra.mxu1 %v10212_v23  ;;  %7380 = vmatprep.subr.bf16.mxu0 %v10217_v35  ;;  %v10283_v60 = vld [vmem:[%s14027_s1 + $0x152c] ss:$16 sps:$4 sm:$0xff]   ;;  %v10287_v28 = vld [vmem:[%s14027_s1 + $0x1508] ss:$16 sps:$4 sm:$0xff]  }
 0x34d   :  { %7421 = vmatprep.subr.bf16.mxu1 %v10220_v40  ;;  %v10286_v14 = vld [vmem:[%s14027_s1 + $0x172c] ss:$16 sps:$4 sm:$0xff]   ;;  %v10290_v48 = vld [vmem:[%s14027_s1 + $0x1708] ss:$16 sps:$4 sm:$0xff]  }
 0x34e   :  { %v10289_v31 = vld [vmem:[%s14027_s1 + $0x150c] ss:$16 sps:$4 sm:$0xff]  }
 0x34f   :  { %7381 = vmatpush1.bf16.msra.mxu0 %v10215_v63  ;;  %v10292_v23 = vld [vmem:[%s14027_s1 + $0x170c] ss:$16 sps:$4 sm:$0xff]   ;;  %v10293_v63 = vld [vmem:[%s14027_s1 + $0x18e8] ss:$16 sps:$4 sm:$0xff]  }
 0x350   :  { %7422 = vmatpush1.bf16.msra.mxu1 %v10218_v34  ;;  %7382 = vmatprep.subr.bf16.mxu0 %v10223_v53  ;;  %v10295_v35 = vld [vmem:[%s14027_s1 + $0x18ec] ss:$16 sps:$4 sm:$0xff]   ;;  %v10296_v34 = vld [vmem:[%s14027_s1 + $0x1ae8] ss:$16 sps:$4 sm:$0xff]  }
 0x351   :  { %7423 = vmatprep.subr.bf16.mxu1 %v10226_v41  ;;  %v10298_v40 = vld [vmem:[%s14027_s1 + $0x1aec] ss:$16 sps:$4 sm:$0xff]  }
 0x352   :  { %v10301_v53 = vld [vmem:[%s14027_s1 + $0x18cc] ss:$16 sps:$4 sm:$0xff]  }
 0x353   :  { %7383 = vmatpush1.bf16.msra.mxu0 %v10221_v47  ;;  %v10304_v41 = vld [vmem:[%s14027_s1 + $0x1acc] ss:$16 sps:$4 sm:$0xff]  }
 0x354   :  { %7424 = vmatpush1.bf16.msra.mxu1 %v10224_v54  ;;  %7384 = vmatprep.subr.bf16.mxu0 %v10229_v38 }
 0x355   :  { %7425 = vmatprep.subr.bf16.mxu1 %v10232_v39  ;;  %v10299_v39 = vld [vmem:[%s14027_s1 + $0x18c8] ss:$16 sps:$4 sm:$0xff]  }
 0x357   :  { %7385 = vmatpush1.bf16.msra.mxu0 %v10227_v16  ;;  %v10302_v16 = vld [vmem:[%s14027_s1 + $0x1ac8] ss:$16 sps:$4 sm:$0xff]  }
 0x358   :  { %7426 = vmatpush1.bf16.msra.mxu1 %v10230_v5  ;;  %7386 = vmatprep.subr.bf16.mxu0 %v10235_v17 }
 0x359   :  { %7427 = vmatprep.subr.bf16.mxu1 %v10238_v7 }
 0x35b   :  { %7387 = vmatpush1.bf16.msra.mxu0 %v10233_v44 }
 0x35c   :  { %7428 = vmatpush1.bf16.msra.mxu1 %v10236_v26  ;;  %7388 = vmatprep.subr.bf16.mxu0 %v10241_v6 }
 0x35d   :  { %7429 = vmatprep.subr.bf16.mxu1 %v10244_v0  ;;  %v10305_v0 = vld [vmem:[%s14027_s1 + $0x18a8] ss:$16 sps:$4 sm:$0xff]  }
 0x35f   :  { %7389 = vmatpush1.bf16.msra.mxu0 %v10239_v1  ;;  %v10308_v1 = vld [vmem:[%s14027_s1 + $0x1aa8] ss:$16 sps:$4 sm:$0xff]  }
 0x360   :  { %7430 = vmatpush1.bf16.msra.mxu1 %v10242_v27  ;;  %7390 = vmatprep.subr.bf16.mxu0 %v10247_v42  ;;  %v10311_v42 = vld [vmem:[%s14027_s1 + $0x1888] ss:$16 sps:$4 sm:$0xff]  }
 0x361   :  { %7431 = vmatprep.subr.bf16.mxu1 %v10250_v43  ;;  %v10314_v43 = vld [vmem:[%s14027_s1 + $0x1a88] ss:$16 sps:$4 sm:$0xff]  }
 0x363   :  { %7391 = vmatpush2.bf16.msra.mxu0 %v10245_v36  ;;  %v10319_v36 = vld [vmem:[%s14027_s1 + $0x186c] ss:$16 sps:$4 sm:$0xff]  }
 0x364   :  { %7432 = vmatpush2.bf16.msra.mxu1 %v10248_v45  ;;  %7392 = vmatprep.subr.bf16.mxu0 %v10253_v24  ;;  %v10322_v45 = vld [vmem:[%s14027_s1 + $0x1a6c] ss:$16 sps:$4 sm:$0xff]   ;;  %v10317_v24 = vld [vmem:[%s14027_s1 + $0x1868] ss:$16 sps:$4 sm:$0xff]  }
 0x365   :  { %7433 = vmatprep.subr.bf16.mxu1 %v10256_v22  ;;  %v10320_v22 = vld [vmem:[%s14027_s1 + $0x1a68] ss:$16 sps:$4 sm:$0xff]  }
 0x367   :  { %7393 = vmatpush2.bf16.msra.mxu0 %v10251_v9  ;;  %v10325_v9 = vld [vmem:[%s14027_s1 + $0x184c] ss:$16 sps:$4 sm:$0xff]  }
 0x368   :  { %7434 = vmatpush2.bf16.msra.mxu1 %v10254_v10  ;;  %7394 = vmatprep.subr.bf16.mxu0 %v10259_v25  ;;  %v10328_v10 = vld [vmem:[%s14027_s1 + $0x1a4c] ss:$16 sps:$4 sm:$0xff]   ;;  %v10323_v25 = vld [vmem:[%s14027_s1 + $0x1848] ss:$16 sps:$4 sm:$0xff]  }
 0x369   :  { %7435 = vmatprep.subr.bf16.mxu1 %v10262_v37  ;;  %v10326_v37 = vld [vmem:[%s14027_s1 + $0x1a48] ss:$16 sps:$4 sm:$0xff]  }
 0x36b   :  { %7395 = vmatpush2.bf16.msra.mxu0 %v10257_v49  ;;  %v10331_v49 = vld [vmem:[%s14027_s1 + $0x182c] ss:$16 sps:$4 sm:$0xff]  }
 0x36c   :  { %7436 = vmatpush2.bf16.msra.mxu1 %v10260_v52  ;;  %7396 = vmatprep.subr.bf16.mxu0 %v10265_v56  ;;  %v10334_v52 = vld [vmem:[%s14027_s1 + $0x1a2c] ss:$16 sps:$4 sm:$0xff]   ;;  %v10329_v56 = vld [vmem:[%s14027_s1 + $0x1828] ss:$16 sps:$4 sm:$0xff]  }
 0x36d   :  { %7437 = vmatprep.subr.bf16.mxu1 %v10268_v57  ;;  %v10332_v57 = vld [vmem:[%s14027_s1 + $0x1a28] ss:$16 sps:$4 sm:$0xff]  }
 0x36f   :  { %7397 = vmatpush2.bf16.msra.mxu0 %v10263_v4  ;;  %v10337_v4 = vld [vmem:[%s14027_s1 + $0x180c] ss:$16 sps:$4 sm:$0xff]  }
 0x370   :  { %7438 = vmatpush2.bf16.msra.mxu1 %v10266_v50  ;;  %7398 = vmatprep.subr.bf16.mxu0 %v10271_v15  ;;  %v10340_v50 = vld [vmem:[%s14027_s1 + $0x1a0c] ss:$16 sps:$4 sm:$0xff]   ;;  %v10335_v15 = vld [vmem:[%s14027_s1 + $0x1808] ss:$16 sps:$4 sm:$0xff]  }
 0x371   :  { %7439 = vmatprep.subr.bf16.mxu1 %v10274_v19  ;;  %v10338_v19 = vld [vmem:[%s14027_s1 + $0x1a08] ss:$16 sps:$4 sm:$0xff]  }
 0x373   :  { %7399 = vmatpush2.bf16.msra.mxu0 %v10269_v58  ;;  %v10343_v58 = vld [vmem:[%s14027_s1 + $0x19ec] ss:$16 sps:$4 sm:$0xff]  }
 0x374   :  { %7440 = vmatpush2.bf16.msra.mxu1 %v10272_v61  ;;  %7400 = vmatprep.subr.bf16.mxu0 %v10277_v62  ;;  %v10346_v61 = vld [vmem:[%s14027_s1 + $0x1bec] ss:$16 sps:$4 sm:$0xff]   ;;  %v10341_v62 = vld [vmem:[%s14027_s1 + $0x19e8] ss:$16 sps:$4 sm:$0xff]  }
 0x375   :  { %7441 = vmatprep.subr.bf16.mxu1 %v10280_v8  ;;  %v10344_v8 = vld [vmem:[%s14027_s1 + $0x1be8] ss:$16 sps:$4 sm:$0xff]  }
 0x377   :  { %7401 = vmatpush2.bf16.msra.mxu0 %v10275_v13  ;;  %v10349_v13 = vld [vmem:[%s14027_s1 + $0x19cc] ss:$16 sps:$4 sm:$0xff]  }
 0x378   :  { %7442 = vmatpush2.bf16.msra.mxu1 %v10278_v59  ;;  %7402 = vmatprep.subr.bf16.mxu0 %v10283_v60  ;;  %v10352_v59 = vld [vmem:[%s14027_s1 + $0x1bcc] ss:$16 sps:$4 sm:$0xff]   ;;  %v10347_v60 = vld [vmem:[%s14027_s1 + $0x19c8] ss:$16 sps:$4 sm:$0xff]  }
 0x379   :  { %7443 = vmatprep.subr.bf16.mxu1 %v10286_v14  ;;  %v10350_v14 = vld [vmem:[%s14027_s1 + $0x1bc8] ss:$16 sps:$4 sm:$0xff]  }
 0x37b   :  { %7403 = vmatpush2.bf16.msra.mxu0 %v10281_v20  ;;  %v10355_v20 = vld [vmem:[%s14027_s1 + $0x19ac] ss:$16 sps:$4 sm:$0xff]  }
 0x37c   :  { %7444 = vmatpush2.bf16.msra.mxu1 %v10284_v46  ;;  %7404 = vmatprep.subr.bf16.mxu0 %v10289_v31  ;;  %v10358_v46 = vld [vmem:[%s14027_s1 + $0x1bac] ss:$16 sps:$4 sm:$0xff]   ;;  %v10353_v31 = vld [vmem:[%s14027_s1 + $0x19a8] ss:$16 sps:$4 sm:$0xff]  }
 0x37d   :  { %7445 = vmatprep.subr.bf16.mxu1 %v10292_v23  ;;  %v10356_v23 = vld [vmem:[%s14027_s1 + $0x1ba8] ss:$16 sps:$4 sm:$0xff]  }
 0x37f   :  { %7405 = vmatpush2.bf16.msra.mxu0 %v10287_v28  ;;  %v10361_v28 = vld [vmem:[%s14027_s1 + $0x198c] ss:$16 sps:$4 sm:$0xff]  }
 0x380   :  { %7446 = vmatpush2.bf16.msra.mxu1 %v10290_v48  ;;  %7456 = vmatprep.subr.bf16.mxu0 %v10295_v35  ;;  %v10364_v48 = vld [vmem:[%s14027_s1 + $0x1b8c] ss:$16 sps:$4 sm:$0xff]   ;;  %v10359_v35 = vld [vmem:[%s14027_s1 + $0x1988] ss:$16 sps:$4 sm:$0xff]  }
 0x381   :  { %7497 = vmatprep.subr.bf16.mxu1 %v10298_v40  ;;  %v10362_v40 = vld [vmem:[%s14027_s1 + $0x1b88] ss:$16 sps:$4 sm:$0xff]  }
 0x382   :  { %v7162_v47 = vpop.f32.mrf.mxu0  ;;  %7407 = vmatmul.mubr.bf16.vlgmr.msra.gmra.mxu0 %v11863_v2  ;;  %v10307_v2 = vld [vmem:[%s14027_s1 + $0x18ac] ss:$16 sps:$4 sm:$0xff]  }
 0x383   :  { %v7203_v54 = vpop.f32.mrf.mxu1  ;;  %7448 = vmatmul.mubr.bf16.vlgmr.msra.gmra.mxu1 %v11867_v3  ;;  %v7163_v38 = vadd.f32 %v7162_v47, %v13414_v51  ;;  %7457 = vmatpush1.bf16.msra.mxu0 %v10293_v63  ;;  %v10310_v3 = vld [vmem:[%s14027_s1 + $0x1aac] ss:$16 sps:$4 sm:$0xff]  }
 0x384   :  { %7498 = vmatpush1.bf16.msra.mxu1 %v10296_v34  ;;  %v7164_v5 = vpop.f32.mrf.mxu0  ;;  %7458 = vmatprep.subr.bf16.mxu0 %v10301_v53  ;;  %v10367_v63 = vld [vmem:[%s14027_s1 + $0x196c] ss:$16 sps:$4 sm:$0xff]   ;;  %v10365_v53 = vld [vmem:[%s14027_s1 + $0x1968] ss:$16 sps:$4 sm:$0xff]  }
 0x385   :  { %v7205_v17 = vpop.f32.mrf.mxu1  ;;  %7499 = vmatprep.subr.bf16.mxu1 %v10304_v41  ;;  %v13616_v51 = vadd.f32 %v7203_v54, %v7163_v38  ;;  %v7165_v7 = vadd.f32 %v7164_v5, %v13419_v18  ;;  %7488 = vmatprep.mubr.bf16.mxu0 %v11893_v11  ;;  %v10313_v11 = vld [vmem:[%s14027_s1 + $0x188c] ss:$16 sps:$4 sm:$0xff]   ;;  %v10368_v41 = vld [vmem:[%s14027_s1 + $0x1b68] ss:$16 sps:$4 sm:$0xff]  }
 0x386   :  { %7529 = vmatprep.mubr.bf16.mxu1 %v11897_v12  ;;  %v7166_v44 = vpop.f32.mrf.mxu0  ;;  %v10316_v12 = vld [vmem:[%s14027_s1 + $0x1a8c] ss:$16 sps:$4 sm:$0xff]   ;;  %v10371_v38 = vld [vmem:[%s14027_s1 + $0x1948] ss:$16 sps:$4 sm:$0xff]  }
 0x387   :  { %v7207_v26 = vpop.f32.mrf.mxu1  ;;  %v13621_v6 = vadd.f32 %v7205_v17, %v7165_v7  ;;  %7459 = vmatpush1.bf16.msra.mxu0 %v10299_v39  ;;  %v10370_v34 = vld [vmem:[%s14027_s1 + $0x1b6c] ss:$16 sps:$4 sm:$0xff]   ;;  %v10374_v39 = vld [vmem:[%s14027_s1 + $0x1b48] ss:$16 sps:$4 sm:$0xff]  }
 0x388   :  { %7500 = vmatpush1.bf16.msra.mxu1 %v10302_v16  ;;  %v7167_v27 = vpop.f32.mrf.mxu0  ;;  %7460 = vmatprep.subr.bf16.mxu0 %v10307_v2  ;;  %v10373_v47 = vld [vmem:[%s14027_s1 + $0x194c] ss:$16 sps:$4 sm:$0xff]   ;;  %v10377_v17 = vld [vmem:[%s14027_s1 + $0x1928] ss:$16 sps:$4 sm:$0xff]  }
 0x389   :  { %v7208_v18 = vpop.f32.mrf.mxu1  ;;  %7501 = vmatprep.subr.bf16.mxu1 %v10310_v3  ;;  %v10376_v54 = vld [vmem:[%s14027_s1 + $0x1b4c] ss:$16 sps:$4 sm:$0xff]   ;;  %v10380_v2 = vld [vmem:[%s14027_s1 + $0x1b28] ss:$16 sps:$4 sm:$0xff]  }
 0x38a   :  { %v10379_v16 = vld [vmem:[%s14027_s1 + $0x192c] ss:$16 sps:$4 sm:$0xff]   ;;  %v10383_v44 = vld [vmem:[%s14027_s1 + $0x1908] ss:$16 sps:$4 sm:$0xff]  }
 0x38b   :  { %7461 = vmatpush1.bf16.msra.mxu0 %v10305_v0  ;;  %v10382_v5 = vld [vmem:[%s14027_s1 + $0x1b2c] ss:$16 sps:$4 sm:$0xff]   ;;  %v10386_v26 = vld [vmem:[%s14027_s1 + $0x1b08] ss:$16 sps:$4 sm:$0xff]  }
 0x38c   :  { %7502 = vmatpush1.bf16.msra.mxu1 %v10308_v1  ;;  %7462 = vmatprep.subr.bf16.mxu0 %v10313_v11  ;;  %v10385_v3 = vld [vmem:[%s14027_s1 + $0x190c] ss:$16 sps:$4 sm:$0xff]   ;;  %v10389_v27 = vld [vmem:[%s14027_s1 + $0x1ce8] ss:$16 sps:$4 sm:$0xff]  }
 0x38d   :  { %7503 = vmatprep.subr.bf16.mxu1 %v10316_v12  ;;  %v10388_v7 = vld [vmem:[%s14027_s1 + $0x1b0c] ss:$16 sps:$4 sm:$0xff]   ;;  %v10392_v18 = vld [vmem:[%s14027_s1 + $0x1ee8] ss:$16 sps:$4 sm:$0xff]  }
 0x38e   :  { %v10391_v0 = vld [vmem:[%s14027_s1 + $0x1cec] ss:$16 sps:$4 sm:$0xff]  }
 0x38f   :  { %7463 = vmatpush1.bf16.msra.mxu0 %v10311_v42  ;;  %v10394_v1 = vld [vmem:[%s14027_s1 + $0x1eec] ss:$16 sps:$4 sm:$0xff]  }
 0x390   :  { %7504 = vmatpush1.bf16.msra.mxu1 %v10314_v43  ;;  %7464 = vmatprep.subr.bf16.mxu0 %v10319_v36  ;;  %v10397_v11 = vld [vmem:[%s14027_s1 + $0x1ccc] ss:$16 sps:$4 sm:$0xff]  }
 0x391   :  { %7505 = vmatprep.subr.bf16.mxu1 %v10322_v45  ;;  %v10400_v12 = vld [vmem:[%s14027_s1 + $0x1ecc] ss:$16 sps:$4 sm:$0xff]   ;;  %v10395_v45 = vld [vmem:[%s14027_s1 + $0x1cc8] ss:$16 sps:$4 sm:$0xff]  }
 0x393   :  { %7465 = vmatpush1.bf16.msra.mxu0 %v10317_v24  ;;  %v10398_v24 = vld [vmem:[%s14027_s1 + $0x1ec8] ss:$16 sps:$4 sm:$0xff]  }
 0x394   :  { %7506 = vmatpush1.bf16.msra.mxu1 %v10320_v22  ;;  %7466 = vmatprep.subr.bf16.mxu0 %v10325_v9 }
 0x395   :  { %7507 = vmatprep.subr.bf16.mxu1 %v10328_v10 }
 0x397   :  { %7467 = vmatpush1.bf16.msra.mxu0 %v10323_v25 }
 0x398   :  { %7508 = vmatpush1.bf16.msra.mxu1 %v10326_v37  ;;  %7468 = vmatprep.subr.bf16.mxu0 %v10331_v49 }
 0x399   :  { %7509 = vmatprep.subr.bf16.mxu1 %v10334_v52  ;;  %v10401_v52 = vld [vmem:[%s14027_s1 + $0x1ca8] ss:$16 sps:$4 sm:$0xff]  }
 0x39b   :  { %7469 = vmatpush1.bf16.msra.mxu0 %v10329_v56  ;;  %v10404_v56 = vld [vmem:[%s14027_s1 + $0x1ea8] ss:$16 sps:$4 sm:$0xff]  }
 0x39c   :  { %7510 = vmatpush1.bf16.msra.mxu1 %v10332_v57  ;;  %7470 = vmatprep.subr.bf16.mxu0 %v10337_v4  ;;  %v10407_v4 = vld [vmem:[%s14027_s1 + $0x1c88] ss:$16 sps:$4 sm:$0xff]  }
 0x39d   :  { %7511 = vmatprep.subr.bf16.mxu1 %v10340_v50  ;;  %v10410_v50 = vld [vmem:[%s14027_s1 + $0x1e88] ss:$16 sps:$4 sm:$0xff]  }
 0x39f   :  { %7471 = vmatpush1.bf16.msra.mxu0 %v10335_v15  ;;  %v10415_v15 = vld [vmem:[%s14027_s1 + $0x1c6c] ss:$16 sps:$4 sm:$0xff]  }
 0x3a0   :  { %7512 = vmatpush1.bf16.msra.mxu1 %v10338_v19  ;;  %7472 = vmatprep.subr.bf16.mxu0 %v10343_v58  ;;  %v10418_v19 = vld [vmem:[%s14027_s1 + $0x1e6c] ss:$16 sps:$4 sm:$0xff]   ;;  %v10413_v58 = vld [vmem:[%s14027_s1 + $0x1c68] ss:$16 sps:$4 sm:$0xff]  }
 0x3a1   :  { %7513 = vmatprep.subr.bf16.mxu1 %v10346_v61  ;;  %v10416_v61 = vld [vmem:[%s14027_s1 + $0x1e68] ss:$16 sps:$4 sm:$0xff]  }
 0x3a3   :  { %7473 = vmatpush2.bf16.msra.mxu0 %v10341_v62  ;;  %v10421_v62 = vld [vmem:[%s14027_s1 + $0x1c4c] ss:$16 sps:$4 sm:$0xff]  }
 0x3a4   :  { %7514 = vmatpush2.bf16.msra.mxu1 %v10344_v8  ;;  %7474 = vmatprep.subr.bf16.mxu0 %v10349_v13  ;;  %v10424_v8 = vld [vmem:[%s14027_s1 + $0x1e4c] ss:$16 sps:$4 sm:$0xff]   ;;  %v10419_v13 = vld [vmem:[%s14027_s1 + $0x1c48] ss:$16 sps:$4 sm:$0xff]  }
 0x3a5   :  { %7515 = vmatprep.subr.bf16.mxu1 %v10352_v59  ;;  %v10422_v59 = vld [vmem:[%s14027_s1 + $0x1e48] ss:$16 sps:$4 sm:$0xff]  }
 0x3a7   :  { %7475 = vmatpush2.bf16.msra.mxu0 %v10347_v60  ;;  %v10427_v60 = vld [vmem:[%s14027_s1 + $0x1c2c] ss:$16 sps:$4 sm:$0xff]  }
 0x3a8   :  { %7516 = vmatpush2.bf16.msra.mxu1 %v10350_v14  ;;  %7476 = vmatprep.subr.bf16.mxu0 %v10355_v20  ;;  %v10430_v14 = vld [vmem:[%s14027_s1 + $0x1e2c] ss:$16 sps:$4 sm:$0xff]   ;;  %v10425_v20 = vld [vmem:[%s14027_s1 + $0x1c28] ss:$16 sps:$4 sm:$0xff]  }
 0x3a9   :  { %7517 = vmatprep.subr.bf16.mxu1 %v10358_v46  ;;  %v10428_v46 = vld [vmem:[%s14027_s1 + $0x1e28] ss:$16 sps:$4 sm:$0xff]  }
 0x3ab   :  { %7477 = vmatpush2.bf16.msra.mxu0 %v10353_v31  ;;  %v10433_v31 = vld [vmem:[%s14027_s1 + $0x1c0c] ss:$16 sps:$4 sm:$0xff]  }
 0x3ac   :  { %7518 = vmatpush2.bf16.msra.mxu1 %v10356_v23  ;;  %7478 = vmatprep.subr.bf16.mxu0 %v10361_v28  ;;  %v10436_v23 = vld [vmem:[%s14027_s1 + $0x1e0c] ss:$16 sps:$4 sm:$0xff]   ;;  %v10431_v28 = vld [vmem:[%s14027_s1 + $0x1c08] ss:$16 sps:$4 sm:$0xff]  }
 0x3ad   :  { %7519 = vmatprep.subr.bf16.mxu1 %v10364_v48  ;;  %v10434_v48 = vld [vmem:[%s14027_s1 + $0x1e08] ss:$16 sps:$4 sm:$0xff]  }
 0x3af   :  { %7479 = vmatpush2.bf16.msra.mxu0 %v10359_v35  ;;  %v10439_v35 = vld [vmem:[%s14027_s1 + $0x1dec] ss:$16 sps:$4 sm:$0xff]  }
 0x3b0   :  { %7520 = vmatpush2.bf16.msra.mxu1 %v10362_v40  ;;  %7480 = vmatprep.subr.bf16.mxu0 %v10367_v63  ;;  %v10442_v40 = vld [vmem:[%s14027_s1 + $0x1fec] ss:$16 sps:$4 sm:$0xff]   ;;  %v10437_v63 = vld [vmem:[%s14027_s1 + $0x1de8] ss:$16 sps:$4 sm:$0xff]  }
 0x3b1   :  { %7521 = vmatprep.subr.bf16.mxu1 %v10370_v34  ;;  %v10440_v34 = vld [vmem:[%s14027_s1 + $0x1fe8] ss:$16 sps:$4 sm:$0xff]  }
 0x3b3   :  { %7481 = vmatpush2.bf16.msra.mxu0 %v10365_v53  ;;  %v10445_v53 = vld [vmem:[%s14027_s1 + $0x1dcc] ss:$16 sps:$4 sm:$0xff]  }
 0x3b4   :  { %7522 = vmatpush2.bf16.msra.mxu1 %v10368_v41  ;;  %7482 = vmatprep.subr.bf16.mxu0 %v10373_v47  ;;  %v10448_v41 = vld [vmem:[%s14027_s1 + $0x1fcc] ss:$16 sps:$4 sm:$0xff]   ;;  %v10443_v47 = vld [vmem:[%s14027_s1 + $0x1dc8] ss:$16 sps:$4 sm:$0xff]  }
 0x3b5   :  { %7523 = vmatprep.subr.bf16.mxu1 %v10376_v54  ;;  %v10446_v54 = vld [vmem:[%s14027_s1 + $0x1fc8] ss:$16 sps:$4 sm:$0xff]  }
 0x3b7   :  { %7483 = vmatpush2.bf16.msra.mxu0 %v10371_v38  ;;  %v10451_v38 = vld [vmem:[%s14027_s1 + $0x1dac] ss:$16 sps:$4 sm:$0xff]  }
 0x3b8   :  { %7524 = vmatpush2.bf16.msra.mxu1 %v10374_v39  ;;  %7484 = vmatprep.subr.bf16.mxu0 %v10379_v16  ;;  %v10454_v39 = vld [vmem:[%s14027_s1 + $0x1fac] ss:$16 sps:$4 sm:$0xff]   ;;  %v10449_v16 = vld [vmem:[%s14027_s1 + $0x1da8] ss:$16 sps:$4 sm:$0xff]  }
 0x3b9   :  { %7525 = vmatprep.subr.bf16.mxu1 %v10382_v5  ;;  %v10452_v5 = vld [vmem:[%s14027_s1 + $0x1fa8] ss:$16 sps:$4 sm:$0xff]  }
 0x3bb   :  { %7485 = vmatpush2.bf16.msra.mxu0 %v10377_v17  ;;  %v10457_v17 = vld [vmem:[%s14027_s1 + $0x1d8c] ss:$16 sps:$4 sm:$0xff]  }
 0x3bc   :  { %7526 = vmatpush2.bf16.msra.mxu1 %v10380_v2  ;;  %7486 = vmatprep.subr.bf16.mxu0 %v10385_v3  ;;  %v10460_v2 = vld [vmem:[%s14027_s1 + $0x1f8c] ss:$16 sps:$4 sm:$0xff]   ;;  %v10455_v3 = vld [vmem:[%s14027_s1 + $0x1d88] ss:$16 sps:$4 sm:$0xff]  }
 0x3bd   :  { %7527 = vmatprep.subr.bf16.mxu1 %v10388_v7  ;;  %v10458_v7 = vld [vmem:[%s14027_s1 + $0x1f88] ss:$16 sps:$4 sm:$0xff]  }
 0x3bf   :  { %7487 = vmatpush2.bf16.msra.mxu0 %v10383_v44  ;;  %v10463_v44 = vld [vmem:[%s14027_s1 + $0x1d6c] ss:$16 sps:$4 sm:$0xff]  }
 0x3c0   :  { %7528 = vmatpush2.bf16.msra.mxu1 %v10386_v26  ;;  %7538 = vmatprep.subr.bf16.mxu0 %v10391_v0  ;;  %v10466_v26 = vld [vmem:[%s14027_s1 + $0x1f6c] ss:$16 sps:$4 sm:$0xff]   ;;  %v10461_v0 = vld [vmem:[%s14027_s1 + $0x1d68] ss:$16 sps:$4 sm:$0xff]  }
 0x3c1   :  { %7579 = vmatprep.subr.bf16.mxu1 %v10394_v1  ;;  %v10464_v1 = vld [vmem:[%s14027_s1 + $0x1f68] ss:$16 sps:$4 sm:$0xff]  }
 0x3c2   :  { %v7244_v42 = vpop.f32.mrf.mxu0  ;;  %7489 = vmatmul.mubr.bf16.vlgmr.msra.gmra.mxu0 %v12101_v21  ;;  %v10403_v21 = vld [vmem:[%s14027_s1 + $0x1cac] ss:$16 sps:$4 sm:$0xff]  }
 0x3c3   :  { %v7285_v43 = vpop.f32.mrf.mxu1  ;;  %7530 = vmatmul.mubr.bf16.vlgmr.msra.gmra.mxu1 %v12105_v29  ;;  %v7245_v36 = vadd.f32 %v7244_v42, %v13616_v51  ;;  %7539 = vmatpush1.bf16.msra.mxu0 %v10389_v27  ;;  %v10406_v29 = vld [vmem:[%s14027_s1 + $0x1eac] ss:$16 sps:$4 sm:$0xff]  }
 0x3c4   :  { %7580 = vmatpush1.bf16.msra.mxu1 %v10392_v18  ;;  %v7246_v22 = vpop.f32.mrf.mxu0  ;;  %7540 = vmatprep.subr.bf16.mxu0 %v10397_v11  ;;  %v10469_v27 = vld [vmem:[%s14027_s1 + $0x1d4c] ss:$16 sps:$4 sm:$0xff]   ;;  %v10467_v11 = vld [vmem:[%s14027_s1 + $0x1d48] ss:$16 sps:$4 sm:$0xff]  }
 0x3c5   :  { %v7287_v9 = vpop.f32.mrf.mxu1  ;;  %7581 = vmatprep.subr.bf16.mxu1 %v10400_v12  ;;  %v13818_v51 = vadd.f32 %v7285_v43, %v7245_v36  ;;  %v7247_v10 = vadd.f32 %v7246_v22, %v13621_v6  ;;  %7570 = vmatprep.mubr.bf16.mxu0 %v12121_v30  ;;  %v10409_v30 = vld [vmem:[%s14027_s1 + $0x1c8c] ss:$16 sps:$4 sm:$0xff]   ;;  %v10470_v12 = vld [vmem:[%s14027_s1 + $0x1f48] ss:$16 sps:$4 sm:$0xff]  }
 0x3c6   :  { %7611 = vmatprep.mubr.bf16.mxu1 %v12125_v32  ;;  %v7248_v25 = vpop.f32.mrf.mxu0  ;;  %v10412_v32 = vld [vmem:[%s14027_s1 + $0x1e8c] ss:$16 sps:$4 sm:$0xff]   ;;  %v10473_v36 = vld [vmem:[%s14027_s1 + $0x1d28] ss:$16 sps:$4 sm:$0xff]  }
 0x3c7   :  { %v7289_v37 = vpop.f32.mrf.mxu1  ;;  %v13823_v49 = vadd.f32 %v7287_v9, %v7247_v10  ;;  %7541 = vmatpush1.bf16.msra.mxu0 %v10395_v45  ;;  %v10472_v18 = vld [vmem:[%s14027_s1 + $0x1f4c] ss:$16 sps:$4 sm:$0xff]   ;;  %v10476_v45 = vld [vmem:[%s14027_s1 + $0x1f28] ss:$16 sps:$4 sm:$0xff]  }
 0x3c8   :  { %7582 = vmatpush1.bf16.msra.mxu1 %v10398_v24  ;;  %v7249_v57 = vpop.f32.mrf.mxu0  ;;  %7542 = vmatprep.subr.bf16.mxu0 %v10403_v21  ;;  %v10475_v42 = vld [vmem:[%s14027_s1 + $0x1d2c] ss:$16 sps:$4 sm:$0xff]   ;;  %v10479_v9 = vld [vmem:[%s14027_s1 + $0x1d08] ss:$16 sps:$4 sm:$0xff]  }
 0x3c9   :  { %v7290_v6 = vpop.f32.mrf.mxu1  ;;  %7583 = vmatprep.subr.bf16.mxu1 %v10406_v29  ;;  %v10478_v43 = vld [vmem:[%s14027_s1 + $0x1f2c] ss:$16 sps:$4 sm:$0xff]   ;;  %v10482_v21 = vld [vmem:[%s14027_s1 + $0x1f08] ss:$16 sps:$4 sm:$0xff]  }
 0x3ca   :  { %v10481_v24 = vld [vmem:[%s14027_s1 + $0x1d0c] ss:$16 sps:$4 sm:$0xff]  }
 0x3cb   :  { %7543 = vmatpush1.bf16.msra.mxu0 %v10401_v52  ;;  %v10484_v22 = vld [vmem:[%s14027_s1 + $0x1f0c] ss:$16 sps:$4 sm:$0xff]  }
 0x3cc   :  { %7584 = vmatpush1.bf16.msra.mxu1 %v10404_v56  ;;  %7544 = vmatprep.subr.bf16.mxu0 %v10409_v30 }
 0x3cd   :  { %7585 = vmatprep.subr.bf16.mxu1 %v10412_v32 }
 0x3cf   :  { %7545 = vmatpush1.bf16.msra.mxu0 %v10407_v4 }
 0x3d0   :  { %7586 = vmatpush1.bf16.msra.mxu1 %v10410_v50  ;;  %7546 = vmatprep.subr.bf16.mxu0 %v10415_v15 }
 0x3d1   :  { %7587 = vmatprep.subr.bf16.mxu1 %v10418_v19 }
 0x3d3   :  { %7547 = vmatpush1.bf16.msra.mxu0 %v10413_v58 }
 0x3d4   :  { %7588 = vmatpush1.bf16.msra.mxu1 %v10416_v61  ;;  %7548 = vmatprep.subr.bf16.mxu0 %v10421_v62 }
 0x3d5   :  { %7589 = vmatprep.subr.bf16.mxu1 %v10424_v8 }
 0x3d7   :  { %7549 = vmatpush1.bf16.msra.mxu0 %v10419_v13 }
 0x3d8   :  { %7590 = vmatpush1.bf16.msra.mxu1 %v10422_v59  ;;  %7550 = vmatprep.subr.bf16.mxu0 %v10427_v60 }
 0x3d9   :  { %7591 = vmatprep.subr.bf16.mxu1 %v10430_v14 }
 0x3db   :  { %7551 = vmatpush1.bf16.msra.mxu0 %v10425_v20 }
 0x3dc   :  { %7592 = vmatpush1.bf16.msra.mxu1 %v10428_v46  ;;  %7552 = vmatprep.subr.bf16.mxu0 %v10433_v31 }
 0x3dd   :  { %7593 = vmatprep.subr.bf16.mxu1 %v10436_v23 }
 0x3df   :  { %7553 = vmatpush1.bf16.msra.mxu0 %v10431_v28 }
 0x3e0   :  { %7594 = vmatpush1.bf16.msra.mxu1 %v10434_v48  ;;  %7554 = vmatprep.subr.bf16.mxu0 %v10439_v35 }
 0x3e1   :  { %7595 = vmatprep.subr.bf16.mxu1 %v10442_v40 }
 0x3e3   :  { %7555 = vmatpush2.bf16.msra.mxu0 %v10437_v63 }
 0x3e4   :  { %7596 = vmatpush2.bf16.msra.mxu1 %v10440_v34  ;;  %7556 = vmatprep.subr.bf16.mxu0 %v10445_v53 }
 0x3e5   :  { %7597 = vmatprep.subr.bf16.mxu1 %v10448_v41 }
 0x3e7   :  { %7557 = vmatpush2.bf16.msra.mxu0 %v10443_v47 }
 0x3e8   :  { %7598 = vmatpush2.bf16.msra.mxu1 %v10446_v54  ;;  %7558 = vmatprep.subr.bf16.mxu0 %v10451_v38 }
 0x3e9   :  { %7599 = vmatprep.subr.bf16.mxu1 %v10454_v39 }
 0x3eb   :  { %7559 = vmatpush2.bf16.msra.mxu0 %v10449_v16 }
 0x3ec   :  { %7600 = vmatpush2.bf16.msra.mxu1 %v10452_v5  ;;  %7560 = vmatprep.subr.bf16.mxu0 %v10457_v17 }
 0x3ed   :  { %7601 = vmatprep.subr.bf16.mxu1 %v10460_v2 }
 0x3ef   :  { %7561 = vmatpush2.bf16.msra.mxu0 %v10455_v3 }
 0x3f0   :  { %7602 = vmatpush2.bf16.msra.mxu1 %v10458_v7  ;;  %7562 = vmatprep.subr.bf16.mxu0 %v10463_v44 }
 0x3f1   :  { %7603 = vmatprep.subr.bf16.mxu1 %v10466_v26 }
 0x3f3   :  { %7563 = vmatpush2.bf16.msra.mxu0 %v10461_v0 }
 0x3f4   :  { %7604 = vmatpush2.bf16.msra.mxu1 %v10464_v1  ;;  %7564 = vmatprep.subr.bf16.mxu0 %v10469_v27 }
 0x3f5   :  { %7605 = vmatprep.subr.bf16.mxu1 %v10472_v18 }
 0x3f7   :  { %7565 = vmatpush2.bf16.msra.mxu0 %v10467_v11 }
 0x3f8   :  { %7606 = vmatpush2.bf16.msra.mxu1 %v10470_v12  ;;  %7566 = vmatprep.subr.bf16.mxu0 %v10475_v42 }
 0x3f9   :  { %7607 = vmatprep.subr.bf16.mxu1 %v10478_v43 }
 0x3fb   :  { %7567 = vmatpush2.bf16.msra.mxu0 %v10473_v36 }
 0x3fc   :  { %7608 = vmatpush2.bf16.msra.mxu1 %v10476_v45  ;;  %7568 = vmatprep.subr.bf16.mxu0 %v10481_v24 }
 0x3fd   :  { %7609 = vmatprep.subr.bf16.mxu1 %v10484_v22 }
 0x3ff   :  { %7569 = vmatpush2.bf16.msra.mxu0 %v10479_v9 }
 0x400   :  { %7610 = vmatpush2.bf16.msra.mxu1 %v10482_v21 }
 0x402   :  { %v7326_v29 = vpop.f32.mrf.mxu0  ;;  %7571 = vmatmul.mubr.bf16.vlgmr.msra.gmra.mxu0 %v12319_v55 }
 0x403   :  { %v7367_v10 = vpop.f32.mrf.mxu1  ;;  %7612 = vmatmul.mubr.bf16.vlgmr.msra.gmra.mxu1 %v12323_v33  ;;  %v7327_v25 = vadd.f32 %v7326_v29, %v13818_v51 }
 0x404   :  { %v7328_v37 = vpop.f32.mrf.mxu0 }
 0x405   :  { %v7369_v52 = vpop.f32.mrf.mxu1  ;;  %v7368_v56 = vadd.f32 %v7367_v10, %v7327_v25  ;;  %v7329_v57 = vadd.f32 %v7328_v37, %v13823_v49 }
 0x406   :  { %v7330_v6 = vpop.f32.mrf.mxu0 }
 0x407   :  { %v7371_v30 = vpop.f32.mrf.mxu1  ;;  %v7370_v32 = vadd.f32 %v7369_v52, %v7329_v57 }
 0x408   :  { %v7331_v4 = vpop.f32.mrf.mxu0 }
 0x409   :  { %v7372_v50 = vpop.f32.mrf.mxu1 }
 0x442   :  { %v7408_v15 = vpop.f32.mrf.mxu0 }
 0x443   :  { %v7449_v19 = vpop.f32.mrf.mxu1  ;;  %v7409_v58 = vadd.f32 %v7408_v15, %v7368_v56 }
 0x444   :  { %v7410_v61 = vpop.f32.mrf.mxu0 }
 0x445   :  { %v7451_v62 = vpop.f32.mrf.mxu1  ;;  %v7450_v55 = vadd.f32 %v7449_v19, %v7409_v58  ;;  %v7411_v8 = vadd.f32 %v7410_v61, %v7370_v32 }
 0x446   :  { %v7412_v33 = vpop.f32.mrf.mxu0 }
 0x447   :  { %v7453_v13 = vpop.f32.mrf.mxu1  ;;  %v7452_v51 = vadd.f32 %v7451_v62, %v7411_v8 }
 0x448   :  { %v7413_v59 = vpop.f32.mrf.mxu0 }
 0x449   :  { %v7454_v60 = vpop.f32.mrf.mxu1 }
 0x482   :  { %v7490_v14 = vpop.f32.mrf.mxu0 }
 0x483   :  { %v7531_v20 = vpop.f32.mrf.mxu1  ;;  %v7491_v63 = vadd.f32 %v7490_v14, %v7450_v55 }
 0x484   :  { %v7492_v49 = vpop.f32.mrf.mxu0 }
 0x485   :  { %v7533_v46 = vpop.f32.mrf.mxu1  ;;  %v7493_v31 = vadd.f32 %v7492_v49, %v7452_v51  ;;  %v7532_v34 = vadd.f32 %v7531_v20, %v7491_v63 }
 0x486   :  { %v7494_v23 = vpop.f32.mrf.mxu0 }
 0x487   :  { %v7535_v28 = vpop.f32.mrf.mxu1  ;;  %v7534_v48 = vadd.f32 %v7533_v46, %v7493_v31 }
 0x488   :  { %v7495_v35 = vpop.f32.mrf.mxu0 }
 0x489   :  { %v7536_v40 = vpop.f32.mrf.mxu1 }
 0x4c2   :  { %v7572_v53 = vpop.f32.mrf.mxu0 }
 0x4c3   :  { %v7613_v41 = vpop.f32.mrf.mxu1  ;;  %v7573_v47 = vadd.f32 %v7572_v53, %v7532_v34 }
 0x4c4   :  { %v7574_v54 = vpop.f32.mrf.mxu0 }
 0x4c5   :  { %v7615_v38 = vpop.f32.mrf.mxu1  ;;  %v13991_v39 = vadd.f32 %v7613_v41, %v7573_v47  ;;  %v7575_v16 = vadd.f32 %v7574_v54, %v7534_v48 }
 0x4c6   :  { %v7576_v5 = vpop.f32.mrf.mxu0 }
 0x4c7   :  { %v7617_v17 = vpop.f32.mrf.mxu1  ;;  %v7635_v2 = vsel %vm7620_vm0, %v13991_v39, 0.0  ;;  %v7651_v3 = vmul.f32 %v13991_v39, %v13991_v39  ;;  %v7735_v7 = vrot.slane %v13991_v39, 4  ;;  %v13998_v44 = vadd.f32 %v7615_v38, %v7575_v16 }
 0x4c8   :  { %v7636_v26 = vrot.slane %v7635_v2, 4  ;;  %v7577_v0 = vpop.f32.mrf.mxu0 }
 0x4c9   :  { %v7618_v1 = vpop.f32.mrf.mxu1  ;;  %v7667_v27 = vsel %vm7620_vm0, %v7651_v3, 0.0  ;;  %v7755_v18 = vsel %vm7620_vm0, %v7735_v7, 0.0  ;;  %v7775_v11 = vrot.slane %v7651_v3, 4  ;;  %v7642_v12 = vsel %vm7620_vm0, %v13998_v44, 0.0 }
 0x4ca   :  { %v7637_v42 = vadd.f32 %v7636_v26, %v7635_v2  ;;  %v7668_v43 = vrot.slane %v7667_v27, 4  ;;  %v7756_v36 = vrot.slane %v7755_v18, 4  ;;  %v7643_v45 = vrot.slane %v7642_v12, 4 }
 0x4cb   :  { %v7795_v24 = vsel %vm7620_vm0, %v7775_v11, 0.0  ;;  %v7652_v22 = vmul.f32 %v13998_v44, %v13998_v44  ;;  %v7736_v9 = vrot.slane %v13998_v44, 4 }
 0x4cc   :  { %v7638_v21 = vrot.slane %v7637_v42, 2  ;;  %v7669_v29 = vadd.f32 %v7668_v43, %v7667_v27  ;;  %v7757_v10 = vadd.f32 %v7756_v36, %v7755_v18  ;;  %v7796_v25 = vrot.slane %v7795_v24, 4 }
 0x4cd   :  { %v7644_v37 = vadd.f32 %v7643_v45, %v7642_v12  ;;  %v7674_v52 = vsel %vm7620_vm0, %v7652_v22, 0.0  ;;  %v7762_v56 = vsel %vm7620_vm0, %v7736_v9, 0.0  ;;  %v7776_v57 = vrot.slane %v7652_v22, 4 }
 0x4ce   :  { %v7639_v6 = vadd.f32 %v7638_v21, %v7637_v42  ;;  %v7670_v30 = vrot.slane %v7669_v29, 2  ;;  %v7758_v32 = vrot.slane %v7757_v10, 2  ;;  %v7797_v4 = vadd.f32 %v7796_v25, %v7795_v24 }
 0x4cf   :  { %v7645_v50 = vrot.slane %v7644_v37, 2  ;;  %v7675_v15 = vrot.slane %v7674_v52, 4  ;;  %v7763_v19 = vrot.slane %v7762_v56, 4  ;;  %v7802_v58 = vsel %vm7620_vm0, %v7776_v57, 0.0 }
 0x4d0   :  { %v7640_v61 = vrot.slane %v7639_v6, 1  ;;  %v7671_v62 = vadd.f32 %v7670_v30, %v7669_v29  ;;  %v7759_v55 = vadd.f32 %v7758_v32, %v7757_v10  ;;  %v7798_v8 = vrot.slane %v7797_v4, 2 }
 0x4d1   :  { %v7646_v33 = vadd.f32 %v7645_v50, %v7644_v37  ;;  %v7676_v13 = vadd.f32 %v7675_v15, %v7674_v52  ;;  %v7764_v51 = vadd.f32 %v7763_v19, %v7762_v56  ;;  %v7803_v59 = vrot.slane %v7802_v58, 4 }
 0x4d2   :  { %v7641_v60 = vadd.f32 %v7640_v61, %v7639_v6  ;;  %v7672_v14 = vrot.slane %v7671_v62, 1  ;;  %v7760_v20 = vrot.slane %v7759_v55, 1  ;;  %v7799_v49 = vadd.f32 %v7798_v8, %v7797_v4 }
 0x4d3   :  { %v7647_v46 = vrot.slane %v7646_v33, 1  ;;  %v7677_v31 = vrot.slane %v7676_v13, 2  ;;  %v7765_v23 = vrot.slane %v7764_v51, 2  ;;  %v7804_v28 = vadd.f32 %v7803_v59, %v7802_v58 }
 0x4d4   :  { %v7673_v48 = vadd.f32 %v7672_v14, %v7671_v62  ;;  %v7683_v35 = vmul.f32 0.25, %v7641_v60  ;;  %v7761_v40 = vadd.f32 %v7760_v20, %v7759_v55  ;;  %v7800_v63 = vrot.slane %v7799_v49, 1 }
 0x4d5   :  { %v7648_v34 = vadd.f32 %v7647_v46, %v7646_v33  ;;  %v7678_v53 = vadd.f32 %v7677_v31, %v7676_v13  ;;  %v7766_v41 = vadd.f32 %v7765_v23, %v7764_v51  ;;  %v7805_v47 = vrot.slane %v7804_v28, 2 }
 0x4d6   :  { %v7687_v54 = vmul.f32 0.25, %v7673_v48  ;;  %v7691_v38 = vmul.f32 %v7683_v35, %v7683_v35  ;;  %v7801_v16 = vadd.f32 %v7800_v63, %v7799_v49  ;;  %v7811_v5 = vmul.f32 0.25, %v7761_v40 }
 0x4d7   :  { %v7679_v17 = vrot.slane %v7678_v53, 1  ;;  %v7684_v2 = vmul.f32 0.25, %v7648_v34  ;;  %v7767_v3 = vrot.slane %v7766_v41, 1  ;;  %v7806_v0 = vadd.f32 %v7805_v47, %v7804_v28 }
 0x4d8   :  { %v7695_v7 = vsub.f32 %v7687_v54, %v7691_v38  ;;  %v7815_v26 = vmul.f32 0.25, %v7801_v16  ;;  %v7819_v1 = vmul.f32 %v7811_v5, %v7811_v5  ;;  %v7699_v52 = vsub.f32 %v13991_v39, %v7683_v35 }
 0x4d9   :  { %v7680_v27 = vadd.f32 %v7679_v17, %v7678_v53  ;;  %v7692_v18 = vmul.f32 %v7684_v2, %v7684_v2  ;;  %v7768_v12 = vadd.f32 %v7767_v3, %v7766_v41  ;;  %v7807_v42 = vrot.slane %v7806_v0, 1 }
 0x4da   :  { %v7703_v11 = vadd.f32 1e-05, %v7695_v7  ;;  %v7823_v43 = vsub.f32 %v7815_v26, %v7819_v1  ;;  %v7827_v6 = vsub.f32 %v13991_v39, %v7811_v5  ;;  %v7700_v50 = vsub.f32 %v13998_v44, %v7684_v2 }
 0x4db   :  { %v7688_v36 = vmul.f32 0.25, %v7680_v27  ;;  %v7808_v45 = vadd.f32 %v7807_v42, %v7806_v0  ;;  %v7812_v24 = vmul.f32 0.25, %v7768_v12 }
 0x4dc   :  { %10493 = vrsqrt.f32 %v7703_v11  ;;  %v7831_v22 = vadd.f32 1e-05, %v7823_v43 }
 0x4dd   :  { %v7696_v9 = vsub.f32 %v7688_v36, %v7692_v18  ;;  %v7816_v21 = vmul.f32 0.25, %v7808_v45  ;;  %v7820_v29 = vmul.f32 %v7812_v24, %v7812_v24  ;;  %v7828_v62 = vsub.f32 %v13998_v44, %v7812_v24 }
 0x4de   :  { %10495 = vrsqrt.f32 %v7831_v22 }
 0x4df   :  { %v7704_v10 = vadd.f32 1e-05, %v7696_v9  ;;  %v7824_v25 = vsub.f32 %v7816_v21, %v7820_v29 }
 0x4e1   :  { %10497 = vrsqrt.f32 %v7704_v10  ;;  %v7832_v37 = vadd.f32 1e-05, %v7824_v25 }
 0x4e3   :  { %10499 = vrsqrt.f32 %v7832_v37 }
 0x4e9   :  { %v10494_v56 = vpop.eup %10493 }
 0x4ea   :  { %v7711_v57 = vmul.f32 %v10494_v56, %v7699_v52 }
 0x4eb   :  { %v10496_v30 = vpop.eup %10495 }
 0x4ec   :  { %vm7715_vm5 = vcmp.gt.f32.partialorder %v7711_v57, 0.0  ;;  %v7719_v32 = vmul.f32 0.2, %v7711_v57  ;;  %v7839_v4 = vmul.f32 %v10496_v30, %v7827_v6 }
 0x4ee   :  { %v10498_v15 = vpop.eup %10497  ;;  %v7723_v19 = vsel %vm7715_vm5, %v7711_v57, %v7719_v32  ;;  %vm7843_vm6 = vcmp.gt.f32.partialorder %v7839_v4, 0.0  ;;  %v7847_v58 = vmul.f32 0.2, %v7839_v4 }
 0x4ef   :  { %7727 = vst [vmem:[%s14030_s3 + $0x10] sm:$0xf] %v7723_v19  ;;  %v7712_v61 = vmul.f32 %v10498_v15, %v7700_v50 }
 0x4f0   :  { %v10500_v55 = vpop.eup %10499  ;;  %v7851_v8 = vsel %vm7843_vm6, %v7839_v4, %v7847_v58 }
 0x4f1   :  { %vm7716_vm7 = vcmp.gt.f32.partialorder %v7712_v61, 0.0  ;;  %v7720_v39 = vmul.f32 0.2, %v7712_v61  ;;  %7855 = vst [vmem:[%s14030_s3 + $0x10] sm:$0xf0] %v7851_v8  ;;  %v7840_v33 = vmul.f32 %v10500_v55, %v7828_v62 }
 0x4f3   :  { %v7724_v13 = vsel %vm7716_vm7, %v7712_v61, %v7720_v39  ;;  %vm7844_vm8 = vcmp.gt.f32.partialorder %v7840_v33, 0.0  ;;  %v7848_v51 = vmul.f32 0.2, %v7840_v33 }
 0x4f4   :  { %7728 = vst [vmem:[%s14030_s3 + $0x18] sm:$0xf] %v7724_v13 }
 0x4f5   :  { %v7852_v59 = vsel %vm7844_vm8, %v7840_v33, %v7848_v51 }
 0x4f6   :  { %7856 = vst [vmem:[%s14030_s3 + $0x18] sm:$0xf0] %v7852_v59 }

// kernel: discriminator_forward.9
= control target key start
LH: loop header
LB: loop body
LE: loop exit
PB: predicated region body
PF: predicated region fallthrough
CT: control target
= control target key end

     0   :  { %s9201_s1 = inlined_call_operand.vmem [shape: bf16[8192,128], index: 1, kind: input, shape index: {}]   ;;  %s9202_s0 = inlined_call_operand.vmem [shape: bf16[8,8192], index: 0, kind: input, shape index: {}]   ;;  %s9203_s2 = inlined_call_operand.vmem [shape: f32[1,128], index: 2, kind: input, shape index: {}]   ;;  %s9204_s3 = inlined_call_operand.vmem [shape: f32[8,128], index: 3, kind: output, shape index: {}]  }
   0x1   :  { %v6940_v0 = vld [vmem:[%s9201_s1 + $0x78] sm:$0xff]   ;;  %v6944_v4 = vld [vmem:[%s9201_s1 + $0x70] sm:$0xff]   ;;  %v6948_v8 = vld [vmem:[%s9201_s1 + $0x68] sm:$0xff]  }
   0x2   :  { %v6941_v1 = vld [vmem:[%s9201_s1 + $0xf8] sm:$0xff]   ;;  %6236 = vmatprep.subr.bf16.mxu0 %v6940_v0  ;;  %v6945_v5 = vld [vmem:[%s9201_s1 + $0xf0] sm:$0xff]   ;;  %v6949_v9 = vld [vmem:[%s9201_s1 + $0xe8] sm:$0xff]  }
   0x3   :  { %v6942_v2 = vld [vmem:[%s9201_s1 + $0x38] sm:$0xff]   ;;  %6258 = vmatprep.subr.bf16.mxu1 %v6941_v1  ;;  %v6946_v6 = vld [vmem:[%s9201_s1 + $0x30] sm:$0xff]   ;;  %v6950_v10 = vld [vmem:[%s9201_s1 + $0x28] sm:$0xff]  }
   0x4   :  { %v6943_v3 = vld [vmem:[%s9201_s1 + $0xb8] sm:$0xff]   ;;  %6237 = vmatpush3.bf16.msra.mxu0 %v6942_v2  ;;  %v6947_v7 = vld [vmem:[%s9201_s1 + $0xb0] sm:$0xff]   ;;  %v6951_v11 = vld [vmem:[%s9201_s1 + $0xa8] sm:$0xff]  }
   0x5   :  { %6259 = vmatpush3.bf16.msra.mxu1 %v6943_v3  ;;  %6238 = vmatprep.subr.bf16.mxu0 %v6944_v4  ;;  %v6952_v12 = vld [vmem:[%s9201_s1 + $0x60] sm:$0xff]   ;;  %v6956_v16 = vld [vmem:[%s9201_s1 + $0x58] sm:$0xff]   ;;  %v6960_v20 = vld [vmem:[%s9201_s1 + $0x50] sm:$0xff]  }
   0x6   :  { %6260 = vmatprep.subr.bf16.mxu1 %v6945_v5  ;;  %v6953_v13 = vld [vmem:[%s9201_s1 + $0xe0] sm:$0xff]   ;;  %v6957_v17 = vld [vmem:[%s9201_s1 + $0xd8] sm:$0xff]   ;;  %v6961_v21 = vld [vmem:[%s9201_s1 + $0xd0] sm:$0xff]  }
   0x7   :  { %v6954_v14 = vld [vmem:[%s9201_s1 + $0x20] sm:$0xff]   ;;  %v6958_v18 = vld [vmem:[%s9201_s1 + $0x18] sm:$0xff]   ;;  %v6962_v22 = vld [vmem:[%s9201_s1 + $0x10] sm:$0xff]  }
   0x8   :  { %6239 = vmatpush3.bf16.msra.mxu0 %v6946_v6  ;;  %v6955_v15 = vld [vmem:[%s9201_s1 + $0xa0] sm:$0xff]   ;;  %v6959_v19 = vld [vmem:[%s9201_s1 + $0x98] sm:$0xff]   ;;  %v6963_v23 = vld [vmem:[%s9201_s1 + $0x90] sm:$0xff]  }
   0x9   :  { %6261 = vmatpush3.bf16.msra.mxu1 %v6947_v7  ;;  %6240 = vmatprep.subr.bf16.mxu0 %v6948_v8  ;;  %v6964_v24 = vld [vmem:[%s9201_s1 + $0x48] sm:$0xff]   ;;  %v6968_v28 = vld [vmem:[%s9201_s1 + $0x40] sm:$0xff]   ;;  %v6976_v38 = vld [vmem:[%s9201_s1 + $0x178] sm:$0xff]  }
   0xa   :  { %6262 = vmatprep.subr.bf16.mxu1 %v6949_v9  ;;  %v6965_v25 = vld [vmem:[%s9201_s1 + $0xc8] sm:$0xff]   ;;  %v6969_v29 = vld [vmem:[%s9201_s1 + $0xc0] sm:$0xff]   ;;  %v6977_v39 = vld [vmem:[%s9201_s1 + $0x1f8] sm:$0xff]  }
   0xb   :  { %v6966_v26 = vld [vmem:[%s9201_s1 + $0x8] sm:$0xff]   ;;  %v6970_v30 = vld [vmem:[%s9201_s1] sm:$0xff]   ;;  %v6978_v40 = vld [vmem:[%s9201_s1 + $0x138] sm:$0xff]  }
   0xc   :  { %6241 = vmatpush3.bf16.msra.mxu0 %v6950_v10  ;;  %v6967_v27 = vld [vmem:[%s9201_s1 + $0x88] sm:$0xff]   ;;  %v6971_v31 = vld [vmem:[%s9201_s1 + $0x80] sm:$0xff]   ;;  %v6979_v41 = vld [vmem:[%s9201_s1 + $0x1b8] sm:$0xff]  }
   0xd   :  { %6263 = vmatpush3.bf16.msra.mxu1 %v6951_v11  ;;  %6242 = vmatprep.subr.bf16.mxu0 %v6952_v12  ;;  %v15_v32 = vld [vmem:[%s9202_s0] sm:$0xff]  ;;  %v16_v33 = vld [vmem:[%s9202_s0 + $0x8] sm:$0xff]  ;;  %v6980_v42 = vld [vmem:[%s9201_s1 + $0x170] sm:$0xff]  }
   0xe   :  { %6264 = vmatprep.subr.bf16.mxu1 %v6953_v13  ;;  %v5660_v34 = vcombine.low %v15_v32, %v15_v32  ;;  %v5661_v35 = vcombine.high %v15_v32, %v15_v32  ;;  %v5662_v36 = vcombine.low %v16_v33, %v16_v33  ;;  %v5663_v37 = vcombine.high %v16_v33, %v16_v33  ;;  %v6981_v43 = vld [vmem:[%s9201_s1 + $0x1f0] sm:$0xff]   ;;  %v6984_v46 = vld [vmem:[%s9201_s1 + $0x168] sm:$0xff]   ;;  %v6988_v50 = vld [vmem:[%s9201_s1 + $0x160] sm:$0xff]  }
   0xf   :  { %v6982_v44 = vld [vmem:[%s9201_s1 + $0x130] sm:$0xff]   ;;  %v6985_v47 = vld [vmem:[%s9201_s1 + $0x1e8] sm:$0xff]   ;;  %v6989_v51 = vld [vmem:[%s9201_s1 + $0x1e0] sm:$0xff]  }
  0x10   :  { %6243 = vmatpush3.bf16.msra.mxu0 %v6954_v14  ;;  %4406 = vmatprep.mubr.bf16.mxu0 %v5661_v35  ;;  %v6983_v45 = vld [vmem:[%s9201_s1 + $0x1b0] sm:$0xff]   ;;  %v6986_v48 = vld [vmem:[%s9201_s1 + $0x128] sm:$0xff]   ;;  %v6990_v52 = vld [vmem:[%s9201_s1 + $0x120] sm:$0xff]  }
  0x11   :  { %6265 = vmatpush3.bf16.msra.mxu1 %v6955_v15  ;;  %6244 = vmatprep.subr.bf16.mxu0 %v6956_v16  ;;  %v6987_v49 = vld [vmem:[%s9201_s1 + $0x1a8] sm:$0xff]   ;;  %v6991_v53 = vld [vmem:[%s9201_s1 + $0x1a0] sm:$0xff]   ;;  %v6992_v54 = vld [vmem:[%s9201_s1 + $0x158] sm:$0xff]  }
  0x12   :  { %6266 = vmatprep.subr.bf16.mxu1 %v6957_v17  ;;  %4446 = vmatprep.mubr.bf16.mxu1 %v5663_v37  ;;  %v6993_v55 = vld [vmem:[%s9201_s1 + $0x1d8] sm:$0xff]   ;;  %v6996_v58 = vld [vmem:[%s9201_s1 + $0x150] sm:$0xff]   ;;  %v7000_v62 = vld [vmem:[%s9201_s1 + $0x148] sm:$0xff]  }
  0x13   :  { %v6994_v56 = vld [vmem:[%s9201_s1 + $0x118] sm:$0xff]   ;;  %v6997_v59 = vld [vmem:[%s9201_s1 + $0x1d0] sm:$0xff]   ;;  %v7001_v63 = vld [vmem:[%s9201_s1 + $0x1c8] sm:$0xff]  }
  0x14   :  { %6245 = vmatpush3.bf16.msra.mxu0 %v6958_v18  ;;  %v6995_v57 = vld [vmem:[%s9201_s1 + $0x198] sm:$0xff]   ;;  %v6998_v60 = vld [vmem:[%s9201_s1 + $0x110] sm:$0xff]   ;;  %v7002_v0 = vld [vmem:[%s9201_s1 + $0x108] sm:$0xff]  }
  0x15   :  { %6267 = vmatpush3.bf16.msra.mxu1 %v6959_v19  ;;  %6246 = vmatprep.subr.bf16.mxu0 %v6960_v20  ;;  %v6999_v61 = vld [vmem:[%s9201_s1 + $0x190] sm:$0xff]   ;;  %v7003_v1 = vld [vmem:[%s9201_s1 + $0x188] sm:$0xff]   ;;  %v7004_v2 = vld [vmem:[%s9201_s1 + $0x140] sm:$0xff]  }
  0x16   :  { %6268 = vmatprep.subr.bf16.mxu1 %v6961_v21  ;;  %v7005_v3 = vld [vmem:[%s9201_s1 + $0x1c0] sm:$0xff]   ;;  %v17_v6 = vld [vmem:[%s9202_s0 + $0x10] sm:$0xff]  ;;  %v18_v9 = vld [vmem:[%s9202_s0 + $0x18] sm:$0xff] }
  0x17   :  { %v7006_v4 = vld [vmem:[%s9201_s1 + $0x100] sm:$0xff]   ;;  %v5664_v7 = vcombine.low %v17_v6, %v17_v6  ;;  %v5665_v8 = vcombine.high %v17_v6, %v17_v6  ;;  %v5666_v10 = vcombine.low %v18_v9, %v18_v9  ;;  %v5667_v11 = vcombine.high %v18_v9, %v18_v9  ;;  %v7012_v12 = vld [vmem:[%s9201_s1 + $0x278] sm:$0xff]   ;;  %v7016_v16 = vld [vmem:[%s9201_s1 + $0x270] sm:$0xff]  }
  0x18   :  { %6247 = vmatpush3.bf16.msra.mxu0 %v6962_v22  ;;  %v7007_v5 = vld [vmem:[%s9201_s1 + $0x180] sm:$0xff]   ;;  %v7013_v13 = vld [vmem:[%s9201_s1 + $0x2f8] sm:$0xff]   ;;  %v7017_v17 = vld [vmem:[%s9201_s1 + $0x2f0] sm:$0xff]  }
  0x19   :  { %6269 = vmatpush3.bf16.msra.mxu1 %v6963_v23  ;;  %6248 = vmatprep.subr.bf16.mxu0 %v6964_v24  ;;  %v7014_v14 = vld [vmem:[%s9201_s1 + $0x238] sm:$0xff]   ;;  %v7018_v18 = vld [vmem:[%s9201_s1 + $0x230] sm:$0xff]   ;;  %v7020_v20 = vld [vmem:[%s9201_s1 + $0x268] sm:$0xff]  }
  0x1a   :  { %6270 = vmatprep.subr.bf16.mxu1 %v6965_v25  ;;  %v7015_v15 = vld [vmem:[%s9201_s1 + $0x2b8] sm:$0xff]   ;;  %v7019_v19 = vld [vmem:[%s9201_s1 + $0x2b0] sm:$0xff]   ;;  %v7021_v21 = vld [vmem:[%s9201_s1 + $0x2e8] sm:$0xff]  }
  0x1b   :  { %v7022_v22 = vld [vmem:[%s9201_s1 + $0x228] sm:$0xff]   ;;  %v7024_v24 = vld [vmem:[%s9201_s1 + $0x260] sm:$0xff]   ;;  %v7032_v32 = vld [vmem:[%s9201_s1 + $0x250] sm:$0xff]  }
  0x1c   :  { %6249 = vmatpush3.bf16.msra.mxu0 %v6966_v26  ;;  %v7023_v23 = vld [vmem:[%s9201_s1 + $0x2a8] sm:$0xff]   ;;  %v7025_v25 = vld [vmem:[%s9201_s1 + $0x2e0] sm:$0xff]   ;;  %v7033_v33 = vld [vmem:[%s9201_s1 + $0x2d0] sm:$0xff]  }
  0x1d   :  { %6271 = vmatpush3.bf16.msra.mxu1 %v6967_v27  ;;  %6250 = vmatprep.subr.bf16.mxu0 %v6968_v28  ;;  %v7026_v26 = vld [vmem:[%s9201_s1 + $0x220] sm:$0xff]   ;;  %v7028_v28 = vld [vmem:[%s9201_s1 + $0x258] sm:$0xff]   ;;  %v7035_v35 = vld [vmem:[%s9201_s1 + $0x290] sm:$0xff]  }
  0x1e   :  { %6272 = vmatprep.subr.bf16.mxu1 %v6969_v29  ;;  %v7027_v27 = vld [vmem:[%s9201_s1 + $0x2a0] sm:$0xff]   ;;  %v7029_v29 = vld [vmem:[%s9201_s1 + $0x2d8] sm:$0xff]   ;;  %v7037_v37 = vld [vmem:[%s9201_s1 + $0x2c8] sm:$0xff]  }
  0x1f   :  { %v7068_v6 = vld [vmem:[%s9201_s1 + $0x350] sm:$0xff]  }
  0x20   :  { %6251 = vmatpush3.bf16.msra.mxu0 %v6970_v30  ;;  %v7030_v30 = vld [vmem:[%s9201_s1 + $0x218] sm:$0xff]   ;;  %v7071_v9 = vld [vmem:[%s9201_s1 + $0x390] sm:$0xff]  }
  0x21   :  { %6273 = vmatpush3.bf16.msra.mxu1 %v6971_v31  ;;  %6280 = vmatprep.subr.bf16.mxu0 %v6976_v38  ;;  %v7031_v31 = vld [vmem:[%s9201_s1 + $0x298] sm:$0xff]   ;;  %v7038_v38 = vld [vmem:[%s9201_s1 + $0x208] sm:$0xff]  }
  0x22   :  { %6302 = vmatprep.subr.bf16.mxu1 %v6977_v39  ;;  %v7039_v39 = vld [vmem:[%s9201_s1 + $0x288] sm:$0xff]  }
  0x23   :  { %4407 = vmatmul.mubr.bf16.vlgmr.msra.gmra.mxu0 %v5660_v34  ;;  %v7034_v34 = vld [vmem:[%s9201_s1 + $0x210] sm:$0xff]  }
  0x24   :  { %4447 = vmatmul.mubr.bf16.vlgmr.msra.gmra.mxu1 %v5662_v36  ;;  %6281 = vmatpush3.bf16.msra.mxu0 %v6978_v40  ;;  %v7036_v36 = vld [vmem:[%s9201_s1 + $0x248] sm:$0xff]   ;;  %v7040_v40 = vld [vmem:[%s9201_s1 + $0x240] sm:$0xff]  }
  0x25   :  { %6303 = vmatpush3.bf16.msra.mxu1 %v6979_v41  ;;  %6282 = vmatprep.subr.bf16.mxu0 %v6980_v42  ;;  %v7041_v41 = vld [vmem:[%s9201_s1 + $0x2c0] sm:$0xff]  }
  0x26   :  { %6304 = vmatprep.subr.bf16.mxu1 %v6981_v43  ;;  %4486 = vmatprep.mubr.bf16.mxu0 %v5665_v8  ;;  %v7042_v42 = vld [vmem:[%s9201_s1 + $0x200] sm:$0xff]   ;;  %v7070_v8 = vld [vmem:[%s9201_s1 + $0x310] sm:$0xff]  }
  0x27   :  { %4526 = vmatprep.mubr.bf16.mxu1 %v5667_v11  ;;  %v7043_v43 = vld [vmem:[%s9201_s1 + $0x280] sm:$0xff]   ;;  %v7073_v11 = vld [vmem:[%s9201_s1 + $0x3c8] sm:$0xff]  }
  0x28   :  { %6283 = vmatpush3.bf16.msra.mxu0 %v6982_v44  ;;  %v19_v44 = vld [vmem:[%s9202_s0 + $0x20] sm:$0xff] }
  0x29   :  { %6305 = vmatpush3.bf16.msra.mxu1 %v6983_v45  ;;  %6284 = vmatprep.subr.bf16.mxu0 %v6984_v46  ;;  %v20_v45 = vld [vmem:[%s9202_s0 + $0x28] sm:$0xff]  ;;  %v5668_v46 = vcombine.low %v19_v44, %v19_v44 }
  0x2a   :  { %6306 = vmatprep.subr.bf16.mxu1 %v6985_v47  ;;  %v5669_v47 = vcombine.high %v19_v44, %v19_v44  ;;  %v7104_v44 = vld [vmem:[%s9201_s1 + $0x450] sm:$0xff]  }
  0x2c   :  { %6285 = vmatpush3.bf16.msra.mxu0 %v6986_v48  ;;  %v5670_v48 = vcombine.low %v20_v45, %v20_v45 }
  0x2d   :  { %6307 = vmatpush3.bf16.msra.mxu1 %v6987_v49  ;;  %6286 = vmatprep.subr.bf16.mxu0 %v6988_v50  ;;  %v5671_v49 = vcombine.high %v20_v45, %v20_v45  ;;  %v7048_v50 = vld [vmem:[%s9201_s1 + $0x378] sm:$0xff]   ;;  %v7105_v45 = vld [vmem:[%s9201_s1 + $0x4d0] sm:$0xff]  }
  0x2e   :  { %6308 = vmatprep.subr.bf16.mxu1 %v6989_v51  ;;  %v7049_v51 = vld [vmem:[%s9201_s1 + $0x3f8] sm:$0xff]  }
  0x30   :  { %6287 = vmatpush3.bf16.msra.mxu0 %v6990_v52  ;;  %v7050_v52 = vld [vmem:[%s9201_s1 + $0x338] sm:$0xff]  }
  0x31   :  { %6309 = vmatpush3.bf16.msra.mxu1 %v6991_v53  ;;  %6288 = vmatprep.subr.bf16.mxu0 %v6992_v54  ;;  %v7051_v53 = vld [vmem:[%s9201_s1 + $0x3b8] sm:$0xff]   ;;  %v7052_v54 = vld [vmem:[%s9201_s1 + $0x370] sm:$0xff]  }
  0x32   :  { %6310 = vmatprep.subr.bf16.mxu1 %v6993_v55  ;;  %v7053_v55 = vld [vmem:[%s9201_s1 + $0x3f0] sm:$0xff]  }
  0x34   :  { %6289 = vmatpush3.bf16.msra.mxu0 %v6994_v56  ;;  %v7054_v56 = vld [vmem:[%s9201_s1 + $0x330] sm:$0xff]  }
  0x35   :  { %6311 = vmatpush3.bf16.msra.mxu1 %v6995_v57  ;;  %6290 = vmatprep.subr.bf16.mxu0 %v6996_v58  ;;  %v7055_v57 = vld [vmem:[%s9201_s1 + $0x3b0] sm:$0xff]   ;;  %v7056_v58 = vld [vmem:[%s9201_s1 + $0x368] sm:$0xff]  }
  0x36   :  { %6312 = vmatprep.subr.bf16.mxu1 %v6997_v59  ;;  %v7057_v59 = vld [vmem:[%s9201_s1 + $0x3e8] sm:$0xff]  }
  0x38   :  { %6291 = vmatpush3.bf16.msra.mxu0 %v6998_v60  ;;  %v7058_v60 = vld [vmem:[%s9201_s1 + $0x328] sm:$0xff]  }
  0x39   :  { %6313 = vmatpush3.bf16.msra.mxu1 %v6999_v61  ;;  %6292 = vmatprep.subr.bf16.mxu0 %v7000_v62  ;;  %v7059_v61 = vld [vmem:[%s9201_s1 + $0x3a8] sm:$0xff]   ;;  %v7060_v62 = vld [vmem:[%s9201_s1 + $0x360] sm:$0xff]  }
  0x3a   :  { %6314 = vmatprep.subr.bf16.mxu1 %v7001_v63  ;;  %v7061_v63 = vld [vmem:[%s9201_s1 + $0x3e0] sm:$0xff]  }
  0x3c   :  { %6293 = vmatpush3.bf16.msra.mxu0 %v7002_v0  ;;  %v7062_v0 = vld [vmem:[%s9201_s1 + $0x320] sm:$0xff]  }
  0x3d   :  { %6315 = vmatpush3.bf16.msra.mxu1 %v7003_v1  ;;  %6294 = vmatprep.subr.bf16.mxu0 %v7004_v2  ;;  %v7063_v1 = vld [vmem:[%s9201_s1 + $0x3a0] sm:$0xff]   ;;  %v7064_v2 = vld [vmem:[%s9201_s1 + $0x358] sm:$0xff]  }
  0x3e   :  { %6316 = vmatprep.subr.bf16.mxu1 %v7005_v3  ;;  %v7065_v3 = vld [vmem:[%s9201_s1 + $0x3d8] sm:$0xff]  }
  0x40   :  { %6295 = vmatpush3.bf16.msra.mxu0 %v7006_v4  ;;  %v7066_v4 = vld [vmem:[%s9201_s1 + $0x318] sm:$0xff]  }
  0x41   :  { %6317 = vmatpush3.bf16.msra.mxu1 %v7007_v5  ;;  %6324 = vmatprep.subr.bf16.mxu0 %v7012_v12  ;;  %v7067_v5 = vld [vmem:[%s9201_s1 + $0x398] sm:$0xff]   ;;  %v7074_v12 = vld [vmem:[%s9201_s1 + $0x308] sm:$0xff]  }
  0x42   :  { %6346 = vmatprep.subr.bf16.mxu1 %v7013_v13  ;;  %v7075_v13 = vld [vmem:[%s9201_s1 + $0x388] sm:$0xff]  }
  0x43   :  { %4487 = vmatmul.mubr.bf16.vlgmr.msra.gmra.mxu0 %v5664_v7  ;;  %v7069_v7 = vld [vmem:[%s9201_s1 + $0x3d0] sm:$0xff]  }
  0x44   :  { %4527 = vmatmul.mubr.bf16.vlgmr.msra.gmra.mxu1 %v5666_v10  ;;  %6325 = vmatpush3.bf16.msra.mxu0 %v7014_v14  ;;  %v7072_v10 = vld [vmem:[%s9201_s1 + $0x348] sm:$0xff]   ;;  %v7076_v14 = vld [vmem:[%s9201_s1 + $0x340] sm:$0xff]  }
  0x45   :  { %6347 = vmatpush3.bf16.msra.mxu1 %v7015_v15  ;;  %6326 = vmatprep.subr.bf16.mxu0 %v7016_v16  ;;  %v7077_v15 = vld [vmem:[%s9201_s1 + $0x3c0] sm:$0xff]  }
  0x46   :  { %6348 = vmatprep.subr.bf16.mxu1 %v7017_v17  ;;  %4566 = vmatprep.mubr.bf16.mxu0 %v5669_v47  ;;  %v7078_v16 = vld [vmem:[%s9201_s1 + $0x300] sm:$0xff]   ;;  %v7107_v47 = vld [vmem:[%s9201_s1 + $0x490] sm:$0xff]  }
  0x47   :  { %4606 = vmatprep.mubr.bf16.mxu1 %v5671_v49  ;;  %v7079_v17 = vld [vmem:[%s9201_s1 + $0x380] sm:$0xff]   ;;  %v7109_v49 = vld [vmem:[%s9201_s1 + $0x4c8] sm:$0xff]  }
  0x48   :  { %6327 = vmatpush3.bf16.msra.mxu0 %v7018_v18  ;;  %v21_v18 = vld [vmem:[%s9202_s0 + $0x30] sm:$0xff] }
  0x49   :  { %6349 = vmatpush3.bf16.msra.mxu1 %v7019_v19  ;;  %6328 = vmatprep.subr.bf16.mxu0 %v7020_v20  ;;  %v22_v19 = vld [vmem:[%s9202_s0 + $0x38] sm:$0xff]  ;;  %v5672_v20 = vcombine.low %v21_v18, %v21_v18 }
  0x4a   :  { %6350 = vmatprep.subr.bf16.mxu1 %v7021_v21  ;;  %v5673_v21 = vcombine.high %v21_v18, %v21_v18  ;;  %v7140_v18 = vld [vmem:[%s9201_s1 + $0x550] sm:$0xff]  }
  0x4c   :  { %6329 = vmatpush3.bf16.msra.mxu0 %v7022_v22  ;;  %v5674_v22 = vcombine.low %v22_v19, %v22_v19 }
  0x4d   :  { %6351 = vmatpush3.bf16.msra.mxu1 %v7023_v23  ;;  %6330 = vmatprep.subr.bf16.mxu0 %v7024_v24  ;;  %v7084_v23 = vld [vmem:[%s9201_s1 + $0x478] sm:$0xff]   ;;  %v5675_v24 = vcombine.high %v22_v19, %v22_v19  ;;  %v7141_v19 = vld [vmem:[%s9201_s1 + $0x5d0] sm:$0xff]  }
  0x4e   :  { %6352 = vmatprep.subr.bf16.mxu1 %v7025_v25  ;;  %v7085_v25 = vld [vmem:[%s9201_s1 + $0x4f8] sm:$0xff]  }
  0x50   :  { %6331 = vmatpush3.bf16.msra.mxu0 %v7026_v26  ;;  %v7086_v26 = vld [vmem:[%s9201_s1 + $0x438] sm:$0xff]  }
  0x51   :  { %6353 = vmatpush3.bf16.msra.mxu1 %v7027_v27  ;;  %6332 = vmatprep.subr.bf16.mxu0 %v7028_v28  ;;  %v7087_v27 = vld [vmem:[%s9201_s1 + $0x4b8] sm:$0xff]   ;;  %v7088_v28 = vld [vmem:[%s9201_s1 + $0x470] sm:$0xff]  }
  0x52   :  { %6354 = vmatprep.subr.bf16.mxu1 %v7029_v29  ;;  %v7089_v29 = vld [vmem:[%s9201_s1 + $0x4f0] sm:$0xff]  }
  0x54   :  { %6333 = vmatpush3.bf16.msra.mxu0 %v7030_v30  ;;  %v7090_v30 = vld [vmem:[%s9201_s1 + $0x430] sm:$0xff]  }
  0x55   :  { %6355 = vmatpush3.bf16.msra.mxu1 %v7031_v31  ;;  %6334 = vmatprep.subr.bf16.mxu0 %v7032_v32  ;;  %v7091_v31 = vld [vmem:[%s9201_s1 + $0x4b0] sm:$0xff]   ;;  %v7092_v32 = vld [vmem:[%s9201_s1 + $0x468] sm:$0xff]  }
  0x56   :  { %6356 = vmatprep.subr.bf16.mxu1 %v7033_v33  ;;  %v7093_v33 = vld [vmem:[%s9201_s1 + $0x4e8] sm:$0xff]  }
  0x58   :  { %6335 = vmatpush3.bf16.msra.mxu0 %v7034_v34  ;;  %v7094_v34 = vld [vmem:[%s9201_s1 + $0x428] sm:$0xff]  }
  0x59   :  { %6357 = vmatpush3.bf16.msra.mxu1 %v7035_v35  ;;  %6336 = vmatprep.subr.bf16.mxu0 %v7036_v36  ;;  %v7095_v35 = vld [vmem:[%s9201_s1 + $0x4a8] sm:$0xff]   ;;  %v7096_v36 = vld [vmem:[%s9201_s1 + $0x460] sm:$0xff]  }
  0x5a   :  { %6358 = vmatprep.subr.bf16.mxu1 %v7037_v37  ;;  %v7097_v37 = vld [vmem:[%s9201_s1 + $0x4e0] sm:$0xff]  }
  0x5c   :  { %6337 = vmatpush3.bf16.msra.mxu0 %v7038_v38  ;;  %v7098_v38 = vld [vmem:[%s9201_s1 + $0x420] sm:$0xff]  }
  0x5d   :  { %6359 = vmatpush3.bf16.msra.mxu1 %v7039_v39  ;;  %6338 = vmatprep.subr.bf16.mxu0 %v7040_v40  ;;  %v7099_v39 = vld [vmem:[%s9201_s1 + $0x4a0] sm:$0xff]   ;;  %v7100_v40 = vld [vmem:[%s9201_s1 + $0x458] sm:$0xff]  }
  0x5e   :  { %6360 = vmatprep.subr.bf16.mxu1 %v7041_v41  ;;  %v7101_v41 = vld [vmem:[%s9201_s1 + $0x4d8] sm:$0xff]  }
  0x60   :  { %6339 = vmatpush3.bf16.msra.mxu0 %v7042_v42  ;;  %v7102_v42 = vld [vmem:[%s9201_s1 + $0x418] sm:$0xff]  }
  0x61   :  { %6361 = vmatpush3.bf16.msra.mxu1 %v7043_v43  ;;  %6368 = vmatprep.subr.bf16.mxu0 %v7048_v50  ;;  %v7103_v43 = vld [vmem:[%s9201_s1 + $0x498] sm:$0xff]   ;;  %v7110_v50 = vld [vmem:[%s9201_s1 + $0x408] sm:$0xff]  }
  0x62   :  { %6390 = vmatprep.subr.bf16.mxu1 %v7049_v51  ;;  %v7111_v51 = vld [vmem:[%s9201_s1 + $0x488] sm:$0xff]  }
  0x63   :  { %4567 = vmatmul.mubr.bf16.vlgmr.msra.gmra.mxu0 %v5668_v46  ;;  %v7106_v46 = vld [vmem:[%s9201_s1 + $0x410] sm:$0xff]  }
  0x64   :  { %4607 = vmatmul.mubr.bf16.vlgmr.msra.gmra.mxu1 %v5670_v48  ;;  %6369 = vmatpush3.bf16.msra.mxu0 %v7050_v52  ;;  %v7108_v48 = vld [vmem:[%s9201_s1 + $0x448] sm:$0xff]   ;;  %v7112_v52 = vld [vmem:[%s9201_s1 + $0x440] sm:$0xff]  }
  0x65   :  { %6391 = vmatpush3.bf16.msra.mxu1 %v7051_v53  ;;  %6370 = vmatprep.subr.bf16.mxu0 %v7052_v54  ;;  %v7113_v53 = vld [vmem:[%s9201_s1 + $0x4c0] sm:$0xff]  }
  0x66   :  { %6392 = vmatprep.subr.bf16.mxu1 %v7053_v55  ;;  %4646 = vmatprep.mubr.bf16.mxu0 %v5673_v21  ;;  %v7114_v54 = vld [vmem:[%s9201_s1 + $0x400] sm:$0xff]   ;;  %v7143_v21 = vld [vmem:[%s9201_s1 + $0x590] sm:$0xff]  }
  0x67   :  { %4686 = vmatprep.mubr.bf16.mxu1 %v5675_v24  ;;  %v7115_v55 = vld [vmem:[%s9201_s1 + $0x480] sm:$0xff]   ;;  %v7146_v24 = vld [vmem:[%s9201_s1 + $0x508] sm:$0xff]  }
  0x68   :  { %6371 = vmatpush3.bf16.msra.mxu0 %v7054_v56  ;;  %v23_v56 = vld [vmem:[%s9202_s0 + $0x40] sm:$0xff] }
  0x69   :  { %6393 = vmatpush3.bf16.msra.mxu1 %v7055_v57  ;;  %6372 = vmatprep.subr.bf16.mxu0 %v7056_v58  ;;  %v5676_v57 = vcombine.low %v23_v56, %v23_v56  ;;  %v5677_v58 = vcombine.high %v23_v56, %v23_v56  ;;  %v7176_v56 = vld [vmem:[%s9201_s1 + $0x650] sm:$0xff]  }
  0x6a   :  { %6394 = vmatprep.subr.bf16.mxu1 %v7057_v59  ;;  %v24_v59 = vld [vmem:[%s9202_s0 + $0x48] sm:$0xff] }
  0x6c   :  { %6373 = vmatpush3.bf16.msra.mxu0 %v7058_v60  ;;  %v5678_v60 = vcombine.low %v24_v59, %v24_v59 }
  0x6d   :  { %6395 = vmatpush3.bf16.msra.mxu1 %v7059_v61  ;;  %6374 = vmatprep.subr.bf16.mxu0 %v7060_v62  ;;  %v5679_v61 = vcombine.high %v24_v59, %v24_v59  ;;  %v7120_v62 = vld [vmem:[%s9201_s1 + $0x578] sm:$0xff]   ;;  %v7179_v59 = vld [vmem:[%s9201_s1 + $0x690] sm:$0xff]  }
  0x6e   :  { %6396 = vmatprep.subr.bf16.mxu1 %v7061_v63  ;;  %v7121_v63 = vld [vmem:[%s9201_s1 + $0x5f8] sm:$0xff]  }
  0x70   :  { %6375 = vmatpush3.bf16.msra.mxu0 %v7062_v0  ;;  %v7122_v0 = vld [vmem:[%s9201_s1 + $0x538] sm:$0xff]  }
  0x71   :  { %6397 = vmatpush3.bf16.msra.mxu1 %v7063_v1  ;;  %6376 = vmatprep.subr.bf16.mxu0 %v7064_v2  ;;  %v7123_v1 = vld [vmem:[%s9201_s1 + $0x5b8] sm:$0xff]   ;;  %v7124_v2 = vld [vmem:[%s9201_s1 + $0x570] sm:$0xff]  }
  0x72   :  { %6398 = vmatprep.subr.bf16.mxu1 %v7065_v3  ;;  %v7125_v3 = vld [vmem:[%s9201_s1 + $0x5f0] sm:$0xff]  }
  0x74   :  { %6377 = vmatpush3.bf16.msra.mxu0 %v7066_v4  ;;  %v7126_v4 = vld [vmem:[%s9201_s1 + $0x530] sm:$0xff]  }
  0x75   :  { %6399 = vmatpush3.bf16.msra.mxu1 %v7067_v5  ;;  %6378 = vmatprep.subr.bf16.mxu0 %v7068_v6  ;;  %v7127_v5 = vld [vmem:[%s9201_s1 + $0x5b0] sm:$0xff]   ;;  %v7128_v6 = vld [vmem:[%s9201_s1 + $0x568] sm:$0xff]  }
  0x76   :  { %6400 = vmatprep.subr.bf16.mxu1 %v7069_v7  ;;  %v7129_v7 = vld [vmem:[%s9201_s1 + $0x5e8] sm:$0xff]  }
  0x78   :  { %6379 = vmatpush3.bf16.msra.mxu0 %v7070_v8  ;;  %v7130_v8 = vld [vmem:[%s9201_s1 + $0x528] sm:$0xff]  }
  0x79   :  { %6401 = vmatpush3.bf16.msra.mxu1 %v7071_v9  ;;  %6380 = vmatprep.subr.bf16.mxu0 %v7072_v10  ;;  %v7131_v9 = vld [vmem:[%s9201_s1 + $0x5a8] sm:$0xff]   ;;  %v7132_v10 = vld [vmem:[%s9201_s1 + $0x560] sm:$0xff]  }
  0x7a   :  { %6402 = vmatprep.subr.bf16.mxu1 %v7073_v11  ;;  %v7133_v11 = vld [vmem:[%s9201_s1 + $0x5e0] sm:$0xff]  }
  0x7c   :  { %6381 = vmatpush3.bf16.msra.mxu0 %v7074_v12  ;;  %v7134_v12 = vld [vmem:[%s9201_s1 + $0x520] sm:$0xff]  }
  0x7d   :  { %6403 = vmatpush3.bf16.msra.mxu1 %v7075_v13  ;;  %6382 = vmatprep.subr.bf16.mxu0 %v7076_v14  ;;  %v7135_v13 = vld [vmem:[%s9201_s1 + $0x5a0] sm:$0xff]   ;;  %v7136_v14 = vld [vmem:[%s9201_s1 + $0x558] sm:$0xff]  }
  0x7e   :  { %6404 = vmatprep.subr.bf16.mxu1 %v7077_v15  ;;  %v7137_v15 = vld [vmem:[%s9201_s1 + $0x5d8] sm:$0xff]  }
  0x80   :  { %6383 = vmatpush3.bf16.msra.mxu0 %v7078_v16  ;;  %v7138_v16 = vld [vmem:[%s9201_s1 + $0x518] sm:$0xff]  }
  0x81   :  { %6405 = vmatpush3.bf16.msra.mxu1 %v7079_v17  ;;  %6412 = vmatprep.subr.bf16.mxu0 %v7084_v23  ;;  %v7139_v17 = vld [vmem:[%s9201_s1 + $0x598] sm:$0xff]   ;;  %v7145_v23 = vld [vmem:[%s9201_s1 + $0x5c8] sm:$0xff]  }
  0x82   :  { %6434 = vmatprep.subr.bf16.mxu1 %v7085_v25  ;;  %v7147_v25 = vld [vmem:[%s9201_s1 + $0x588] sm:$0xff]  }
  0x83   :  { %4647 = vmatmul.mubr.bf16.vlgmr.msra.gmra.mxu0 %v5672_v20  ;;  %v7142_v20 = vld [vmem:[%s9201_s1 + $0x510] sm:$0xff]  }
  0x84   :  { %4687 = vmatmul.mubr.bf16.vlgmr.msra.gmra.mxu1 %v5674_v22  ;;  %6413 = vmatpush3.bf16.msra.mxu0 %v7086_v26  ;;  %v7144_v22 = vld [vmem:[%s9201_s1 + $0x548] sm:$0xff]   ;;  %v7148_v26 = vld [vmem:[%s9201_s1 + $0x540] sm:$0xff]  }
  0x85   :  { %6435 = vmatpush3.bf16.msra.mxu1 %v7087_v27  ;;  %6414 = vmatprep.subr.bf16.mxu0 %v7088_v28  ;;  %v7149_v27 = vld [vmem:[%s9201_s1 + $0x5c0] sm:$0xff]  }
  0x86   :  { %6436 = vmatprep.subr.bf16.mxu1 %v7089_v29  ;;  %4726 = vmatprep.mubr.bf16.mxu0 %v5677_v58  ;;  %v7150_v28 = vld [vmem:[%s9201_s1 + $0x500] sm:$0xff]   ;;  %v7178_v58 = vld [vmem:[%s9201_s1 + $0x610] sm:$0xff]  }
  0x87   :  { %4766 = vmatprep.mubr.bf16.mxu1 %v5679_v61  ;;  %v7151_v29 = vld [vmem:[%s9201_s1 + $0x580] sm:$0xff]   ;;  %v7181_v61 = vld [vmem:[%s9201_s1 + $0x6c8] sm:$0xff]  }
  0x88   :  { %6415 = vmatpush3.bf16.msra.mxu0 %v7090_v30  ;;  %v25_v30 = vld [vmem:[%s9202_s0 + $0x50] sm:$0xff] }
  0x89   :  { %6437 = vmatpush3.bf16.msra.mxu1 %v7091_v31  ;;  %6416 = vmatprep.subr.bf16.mxu0 %v7092_v32  ;;  %v26_v31 = vld [vmem:[%s9202_s0 + $0x58] sm:$0xff]  ;;  %v5680_v32 = vcombine.low %v25_v30, %v25_v30 }
  0x8a   :  { %6438 = vmatprep.subr.bf16.mxu1 %v7093_v33  ;;  %v5681_v33 = vcombine.high %v25_v30, %v25_v30  ;;  %v7199_v30 = vld [vmem:[%s9201_s1 + $0x7b0] sm:$0xff]  }
  0x8c   :  { %6417 = vmatpush3.bf16.msra.mxu0 %v7094_v34  ;;  %v5682_v34 = vcombine.low %v26_v31, %v26_v31 }
  0x8d   :  { %6439 = vmatpush3.bf16.msra.mxu1 %v7095_v35  ;;  %6418 = vmatprep.subr.bf16.mxu0 %v7096_v36  ;;  %v5683_v35 = vcombine.high %v26_v31, %v26_v31  ;;  %v7156_v36 = vld [vmem:[%s9201_s1 + $0x678] sm:$0xff]   ;;  %v7200_v31 = vld [vmem:[%s9201_s1 + $0x768] sm:$0xff]  }
  0x8e   :  { %6440 = vmatprep.subr.bf16.mxu1 %v7097_v37  ;;  %v7157_v37 = vld [vmem:[%s9201_s1 + $0x6f8] sm:$0xff]  }
  0x90   :  { %6419 = vmatpush3.bf16.msra.mxu0 %v7098_v38  ;;  %v7158_v38 = vld [vmem:[%s9201_s1 + $0x638] sm:$0xff]  }
  0x91   :  { %6441 = vmatpush3.bf16.msra.mxu1 %v7099_v39  ;;  %6420 = vmatprep.subr.bf16.mxu0 %v7100_v40  ;;  %v7159_v39 = vld [vmem:[%s9201_s1 + $0x6b8] sm:$0xff]   ;;  %v7160_v40 = vld [vmem:[%s9201_s1 + $0x670] sm:$0xff]  }
  0x92   :  { %6442 = vmatprep.subr.bf16.mxu1 %v7101_v41  ;;  %v7161_v41 = vld [vmem:[%s9201_s1 + $0x6f0] sm:$0xff]  }
  0x94   :  { %6421 = vmatpush3.bf16.msra.mxu0 %v7102_v42  ;;  %v7162_v42 = vld [vmem:[%s9201_s1 + $0x630] sm:$0xff]  }
  0x95   :  { %6443 = vmatpush3.bf16.msra.mxu1 %v7103_v43  ;;  %6422 = vmatprep.subr.bf16.mxu0 %v7104_v44  ;;  %v7163_v43 = vld [vmem:[%s9201_s1 + $0x6b0] sm:$0xff]   ;;  %v7164_v44 = vld [vmem:[%s9201_s1 + $0x668] sm:$0xff]  }
  0x96   :  { %6444 = vmatprep.subr.bf16.mxu1 %v7105_v45  ;;  %v7165_v45 = vld [vmem:[%s9201_s1 + $0x6e8] sm:$0xff]  }
  0x98   :  { %6423 = vmatpush3.bf16.msra.mxu0 %v7106_v46  ;;  %v7166_v46 = vld [vmem:[%s9201_s1 + $0x628] sm:$0xff]  }
  0x99   :  { %6445 = vmatpush3.bf16.msra.mxu1 %v7107_v47  ;;  %6424 = vmatprep.subr.bf16.mxu0 %v7108_v48  ;;  %v7167_v47 = vld [vmem:[%s9201_s1 + $0x6a8] sm:$0xff]   ;;  %v7168_v48 = vld [vmem:[%s9201_s1 + $0x660] sm:$0xff]  }
  0x9a   :  { %6446 = vmatprep.subr.bf16.mxu1 %v7109_v49  ;;  %v7169_v49 = vld [vmem:[%s9201_s1 + $0x6e0] sm:$0xff]  }
  0x9c   :  { %6425 = vmatpush3.bf16.msra.mxu0 %v7110_v50  ;;  %v7170_v50 = vld [vmem:[%s9201_s1 + $0x620] sm:$0xff]  }
  0x9d   :  { %6447 = vmatpush3.bf16.msra.mxu1 %v7111_v51  ;;  %6426 = vmatprep.subr.bf16.mxu0 %v7112_v52  ;;  %v7171_v51 = vld [vmem:[%s9201_s1 + $0x6a0] sm:$0xff]   ;;  %v7172_v52 = vld [vmem:[%s9201_s1 + $0x658] sm:$0xff]  }
  0x9e   :  { %6448 = vmatprep.subr.bf16.mxu1 %v7113_v53  ;;  %v7173_v53 = vld [vmem:[%s9201_s1 + $0x6d8] sm:$0xff]  }
  0xa0   :  { %6427 = vmatpush3.bf16.msra.mxu0 %v7114_v54  ;;  %v7174_v54 = vld [vmem:[%s9201_s1 + $0x618] sm:$0xff]  }
  0xa1   :  { %6449 = vmatpush3.bf16.msra.mxu1 %v7115_v55  ;;  %6456 = vmatprep.subr.bf16.mxu0 %v7120_v62  ;;  %v7175_v55 = vld [vmem:[%s9201_s1 + $0x698] sm:$0xff]   ;;  %v7182_v62 = vld [vmem:[%s9201_s1 + $0x608] sm:$0xff]  }
  0xa2   :  { %6478 = vmatprep.subr.bf16.mxu1 %v7121_v63  ;;  %v7183_v63 = vld [vmem:[%s9201_s1 + $0x688] sm:$0xff]  }
  0xa3   :  { %4727 = vmatmul.mubr.bf16.vlgmr.msra.gmra.mxu0 %v5676_v57  ;;  %v7177_v57 = vld [vmem:[%s9201_s1 + $0x6d0] sm:$0xff]  }
  0xa4   :  { %4767 = vmatmul.mubr.bf16.vlgmr.msra.gmra.mxu1 %v5678_v60  ;;  %6457 = vmatpush3.bf16.msra.mxu0 %v7122_v0  ;;  %v7180_v60 = vld [vmem:[%s9201_s1 + $0x648] sm:$0xff]   ;;  %v7184_v0 = vld [vmem:[%s9201_s1 + $0x640] sm:$0xff]  }
  0xa5   :  { %6479 = vmatpush3.bf16.msra.mxu1 %v7123_v1  ;;  %6458 = vmatprep.subr.bf16.mxu0 %v7124_v2  ;;  %v7185_v1 = vld [vmem:[%s9201_s1 + $0x6c0] sm:$0xff]  }
  0xa6   :  { %6480 = vmatprep.subr.bf16.mxu1 %v7125_v3  ;;  %4806 = vmatprep.mubr.bf16.mxu0 %v5681_v33  ;;  %v7186_v2 = vld [vmem:[%s9201_s1 + $0x600] sm:$0xff]   ;;  %v7202_v33 = vld [vmem:[%s9201_s1 + $0x728] sm:$0xff]  }
  0xa7   :  { %4846 = vmatprep.mubr.bf16.mxu1 %v5683_v35  ;;  %v7187_v3 = vld [vmem:[%s9201_s1 + $0x680] sm:$0xff]  }
  0xa8   :  { %6459 = vmatpush3.bf16.msra.mxu0 %v7126_v4  ;;  %v27_v4 = vld [vmem:[%s9202_s0 + $0x60] sm:$0xff] }
  0xa9   :  { %6481 = vmatpush3.bf16.msra.mxu1 %v7127_v5  ;;  %6460 = vmatprep.subr.bf16.mxu0 %v7128_v6  ;;  %v28_v5 = vld [vmem:[%s9202_s0 + $0x68] sm:$0xff]  ;;  %v7204_v35 = vld [vmem:[%s9201_s1 + $0x760] sm:$0xff]  }
  0xaa   :  { %6482 = vmatprep.subr.bf16.mxu1 %v7129_v7 }
  0xac   :  { %6461 = vmatpush3.bf16.msra.mxu0 %v7130_v8  ;;  %v5684_v8 = vcombine.low %v27_v4, %v27_v4 }
  0xad   :  { %6483 = vmatpush3.bf16.msra.mxu1 %v7131_v9  ;;  %6462 = vmatprep.subr.bf16.mxu0 %v7132_v10  ;;  %v5685_v9 = vcombine.high %v27_v4, %v27_v4  ;;  %v5686_v10 = vcombine.low %v28_v5, %v28_v5 }
  0xae   :  { %6484 = vmatprep.subr.bf16.mxu1 %v7133_v11  ;;  %v7192_v11 = vld [vmem:[%s9201_s1 + $0x778] sm:$0xff]  }
  0xb0   :  { %6463 = vmatpush3.bf16.msra.mxu0 %v7134_v12  ;;  %v5687_v12 = vcombine.high %v28_v5, %v28_v5 }
  0xb1   :  { %6485 = vmatpush3.bf16.msra.mxu1 %v7135_v13  ;;  %6464 = vmatprep.subr.bf16.mxu0 %v7136_v14  ;;  %v7193_v13 = vld [vmem:[%s9201_s1 + $0x7f8] sm:$0xff]  }
  0xb2   :  { %6486 = vmatprep.subr.bf16.mxu1 %v7137_v15 }
  0xb4   :  { %6465 = vmatpush3.bf16.msra.mxu0 %v7138_v16  ;;  %v7194_v16 = vld [vmem:[%s9201_s1 + $0x738] sm:$0xff]  }
  0xb5   :  { %6487 = vmatpush3.bf16.msra.mxu1 %v7139_v17  ;;  %6466 = vmatprep.subr.bf16.mxu0 %v7140_v18 }
  0xb6   :  { %6488 = vmatprep.subr.bf16.mxu1 %v7141_v19  ;;  %v7195_v19 = vld [vmem:[%s9201_s1 + $0x7b8] sm:$0xff]  }
  0xb8   :  { %6467 = vmatpush3.bf16.msra.mxu0 %v7142_v20  ;;  %v5659_v20 = vld [vmem:[%s9203_s2] ss:$0 sm:$0xff] }
  0xb9   :  { %6489 = vmatpush3.bf16.msra.mxu1 %v7143_v21  ;;  %6468 = vmatprep.subr.bf16.mxu0 %v7144_v22 }
  0xba   :  { %6490 = vmatprep.subr.bf16.mxu1 %v7145_v23 }
  0xbc   :  { %6469 = vmatpush3.bf16.msra.mxu0 %v7146_v24  ;;  %v7196_v24 = vld [vmem:[%s9201_s1 + $0x770] sm:$0xff]  }
  0xbd   :  { %6491 = vmatpush3.bf16.msra.mxu1 %v7147_v25  ;;  %6470 = vmatprep.subr.bf16.mxu0 %v7148_v26  ;;  %v7197_v25 = vld [vmem:[%s9201_s1 + $0x7f0] sm:$0xff]  }
  0xbe   :  { %6492 = vmatprep.subr.bf16.mxu1 %v7149_v27 }
  0xc0   :  { %6471 = vmatpush3.bf16.msra.mxu0 %v7150_v28 }
  0xc1   :  { %6493 = vmatpush3.bf16.msra.mxu1 %v7151_v29  ;;  %6500 = vmatprep.subr.bf16.mxu0 %v7156_v36  ;;  %v7198_v29 = vld [vmem:[%s9201_s1 + $0x730] sm:$0xff]   ;;  %v7205_v36 = vld [vmem:[%s9201_s1 + $0x7e0] sm:$0xff]  }
  0xc2   :  { %6522 = vmatprep.subr.bf16.mxu1 %v7157_v37  ;;  %v7206_v37 = vld [vmem:[%s9201_s1 + $0x720] sm:$0xff]  }
  0xc3   :  { %4807 = vmatmul.mubr.bf16.vlgmr.msra.gmra.mxu0 %v5680_v32  ;;  %v7201_v32 = vld [vmem:[%s9201_s1 + $0x7e8] sm:$0xff]  }
  0xc4   :  { %4847 = vmatmul.mubr.bf16.vlgmr.msra.gmra.mxu1 %v5682_v34  ;;  %6501 = vmatpush3.bf16.msra.mxu0 %v7158_v38  ;;  %v7203_v34 = vld [vmem:[%s9201_s1 + $0x7a8] sm:$0xff]   ;;  %v7207_v38 = vld [vmem:[%s9201_s1 + $0x7a0] sm:$0xff]  }
  0xc5   :  { %6523 = vmatpush3.bf16.msra.mxu1 %v7159_v39  ;;  %6502 = vmatprep.subr.bf16.mxu0 %v7160_v40  ;;  %v7208_v39 = vld [vmem:[%s9201_s1 + $0x758] sm:$0xff]  }
  0xc6   :  { %6524 = vmatprep.subr.bf16.mxu1 %v7161_v41  ;;  %4886 = vmatprep.mubr.bf16.mxu0 %v5685_v9  ;;  %v7209_v40 = vld [vmem:[%s9201_s1 + $0x7d8] sm:$0xff]  }
  0xc7   :  { %4926 = vmatprep.mubr.bf16.mxu1 %v5687_v12  ;;  %v7210_v41 = vld [vmem:[%s9201_s1 + $0x718] sm:$0xff]  }
  0xc8   :  { %6503 = vmatpush3.bf16.msra.mxu0 %v7162_v42  ;;  %v7211_v42 = vld [vmem:[%s9201_s1 + $0x798] sm:$0xff]  }
  0xc9   :  { %6525 = vmatpush3.bf16.msra.mxu1 %v7163_v43  ;;  %6504 = vmatprep.subr.bf16.mxu0 %v7164_v44  ;;  %v7212_v43 = vld [vmem:[%s9201_s1 + $0x750] sm:$0xff]  }
  0xca   :  { %6526 = vmatprep.subr.bf16.mxu1 %v7165_v45  ;;  %v7213_v44 = vld [vmem:[%s9201_s1 + $0x7d0] sm:$0xff]  }
  0xcb   :  { %v7214_v45 = vld [vmem:[%s9201_s1 + $0x710] sm:$0xff]  }
  0xcc   :  { %6505 = vmatpush3.bf16.msra.mxu0 %v7166_v46  ;;  %v7215_v46 = vld [vmem:[%s9201_s1 + $0x790] sm:$0xff]  }
  0xcd   :  { %6527 = vmatpush3.bf16.msra.mxu1 %v7167_v47  ;;  %6506 = vmatprep.subr.bf16.mxu0 %v7168_v48  ;;  %v7216_v47 = vld [vmem:[%s9201_s1 + $0x748] sm:$0xff]  }
  0xce   :  { %6528 = vmatprep.subr.bf16.mxu1 %v7169_v49  ;;  %v7217_v48 = vld [vmem:[%s9201_s1 + $0x7c8] sm:$0xff]  }
  0xcf   :  { %v7218_v49 = vld [vmem:[%s9201_s1 + $0x708] sm:$0xff]  }
  0xd0   :  { %6507 = vmatpush3.bf16.msra.mxu0 %v7170_v50  ;;  %v7219_v50 = vld [vmem:[%s9201_s1 + $0x788] sm:$0xff]  }
  0xd1   :  { %6529 = vmatpush3.bf16.msra.mxu1 %v7171_v51  ;;  %6508 = vmatprep.subr.bf16.mxu0 %v7172_v52  ;;  %v7220_v51 = vld [vmem:[%s9201_s1 + $0x740] sm:$0xff]  }
  0xd2   :  { %6530 = vmatprep.subr.bf16.mxu1 %v7173_v53  ;;  %v7221_v52 = vld [vmem:[%s9201_s1 + $0x7c0] sm:$0xff]  }
  0xd3   :  { %v7222_v53 = vld [vmem:[%s9201_s1 + $0x700] sm:$0xff]  }
  0xd4   :  { %6509 = vmatpush3.bf16.msra.mxu0 %v7174_v54  ;;  %v7223_v54 = vld [vmem:[%s9201_s1 + $0x780] sm:$0xff]  }
  0xd5   :  { %6531 = vmatpush3.bf16.msra.mxu1 %v7175_v55  ;;  %6510 = vmatprep.subr.bf16.mxu0 %v7176_v56  ;;  %v29_v55 = vld [vmem:[%s9202_s0 + $0x70] sm:$0xff]  ;;  %v30_v56 = vld [vmem:[%s9202_s0 + $0x78] sm:$0xff] }
  0xd6   :  { %6532 = vmatprep.subr.bf16.mxu1 %v7177_v57 }
  0xd8   :  { %6511 = vmatpush3.bf16.msra.mxu0 %v7178_v58 }
  0xd9   :  { %6533 = vmatpush3.bf16.msra.mxu1 %v7179_v59  ;;  %6512 = vmatprep.subr.bf16.mxu0 %v7180_v60  ;;  %v5688_v59 = vcombine.low %v29_v55, %v29_v55  ;;  %v5689_v60 = vcombine.high %v29_v55, %v29_v55 }
  0xda   :  { %6534 = vmatprep.subr.bf16.mxu1 %v7181_v61  ;;  %v5690_v61 = vcombine.low %v30_v56, %v30_v56 }
  0xdc   :  { %6513 = vmatpush3.bf16.msra.mxu0 %v7182_v62  ;;  %v7228_v62 = vld [vmem:[%s9201_s1 + $0x878] sm:$0xff]  }
  0xdd   :  { %6535 = vmatpush3.bf16.msra.mxu1 %v7183_v63  ;;  %6514 = vmatprep.subr.bf16.mxu0 %v7184_v0  ;;  %v5691_v63 = vcombine.high %v30_v56, %v30_v56  ;;  %v7229_v0 = vld [vmem:[%s9201_s1 + $0x8f8] sm:$0xff]  }
  0xde   :  { %6536 = vmatprep.subr.bf16.mxu1 %v7185_v1 }
  0xe0   :  { %6515 = vmatpush3.bf16.msra.mxu0 %v7186_v2 }
  0xe1   :  { %6537 = vmatpush3.bf16.msra.mxu1 %v7187_v3  ;;  %6544 = vmatprep.subr.bf16.mxu0 %v7192_v11  ;;  %v7230_v3 = vld [vmem:[%s9201_s1 + $0x838] sm:$0xff]   ;;  %v7233_v11 = vld [vmem:[%s9201_s1 + $0x8f0] sm:$0xff]  }
  0xe2   :  { %6566 = vmatprep.subr.bf16.mxu1 %v7193_v13 }
  0xe3   :  { %v6252_v6 = vpop.f32.mrf.mxu0  ;;  %4887 = vmatmul.mubr.bf16.vlgmr.msra.gmra.mxu0 %v5684_v8 }
  0xe4   :  { %v6274_v7 = vpop.f32.mrf.mxu1  ;;  %4927 = vmatmul.mubr.bf16.vlgmr.msra.gmra.mxu1 %v5686_v10  ;;  %6545 = vmatpush3.bf16.msra.mxu0 %v7194_v16  ;;  %v7232_v10 = vld [vmem:[%s9201_s1 + $0x870] sm:$0xff]  }
  0xe5   :  { %v6253_v14 = vpop.f32.mrf.mxu0  ;;  %6567 = vmatpush3.bf16.msra.mxu1 %v7195_v19  ;;  %6546 = vmatprep.subr.bf16.mxu0 %v7196_v24  ;;  %v7235_v16 = vld [vmem:[%s9201_s1 + $0x8b0] sm:$0xff]   ;;  %v7238_v19 = vld [vmem:[%s9201_s1 + $0x828] sm:$0xff]   ;;  %v7243_v24 = vld [vmem:[%s9201_s1 + $0x8a0] sm:$0xff]  }
  0xe6   :  { %v6275_v15 = vpop.f32.mrf.mxu1  ;;  %v6254_v17 = vadd.f32 %v6253_v14, %v6252_v6  ;;  %6568 = vmatprep.subr.bf16.mxu1 %v7197_v25  ;;  %4966 = vmatprep.mubr.bf16.mxu0 %v5689_v60  ;;  %v7231_v6 = vld [vmem:[%s9201_s1 + $0x8b8] sm:$0xff]   ;;  %v7268_v60 = vld [vmem:[%s9201_s1 + $0x970] sm:$0xff]  }
  0xe7   :  { %v6276_v18 = vadd.f32 %v6275_v15, %v6274_v7  ;;  %v6255_v21 = vpop.f32.mrf.mxu0  ;;  %5006 = vmatprep.mubr.bf16.mxu1 %v5691_v63  ;;  %v7234_v15 = vld [vmem:[%s9201_s1 + $0x830] sm:$0xff]   ;;  %v7244_v25 = vld [vmem:[%s9201_s1 + $0x858] sm:$0xff]  }
  0xe8   :  { %v6277_v22 = vpop.f32.mrf.mxu1  ;;  %v4409_v23 = vadd.f32 %v6254_v17, %v5659_v20  ;;  %6547 = vmatpush3.bf16.msra.mxu0 %v7198_v29  ;;  %v7236_v17 = vld [vmem:[%s9201_s1 + $0x868] sm:$0xff]   ;;  %v7240_v21 = vld [vmem:[%s9201_s1 + $0x860] sm:$0xff]   ;;  %v7248_v29 = vld [vmem:[%s9201_s1 + $0x850] sm:$0xff]  }
  0xe9   :  { %v6256_v26 = vpop.f32.mrf.mxu0  ;;  %6569 = vmatpush3.bf16.msra.mxu1 %v7199_v30  ;;  %6548 = vmatprep.subr.bf16.mxu0 %v7200_v31  ;;  %v7239_v20 = vld [vmem:[%s9201_s1 + $0x8a8] sm:$0xff]   ;;  %v7241_v22 = vld [vmem:[%s9201_s1 + $0x8e0] sm:$0xff]   ;;  %v7249_v30 = vld [vmem:[%s9201_s1 + $0x8d0] sm:$0xff]  }
  0xea   :  { %v6278_v27 = vpop.f32.mrf.mxu1  ;;  %v8271_v28 = vadd.f32 %v6276_v18, %v4409_v23  ;;  %6570 = vmatprep.subr.bf16.mxu1 %v7201_v32  ;;  %v7237_v18 = vld [vmem:[%s9201_s1 + $0x8e8] sm:$0xff]   ;;  %v7242_v23 = vld [vmem:[%s9201_s1 + $0x820] sm:$0xff]   ;;  %v7245_v26 = vld [vmem:[%s9201_s1 + $0x8d8] sm:$0xff]  }
  0xeb   :  { %v7246_v27 = vld [vmem:[%s9201_s1 + $0x818] sm:$0xff]   ;;  %v7250_v31 = vld [vmem:[%s9201_s1 + $0x810] sm:$0xff]  }
  0xec   :  { %6549 = vmatpush3.bf16.msra.mxu0 %v7202_v33  ;;  %v7251_v32 = vld [vmem:[%s9201_s1 + $0x890] sm:$0xff]   ;;  %v7252_v33 = vld [vmem:[%s9201_s1 + $0x848] sm:$0xff]  }
  0xed   :  { %6571 = vmatpush3.bf16.msra.mxu1 %v7203_v34  ;;  %6550 = vmatprep.subr.bf16.mxu0 %v7204_v35  ;;  %v7253_v34 = vld [vmem:[%s9201_s1 + $0x8c8] sm:$0xff]   ;;  %v7269_v63 = vld [vmem:[%s9201_s1 + $0x9f0] sm:$0xff]  }
  0xee   :  { %6572 = vmatprep.subr.bf16.mxu1 %v7205_v36  ;;  %v7254_v35 = vld [vmem:[%s9201_s1 + $0x808] sm:$0xff]  }
  0xef   :  { %v7255_v36 = vld [vmem:[%s9201_s1 + $0x888] sm:$0xff]  }
  0xf0   :  { %6551 = vmatpush3.bf16.msra.mxu0 %v7206_v37  ;;  %v7256_v37 = vld [vmem:[%s9201_s1 + $0x840] sm:$0xff]  }
  0xf1   :  { %6573 = vmatpush3.bf16.msra.mxu1 %v7207_v38  ;;  %6552 = vmatprep.subr.bf16.mxu0 %v7208_v39  ;;  %v7257_v38 = vld [vmem:[%s9201_s1 + $0x8c0] sm:$0xff]  }
  0xf2   :  { %6574 = vmatprep.subr.bf16.mxu1 %v7209_v40  ;;  %v7258_v39 = vld [vmem:[%s9201_s1 + $0x800] sm:$0xff]  }
  0xf3   :  { %v7259_v40 = vld [vmem:[%s9201_s1 + $0x880] sm:$0xff]  }
  0xf4   :  { %6553 = vmatpush3.bf16.msra.mxu0 %v7210_v41  ;;  %v31_v41 = vld [vmem:[%s9202_s0 + $0x80] sm:$0xff] }
  0xf5   :  { %6575 = vmatpush3.bf16.msra.mxu1 %v7211_v42  ;;  %6554 = vmatprep.subr.bf16.mxu0 %v7212_v43  ;;  %v5692_v43 = vcombine.low %v31_v41, %v31_v41 }
  0xf6   :  { %6576 = vmatprep.subr.bf16.mxu1 %v7213_v44  ;;  %v5693_v44 = vcombine.high %v31_v41, %v31_v41  ;;  %v7303_v41 = vld [vmem:[%s9201_s1 + $0xab8] sm:$0xff]  }
  0xf8   :  { %6555 = vmatpush3.bf16.msra.mxu0 %v7214_v45  ;;  %v32_v45 = vld [vmem:[%s9202_s0 + $0x88] sm:$0xff] }
  0xf9   :  { %6577 = vmatpush3.bf16.msra.mxu1 %v7215_v46  ;;  %6556 = vmatprep.subr.bf16.mxu0 %v7216_v47  ;;  %v5694_v47 = vcombine.low %v32_v45, %v32_v45 }
  0xfa   :  { %6578 = vmatprep.subr.bf16.mxu1 %v7217_v48  ;;  %v5695_v48 = vcombine.high %v32_v45, %v32_v45 }
  0xfc   :  { %6557 = vmatpush3.bf16.msra.mxu0 %v7218_v49  ;;  %v7264_v49 = vld [vmem:[%s9201_s1 + $0x978] sm:$0xff]  }
  0xfd   :  { %6579 = vmatpush3.bf16.msra.mxu1 %v7219_v50  ;;  %6558 = vmatprep.subr.bf16.mxu0 %v7220_v51  ;;  %v7265_v51 = vld [vmem:[%s9201_s1 + $0x9f8] sm:$0xff]  }
  0xfe   :  { %6580 = vmatprep.subr.bf16.mxu1 %v7221_v52 }
 0x100   :  { %6559 = vmatpush3.bf16.msra.mxu0 %v7222_v53 }
 0x101   :  { %6581 = vmatpush3.bf16.msra.mxu1 %v7223_v54  ;;  %6588 = vmatprep.subr.bf16.mxu0 %v7228_v62  ;;  %v7266_v54 = vld [vmem:[%s9201_s1 + $0x938] sm:$0xff]  }
 0x102   :  { %6610 = vmatprep.subr.bf16.mxu1 %v7229_v0 }
 0x103   :  { %v6296_v57 = vpop.f32.mrf.mxu0  ;;  %4967 = vmatmul.mubr.bf16.vlgmr.msra.gmra.mxu0 %v5688_v59 }
 0x104   :  { %v6318_v58 = vpop.f32.mrf.mxu1  ;;  %5007 = vmatmul.mubr.bf16.vlgmr.msra.gmra.mxu1 %v5690_v61  ;;  %6589 = vmatpush3.bf16.msra.mxu0 %v7230_v3  ;;  %v7272_v3 = vld [vmem:[%s9201_s1 + $0x968] sm:$0xff]  }
 0x105   :  { %v6297_v1 = vpop.f32.mrf.mxu0  ;;  %6611 = vmatpush3.bf16.msra.mxu1 %v7231_v6  ;;  %6590 = vmatprep.subr.bf16.mxu0 %v7232_v10  ;;  %v7275_v6 = vld [vmem:[%s9201_s1 + $0x9a8] sm:$0xff]   ;;  %v7279_v10 = vld [vmem:[%s9201_s1 + $0x9a0] sm:$0xff]  }
 0x106   :  { %v6319_v2 = vpop.f32.mrf.mxu1  ;;  %v6298_v4 = vadd.f32 %v6297_v1, %v6296_v57  ;;  %6612 = vmatprep.subr.bf16.mxu1 %v7233_v11  ;;  %5046 = vmatprep.mubr.bf16.mxu0 %v5693_v44  ;;  %v7267_v57 = vld [vmem:[%s9201_s1 + $0x9b8] sm:$0xff]   ;;  %v7270_v1 = vld [vmem:[%s9201_s1 + $0x930] sm:$0xff]  }
 0x107   :  { %v6320_v5 = vadd.f32 %v6319_v2, %v6318_v58  ;;  %v6299_v7 = vpop.f32.mrf.mxu0  ;;  %5086 = vmatprep.mubr.bf16.mxu1 %v5695_v48  ;;  %v7271_v2 = vld [vmem:[%s9201_s1 + $0x9b0] sm:$0xff]   ;;  %v7280_v11 = vld [vmem:[%s9201_s1 + $0x958] sm:$0xff]  }
 0x108   :  { %v6321_v8 = vpop.f32.mrf.mxu1  ;;  %v4489_v9 = vadd.f32 %v6298_v4, %v8271_v28  ;;  %6591 = vmatpush3.bf16.msra.mxu0 %v7234_v15  ;;  %v7247_v28 = vld [vmem:[%s9201_s1 + $0x898] sm:$0xff]   ;;  %v7273_v4 = vld [vmem:[%s9201_s1 + $0x9e8] sm:$0xff]   ;;  %v7276_v7 = vld [vmem:[%s9201_s1 + $0x960] sm:$0xff]  }
 0x109   :  { %v6300_v12 = vpop.f32.mrf.mxu0  ;;  %6613 = vmatpush3.bf16.msra.mxu1 %v7235_v16  ;;  %6592 = vmatprep.subr.bf16.mxu0 %v7236_v17  ;;  %v7277_v8 = vld [vmem:[%s9201_s1 + $0x9e0] sm:$0xff]   ;;  %v7284_v15 = vld [vmem:[%s9201_s1 + $0x950] sm:$0xff]  }
 0x10a   :  { %v6322_v13 = vpop.f32.mrf.mxu1  ;;  %v8376_v14 = vadd.f32 %v6320_v5, %v4489_v9  ;;  %6614 = vmatprep.subr.bf16.mxu1 %v7237_v18  ;;  %v7274_v5 = vld [vmem:[%s9201_s1 + $0x928] sm:$0xff]   ;;  %v7278_v9 = vld [vmem:[%s9201_s1 + $0x920] sm:$0xff]   ;;  %v7281_v12 = vld [vmem:[%s9201_s1 + $0x9d8] sm:$0xff]  }
 0x10b   :  { %v7282_v13 = vld [vmem:[%s9201_s1 + $0x918] sm:$0xff]   ;;  %v7285_v16 = vld [vmem:[%s9201_s1 + $0x9d0] sm:$0xff]  }
 0x10c   :  { %6593 = vmatpush3.bf16.msra.mxu0 %v7238_v19  ;;  %v7286_v17 = vld [vmem:[%s9201_s1 + $0x910] sm:$0xff]   ;;  %v7288_v19 = vld [vmem:[%s9201_s1 + $0x948] sm:$0xff]  }
 0x10d   :  { %6615 = vmatpush3.bf16.msra.mxu1 %v7239_v20  ;;  %6594 = vmatprep.subr.bf16.mxu0 %v7240_v21  ;;  %v7287_v18 = vld [vmem:[%s9201_s1 + $0x990] sm:$0xff]   ;;  %v7289_v20 = vld [vmem:[%s9201_s1 + $0x9c8] sm:$0xff]  }
 0x10e   :  { %6616 = vmatprep.subr.bf16.mxu1 %v7241_v22  ;;  %v7290_v21 = vld [vmem:[%s9201_s1 + $0x908] sm:$0xff]  }
 0x10f   :  { %v7291_v22 = vld [vmem:[%s9201_s1 + $0x988] sm:$0xff]  }
 0x110   :  { %6595 = vmatpush3.bf16.msra.mxu0 %v7242_v23  ;;  %v7292_v23 = vld [vmem:[%s9201_s1 + $0x940] sm:$0xff]  }
 0x111   :  { %6617 = vmatpush3.bf16.msra.mxu1 %v7243_v24  ;;  %6596 = vmatprep.subr.bf16.mxu0 %v7244_v25  ;;  %v7293_v24 = vld [vmem:[%s9201_s1 + $0x9c0] sm:$0xff]  }
 0x112   :  { %6618 = vmatprep.subr.bf16.mxu1 %v7245_v26  ;;  %v7294_v25 = vld [vmem:[%s9201_s1 + $0x900] sm:$0xff]  }
 0x113   :  { %v7295_v26 = vld [vmem:[%s9201_s1 + $0x980] sm:$0xff]  }
 0x114   :  { %6597 = vmatpush3.bf16.msra.mxu0 %v7246_v27  ;;  %v33_v27 = vld [vmem:[%s9202_s0 + $0x90] sm:$0xff] }
 0x115   :  { %6619 = vmatpush3.bf16.msra.mxu1 %v7247_v28  ;;  %6598 = vmatprep.subr.bf16.mxu0 %v7248_v29  ;;  %v34_v28 = vld [vmem:[%s9202_s0 + $0x98] sm:$0xff] }
 0x116   :  { %6620 = vmatprep.subr.bf16.mxu1 %v7249_v30  ;;  %v5696_v30 = vcombine.low %v33_v27, %v33_v27 }
 0x118   :  { %6599 = vmatpush3.bf16.msra.mxu0 %v7250_v31  ;;  %v5697_v31 = vcombine.high %v33_v27, %v33_v27 }
 0x119   :  { %6621 = vmatpush3.bf16.msra.mxu1 %v7251_v32  ;;  %6600 = vmatprep.subr.bf16.mxu0 %v7252_v33  ;;  %v5698_v32 = vcombine.low %v34_v28, %v34_v28  ;;  %v5699_v33 = vcombine.high %v34_v28, %v34_v28  ;;  %v7339_v28 = vld [vmem:[%s9201_s1 + $0xbb8] sm:$0xff]  }
 0x11a   :  { %6622 = vmatprep.subr.bf16.mxu1 %v7253_v34 }
 0x11c   :  { %6601 = vmatpush3.bf16.msra.mxu0 %v7254_v35  ;;  %v7300_v35 = vld [vmem:[%s9201_s1 + $0xa78] sm:$0xff]  }
 0x11d   :  { %6623 = vmatpush3.bf16.msra.mxu1 %v7255_v36  ;;  %6602 = vmatprep.subr.bf16.mxu0 %v7256_v37  ;;  %v7301_v36 = vld [vmem:[%s9201_s1 + $0xaf8] sm:$0xff]  }
 0x11e   :  { %6624 = vmatprep.subr.bf16.mxu1 %v7257_v38  ;;  %v7302_v38 = vld [vmem:[%s9201_s1 + $0xa38] sm:$0xff]  }
 0x120   :  { %6603 = vmatpush3.bf16.msra.mxu0 %v7258_v39 }
 0x121   :  { %6625 = vmatpush3.bf16.msra.mxu1 %v7259_v40  ;;  %6632 = vmatprep.subr.bf16.mxu0 %v7264_v49 }
 0x122   :  { %6654 = vmatprep.subr.bf16.mxu1 %v7265_v51 }
 0x123   :  { %v6340_v42 = vpop.f32.mrf.mxu0  ;;  %5047 = vmatmul.mubr.bf16.vlgmr.msra.gmra.mxu0 %v5692_v43 }
 0x124   :  { %v6362_v46 = vpop.f32.mrf.mxu1  ;;  %5087 = vmatmul.mubr.bf16.vlgmr.msra.gmra.mxu1 %v5694_v47  ;;  %6633 = vmatpush3.bf16.msra.mxu0 %v7266_v54  ;;  %v7305_v47 = vld [vmem:[%s9201_s1 + $0xaf0] sm:$0xff]   ;;  %v7309_v54 = vld [vmem:[%s9201_s1 + $0xae8] sm:$0xff]  }
 0x125   :  { %v6341_v50 = vpop.f32.mrf.mxu0  ;;  %6655 = vmatpush3.bf16.msra.mxu1 %v7267_v57  ;;  %6634 = vmatprep.subr.bf16.mxu0 %v7268_v60  ;;  %v7312_v57 = vld [vmem:[%s9201_s1 + $0xa60] sm:$0xff]  }
 0x126   :  { %v6342_v52 = vadd.f32 %v6341_v50, %v6340_v42  ;;  %v6363_v53 = vpop.f32.mrf.mxu1  ;;  %6656 = vmatprep.subr.bf16.mxu1 %v7269_v63  ;;  %5126 = vmatprep.mubr.bf16.mxu0 %v5697_v31  ;;  %v7306_v50 = vld [vmem:[%s9201_s1 + $0xa30] sm:$0xff]   ;;  %v7315_v60 = vld [vmem:[%s9201_s1 + $0xaa0] sm:$0xff]   ;;  %v7318_v63 = vld [vmem:[%s9201_s1 + $0xa18] sm:$0xff]  }
 0x127   :  { %v6364_v55 = vadd.f32 %v6363_v53, %v6362_v46  ;;  %v6343_v56 = vpop.f32.mrf.mxu0  ;;  %5166 = vmatprep.mubr.bf16.mxu1 %v5699_v33  ;;  %v7304_v46 = vld [vmem:[%s9201_s1 + $0xa70] sm:$0xff]   ;;  %v7308_v53 = vld [vmem:[%s9201_s1 + $0xa68] sm:$0xff]  }
 0x128   :  { %v4569_v58 = vadd.f32 %v6342_v52, %v8376_v14  ;;  %v6365_v59 = vpop.f32.mrf.mxu1  ;;  %6635 = vmatpush3.bf16.msra.mxu0 %v7270_v1  ;;  %v7283_v14 = vld [vmem:[%s9201_s1 + $0x998] sm:$0xff]   ;;  %v7307_v52 = vld [vmem:[%s9201_s1 + $0xab0] sm:$0xff]   ;;  %v7311_v56 = vld [vmem:[%s9201_s1 + $0xaa8] sm:$0xff]  }
 0x129   :  { %v6344_v61 = vpop.f32.mrf.mxu0  ;;  %6657 = vmatpush3.bf16.msra.mxu1 %v7271_v2  ;;  %6636 = vmatprep.subr.bf16.mxu0 %v7272_v3  ;;  %v7314_v59 = vld [vmem:[%s9201_s1 + $0xa20] sm:$0xff]   ;;  %v7320_v1 = vld [vmem:[%s9201_s1 + $0xa50] sm:$0xff]  }
 0x12a   :  { %v8478_v62 = vadd.f32 %v6364_v55, %v4569_v58  ;;  %v6366_v0 = vpop.f32.mrf.mxu1  ;;  %6658 = vmatprep.subr.bf16.mxu1 %v7273_v4  ;;  %v7310_v55 = vld [vmem:[%s9201_s1 + $0xa28] sm:$0xff]   ;;  %v7313_v58 = vld [vmem:[%s9201_s1 + $0xae0] sm:$0xff]   ;;  %v7316_v61 = vld [vmem:[%s9201_s1 + $0xa58] sm:$0xff]  }
 0x12b   :  { %v7319_v0 = vld [vmem:[%s9201_s1 + $0xa98] sm:$0xff]   ;;  %v7321_v2 = vld [vmem:[%s9201_s1 + $0xad0] sm:$0xff]  }
 0x12c   :  { %6637 = vmatpush3.bf16.msra.mxu0 %v7274_v5  ;;  %v7322_v3 = vld [vmem:[%s9201_s1 + $0xa10] sm:$0xff]   ;;  %v7324_v5 = vld [vmem:[%s9201_s1 + $0xa48] sm:$0xff]  }
 0x12d   :  { %6659 = vmatpush3.bf16.msra.mxu1 %v7275_v6  ;;  %6638 = vmatprep.subr.bf16.mxu0 %v7276_v7  ;;  %v7323_v4 = vld [vmem:[%s9201_s1 + $0xa90] sm:$0xff]   ;;  %v7325_v6 = vld [vmem:[%s9201_s1 + $0xac8] sm:$0xff]  }
 0x12e   :  { %6660 = vmatprep.subr.bf16.mxu1 %v7277_v8  ;;  %v7326_v7 = vld [vmem:[%s9201_s1 + $0xa08] sm:$0xff]   ;;  %v7341_v33 = vld [vmem:[%s9201_s1 + $0xbf0] sm:$0xff]  }
 0x12f   :  { %v7327_v8 = vld [vmem:[%s9201_s1 + $0xa88] sm:$0xff]  }
 0x130   :  { %6639 = vmatpush3.bf16.msra.mxu0 %v7278_v9  ;;  %v7328_v9 = vld [vmem:[%s9201_s1 + $0xa40] sm:$0xff]  }
 0x131   :  { %6661 = vmatpush3.bf16.msra.mxu1 %v7279_v10  ;;  %6640 = vmatprep.subr.bf16.mxu0 %v7280_v11  ;;  %v7329_v10 = vld [vmem:[%s9201_s1 + $0xac0] sm:$0xff]  }
 0x132   :  { %6662 = vmatprep.subr.bf16.mxu1 %v7281_v12  ;;  %v7330_v11 = vld [vmem:[%s9201_s1 + $0xa00] sm:$0xff]  }
 0x133   :  { %v7331_v12 = vld [vmem:[%s9201_s1 + $0xa80] sm:$0xff]  }
 0x134   :  { %6641 = vmatpush3.bf16.msra.mxu0 %v7282_v13  ;;  %v35_v13 = vld [vmem:[%s9202_s0 + $0xa0] sm:$0xff] }
 0x135   :  { %6663 = vmatpush3.bf16.msra.mxu1 %v7283_v14  ;;  %6642 = vmatprep.subr.bf16.mxu0 %v7284_v15  ;;  %v36_v14 = vld [vmem:[%s9202_s0 + $0xa8] sm:$0xff] }
 0x136   :  { %6664 = vmatprep.subr.bf16.mxu1 %v7285_v16 }
 0x138   :  { %6643 = vmatpush3.bf16.msra.mxu0 %v7286_v17  ;;  %v5700_v17 = vcombine.low %v35_v13, %v35_v13 }
 0x139   :  { %6665 = vmatpush3.bf16.msra.mxu1 %v7287_v18  ;;  %6644 = vmatprep.subr.bf16.mxu0 %v7288_v19  ;;  %v5701_v18 = vcombine.high %v35_v13, %v35_v13  ;;  %v5702_v19 = vcombine.low %v36_v14, %v36_v14 }
 0x13a   :  { %6666 = vmatprep.subr.bf16.mxu1 %v7289_v20  ;;  %v7336_v20 = vld [vmem:[%s9201_s1 + $0xb78] sm:$0xff]  }
 0x13c   :  { %6645 = vmatpush3.bf16.msra.mxu0 %v7290_v21  ;;  %v5703_v21 = vcombine.high %v36_v14, %v36_v14 }
 0x13d   :  { %6667 = vmatpush3.bf16.msra.mxu1 %v7291_v22  ;;  %6646 = vmatprep.subr.bf16.mxu0 %v7292_v23  ;;  %v7337_v22 = vld [vmem:[%s9201_s1 + $0xbf8] sm:$0xff]  }
 0x13e   :  { %6668 = vmatprep.subr.bf16.mxu1 %v7293_v24 }
 0x140   :  { %6647 = vmatpush3.bf16.msra.mxu0 %v7294_v25  ;;  %v7338_v25 = vld [vmem:[%s9201_s1 + $0xb38] sm:$0xff]  }
 0x141   :  { %6669 = vmatpush3.bf16.msra.mxu1 %v7295_v26  ;;  %6676 = vmatprep.subr.bf16.mxu0 %v7300_v35 }
 0x142   :  { %6698 = vmatprep.subr.bf16.mxu1 %v7301_v36 }
 0x143   :  { %v6384_v29 = vpop.f32.mrf.mxu0  ;;  %5127 = vmatmul.mubr.bf16.vlgmr.msra.gmra.mxu0 %v5696_v30 }
 0x144   :  { %v6406_v34 = vpop.f32.mrf.mxu1  ;;  %5167 = vmatmul.mubr.bf16.vlgmr.msra.gmra.mxu1 %v5698_v32  ;;  %6677 = vmatpush3.bf16.msra.mxu0 %v7302_v38  ;;  %v7340_v32 = vld [vmem:[%s9201_s1 + $0xb70] sm:$0xff]  }
 0x145   :  { %v6385_v37 = vpop.f32.mrf.mxu0  ;;  %6699 = vmatpush3.bf16.msra.mxu1 %v7303_v41  ;;  %6678 = vmatprep.subr.bf16.mxu0 %v7304_v46  ;;  %v7343_v38 = vld [vmem:[%s9201_s1 + $0xbb0] sm:$0xff]   ;;  %v7346_v41 = vld [vmem:[%s9201_s1 + $0xb28] sm:$0xff]   ;;  %v7351_v46 = vld [vmem:[%s9201_s1 + $0xba0] sm:$0xff]  }
 0x146   :  { %v6386_v39 = vadd.f32 %v6385_v37, %v6384_v29  ;;  %v6407_v40 = vpop.f32.mrf.mxu1  ;;  %6700 = vmatprep.subr.bf16.mxu1 %v7305_v47  ;;  %5206 = vmatprep.mubr.bf16.mxu0 %v5701_v18  ;;  %v7342_v37 = vld [vmem:[%s9201_s1 + $0xb30] sm:$0xff]   ;;  %v7352_v47 = vld [vmem:[%s9201_s1 + $0xb58] sm:$0xff]  }
 0x147   :  { %v6408_v42 = vadd.f32 %v6407_v40, %v6406_v34  ;;  %v6387_v43 = vpop.f32.mrf.mxu0  ;;  %5246 = vmatprep.mubr.bf16.mxu1 %v5703_v21  ;;  %v7345_v40 = vld [vmem:[%s9201_s1 + $0xbe8] sm:$0xff]   ;;  %v7376_v18 = vld [vmem:[%s9201_s1 + $0xc70] sm:$0xff]  }
 0x148   :  { %v4649_v44 = vadd.f32 %v6386_v39, %v8478_v62  ;;  %v6409_v45 = vpop.f32.mrf.mxu1  ;;  %6679 = vmatpush3.bf16.msra.mxu0 %v7306_v50  ;;  %v7317_v62 = vld [vmem:[%s9201_s1 + $0xad8] sm:$0xff]   ;;  %v7344_v39 = vld [vmem:[%s9201_s1 + $0xb68] sm:$0xff]   ;;  %v7348_v43 = vld [vmem:[%s9201_s1 + $0xb60] sm:$0xff]  }
 0x149   :  { %v6388_v48 = vpop.f32.mrf.mxu0  ;;  %6701 = vmatpush3.bf16.msra.mxu1 %v7307_v52  ;;  %6680 = vmatprep.subr.bf16.mxu0 %v7308_v53  ;;  %v7350_v45 = vld [vmem:[%s9201_s1 + $0xb20] sm:$0xff]   ;;  %v7355_v50 = vld [vmem:[%s9201_s1 + $0xb98] sm:$0xff]   ;;  %v7357_v52 = vld [vmem:[%s9201_s1 + $0xbd0] sm:$0xff]  }
 0x14a   :  { %v8586_v49 = vadd.f32 %v6408_v42, %v4649_v44  ;;  %v6410_v51 = vpop.f32.mrf.mxu1  ;;  %6702 = vmatprep.subr.bf16.mxu1 %v7309_v54  ;;  %v7347_v42 = vld [vmem:[%s9201_s1 + $0xba8] sm:$0xff]   ;;  %v7349_v44 = vld [vmem:[%s9201_s1 + $0xbe0] sm:$0xff]   ;;  %v7353_v48 = vld [vmem:[%s9201_s1 + $0xbd8] sm:$0xff]  }
 0x14b   :  { %v7356_v51 = vld [vmem:[%s9201_s1 + $0xb50] sm:$0xff]  }
 0x14c   :  { %6681 = vmatpush3.bf16.msra.mxu0 %v7310_v55  ;;  %v7358_v53 = vld [vmem:[%s9201_s1 + $0xb10] sm:$0xff]   ;;  %v7360_v55 = vld [vmem:[%s9201_s1 + $0xb48] sm:$0xff]  }
 0x14d   :  { %6703 = vmatpush3.bf16.msra.mxu1 %v7311_v56  ;;  %6682 = vmatprep.subr.bf16.mxu0 %v7312_v57  ;;  %v7359_v54 = vld [vmem:[%s9201_s1 + $0xb90] sm:$0xff]   ;;  %v7361_v56 = vld [vmem:[%s9201_s1 + $0xbc8] sm:$0xff]  }
 0x14e   :  { %6704 = vmatprep.subr.bf16.mxu1 %v7313_v58  ;;  %v7362_v57 = vld [vmem:[%s9201_s1 + $0xb08] sm:$0xff]   ;;  %v7377_v21 = vld [vmem:[%s9201_s1 + $0xcf0] sm:$0xff]  }
 0x14f   :  { %v7363_v58 = vld [vmem:[%s9201_s1 + $0xb88] sm:$0xff]  }
 0x150   :  { %6683 = vmatpush3.bf16.msra.mxu0 %v7314_v59  ;;  %v7364_v59 = vld [vmem:[%s9201_s1 + $0xb40] sm:$0xff]  }
 0x151   :  { %6705 = vmatpush3.bf16.msra.mxu1 %v7315_v60  ;;  %6684 = vmatprep.subr.bf16.mxu0 %v7316_v61  ;;  %v7365_v60 = vld [vmem:[%s9201_s1 + $0xbc0] sm:$0xff]  }
 0x152   :  { %6706 = vmatprep.subr.bf16.mxu1 %v7317_v62  ;;  %v7366_v61 = vld [vmem:[%s9201_s1 + $0xb00] sm:$0xff]  }
 0x153   :  { %v7367_v62 = vld [vmem:[%s9201_s1 + $0xb80] sm:$0xff]  }
 0x154   :  { %6685 = vmatpush3.bf16.msra.mxu0 %v7318_v63  ;;  %v37_v63 = vld [vmem:[%s9202_s0 + $0xb0] sm:$0xff] }
 0x155   :  { %6707 = vmatpush3.bf16.msra.mxu1 %v7319_v0  ;;  %6686 = vmatprep.subr.bf16.mxu0 %v7320_v1  ;;  %v5704_v1 = vcombine.low %v37_v63, %v37_v63 }
 0x156   :  { %6708 = vmatprep.subr.bf16.mxu1 %v7321_v2  ;;  %v5705_v2 = vcombine.high %v37_v63, %v37_v63  ;;  %v7411_v63 = vld [vmem:[%s9201_s1 + $0xdb8] sm:$0xff]  }
 0x158   :  { %6687 = vmatpush3.bf16.msra.mxu0 %v7322_v3  ;;  %v38_v3 = vld [vmem:[%s9202_s0 + $0xb8] sm:$0xff] }
 0x159   :  { %6709 = vmatpush3.bf16.msra.mxu1 %v7323_v4  ;;  %6688 = vmatprep.subr.bf16.mxu0 %v7324_v5  ;;  %v5706_v5 = vcombine.low %v38_v3, %v38_v3 }
 0x15a   :  { %6710 = vmatprep.subr.bf16.mxu1 %v7325_v6  ;;  %v5707_v6 = vcombine.high %v38_v3, %v38_v3 }
 0x15c   :  { %6689 = vmatpush3.bf16.msra.mxu0 %v7326_v7  ;;  %v7372_v7 = vld [vmem:[%s9201_s1 + $0xc78] sm:$0xff]  }
 0x15d   :  { %6711 = vmatpush3.bf16.msra.mxu1 %v7327_v8  ;;  %6690 = vmatprep.subr.bf16.mxu0 %v7328_v9  ;;  %v7373_v9 = vld [vmem:[%s9201_s1 + $0xcf8] sm:$0xff]  }
 0x15e   :  { %6712 = vmatprep.subr.bf16.mxu1 %v7329_v10 }
 0x160   :  { %6691 = vmatpush3.bf16.msra.mxu0 %v7330_v11 }
 0x161   :  { %6713 = vmatpush3.bf16.msra.mxu1 %v7331_v12  ;;  %6720 = vmatprep.subr.bf16.mxu0 %v7336_v20  ;;  %v7374_v12 = vld [vmem:[%s9201_s1 + $0xc38] sm:$0xff]  }
 0x162   :  { %6742 = vmatprep.subr.bf16.mxu1 %v7337_v22 }
 0x163   :  { %v6428_v15 = vpop.f32.mrf.mxu0  ;;  %5207 = vmatmul.mubr.bf16.vlgmr.msra.gmra.mxu0 %v5700_v17 }
 0x164   :  { %v6450_v16 = vpop.f32.mrf.mxu1  ;;  %5247 = vmatmul.mubr.bf16.vlgmr.msra.gmra.mxu1 %v5702_v19  ;;  %6721 = vmatpush3.bf16.msra.mxu0 %v7338_v25  ;;  %v7380_v25 = vld [vmem:[%s9201_s1 + $0xc68] sm:$0xff]  }
 0x165   :  { %v6429_v23 = vpop.f32.mrf.mxu0  ;;  %6743 = vmatpush3.bf16.msra.mxu1 %v7339_v28  ;;  %6722 = vmatprep.subr.bf16.mxu0 %v7340_v32  ;;  %v7383_v28 = vld [vmem:[%s9201_s1 + $0xca8] sm:$0xff]   ;;  %v7387_v32 = vld [vmem:[%s9201_s1 + $0xca0] sm:$0xff]  }
 0x166   :  { %v6451_v24 = vpop.f32.mrf.mxu1  ;;  %v6430_v26 = vadd.f32 %v6429_v23, %v6428_v15  ;;  %6744 = vmatprep.subr.bf16.mxu1 %v7341_v33  ;;  %5286 = vmatprep.mubr.bf16.mxu0 %v5705_v2  ;;  %v7375_v15 = vld [vmem:[%s9201_s1 + $0xcb8] sm:$0xff]   ;;  %v7378_v23 = vld [vmem:[%s9201_s1 + $0xc30] sm:$0xff]  }
 0x167   :  { %v6452_v27 = vadd.f32 %v6451_v24, %v6450_v16  ;;  %v6431_v29 = vpop.f32.mrf.mxu0  ;;  %5326 = vmatprep.mubr.bf16.mxu1 %v5707_v6  ;;  %v7379_v24 = vld [vmem:[%s9201_s1 + $0xcb0] sm:$0xff]   ;;  %v7388_v33 = vld [vmem:[%s9201_s1 + $0xc58] sm:$0xff]  }
 0x168   :  { %v6453_v30 = vpop.f32.mrf.mxu1  ;;  %v4729_v31 = vadd.f32 %v6430_v26, %v8586_v49  ;;  %6723 = vmatpush3.bf16.msra.mxu0 %v7342_v37  ;;  %v7354_v49 = vld [vmem:[%s9201_s1 + $0xb18] sm:$0xff]   ;;  %v7381_v26 = vld [vmem:[%s9201_s1 + $0xce8] sm:$0xff]   ;;  %v7384_v29 = vld [vmem:[%s9201_s1 + $0xc60] sm:$0xff]  }
 0x169   :  { %v6432_v34 = vpop.f32.mrf.mxu0  ;;  %6745 = vmatpush3.bf16.msra.mxu1 %v7343_v38  ;;  %6724 = vmatprep.subr.bf16.mxu0 %v7344_v39  ;;  %v7385_v30 = vld [vmem:[%s9201_s1 + $0xce0] sm:$0xff]   ;;  %v7392_v37 = vld [vmem:[%s9201_s1 + $0xc50] sm:$0xff]  }
 0x16a   :  { %v6454_v35 = vpop.f32.mrf.mxu1  ;;  %v8691_v36 = vadd.f32 %v6452_v27, %v4729_v31  ;;  %6746 = vmatprep.subr.bf16.mxu1 %v7345_v40  ;;  %v7382_v27 = vld [vmem:[%s9201_s1 + $0xc28] sm:$0xff]   ;;  %v7386_v31 = vld [vmem:[%s9201_s1 + $0xc20] sm:$0xff]   ;;  %v7389_v34 = vld [vmem:[%s9201_s1 + $0xcd8] sm:$0xff]  }
 0x16b   :  { %v7390_v35 = vld [vmem:[%s9201_s1 + $0xc18] sm:$0xff]   ;;  %v7393_v38 = vld [vmem:[%s9201_s1 + $0xcd0] sm:$0xff]  }
 0x16c   :  { %6725 = vmatpush3.bf16.msra.mxu0 %v7346_v41  ;;  %v7394_v39 = vld [vmem:[%s9201_s1 + $0xc10] sm:$0xff]   ;;  %v7396_v41 = vld [vmem:[%s9201_s1 + $0xc48] sm:$0xff]  }
 0x16d   :  { %6747 = vmatpush3.bf16.msra.mxu1 %v7347_v42  ;;  %6726 = vmatprep.subr.bf16.mxu0 %v7348_v43  ;;  %v7395_v40 = vld [vmem:[%s9201_s1 + $0xc90] sm:$0xff]   ;;  %v7397_v42 = vld [vmem:[%s9201_s1 + $0xcc8] sm:$0xff]  }
 0x16e   :  { %6748 = vmatprep.subr.bf16.mxu1 %v7349_v44  ;;  %v7398_v43 = vld [vmem:[%s9201_s1 + $0xc08] sm:$0xff]  }
 0x16f   :  { %v7399_v44 = vld [vmem:[%s9201_s1 + $0xc88] sm:$0xff]  }
 0x170   :  { %6727 = vmatpush3.bf16.msra.mxu0 %v7350_v45  ;;  %v7400_v45 = vld [vmem:[%s9201_s1 + $0xc40] sm:$0xff]  }
 0x171   :  { %6749 = vmatpush3.bf16.msra.mxu1 %v7351_v46  ;;  %6728 = vmatprep.subr.bf16.mxu0 %v7352_v47  ;;  %v7401_v46 = vld [vmem:[%s9201_s1 + $0xcc0] sm:$0xff]  }
 0x172   :  { %6750 = vmatprep.subr.bf16.mxu1 %v7353_v48  ;;  %v7402_v47 = vld [vmem:[%s9201_s1 + $0xc00] sm:$0xff]  }
 0x173   :  { %v7403_v48 = vld [vmem:[%s9201_s1 + $0xc80] sm:$0xff]  }
 0x174   :  { %6729 = vmatpush3.bf16.msra.mxu0 %v7354_v49  ;;  %v39_v49 = vld [vmem:[%s9202_s0 + $0xc0] sm:$0xff] }
 0x175   :  { %6751 = vmatpush3.bf16.msra.mxu1 %v7355_v50  ;;  %6730 = vmatprep.subr.bf16.mxu0 %v7356_v51  ;;  %v40_v50 = vld [vmem:[%s9202_s0 + $0xc8] sm:$0xff] }
 0x176   :  { %6752 = vmatprep.subr.bf16.mxu1 %v7357_v52  ;;  %v5708_v52 = vcombine.low %v39_v49, %v39_v49 }
 0x178   :  { %6731 = vmatpush3.bf16.msra.mxu0 %v7358_v53  ;;  %v5709_v53 = vcombine.high %v39_v49, %v39_v49  ;;  %v7447_v49 = vld [vmem:[%s9201_s1 + $0xeb8] sm:$0xff]  }
 0x179   :  { %6753 = vmatpush3.bf16.msra.mxu1 %v7359_v54  ;;  %6732 = vmatprep.subr.bf16.mxu0 %v7360_v55  ;;  %v5710_v54 = vcombine.low %v40_v50, %v40_v50  ;;  %v5711_v55 = vcombine.high %v40_v50, %v40_v50 }
 0x17a   :  { %6754 = vmatprep.subr.bf16.mxu1 %v7361_v56 }
 0x17c   :  { %6733 = vmatpush3.bf16.msra.mxu0 %v7362_v57  ;;  %v7408_v57 = vld [vmem:[%s9201_s1 + $0xd78] sm:$0xff]  }
 0x17d   :  { %6755 = vmatpush3.bf16.msra.mxu1 %v7363_v58  ;;  %6734 = vmatprep.subr.bf16.mxu0 %v7364_v59  ;;  %v7409_v58 = vld [vmem:[%s9201_s1 + $0xdf8] sm:$0xff]  }
 0x17e   :  { %6756 = vmatprep.subr.bf16.mxu1 %v7365_v60  ;;  %v7410_v60 = vld [vmem:[%s9201_s1 + $0xd38] sm:$0xff]  }
 0x180   :  { %6735 = vmatpush3.bf16.msra.mxu0 %v7366_v61 }
 0x181   :  { %6757 = vmatpush3.bf16.msra.mxu1 %v7367_v62  ;;  %6764 = vmatprep.subr.bf16.mxu0 %v7372_v7 }
 0x182   :  { %6786 = vmatprep.subr.bf16.mxu1 %v7373_v9 }
 0x183   :  { %v6472_v0 = vpop.f32.mrf.mxu0  ;;  %5287 = vmatmul.mubr.bf16.vlgmr.msra.gmra.mxu0 %v5704_v1 }
 0x184   :  { %v6494_v4 = vpop.f32.mrf.mxu1  ;;  %5327 = vmatmul.mubr.bf16.vlgmr.msra.gmra.mxu1 %v5706_v5  ;;  %6765 = vmatpush3.bf16.msra.mxu0 %v7374_v12  ;;  %v7413_v5 = vld [vmem:[%s9201_s1 + $0xdf0] sm:$0xff]   ;;  %v7417_v12 = vld [vmem:[%s9201_s1 + $0xde8] sm:$0xff]  }
 0x185   :  { %v6473_v8 = vpop.f32.mrf.mxu0  ;;  %6787 = vmatpush3.bf16.msra.mxu1 %v7375_v15  ;;  %6766 = vmatprep.subr.bf16.mxu0 %v7376_v18  ;;  %v7420_v15 = vld [vmem:[%s9201_s1 + $0xd60] sm:$0xff]  }
 0x186   :  { %v6474_v10 = vadd.f32 %v6473_v8, %v6472_v0  ;;  %v6495_v11 = vpop.f32.mrf.mxu1  ;;  %6788 = vmatprep.subr.bf16.mxu1 %v7377_v21  ;;  %5366 = vmatprep.mubr.bf16.mxu0 %v5709_v53  ;;  %v7414_v8 = vld [vmem:[%s9201_s1 + $0xd30] sm:$0xff]   ;;  %v7423_v18 = vld [vmem:[%s9201_s1 + $0xda0] sm:$0xff]   ;;  %v7426_v21 = vld [vmem:[%s9201_s1 + $0xd18] sm:$0xff]  }
 0x187   :  { %v6496_v13 = vadd.f32 %v6495_v11, %v6494_v4  ;;  %v6475_v14 = vpop.f32.mrf.mxu0  ;;  %5406 = vmatprep.mubr.bf16.mxu1 %v5711_v55  ;;  %v7412_v4 = vld [vmem:[%s9201_s1 + $0xd70] sm:$0xff]   ;;  %v7416_v11 = vld [vmem:[%s9201_s1 + $0xd68] sm:$0xff]  }
 0x188   :  { %v4809_v16 = vadd.f32 %v6474_v10, %v8691_v36  ;;  %v6497_v17 = vpop.f32.mrf.mxu1  ;;  %6767 = vmatpush3.bf16.msra.mxu0 %v7378_v23  ;;  %v7391_v36 = vld [vmem:[%s9201_s1 + $0xc98] sm:$0xff]   ;;  %v7415_v10 = vld [vmem:[%s9201_s1 + $0xdb0] sm:$0xff]   ;;  %v7419_v14 = vld [vmem:[%s9201_s1 + $0xda8] sm:$0xff]  }
 0x189   :  { %v6476_v19 = vpop.f32.mrf.mxu0  ;;  %6789 = vmatpush3.bf16.msra.mxu1 %v7379_v24  ;;  %6768 = vmatprep.subr.bf16.mxu0 %v7380_v25  ;;  %v7422_v17 = vld [vmem:[%s9201_s1 + $0xd20] sm:$0xff]   ;;  %v7428_v23 = vld [vmem:[%s9201_s1 + $0xd50] sm:$0xff]  }
 0x18a   :  { %v8793_v20 = vadd.f32 %v6496_v13, %v4809_v16  ;;  %v6498_v22 = vpop.f32.mrf.mxu1  ;;  %6790 = vmatprep.subr.bf16.mxu1 %v7381_v26  ;;  %v7418_v13 = vld [vmem:[%s9201_s1 + $0xd28] sm:$0xff]   ;;  %v7421_v16 = vld [vmem:[%s9201_s1 + $0xde0] sm:$0xff]   ;;  %v7424_v19 = vld [vmem:[%s9201_s1 + $0xd58] sm:$0xff]  }
 0x18b   :  { %v7427_v22 = vld [vmem:[%s9201_s1 + $0xd98] sm:$0xff]   ;;  %v7429_v24 = vld [vmem:[%s9201_s1 + $0xdd0] sm:$0xff]  }
 0x18c   :  { %6769 = vmatpush3.bf16.msra.mxu0 %v7382_v27  ;;  %v7430_v25 = vld [vmem:[%s9201_s1 + $0xd10] sm:$0xff]   ;;  %v7432_v27 = vld [vmem:[%s9201_s1 + $0xd48] sm:$0xff]  }
 0x18d   :  { %6791 = vmatpush3.bf16.msra.mxu1 %v7383_v28  ;;  %6770 = vmatprep.subr.bf16.mxu0 %v7384_v29  ;;  %v7431_v26 = vld [vmem:[%s9201_s1 + $0xd90] sm:$0xff]   ;;  %v7433_v28 = vld [vmem:[%s9201_s1 + $0xdc8] sm:$0xff]  }
 0x18e   :  { %6792 = vmatprep.subr.bf16.mxu1 %v7385_v30  ;;  %v7434_v29 = vld [vmem:[%s9201_s1 + $0xd08] sm:$0xff]   ;;  %v7449_v55 = vld [vmem:[%s9201_s1 + $0xef0] sm:$0xff]  }
 0x18f   :  { %v7435_v30 = vld [vmem:[%s9201_s1 + $0xd88] sm:$0xff]  }
 0x190   :  { %6771 = vmatpush3.bf16.msra.mxu0 %v7386_v31  ;;  %v7436_v31 = vld [vmem:[%s9201_s1 + $0xd40] sm:$0xff]  }
 0x191   :  { %6793 = vmatpush3.bf16.msra.mxu1 %v7387_v32  ;;  %6772 = vmatprep.subr.bf16.mxu0 %v7388_v33  ;;  %v7437_v32 = vld [vmem:[%s9201_s1 + $0xdc0] sm:$0xff]  }
 0x192   :  { %6794 = vmatprep.subr.bf16.mxu1 %v7389_v34  ;;  %v7438_v33 = vld [vmem:[%s9201_s1 + $0xd00] sm:$0xff]  }
 0x193   :  { %v7439_v34 = vld [vmem:[%s9201_s1 + $0xd80] sm:$0xff]  }
 0x194   :  { %6773 = vmatpush3.bf16.msra.mxu0 %v7390_v35  ;;  %v41_v35 = vld [vmem:[%s9202_s0 + $0xd0] sm:$0xff] }
 0x195   :  { %6795 = vmatpush3.bf16.msra.mxu1 %v7391_v36  ;;  %6774 = vmatprep.subr.bf16.mxu0 %v7392_v37  ;;  %v42_v36 = vld [vmem:[%s9202_s0 + $0xd8] sm:$0xff] }
 0x196   :  { %6796 = vmatprep.subr.bf16.mxu1 %v7393_v38  ;;  %v5712_v38 = vcombine.low %v41_v35, %v41_v35 }
 0x198   :  { %6775 = vmatpush3.bf16.msra.mxu0 %v7394_v39  ;;  %v5713_v39 = vcombine.high %v41_v35, %v41_v35 }
 0x199   :  { %6797 = vmatpush3.bf16.msra.mxu1 %v7395_v40  ;;  %6776 = vmatprep.subr.bf16.mxu0 %v7396_v41  ;;  %v5714_v40 = vcombine.low %v42_v36, %v42_v36 }
 0x19a   :  { %6798 = vmatprep.subr.bf16.mxu1 %v7397_v42  ;;  %v7444_v42 = vld [vmem:[%s9201_s1 + $0xe78] sm:$0xff]  }
 0x19c   :  { %6777 = vmatpush3.bf16.msra.mxu0 %v7398_v43  ;;  %v5715_v43 = vcombine.high %v42_v36, %v42_v36  ;;  %v7483_v36 = vld [vmem:[%s9201_s1 + $0xfb8] sm:$0xff]  }
 0x19d   :  { %6799 = vmatpush3.bf16.msra.mxu1 %v7399_v44  ;;  %6778 = vmatprep.subr.bf16.mxu0 %v7400_v45  ;;  %v7445_v44 = vld [vmem:[%s9201_s1 + $0xef8] sm:$0xff]  }
 0x19e   :  { %6800 = vmatprep.subr.bf16.mxu1 %v7401_v46  ;;  %v7446_v46 = vld [vmem:[%s9201_s1 + $0xe38] sm:$0xff]  }
 0x1a0   :  { %6779 = vmatpush3.bf16.msra.mxu0 %v7402_v47 }
 0x1a1   :  { %6801 = vmatpush3.bf16.msra.mxu1 %v7403_v48  ;;  %6808 = vmatprep.subr.bf16.mxu0 %v7408_v57 }
 0x1a2   :  { %6830 = vmatprep.subr.bf16.mxu1 %v7409_v58  ;;  %v7450_v58 = vld [vmem:[%s9201_s1 + $0xe30] sm:$0xff]  }
 0x1a3   :  { %v6516_v51 = vpop.f32.mrf.mxu0  ;;  %5367 = vmatmul.mubr.bf16.vlgmr.msra.gmra.mxu0 %v5708_v52 }
 0x1a4   :  { %v6538_v56 = vpop.f32.mrf.mxu1  ;;  %5407 = vmatmul.mubr.bf16.vlgmr.msra.gmra.mxu1 %v5710_v54  ;;  %6809 = vmatpush3.bf16.msra.mxu0 %v7410_v60  ;;  %v7448_v54 = vld [vmem:[%s9201_s1 + $0xe70] sm:$0xff]  }
 0x1a5   :  { %v6517_v59 = vpop.f32.mrf.mxu0  ;;  %6831 = vmatpush3.bf16.msra.mxu1 %v7411_v63  ;;  %6810 = vmatprep.subr.bf16.mxu0 %v7412_v4  ;;  %v7451_v60 = vld [vmem:[%s9201_s1 + $0xeb0] sm:$0xff]   ;;  %v7454_v63 = vld [vmem:[%s9201_s1 + $0xe28] sm:$0xff]   ;;  %v7459_v4 = vld [vmem:[%s9201_s1 + $0xea0] sm:$0xff]  }
 0x1a6   :  { %v6518_v61 = vadd.f32 %v6517_v59, %v6516_v51  ;;  %v6539_v62 = vpop.f32.mrf.mxu1  ;;  %6832 = vmatprep.subr.bf16.mxu1 %v7413_v5  ;;  %5446 = vmatprep.mubr.bf16.mxu0 %v5713_v39  ;;  %v7460_v5 = vld [vmem:[%s9201_s1 + $0xe58] sm:$0xff]  }
 0x1a7   :  { %v6540_v0 = vadd.f32 %v6539_v62, %v6538_v56  ;;  %v6519_v1 = vpop.f32.mrf.mxu0  ;;  %5486 = vmatprep.mubr.bf16.mxu1 %v5715_v43  ;;  %v7453_v62 = vld [vmem:[%s9201_s1 + $0xee8] sm:$0xff]  }
 0x1a8   :  { %v4889_v2 = vadd.f32 %v6518_v61, %v8793_v20  ;;  %v6541_v3 = vpop.f32.mrf.mxu1  ;;  %6811 = vmatpush3.bf16.msra.mxu0 %v7414_v8  ;;  %v7425_v20 = vld [vmem:[%s9201_s1 + $0xdd8] sm:$0xff]   ;;  %v7452_v61 = vld [vmem:[%s9201_s1 + $0xe68] sm:$0xff]   ;;  %v7456_v1 = vld [vmem:[%s9201_s1 + $0xe60] sm:$0xff]  }
 0x1a9   :  { %v6520_v6 = vpop.f32.mrf.mxu0  ;;  %6833 = vmatpush3.bf16.msra.mxu1 %v7415_v10  ;;  %6812 = vmatprep.subr.bf16.mxu0 %v7416_v11  ;;  %v7458_v3 = vld [vmem:[%s9201_s1 + $0xe20] sm:$0xff]   ;;  %v7463_v8 = vld [vmem:[%s9201_s1 + $0xe98] sm:$0xff]   ;;  %v7465_v10 = vld [vmem:[%s9201_s1 + $0xed0] sm:$0xff]  }
 0x1aa   :  { %v8901_v7 = vadd.f32 %v6540_v0, %v4889_v2  ;;  %v6542_v9 = vpop.f32.mrf.mxu1  ;;  %6834 = vmatprep.subr.bf16.mxu1 %v7417_v12  ;;  %v7455_v0 = vld [vmem:[%s9201_s1 + $0xea8] sm:$0xff]   ;;  %v7457_v2 = vld [vmem:[%s9201_s1 + $0xee0] sm:$0xff]   ;;  %v7461_v6 = vld [vmem:[%s9201_s1 + $0xed8] sm:$0xff]  }
 0x1ab   :  { %v7464_v9 = vld [vmem:[%s9201_s1 + $0xe50] sm:$0xff]  }
 0x1ac   :  { %6813 = vmatpush3.bf16.msra.mxu0 %v7418_v13  ;;  %v7466_v11 = vld [vmem:[%s9201_s1 + $0xe10] sm:$0xff]   ;;  %v7468_v13 = vld [vmem:[%s9201_s1 + $0xe48] sm:$0xff]  }
 0x1ad   :  { %6835 = vmatpush3.bf16.msra.mxu1 %v7419_v14  ;;  %6814 = vmatprep.subr.bf16.mxu0 %v7420_v15  ;;  %v7467_v12 = vld [vmem:[%s9201_s1 + $0xe90] sm:$0xff]   ;;  %v7469_v14 = vld [vmem:[%s9201_s1 + $0xec8] sm:$0xff]  }
 0x1ae   :  { %6836 = vmatprep.subr.bf16.mxu1 %v7421_v16  ;;  %v7470_v15 = vld [vmem:[%s9201_s1 + $0xe08] sm:$0xff]  }
 0x1af   :  { %v7471_v16 = vld [vmem:[%s9201_s1 + $0xe88] sm:$0xff]  }
 0x1b0   :  { %6815 = vmatpush3.bf16.msra.mxu0 %v7422_v17  ;;  %v7472_v17 = vld [vmem:[%s9201_s1 + $0xe40] sm:$0xff]  }
 0x1b1   :  { %6837 = vmatpush3.bf16.msra.mxu1 %v7423_v18  ;;  %6816 = vmatprep.subr.bf16.mxu0 %v7424_v19  ;;  %v7473_v18 = vld [vmem:[%s9201_s1 + $0xec0] sm:$0xff]  }
 0x1b2   :  { %6838 = vmatprep.subr.bf16.mxu1 %v7425_v20  ;;  %v7474_v19 = vld [vmem:[%s9201_s1 + $0xe00] sm:$0xff]  }
 0x1b3   :  { %v7475_v20 = vld [vmem:[%s9201_s1 + $0xe80] sm:$0xff]  }
 0x1b4   :  { %6817 = vmatpush3.bf16.msra.mxu0 %v7426_v21  ;;  %v43_v21 = vld [vmem:[%s9202_s0 + $0xe0] sm:$0xff] }
 0x1b5   :  { %6839 = vmatpush3.bf16.msra.mxu1 %v7427_v22  ;;  %6818 = vmatprep.subr.bf16.mxu0 %v7428_v23  ;;  %v5716_v22 = vcombine.low %v43_v21, %v43_v21  ;;  %v5717_v23 = vcombine.high %v43_v21, %v43_v21 }
 0x1b6   :  { %6840 = vmatprep.subr.bf16.mxu1 %v7429_v24  ;;  %v44_v24 = vld [vmem:[%s9202_s0 + $0xe8] sm:$0xff] }
 0x1b8   :  { %6819 = vmatpush3.bf16.msra.mxu0 %v7430_v25 }
 0x1b9   :  { %6841 = vmatpush3.bf16.msra.mxu1 %v7431_v26  ;;  %6820 = vmatprep.subr.bf16.mxu0 %v7432_v27  ;;  %v5718_v27 = vcombine.low %v44_v24, %v44_v24 }
 0x1ba   :  { %6842 = vmatprep.subr.bf16.mxu1 %v7433_v28  ;;  %v5719_v28 = vcombine.high %v44_v24, %v44_v24 }
 0x1bc   :  { %6821 = vmatpush3.bf16.msra.mxu0 %v7434_v29  ;;  %v7480_v29 = vld [vmem:[%s9201_s1 + $0xf78] sm:$0xff]  }
 0x1bd   :  { %6843 = vmatpush3.bf16.msra.mxu1 %v7435_v30  ;;  %6822 = vmatprep.subr.bf16.mxu0 %v7436_v31  ;;  %v7481_v30 = vld [vmem:[%s9201_s1 + $0xff8] sm:$0xff]  }
 0x1be   :  { %6844 = vmatprep.subr.bf16.mxu1 %v7437_v32 }
 0x1c0   :  { %6823 = vmatpush3.bf16.msra.mxu0 %v7438_v33  ;;  %v7482_v33 = vld [vmem:[%s9201_s1 + $0xf38] sm:$0xff]  }
 0x1c1   :  { %6845 = vmatpush3.bf16.msra.mxu1 %v7439_v34  ;;  %6852 = vmatprep.subr.bf16.mxu0 %v7444_v42 }
 0x1c2   :  { %6874 = vmatprep.subr.bf16.mxu1 %v7445_v44 }
 0x1c3   :  { %v6560_v37 = vpop.f32.mrf.mxu0  ;;  %5447 = vmatmul.mubr.bf16.vlgmr.msra.gmra.mxu0 %v5712_v38 }
 0x1c4   :  { %v6582_v41 = vpop.f32.mrf.mxu1  ;;  %5487 = vmatmul.mubr.bf16.vlgmr.msra.gmra.mxu1 %v5714_v40  ;;  %6853 = vmatpush3.bf16.msra.mxu0 %v7446_v46  ;;  %v7484_v40 = vld [vmem:[%s9201_s1 + $0xf70] sm:$0xff]  }
 0x1c5   :  { %v6561_v45 = vpop.f32.mrf.mxu0  ;;  %6875 = vmatpush3.bf16.msra.mxu1 %v7447_v49  ;;  %6854 = vmatprep.subr.bf16.mxu0 %v7448_v54  ;;  %v7487_v46 = vld [vmem:[%s9201_s1 + $0xfb0] sm:$0xff]   ;;  %v7490_v49 = vld [vmem:[%s9201_s1 + $0xf28] sm:$0xff]   ;;  %v7495_v54 = vld [vmem:[%s9201_s1 + $0xfa0] sm:$0xff]  }
 0x1c6   :  { %v6562_v47 = vadd.f32 %v6561_v45, %v6560_v37  ;;  %v6583_v48 = vpop.f32.mrf.mxu1  ;;  %6876 = vmatprep.subr.bf16.mxu1 %v7449_v55  ;;  %5526 = vmatprep.mubr.bf16.mxu0 %v5717_v23  ;;  %v7486_v45 = vld [vmem:[%s9201_s1 + $0xf30] sm:$0xff]   ;;  %v7496_v55 = vld [vmem:[%s9201_s1 + $0xf58] sm:$0xff]  }
 0x1c7   :  { %v6584_v50 = vadd.f32 %v6583_v48, %v6582_v41  ;;  %v6563_v51 = vpop.f32.mrf.mxu0  ;;  %5566 = vmatprep.mubr.bf16.mxu1 %v5719_v28  ;;  %v7485_v41 = vld [vmem:[%s9201_s1 + $0xff0] sm:$0xff]   ;;  %v7489_v48 = vld [vmem:[%s9201_s1 + $0xfe8] sm:$0xff]  }
 0x1c8   :  { %v4969_v52 = vadd.f32 %v6562_v47, %v8901_v7  ;;  %v6585_v53 = vpop.f32.mrf.mxu1  ;;  %6855 = vmatpush3.bf16.msra.mxu0 %v7450_v58  ;;  %v7462_v7 = vld [vmem:[%s9201_s1 + $0xe18] sm:$0xff]   ;;  %v7488_v47 = vld [vmem:[%s9201_s1 + $0xf68] sm:$0xff]   ;;  %v7492_v51 = vld [vmem:[%s9201_s1 + $0xf60] sm:$0xff]  }
 0x1c9   :  { %v6564_v56 = vpop.f32.mrf.mxu0  ;;  %6877 = vmatpush3.bf16.msra.mxu1 %v7451_v60  ;;  %6856 = vmatprep.subr.bf16.mxu0 %v7452_v61  ;;  %v7494_v53 = vld [vmem:[%s9201_s1 + $0xf20] sm:$0xff]   ;;  %v7499_v58 = vld [vmem:[%s9201_s1 + $0xf98] sm:$0xff]   ;;  %v7501_v60 = vld [vmem:[%s9201_s1 + $0xfd0] sm:$0xff]  }
 0x1ca   :  { %v9006_v57 = vadd.f32 %v6584_v50, %v4969_v52  ;;  %v6586_v59 = vpop.f32.mrf.mxu1  ;;  %6878 = vmatprep.subr.bf16.mxu1 %v7453_v62  ;;  %v7491_v50 = vld [vmem:[%s9201_s1 + $0xfa8] sm:$0xff]   ;;  %v7493_v52 = vld [vmem:[%s9201_s1 + $0xfe0] sm:$0xff]   ;;  %v7497_v56 = vld [vmem:[%s9201_s1 + $0xfd8] sm:$0xff]  }
 0x1cb   :  { %v7500_v59 = vld [vmem:[%s9201_s1 + $0xf50] sm:$0xff]  }
 0x1cc   :  { %6857 = vmatpush3.bf16.msra.mxu0 %v7454_v63  ;;  %v7502_v61 = vld [vmem:[%s9201_s1 + $0xf10] sm:$0xff]   ;;  %v7504_v63 = vld [vmem:[%s9201_s1 + $0xf48] sm:$0xff]  }
 0x1cd   :  { %6879 = vmatpush3.bf16.msra.mxu1 %v7455_v0  ;;  %6858 = vmatprep.subr.bf16.mxu0 %v7456_v1  ;;  %v7503_v62 = vld [vmem:[%s9201_s1 + $0xf90] sm:$0xff]   ;;  %v7505_v0 = vld [vmem:[%s9201_s1 + $0xfc8] sm:$0xff]  }
 0x1ce   :  { %6880 = vmatprep.subr.bf16.mxu1 %v7457_v2  ;;  %v7506_v1 = vld [vmem:[%s9201_s1 + $0xf08] sm:$0xff]  }
 0x1cf   :  { %v7507_v2 = vld [vmem:[%s9201_s1 + $0xf88] sm:$0xff]  }
 0x1d0   :  { %6859 = vmatpush3.bf16.msra.mxu0 %v7458_v3  ;;  %v7508_v3 = vld [vmem:[%s9201_s1 + $0xf40] sm:$0xff]  }
 0x1d1   :  { %6881 = vmatpush3.bf16.msra.mxu1 %v7459_v4  ;;  %6860 = vmatprep.subr.bf16.mxu0 %v7460_v5  ;;  %v7509_v4 = vld [vmem:[%s9201_s1 + $0xfc0] sm:$0xff]  }
 0x1d2   :  { %6882 = vmatprep.subr.bf16.mxu1 %v7461_v6  ;;  %v7510_v5 = vld [vmem:[%s9201_s1 + $0xf00] sm:$0xff]  }
 0x1d3   :  { %v7511_v6 = vld [vmem:[%s9201_s1 + $0xf80] sm:$0xff]  }
 0x1d4   :  { %6861 = vmatpush3.bf16.msra.mxu0 %v7462_v7  ;;  %v45_v7 = vld [vmem:[%s9202_s0 + $0xf0] sm:$0xff] }
 0x1d5   :  { %6883 = vmatpush3.bf16.msra.mxu1 %v7463_v8  ;;  %6862 = vmatprep.subr.bf16.mxu0 %v7464_v9  ;;  %v46_v8 = vld [vmem:[%s9202_s0 + $0xf8] sm:$0xff] }
 0x1d6   :  { %6884 = vmatprep.subr.bf16.mxu1 %v7465_v10  ;;  %v5720_v10 = vcombine.low %v45_v7, %v45_v7 }
 0x1d8   :  { %6863 = vmatpush3.bf16.msra.mxu0 %v7466_v11  ;;  %v5721_v11 = vcombine.high %v45_v7, %v45_v7 }
 0x1d9   :  { %6885 = vmatpush3.bf16.msra.mxu1 %v7467_v12  ;;  %6864 = vmatprep.subr.bf16.mxu0 %v7468_v13  ;;  %v5722_v12 = vcombine.low %v46_v8, %v46_v8  ;;  %v5723_v13 = vcombine.high %v46_v8, %v46_v8 }
 0x1da   :  { %6886 = vmatprep.subr.bf16.mxu1 %v7469_v14 }
 0x1dc   :  { %6865 = vmatpush3.bf16.msra.mxu0 %v7470_v15 }
 0x1dd   :  { %6887 = vmatpush3.bf16.msra.mxu1 %v7471_v16  ;;  %6866 = vmatprep.subr.bf16.mxu0 %v7472_v17 }
 0x1de   :  { %6888 = vmatprep.subr.bf16.mxu1 %v7473_v18 }
 0x1e0   :  { %6867 = vmatpush3.bf16.msra.mxu0 %v7474_v19 }
 0x1e1   :  { %6889 = vmatpush3.bf16.msra.mxu1 %v7475_v20  ;;  %6896 = vmatprep.subr.bf16.mxu0 %v7480_v29 }
 0x1e2   :  { %6918 = vmatprep.subr.bf16.mxu1 %v7481_v30 }
 0x1e3   :  { %v6604_v25 = vpop.f32.mrf.mxu0  ;;  %5527 = vmatmul.mubr.bf16.vlgmr.msra.gmra.mxu0 %v5716_v22 }
 0x1e4   :  { %v6626_v26 = vpop.f32.mrf.mxu1  ;;  %5567 = vmatmul.mubr.bf16.vlgmr.msra.gmra.mxu1 %v5718_v27  ;;  %6897 = vmatpush3.bf16.msra.mxu0 %v7482_v33 }
 0x1e5   :  { %v6605_v31 = vpop.f32.mrf.mxu0  ;;  %6919 = vmatpush3.bf16.msra.mxu1 %v7483_v36  ;;  %6898 = vmatprep.subr.bf16.mxu0 %v7484_v40 }
 0x1e6   :  { %v6627_v32 = vpop.f32.mrf.mxu1  ;;  %v6606_v34 = vadd.f32 %v6605_v31, %v6604_v25  ;;  %6920 = vmatprep.subr.bf16.mxu1 %v7485_v41  ;;  %5606 = vmatprep.mubr.bf16.mxu0 %v5721_v11 }
 0x1e7   :  { %v6628_v35 = vadd.f32 %v6627_v32, %v6626_v26  ;;  %v6607_v37 = vpop.f32.mrf.mxu0  ;;  %5646 = vmatprep.mubr.bf16.mxu1 %v5723_v13 }
 0x1e8   :  { %v6629_v38 = vpop.f32.mrf.mxu1  ;;  %v5049_v39 = vadd.f32 %v6606_v34, %v9006_v57  ;;  %6899 = vmatpush3.bf16.msra.mxu0 %v7486_v45  ;;  %v7498_v57 = vld [vmem:[%s9201_s1 + $0xf18] sm:$0xff]  }
 0x1e9   :  { %v6608_v42 = vpop.f32.mrf.mxu0  ;;  %6921 = vmatpush3.bf16.msra.mxu1 %v7487_v46  ;;  %6900 = vmatprep.subr.bf16.mxu0 %v7488_v47 }
 0x1ea   :  { %v6630_v43 = vpop.f32.mrf.mxu1  ;;  %v9111_v44 = vadd.f32 %v6628_v35, %v5049_v39  ;;  %6922 = vmatprep.subr.bf16.mxu1 %v7489_v48 }
 0x1ec   :  { %6901 = vmatpush3.bf16.msra.mxu0 %v7490_v49 }
 0x1ed   :  { %6923 = vmatpush3.bf16.msra.mxu1 %v7491_v50  ;;  %6902 = vmatprep.subr.bf16.mxu0 %v7492_v51 }
 0x1ee   :  { %6924 = vmatprep.subr.bf16.mxu1 %v7493_v52 }
 0x1f0   :  { %6903 = vmatpush3.bf16.msra.mxu0 %v7494_v53 }
 0x1f1   :  { %6925 = vmatpush3.bf16.msra.mxu1 %v7495_v54  ;;  %6904 = vmatprep.subr.bf16.mxu0 %v7496_v55 }
 0x1f2   :  { %6926 = vmatprep.subr.bf16.mxu1 %v7497_v56 }
 0x1f4   :  { %6905 = vmatpush3.bf16.msra.mxu0 %v7498_v57 }
 0x1f5   :  { %6927 = vmatpush3.bf16.msra.mxu1 %v7499_v58  ;;  %6906 = vmatprep.subr.bf16.mxu0 %v7500_v59 }
 0x1f6   :  { %6928 = vmatprep.subr.bf16.mxu1 %v7501_v60 }
 0x1f8   :  { %6907 = vmatpush3.bf16.msra.mxu0 %v7502_v61 }
 0x1f9   :  { %6929 = vmatpush3.bf16.msra.mxu1 %v7503_v62  ;;  %6908 = vmatprep.subr.bf16.mxu0 %v7504_v63 }
 0x1fa   :  { %6930 = vmatprep.subr.bf16.mxu1 %v7505_v0 }
 0x1fc   :  { %6909 = vmatpush3.bf16.msra.mxu0 %v7506_v1 }
 0x1fd   :  { %6931 = vmatpush3.bf16.msra.mxu1 %v7507_v2  ;;  %6910 = vmatprep.subr.bf16.mxu0 %v7508_v3 }
 0x1fe   :  { %6932 = vmatprep.subr.bf16.mxu1 %v7509_v4 }
 0x200   :  { %6911 = vmatpush3.bf16.msra.mxu0 %v7510_v5 }
 0x201   :  { %6933 = vmatpush3.bf16.msra.mxu1 %v7511_v6 }
 0x203   :  { %v6648_v9 = vpop.f32.mrf.mxu0  ;;  %5607 = vmatmul.mubr.bf16.vlgmr.msra.gmra.mxu0 %v5720_v10 }
 0x204   :  { %v6670_v14 = vpop.f32.mrf.mxu1  ;;  %5647 = vmatmul.mubr.bf16.vlgmr.msra.gmra.mxu1 %v5722_v12 }
 0x205   :  { %v6649_v15 = vpop.f32.mrf.mxu0 }
 0x206   :  { %v6650_v16 = vadd.f32 %v6649_v15, %v6648_v9  ;;  %v6671_v17 = vpop.f32.mrf.mxu1 }
 0x207   :  { %v6672_v18 = vadd.f32 %v6671_v17, %v6670_v14  ;;  %v6651_v19 = vpop.f32.mrf.mxu0 }
 0x208   :  { %v5129_v20 = vadd.f32 %v6650_v16, %v9111_v44  ;;  %v6673_v21 = vpop.f32.mrf.mxu1 }
 0x209   :  { %v6652_v22 = vpop.f32.mrf.mxu0 }
 0x20a   :  { %v5169_v23 = vadd.f32 %v6672_v18, %v5129_v20  ;;  %v6674_v24 = vpop.f32.mrf.mxu1 }
 0x223   :  { %v6692_v25 = vpop.f32.mrf.mxu0 }
 0x224   :  { %v6714_v26 = vpop.f32.mrf.mxu1 }
 0x225   :  { %v6693_v27 = vpop.f32.mrf.mxu0 }
 0x226   :  { %v6694_v28 = vadd.f32 %v6693_v27, %v6692_v25  ;;  %v6715_v29 = vpop.f32.mrf.mxu1 }
 0x227   :  { %v6716_v30 = vadd.f32 %v6715_v29, %v6714_v26  ;;  %v6695_v31 = vpop.f32.mrf.mxu0 }
 0x228   :  { %v5209_v32 = vadd.f32 %v6694_v28, %v5169_v23  ;;  %v6717_v33 = vpop.f32.mrf.mxu1 }
 0x229   :  { %v6696_v34 = vpop.f32.mrf.mxu0 }
 0x22a   :  { %v5249_v35 = vadd.f32 %v6716_v30, %v5209_v32  ;;  %v6718_v36 = vpop.f32.mrf.mxu1 }
 0x243   :  { %v6736_v37 = vpop.f32.mrf.mxu0 }
 0x244   :  { %v6758_v38 = vpop.f32.mrf.mxu1 }
 0x245   :  { %v6737_v39 = vpop.f32.mrf.mxu0 }
 0x246   :  { %v6759_v40 = vpop.f32.mrf.mxu1  ;;  %v6738_v41 = vadd.f32 %v6737_v39, %v6736_v37 }
 0x247   :  { %v6760_v42 = vadd.f32 %v6759_v40, %v6758_v38  ;;  %v6739_v43 = vpop.f32.mrf.mxu0 }
 0x248   :  { %v6761_v44 = vpop.f32.mrf.mxu1  ;;  %v5289_v45 = vadd.f32 %v6738_v41, %v5249_v35 }
 0x249   :  { %v6740_v46 = vpop.f32.mrf.mxu0 }
 0x24a   :  { %v6762_v47 = vpop.f32.mrf.mxu1  ;;  %v5329_v48 = vadd.f32 %v6760_v42, %v5289_v45 }
 0x263   :  { %v6780_v49 = vpop.f32.mrf.mxu0 }
 0x264   :  { %v6802_v50 = vpop.f32.mrf.mxu1 }
 0x265   :  { %v6781_v51 = vpop.f32.mrf.mxu0 }
 0x266   :  { %v6782_v52 = vadd.f32 %v6781_v51, %v6780_v49  ;;  %v6803_v53 = vpop.f32.mrf.mxu1 }
 0x267   :  { %v6804_v54 = vadd.f32 %v6803_v53, %v6802_v50  ;;  %v6783_v55 = vpop.f32.mrf.mxu0 }
 0x268   :  { %v5369_v56 = vadd.f32 %v6782_v52, %v5329_v48  ;;  %v6805_v57 = vpop.f32.mrf.mxu1 }
 0x269   :  { %v6784_v58 = vpop.f32.mrf.mxu0 }
 0x26a   :  { %v5409_v59 = vadd.f32 %v6804_v54, %v5369_v56  ;;  %v6806_v60 = vpop.f32.mrf.mxu1 }
 0x283   :  { %v6824_v61 = vpop.f32.mrf.mxu0 }
 0x284   :  { %v6846_v62 = vpop.f32.mrf.mxu1 }
 0x285   :  { %v6825_v63 = vpop.f32.mrf.mxu0 }
 0x286   :  { %v6847_v0 = vpop.f32.mrf.mxu1  ;;  %v6826_v13 = vadd.f32 %v6825_v63, %v6824_v61 }
 0x287   :  { %v6827_v1 = vpop.f32.mrf.mxu0  ;;  %v6848_v15 = vadd.f32 %v6847_v0, %v6846_v62 }
 0x288   :  { %v6849_v2 = vpop.f32.mrf.mxu1  ;;  %v5449_v14 = vadd.f32 %v6826_v13, %v5409_v59 }
 0x289   :  { %v6828_v3 = vpop.f32.mrf.mxu0 }
 0x28a   :  { %v6850_v4 = vpop.f32.mrf.mxu1  ;;  %v5489_v17 = vadd.f32 %v6848_v15, %v5449_v14 }
 0x2a3   :  { %v6868_v5 = vpop.f32.mrf.mxu0 }
 0x2a4   :  { %v6890_v6 = vpop.f32.mrf.mxu1 }
 0x2a5   :  { %v6869_v7 = vpop.f32.mrf.mxu0 }
 0x2a6   :  { %v6891_v8 = vpop.f32.mrf.mxu1  ;;  %v6870_v16 = vadd.f32 %v6869_v7, %v6868_v5 }
 0x2a7   :  { %v6871_v9 = vpop.f32.mrf.mxu0  ;;  %v6892_v19 = vadd.f32 %v6891_v8, %v6890_v6 }
 0x2a8   :  { %v6893_v10 = vpop.f32.mrf.mxu1  ;;  %v5529_v18 = vadd.f32 %v6870_v16, %v5489_v17 }
 0x2a9   :  { %v6872_v11 = vpop.f32.mrf.mxu0 }
 0x2aa   :  { %v6894_v12 = vpop.f32.mrf.mxu1  ;;  %v5569_v23 = vadd.f32 %v6892_v19, %v5529_v18 }
 0x2c3   :  { %v6912_v20 = vpop.f32.mrf.mxu0 }
 0x2c4   :  { %v6934_v21 = vpop.f32.mrf.mxu1 }
 0x2c5   :  { %v6913_v22 = vpop.f32.mrf.mxu0 }
 0x2c6   :  { %v6914_v24 = vadd.f32 %v6913_v22, %v6912_v20  ;;  %v6935_v25 = vpop.f32.mrf.mxu1 }
 0x2c7   :  { %v6915_v26 = vpop.f32.mrf.mxu0  ;;  %v6936_v28 = vadd.f32 %v6935_v25, %v6934_v21 }
 0x2c8   :  { %v5609_v27 = vadd.f32 %v6914_v24, %v5569_v23  ;;  %v6937_v29 = vpop.f32.mrf.mxu1 }
 0x2c9   :  { %v6916_v30 = vpop.f32.mrf.mxu0 }
 0x2ca   :  { %v5649_v31 = vadd.f32 %v6936_v28, %v5609_v27  ;;  %v6938_v32 = vpop.f32.mrf.mxu1 }
 0x2cc   :  { %5654 = vst [vmem:[%s9204_s3] sm:$0xff] %v5649_v31 }

</bundles_post_ra>
